<compile_context>
chip_gen: v7x
topology: tpu7x:2x2x1
jax: 0.10.0
libtpu: 0.0.40
codegen_flags: <defaults>
</compile_context>

<pallas_src>
import jax
import jax.numpy as jnp
from jax.experimental import pallas as pl
from jax.experimental.pallas import tpu as pltpu


Z_DIM = 25
C0, L0 = 256, 22            # activation shape right after the Linear layer
K_S2 = 5                    # kernel size of the 4 stride-2 layers
K_LAST = 6                  # kernel size of the final stride-1 layer
L_OUT = 336                 # final output length


# ---------------------------- in-kernel helpers ---------------------------- #

def _select_matrix(lin, lout, mult, offset):
    """0/1 matrix S (lin, lout) with S[m, t] = 1 iff t == mult*m + offset.

    Scatters per-tap matmul results into their (strided) output positions using
    the MXU; output positions outside [0, lout) simply have no column, which
    implements PyTorch's transposed-conv output cropping.
    """
    m = jax.lax.broadcasted_iota(jnp.int32, (lin, lout), 0)
    t = jax.lax.broadcasted_iota(jnp.int32, (lin, lout), 1)
    return (t == mult * m + offset).astype(jnp.float32)


def _convt_stride2_relu(x, w_stack, bias):
    """ConvTranspose1d(stride=2, k=5, padding=2) + ReLU.

    x:       (Cin, Lin)      activation value
    w_stack: (5*Cout, Cin)   rows [kk*Cout:(kk+1)*Cout] = w[:, :, 4-kk].T (flipped taps)
    bias:    (Cout, 1)
    returns  (Cout, 2*Lin - 1)
    """
    cin, lin = x.shape
    cout = w_stack.shape[0] // K_S2
    lout = 2 * lin - 1
    # One fat channel contraction for ALL taps on the undilated input.
    v = jnp.dot(w_stack, x, preferred_element_type=jnp.float32)      # (5*Cout, Lin)
    acc = jnp.zeros((cout, lout), jnp.float32)
    for kk in range(K_S2):
        # flipped tap kk contributes to output t = 2*m + 2 - kk
        s = _select_matrix(lin, lout, 2, 2 - kk)
        acc = acc + jnp.dot(v[kk * cout:(kk + 1) * cout, :], s,
                            preferred_element_type=jnp.float32)
    return jnp.maximum(acc + bias, 0.0)


# --------------------------------- kernel ---------------------------------- #

def _generator_kernel(z_ref, fcw_ref, fcb_ref,
                      w1_ref, b1_ref, w2_ref, b2_ref,
                      w3_ref, b3_ref, w4_ref, b4_ref,
                      w5_ref, b5_ref, o_ref):
    b = pl.program_id(0)

    # ---- Linear(25 -> 5632) + ReLU, produced directly as (256, 22) ----------
    # fcw_ref[i][c, l] == W_fc[c*22 + l, i]  -> 25 scalar*matrix FMAs (VPU),
    # z scalars come from SMEM.  No in-kernel reshape needed.
    x = fcb_ref[...]
    for i in range(Z_DIM):
        x = x + z_ref[b, i] * fcw_ref[i]
    x = jnp.maximum(x, 0.0)                                          # (256, 22)

    # ---- 4 x (ConvTranspose1d s=2 k=5 p=2 + ReLU) ----------------------------
    x = _convt_stride2_relu(x, w1_ref[...], b1_ref[...])             # (128, 43)
    x = _convt_stride2_relu(x, w2_ref[...], b2_ref[...])             # (64, 85)
    x = _convt_stride2_relu(x, w3_ref[...], b3_ref[...])             # (32, 169)
    x = _convt_stride2_relu(x, w4_ref[...], b4_ref[...])             # (16, 337)

    # ---- ConvTranspose1d(16 -> 1, k=6, s=1, p=3) + Tanh ----------------------
    lin = x.shape[1]                                                 # 337
    v = jnp.dot(w5_ref[...], x, preferred_element_type=jnp.float32)  # (6, 337)
    y = jnp.zeros((1, L_OUT), jnp.float32)
    for kk in range(K_LAST):
        s = _select_matrix(lin, L_OUT, 1, 2 - kk)                    # t = m + 2 - kk
        y = y + jnp.dot(v[kk:kk + 1, :], s, preferred_element_type=jnp.float32)
    y = jnp.tanh(y + b5_ref[...])
    o_ref[0] = y.astype(o_ref.dtype)


# -------------------------------- wrapper ----------------------------------- #

def prepack_params(p):
    """One-time host-side repack of PyTorch-layout parameters for the kernel."""
    fcw = p["fc_w"].T.reshape(Z_DIM, C0, L0)          # (25, 256, 22)
    fcb = p["fc_b"].reshape(C0, L0)                   # (256, 22)
    packed = [fcw, fcb]
    for wn, bn in (("w1", "b1"), ("w2", "b2"), ("w3", "b3"), ("w4", "b4")):
        w = p[wn]                                     # (Cin, Cout, 5)
        cin, cout, k = w.shape
        # rows [kk*Cout:(kk+1)*Cout] = flipped tap kk = w[:, :, k-1-kk].T
        w_stack = jnp.transpose(w[:, :, ::-1], (2, 1, 0)).reshape(k * cout, cin)
        packed += [w_stack, p[bn].reshape(cout, 1)]
    w5 = p["w5"]                                      # (16, 1, 6)
    packed += [jnp.transpose(w5[:, 0, ::-1], (1, 0)), # (6, 16) flipped taps
               p["b5"].reshape(1, 1)]
    return tuple(packed)


@jax.jit
def generator_forward(z, packed):
    """z: (B, 25) f32 -> (B, 1, 336) f32.  Single fused Pallas call."""
    bsz = z.shape[0]

    def resident(arr):
        # Whole array in VMEM; constant index_map => DMA'd once, shared by all
        # grid steps.
        nd = arr.ndim
        return pl.BlockSpec(arr.shape, lambda b: (0,) * nd)

    return pl.pallas_call(
        _generator_kernel,
        out_shape=jax.ShapeDtypeStruct((bsz, 1, L_OUT), jnp.float32),
        grid=(bsz,),
        in_specs=[pl.BlockSpec(memory_space=pltpu.MemorySpace.SMEM)]  # z scalars
                + [resident(w) for w in packed],
        out_specs=pl.BlockSpec((1, 1, L_OUT), lambda b: (b, 0, 0)),
        compiler_params=pltpu.CompilerParams(
            dimension_semantics=("parallel",)),   # v7x: one batch element per TC
    )(z, *packed)


# ---------------------- Pure-JAX reference (for checking) ------------------- #

def _convt_ref(x, w, b, stride, padding, output_padding):
    cin, cout, k = w.shape
    w_oik = jnp.transpose(w, (1, 0, 2))[:, :, ::-1]
    y = jax.lax.conv_general_dilated(
        x, w_oik, window_strides=(1,),
        padding=[(k - 1 - padding, k - 1 - padding + output_padding)],
        lhs_dilation=(stride,), rhs_dilation=(1,),
        dimension_numbers=("NCH", "OIH", "NCH"))
    return y + b.reshape(1, cout, 1)


def reference_forward(z, p):
    h = jnp.maximum(z @ p["fc_w"].T + p["fc_b"], 0.0)
    x = h.reshape(z.shape[0], 256, 22)
    x = jnp.maximum(_convt_ref(x, p["w1"], p["b1"], 2, 2, 0), 0.0)
    x = jnp.maximum(_convt_ref(x, p["w2"], p["b2"], 2, 2, 0), 0.0)
    x = jnp.maximum(_convt_ref(x, p["w3"], p["b3"], 2, 2, 0), 0.0)
    x = jnp.maximum(_convt_ref(x, p["w4"], p["b4"], 2, 2, 0), 0.0)
    x = jnp.tanh(_convt_ref(x, p["w5"], p["b5"], 1, 3, 0))
    return x


# ---------------------------------- main ------------------------------------ #

def _uniform(key, shape, bound):
    return jax.random.uniform(key, shape, jnp.float32, -bound, bound)


def make_params(key):
    ks = jax.random.split(key, 12)
    p = {}
    p["fc_w"] = _uniform(ks[0], (5632, 25), 1.0 / 25 ** 0.5)
    p["fc_b"] = _uniform(ks[1], (5632,), 1.0 / 25 ** 0.5)
    conv_defs = [
        ("w1", "b1", 256, 128, 5),
        ("w2", "b2", 128, 64, 5),
        ("w3", "b3", 64, 32, 5),
        ("w4", "b4", 32, 16, 5),
        ("w5", "b5", 16, 1, 6),
    ]
    for i, (wn, bn, cin, cout, k) in enumerate(conv_defs):
        bound = 1.0 / (cin * k) ** 0.5
        p[wn] = _uniform(ks[2 + 2 * i], (cin, cout, k), bound)
        p[bn] = _uniform(ks[3 + 2 * i], (cout,), bound)
    return p


if __name__ == "__main__":
    key = jax.random.PRNGKey(0)
    kp, kz = jax.random.split(key)
    params = make_params(kp)
    packed = prepack_params(params)

    batch = 2
    z = jax.random.normal(kz, (batch, 25), jnp.float32)

    out = jax.block_until_ready(generator_forward(z, packed))
    assert out.shape == (batch, 1, L_OUT), out.shape

    ref = jax.block_until_ready(reference_forward(z, params))
    assert jnp.allclose(out, ref, atol=1e-4, rtol=1e-4), float(
        jnp.max(jnp.abs(out - ref)))

    print("KERNEL_OK")
</pallas_src>

<mosaic_0001>
module attributes {stable_mosaic.version = 11 : i64} {
  func.func @_generator_kernel(%arg0: i32, %arg1: memref<2x25xf32, #tpu.memory_space<smem>>, %arg2: memref<25x256x22xf32, #tpu.memory_space<vmem>>, %arg3: memref<256x22xf32, #tpu.memory_space<vmem>>, %arg4: memref<640x256xf32, #tpu.memory_space<vmem>>, %arg5: memref<128x1xf32, #tpu.memory_space<vmem>>, %arg6: memref<320x128xf32, #tpu.memory_space<vmem>>, %arg7: memref<64x1xf32, #tpu.memory_space<vmem>>, %arg8: memref<160x64xf32, #tpu.memory_space<vmem>>, %arg9: memref<32x1xf32, #tpu.memory_space<vmem>>, %arg10: memref<80x32xf32, #tpu.memory_space<vmem>>, %arg11: memref<16x1xf32, #tpu.memory_space<vmem>>, %arg12: memref<6x16xf32, #tpu.memory_space<vmem>>, %arg13: memref<1x1xf32, #tpu.memory_space<vmem>>, %arg14: memref<1x1x336xf32, #tpu.memory_space<vmem>>) attributes {dimension_semantics = [#tpu.dimension_semantics<parallel>], iteration_bounds = array<i64: 2>, scalar_prefetch = 0 : i64, scratch_operands = 0 : i64, tpu.core_type = #tpu.core_type<tc>, window_params = [{transform_indices = @transform_0, window_bounds = array<i64: 2, 25>}, {pipeline_mode = #tpu.pipeline_mode<synchronous>, transform_indices = @transform_1, window_bounds = array<i64: 25, 256, 22>}, {pipeline_mode = #tpu.pipeline_mode<synchronous>, transform_indices = @transform_2, window_bounds = array<i64: 256, 22>}, {pipeline_mode = #tpu.pipeline_mode<synchronous>, transform_indices = @transform_3, window_bounds = array<i64: 640, 256>}, {pipeline_mode = #tpu.pipeline_mode<synchronous>, transform_indices = @transform_4, window_bounds = array<i64: 128, 1>}, {pipeline_mode = #tpu.pipeline_mode<synchronous>, transform_indices = @transform_5, window_bounds = array<i64: 320, 128>}, {pipeline_mode = #tpu.pipeline_mode<synchronous>, transform_indices = @transform_6, window_bounds = array<i64: 64, 1>}, {pipeline_mode = #tpu.pipeline_mode<synchronous>, transform_indices = @transform_7, window_bounds = array<i64: 160, 64>}, {pipeline_mode = #tpu.pipeline_mode<synchronous>, transform_indices = @transform_8, window_bounds = array<i64: 32, 1>}, {pipeline_mode = #tpu.pipeline_mode<synchronous>, transform_indices = @transform_9, window_bounds = array<i64: 80, 32>}, {pipeline_mode = #tpu.pipeline_mode<synchronous>, transform_indices = @transform_10, window_bounds = array<i64: 16, 1>}, {pipeline_mode = #tpu.pipeline_mode<synchronous>, transform_indices = @transform_11, window_bounds = array<i64: 6, 16>}, {pipeline_mode = #tpu.pipeline_mode<synchronous>, transform_indices = @transform_12, window_bounds = array<i64: 1, 1>}, {transform_indices = @transform_13, window_bounds = array<i64: 1, 1, 336>}]} {
    %c0 = arith.constant 0 : index
    %c0_0 = arith.constant 0 : index
    %0 = vector.load %arg3[%c0, %c0_0] : memref<256x22xf32, #tpu.memory_space<vmem>>, vector<256x22xf32>
    %1 = arith.index_cast %arg0 : i32 to index
    %c0_1 = arith.constant 0 : index
    %2 = memref.load %arg1[%1, %c0_1] : memref<2x25xf32, #tpu.memory_space<smem>>
    %c0_2 = arith.constant 0 : index
    %c0_3 = arith.constant 0 : index
    %c0_4 = arith.constant 0 : index
    %3 = vector.load %arg2[%c0_2, %c0_3, %c0_4] : memref<25x256x22xf32, #tpu.memory_space<vmem>>, vector<1x256x22xf32>
    %4 = vector.shape_cast %3 : vector<1x256x22xf32> to vector<256x22xf32>
    %5 = vector.broadcast %2 : f32 to vector<256x22xf32>
    %6 = arith.mulf %5, %4 : vector<256x22xf32>
    %7 = arith.addf %0, %6 : vector<256x22xf32>
    %8 = arith.index_cast %arg0 : i32 to index
    %c1 = arith.constant 1 : index
    %9 = memref.load %arg1[%8, %c1] : memref<2x25xf32, #tpu.memory_space<smem>>
    %c1_5 = arith.constant 1 : index
    %c0_6 = arith.constant 0 : index
    %c0_7 = arith.constant 0 : index
    %10 = vector.load %arg2[%c1_5, %c0_6, %c0_7] : memref<25x256x22xf32, #tpu.memory_space<vmem>>, vector<1x256x22xf32>
    %11 = vector.shape_cast %10 : vector<1x256x22xf32> to vector<256x22xf32>
    %12 = vector.broadcast %9 : f32 to vector<256x22xf32>
    %13 = arith.mulf %12, %11 : vector<256x22xf32>
    %14 = arith.addf %7, %13 : vector<256x22xf32>
    %15 = arith.index_cast %arg0 : i32 to index
    %c2 = arith.constant 2 : index
    %16 = memref.load %arg1[%15, %c2] : memref<2x25xf32, #tpu.memory_space<smem>>
    %c2_8 = arith.constant 2 : index
    %c0_9 = arith.constant 0 : index
    %c0_10 = arith.constant 0 : index
    %17 = vector.load %arg2[%c2_8, %c0_9, %c0_10] : memref<25x256x22xf32, #tpu.memory_space<vmem>>, vector<1x256x22xf32>
    %18 = vector.shape_cast %17 : vector<1x256x22xf32> to vector<256x22xf32>
    %19 = vector.broadcast %16 : f32 to vector<256x22xf32>
    %20 = arith.mulf %19, %18 : vector<256x22xf32>
    %21 = arith.addf %14, %20 : vector<256x22xf32>
    %22 = arith.index_cast %arg0 : i32 to index
    %c3 = arith.constant 3 : index
    %23 = memref.load %arg1[%22, %c3] : memref<2x25xf32, #tpu.memory_space<smem>>
    %c3_11 = arith.constant 3 : index
    %c0_12 = arith.constant 0 : index
    %c0_13 = arith.constant 0 : index
    %24 = vector.load %arg2[%c3_11, %c0_12, %c0_13] : memref<25x256x22xf32, #tpu.memory_space<vmem>>, vector<1x256x22xf32>
    %25 = vector.shape_cast %24 : vector<1x256x22xf32> to vector<256x22xf32>
    %26 = vector.broadcast %23 : f32 to vector<256x22xf32>
    %27 = arith.mulf %26, %25 : vector<256x22xf32>
    %28 = arith.addf %21, %27 : vector<256x22xf32>
    %29 = arith.index_cast %arg0 : i32 to index
    %c4 = arith.constant 4 : index
    %30 = memref.load %arg1[%29, %c4] : memref<2x25xf32, #tpu.memory_space<smem>>
    %c4_14 = arith.constant 4 : index
    %c0_15 = arith.constant 0 : index
    %c0_16 = arith.constant 0 : index
    %31 = vector.load %arg2[%c4_14, %c0_15, %c0_16] : memref<25x256x22xf32, #tpu.memory_space<vmem>>, vector<1x256x22xf32>
    %32 = vector.shape_cast %31 : vector<1x256x22xf32> to vector<256x22xf32>
    %33 = vector.broadcast %30 : f32 to vector<256x22xf32>
    %34 = arith.mulf %33, %32 : vector<256x22xf32>
    %35 = arith.addf %28, %34 : vector<256x22xf32>
    %36 = arith.index_cast %arg0 : i32 to index
    %c5 = arith.constant 5 : index
    %37 = memref.load %arg1[%36, %c5] : memref<2x25xf32, #tpu.memory_space<smem>>
    %c5_17 = arith.constant 5 : index
    %c0_18 = arith.constant 0 : index
    %c0_19 = arith.constant 0 : index
    %38 = vector.load %arg2[%c5_17, %c0_18, %c0_19] : memref<25x256x22xf32, #tpu.memory_space<vmem>>, vector<1x256x22xf32>
    %39 = vector.shape_cast %38 : vector<1x256x22xf32> to vector<256x22xf32>
    %40 = vector.broadcast %37 : f32 to vector<256x22xf32>
    %41 = arith.mulf %40, %39 : vector<256x22xf32>
    %42 = arith.addf %35, %41 : vector<256x22xf32>
    %43 = arith.index_cast %arg0 : i32 to index
    %c6 = arith.constant 6 : index
    %44 = memref.load %arg1[%43, %c6] : memref<2x25xf32, #tpu.memory_space<smem>>
    %c6_20 = arith.constant 6 : index
    %c0_21 = arith.constant 0 : index
    %c0_22 = arith.constant 0 : index
    %45 = vector.load %arg2[%c6_20, %c0_21, %c0_22] : memref<25x256x22xf32, #tpu.memory_space<vmem>>, vector<1x256x22xf32>
    %46 = vector.shape_cast %45 : vector<1x256x22xf32> to vector<256x22xf32>
    %47 = vector.broadcast %44 : f32 to vector<256x22xf32>
    %48 = arith.mulf %47, %46 : vector<256x22xf32>
    %49 = arith.addf %42, %48 : vector<256x22xf32>
    %50 = arith.index_cast %arg0 : i32 to index
    %c7 = arith.constant 7 : index
    %51 = memref.load %arg1[%50, %c7] : memref<2x25xf32, #tpu.memory_space<smem>>
    %c7_23 = arith.constant 7 : index
    %c0_24 = arith.constant 0 : index
    %c0_25 = arith.constant 0 : index
    %52 = vector.load %arg2[%c7_23, %c0_24, %c0_25] : memref<25x256x22xf32, #tpu.memory_space<vmem>>, vector<1x256x22xf32>
    %53 = vector.shape_cast %52 : vector<1x256x22xf32> to vector<256x22xf32>
    %54 = vector.broadcast %51 : f32 to vector<256x22xf32>
    %55 = arith.mulf %54, %53 : vector<256x22xf32>
    %56 = arith.addf %49, %55 : vector<256x22xf32>
    %57 = arith.index_cast %arg0 : i32 to index
    %c8 = arith.constant 8 : index
    %58 = memref.load %arg1[%57, %c8] : memref<2x25xf32, #tpu.memory_space<smem>>
    %c8_26 = arith.constant 8 : index
    %c0_27 = arith.constant 0 : index
    %c0_28 = arith.constant 0 : index
    %59 = vector.load %arg2[%c8_26, %c0_27, %c0_28] : memref<25x256x22xf32, #tpu.memory_space<vmem>>, vector<1x256x22xf32>
    %60 = vector.shape_cast %59 : vector<1x256x22xf32> to vector<256x22xf32>
    %61 = vector.broadcast %58 : f32 to vector<256x22xf32>
    %62 = arith.mulf %61, %60 : vector<256x22xf32>
    %63 = arith.addf %56, %62 : vector<256x22xf32>
    %64 = arith.index_cast %arg0 : i32 to index
    %c9 = arith.constant 9 : index
    %65 = memref.load %arg1[%64, %c9] : memref<2x25xf32, #tpu.memory_space<smem>>
    %c9_29 = arith.constant 9 : index
    %c0_30 = arith.constant 0 : index
    %c0_31 = arith.constant 0 : index
    %66 = vector.load %arg2[%c9_29, %c0_30, %c0_31] : memref<25x256x22xf32, #tpu.memory_space<vmem>>, vector<1x256x22xf32>
    %67 = vector.shape_cast %66 : vector<1x256x22xf32> to vector<256x22xf32>
    %68 = vector.broadcast %65 : f32 to vector<256x22xf32>
    %69 = arith.mulf %68, %67 : vector<256x22xf32>
    %70 = arith.addf %63, %69 : vector<256x22xf32>
    %71 = arith.index_cast %arg0 : i32 to index
    %c10 = arith.constant 10 : index
    %72 = memref.load %arg1[%71, %c10] : memref<2x25xf32, #tpu.memory_space<smem>>
    %c10_32 = arith.constant 10 : index
    %c0_33 = arith.constant 0 : index
    %c0_34 = arith.constant 0 : index
    %73 = vector.load %arg2[%c10_32, %c0_33, %c0_34] : memref<25x256x22xf32, #tpu.memory_space<vmem>>, vector<1x256x22xf32>
    %74 = vector.shape_cast %73 : vector<1x256x22xf32> to vector<256x22xf32>
    %75 = vector.broadcast %72 : f32 to vector<256x22xf32>
    %76 = arith.mulf %75, %74 : vector<256x22xf32>
    %77 = arith.addf %70, %76 : vector<256x22xf32>
    %78 = arith.index_cast %arg0 : i32 to index
    %c11 = arith.constant 11 : index
    %79 = memref.load %arg1[%78, %c11] : memref<2x25xf32, #tpu.memory_space<smem>>
    %c11_35 = arith.constant 11 : index
    %c0_36 = arith.constant 0 : index
    %c0_37 = arith.constant 0 : index
    %80 = vector.load %arg2[%c11_35, %c0_36, %c0_37] : memref<25x256x22xf32, #tpu.memory_space<vmem>>, vector<1x256x22xf32>
    %81 = vector.shape_cast %80 : vector<1x256x22xf32> to vector<256x22xf32>
    %82 = vector.broadcast %79 : f32 to vector<256x22xf32>
    %83 = arith.mulf %82, %81 : vector<256x22xf32>
    %84 = arith.addf %77, %83 : vector<256x22xf32>
    %85 = arith.index_cast %arg0 : i32 to index
    %c12 = arith.constant 12 : index
    %86 = memref.load %arg1[%85, %c12] : memref<2x25xf32, #tpu.memory_space<smem>>
    %c12_38 = arith.constant 12 : index
    %c0_39 = arith.constant 0 : index
    %c0_40 = arith.constant 0 : index
    %87 = vector.load %arg2[%c12_38, %c0_39, %c0_40] : memref<25x256x22xf32, #tpu.memory_space<vmem>>, vector<1x256x22xf32>
    %88 = vector.shape_cast %87 : vector<1x256x22xf32> to vector<256x22xf32>
    %89 = vector.broadcast %86 : f32 to vector<256x22xf32>
    %90 = arith.mulf %89, %88 : vector<256x22xf32>
    %91 = arith.addf %84, %90 : vector<256x22xf32>
    %92 = arith.index_cast %arg0 : i32 to index
    %c13 = arith.constant 13 : index
    %93 = memref.load %arg1[%92, %c13] : memref<2x25xf32, #tpu.memory_space<smem>>
    %c13_41 = arith.constant 13 : index
    %c0_42 = arith.constant 0 : index
    %c0_43 = arith.constant 0 : index
    %94 = vector.load %arg2[%c13_41, %c0_42, %c0_43] : memref<25x256x22xf32, #tpu.memory_space<vmem>>, vector<1x256x22xf32>
    %95 = vector.shape_cast %94 : vector<1x256x22xf32> to vector<256x22xf32>
    %96 = vector.broadcast %93 : f32 to vector<256x22xf32>
    %97 = arith.mulf %96, %95 : vector<256x22xf32>
    %98 = arith.addf %91, %97 : vector<256x22xf32>
    %99 = arith.index_cast %arg0 : i32 to index
    %c14 = arith.constant 14 : index
    %100 = memref.load %arg1[%99, %c14] : memref<2x25xf32, #tpu.memory_space<smem>>
    %c14_44 = arith.constant 14 : index
    %c0_45 = arith.constant 0 : index
    %c0_46 = arith.constant 0 : index
    %101 = vector.load %arg2[%c14_44, %c0_45, %c0_46] : memref<25x256x22xf32, #tpu.memory_space<vmem>>, vector<1x256x22xf32>
    %102 = vector.shape_cast %101 : vector<1x256x22xf32> to vector<256x22xf32>
    %103 = vector.broadcast %100 : f32 to vector<256x22xf32>
    %104 = arith.mulf %103, %102 : vector<256x22xf32>
    %105 = arith.addf %98, %104 : vector<256x22xf32>
    %106 = arith.index_cast %arg0 : i32 to index
    %c15 = arith.constant 15 : index
    %107 = memref.load %arg1[%106, %c15] : memref<2x25xf32, #tpu.memory_space<smem>>
    %c15_47 = arith.constant 15 : index
    %c0_48 = arith.constant 0 : index
    %c0_49 = arith.constant 0 : index
    %108 = vector.load %arg2[%c15_47, %c0_48, %c0_49] : memref<25x256x22xf32, #tpu.memory_space<vmem>>, vector<1x256x22xf32>
    %109 = vector.shape_cast %108 : vector<1x256x22xf32> to vector<256x22xf32>
    %110 = vector.broadcast %107 : f32 to vector<256x22xf32>
    %111 = arith.mulf %110, %109 : vector<256x22xf32>
    %112 = arith.addf %105, %111 : vector<256x22xf32>
    %113 = arith.index_cast %arg0 : i32 to index
    %c16 = arith.constant 16 : index
    %114 = memref.load %arg1[%113, %c16] : memref<2x25xf32, #tpu.memory_space<smem>>
    %c16_50 = arith.constant 16 : index
    %c0_51 = arith.constant 0 : index
    %c0_52 = arith.constant 0 : index
    %115 = vector.load %arg2[%c16_50, %c0_51, %c0_52] : memref<25x256x22xf32, #tpu.memory_space<vmem>>, vector<1x256x22xf32>
    %116 = vector.shape_cast %115 : vector<1x256x22xf32> to vector<256x22xf32>
    %117 = vector.broadcast %114 : f32 to vector<256x22xf32>
    %118 = arith.mulf %117, %116 : vector<256x22xf32>
    %119 = arith.addf %112, %118 : vector<256x22xf32>
    %120 = arith.index_cast %arg0 : i32 to index
    %c17 = arith.constant 17 : index
    %121 = memref.load %arg1[%120, %c17] : memref<2x25xf32, #tpu.memory_space<smem>>
    %c17_53 = arith.constant 17 : index
    %c0_54 = arith.constant 0 : index
    %c0_55 = arith.constant 0 : index
    %122 = vector.load %arg2[%c17_53, %c0_54, %c0_55] : memref<25x256x22xf32, #tpu.memory_space<vmem>>, vector<1x256x22xf32>
    %123 = vector.shape_cast %122 : vector<1x256x22xf32> to vector<256x22xf32>
    %124 = vector.broadcast %121 : f32 to vector<256x22xf32>
    %125 = arith.mulf %124, %123 : vector<256x22xf32>
    %126 = arith.addf %119, %125 : vector<256x22xf32>
    %127 = arith.index_cast %arg0 : i32 to index
    %c18 = arith.constant 18 : index
    %128 = memref.load %arg1[%127, %c18] : memref<2x25xf32, #tpu.memory_space<smem>>
    %c18_56 = arith.constant 18 : index
    %c0_57 = arith.constant 0 : index
    %c0_58 = arith.constant 0 : index
    %129 = vector.load %arg2[%c18_56, %c0_57, %c0_58] : memref<25x256x22xf32, #tpu.memory_space<vmem>>, vector<1x256x22xf32>
    %130 = vector.shape_cast %129 : vector<1x256x22xf32> to vector<256x22xf32>
    %131 = vector.broadcast %128 : f32 to vector<256x22xf32>
    %132 = arith.mulf %131, %130 : vector<256x22xf32>
    %133 = arith.addf %126, %132 : vector<256x22xf32>
    %134 = arith.index_cast %arg0 : i32 to index
    %c19 = arith.constant 19 : index
    %135 = memref.load %arg1[%134, %c19] : memref<2x25xf32, #tpu.memory_space<smem>>
    %c19_59 = arith.constant 19 : index
    %c0_60 = arith.constant 0 : index
    %c0_61 = arith.constant 0 : index
    %136 = vector.load %arg2[%c19_59, %c0_60, %c0_61] : memref<25x256x22xf32, #tpu.memory_space<vmem>>, vector<1x256x22xf32>
    %137 = vector.shape_cast %136 : vector<1x256x22xf32> to vector<256x22xf32>
    %138 = vector.broadcast %135 : f32 to vector<256x22xf32>
    %139 = arith.mulf %138, %137 : vector<256x22xf32>
    %140 = arith.addf %133, %139 : vector<256x22xf32>
    %141 = arith.index_cast %arg0 : i32 to index
    %c20 = arith.constant 20 : index
    %142 = memref.load %arg1[%141, %c20] : memref<2x25xf32, #tpu.memory_space<smem>>
    %c20_62 = arith.constant 20 : index
    %c0_63 = arith.constant 0 : index
    %c0_64 = arith.constant 0 : index
    %143 = vector.load %arg2[%c20_62, %c0_63, %c0_64] : memref<25x256x22xf32, #tpu.memory_space<vmem>>, vector<1x256x22xf32>
    %144 = vector.shape_cast %143 : vector<1x256x22xf32> to vector<256x22xf32>
    %145 = vector.broadcast %142 : f32 to vector<256x22xf32>
    %146 = arith.mulf %145, %144 : vector<256x22xf32>
    %147 = arith.addf %140, %146 : vector<256x22xf32>
    %148 = arith.index_cast %arg0 : i32 to index
    %c21 = arith.constant 21 : index
    %149 = memref.load %arg1[%148, %c21] : memref<2x25xf32, #tpu.memory_space<smem>>
    %c21_65 = arith.constant 21 : index
    %c0_66 = arith.constant 0 : index
    %c0_67 = arith.constant 0 : index
    %150 = vector.load %arg2[%c21_65, %c0_66, %c0_67] : memref<25x256x22xf32, #tpu.memory_space<vmem>>, vector<1x256x22xf32>
    %151 = vector.shape_cast %150 : vector<1x256x22xf32> to vector<256x22xf32>
    %152 = vector.broadcast %149 : f32 to vector<256x22xf32>
    %153 = arith.mulf %152, %151 : vector<256x22xf32>
    %154 = arith.addf %147, %153 : vector<256x22xf32>
    %155 = arith.index_cast %arg0 : i32 to index
    %c22 = arith.constant 22 : index
    %156 = memref.load %arg1[%155, %c22] : memref<2x25xf32, #tpu.memory_space<smem>>
    %c22_68 = arith.constant 22 : index
    %c0_69 = arith.constant 0 : index
    %c0_70 = arith.constant 0 : index
    %157 = vector.load %arg2[%c22_68, %c0_69, %c0_70] : memref<25x256x22xf32, #tpu.memory_space<vmem>>, vector<1x256x22xf32>
    %158 = vector.shape_cast %157 : vector<1x256x22xf32> to vector<256x22xf32>
    %159 = vector.broadcast %156 : f32 to vector<256x22xf32>
    %160 = arith.mulf %159, %158 : vector<256x22xf32>
    %161 = arith.addf %154, %160 : vector<256x22xf32>
    %162 = arith.index_cast %arg0 : i32 to index
    %c23 = arith.constant 23 : index
    %163 = memref.load %arg1[%162, %c23] : memref<2x25xf32, #tpu.memory_space<smem>>
    %c23_71 = arith.constant 23 : index
    %c0_72 = arith.constant 0 : index
    %c0_73 = arith.constant 0 : index
    %164 = vector.load %arg2[%c23_71, %c0_72, %c0_73] : memref<25x256x22xf32, #tpu.memory_space<vmem>>, vector<1x256x22xf32>
    %165 = vector.shape_cast %164 : vector<1x256x22xf32> to vector<256x22xf32>
    %166 = vector.broadcast %163 : f32 to vector<256x22xf32>
    %167 = arith.mulf %166, %165 : vector<256x22xf32>
    %168 = arith.addf %161, %167 : vector<256x22xf32>
    %169 = arith.index_cast %arg0 : i32 to index
    %c24 = arith.constant 24 : index
    %170 = memref.load %arg1[%169, %c24] : memref<2x25xf32, #tpu.memory_space<smem>>
    %c24_74 = arith.constant 24 : index
    %c0_75 = arith.constant 0 : index
    %c0_76 = arith.constant 0 : index
    %171 = vector.load %arg2[%c24_74, %c0_75, %c0_76] : memref<25x256x22xf32, #tpu.memory_space<vmem>>, vector<1x256x22xf32>
    %172 = vector.shape_cast %171 : vector<1x256x22xf32> to vector<256x22xf32>
    %173 = vector.broadcast %170 : f32 to vector<256x22xf32>
    %174 = arith.mulf %173, %172 : vector<256x22xf32>
    %175 = arith.addf %168, %174 : vector<256x22xf32>
    %cst = arith.constant 0.000000e+00 : f32
    %176 = vector.broadcast %cst : f32 to vector<256x22xf32>
    %177 = arith.maximumf %175, %176 : vector<256x22xf32>
    %c0_77 = arith.constant 0 : index
    %c0_78 = arith.constant 0 : index
    %178 = vector.load %arg4[%c0_77, %c0_78] : memref<640x256xf32, #tpu.memory_space<vmem>>, vector<640x256xf32>
    %c0_79 = arith.constant 0 : index
    %c0_80 = arith.constant 0 : index
    %179 = vector.load %arg5[%c0_79, %c0_80] : memref<128x1xf32, #tpu.memory_space<vmem>>, vector<128x1xf32>
    %cst_81 = arith.constant dense<0.000000e+00> : vector<640x22xf32>
    %180 = tpu.matmul %178, %177, %cst_81 {dimension_numbers = #tpu.dot_dimension_numbers<[1], [0], [0], [1], [0, 0, 1, 1], [], []>} : vector<640x256xf32>, vector<256x22xf32>, vector<640x22xf32> -> vector<640x22xf32>
    %cst_82 = arith.constant 0.000000e+00 : f32
    %181 = vector.broadcast %cst_82 : f32 to vector<128x43xf32>
    %182 = tpu.iota {dimensions = array<i32: 0>} : vector<22x43xi32>
    %183 = tpu.iota {dimensions = array<i32: 1>} : vector<22x43xi32>
    %c2_i32 = arith.constant 2 : i32
    %184 = vector.broadcast %c2_i32 : i32 to vector<22x43xi32>
    %185 = arith.muli %184, %182 : vector<22x43xi32>
    %c2_i32_83 = arith.constant 2 : i32
    %186 = vector.broadcast %c2_i32_83 : i32 to vector<22x43xi32>
    %187 = arith.addi %185, %186 : vector<22x43xi32>
    %188 = arith.cmpi eq, %183, %187 : vector<22x43xi32>
    %189 = arith.extui %188 : vector<22x43xi1> to vector<22x43xi32>
    %190 = arith.sitofp %189 : vector<22x43xi32> to vector<22x43xf32>
    %191 = vector.extract_strided_slice %180 {offsets = [0, 0], sizes = [128, 22], strides = [1, 1]} : vector<640x22xf32> to vector<128x22xf32>
    %cst_84 = arith.constant dense<0.000000e+00> : vector<128x43xf32>
    %192 = tpu.matmul %191, %190, %cst_84 {dimension_numbers = #tpu.dot_dimension_numbers<[1], [0], [0], [1], [0, 0, 1, 1], [], []>} : vector<128x22xf32>, vector<22x43xf32>, vector<128x43xf32> -> vector<128x43xf32>
    %193 = arith.addf %181, %192 : vector<128x43xf32>
    %194 = tpu.iota {dimensions = array<i32: 0>} : vector<22x43xi32>
    %195 = tpu.iota {dimensions = array<i32: 1>} : vector<22x43xi32>
    %c2_i32_85 = arith.constant 2 : i32
    %196 = vector.broadcast %c2_i32_85 : i32 to vector<22x43xi32>
    %197 = arith.muli %196, %194 : vector<22x43xi32>
    %c1_i32 = arith.constant 1 : i32
    %198 = vector.broadcast %c1_i32 : i32 to vector<22x43xi32>
    %199 = arith.addi %197, %198 : vector<22x43xi32>
    %200 = arith.cmpi eq, %195, %199 : vector<22x43xi32>
    %201 = arith.extui %200 : vector<22x43xi1> to vector<22x43xi32>
    %202 = arith.sitofp %201 : vector<22x43xi32> to vector<22x43xf32>
    %203 = vector.extract_strided_slice %180 {offsets = [128, 0], sizes = [128, 22], strides = [1, 1]} : vector<640x22xf32> to vector<128x22xf32>
    %cst_86 = arith.constant dense<0.000000e+00> : vector<128x43xf32>
    %204 = tpu.matmul %203, %202, %cst_86 {dimension_numbers = #tpu.dot_dimension_numbers<[1], [0], [0], [1], [0, 0, 1, 1], [], []>} : vector<128x22xf32>, vector<22x43xf32>, vector<128x43xf32> -> vector<128x43xf32>
    %205 = arith.addf %193, %204 : vector<128x43xf32>
    %206 = tpu.iota {dimensions = array<i32: 0>} : vector<22x43xi32>
    %207 = tpu.iota {dimensions = array<i32: 1>} : vector<22x43xi32>
    %c2_i32_87 = arith.constant 2 : i32
    %208 = vector.broadcast %c2_i32_87 : i32 to vector<22x43xi32>
    %209 = arith.muli %208, %206 : vector<22x43xi32>
    %c0_i32 = arith.constant 0 : i32
    %210 = vector.broadcast %c0_i32 : i32 to vector<22x43xi32>
    %211 = arith.addi %209, %210 : vector<22x43xi32>
    %212 = arith.cmpi eq, %207, %211 : vector<22x43xi32>
    %213 = arith.extui %212 : vector<22x43xi1> to vector<22x43xi32>
    %214 = arith.sitofp %213 : vector<22x43xi32> to vector<22x43xf32>
    %215 = vector.extract_strided_slice %180 {offsets = [256, 0], sizes = [128, 22], strides = [1, 1]} : vector<640x22xf32> to vector<128x22xf32>
    %cst_88 = arith.constant dense<0.000000e+00> : vector<128x43xf32>
    %216 = tpu.matmul %215, %214, %cst_88 {dimension_numbers = #tpu.dot_dimension_numbers<[1], [0], [0], [1], [0, 0, 1, 1], [], []>} : vector<128x22xf32>, vector<22x43xf32>, vector<128x43xf32> -> vector<128x43xf32>
    %217 = arith.addf %205, %216 : vector<128x43xf32>
    %218 = tpu.iota {dimensions = array<i32: 0>} : vector<22x43xi32>
    %219 = tpu.iota {dimensions = array<i32: 1>} : vector<22x43xi32>
    %c2_i32_89 = arith.constant 2 : i32
    %220 = vector.broadcast %c2_i32_89 : i32 to vector<22x43xi32>
    %221 = arith.muli %220, %218 : vector<22x43xi32>
    %c-1_i32 = arith.constant -1 : i32
    %222 = vector.broadcast %c-1_i32 : i32 to vector<22x43xi32>
    %223 = arith.addi %221, %222 : vector<22x43xi32>
    %224 = arith.cmpi eq, %219, %223 : vector<22x43xi32>
    %225 = arith.extui %224 : vector<22x43xi1> to vector<22x43xi32>
    %226 = arith.sitofp %225 : vector<22x43xi32> to vector<22x43xf32>
    %227 = vector.extract_strided_slice %180 {offsets = [384, 0], sizes = [128, 22], strides = [1, 1]} : vector<640x22xf32> to vector<128x22xf32>
    %cst_90 = arith.constant dense<0.000000e+00> : vector<128x43xf32>
    %228 = tpu.matmul %227, %226, %cst_90 {dimension_numbers = #tpu.dot_dimension_numbers<[1], [0], [0], [1], [0, 0, 1, 1], [], []>} : vector<128x22xf32>, vector<22x43xf32>, vector<128x43xf32> -> vector<128x43xf32>
    %229 = arith.addf %217, %228 : vector<128x43xf32>
    %230 = tpu.iota {dimensions = array<i32: 0>} : vector<22x43xi32>
    %231 = tpu.iota {dimensions = array<i32: 1>} : vector<22x43xi32>
    %c2_i32_91 = arith.constant 2 : i32
    %232 = vector.broadcast %c2_i32_91 : i32 to vector<22x43xi32>
    %233 = arith.muli %232, %230 : vector<22x43xi32>
    %c-2_i32 = arith.constant -2 : i32
    %234 = vector.broadcast %c-2_i32 : i32 to vector<22x43xi32>
    %235 = arith.addi %233, %234 : vector<22x43xi32>
    %236 = arith.cmpi eq, %231, %235 : vector<22x43xi32>
    %237 = arith.extui %236 : vector<22x43xi1> to vector<22x43xi32>
    %238 = arith.sitofp %237 : vector<22x43xi32> to vector<22x43xf32>
    %239 = vector.extract_strided_slice %180 {offsets = [512, 0], sizes = [128, 22], strides = [1, 1]} : vector<640x22xf32> to vector<128x22xf32>
    %cst_92 = arith.constant dense<0.000000e+00> : vector<128x43xf32>
    %240 = tpu.matmul %239, %238, %cst_92 {dimension_numbers = #tpu.dot_dimension_numbers<[1], [0], [0], [1], [0, 0, 1, 1], [], []>} : vector<128x22xf32>, vector<22x43xf32>, vector<128x43xf32> -> vector<128x43xf32>
    %241 = arith.addf %229, %240 : vector<128x43xf32>
    %242 = vector.broadcast %179 : vector<128x1xf32> to vector<128x43xf32>
    %243 = arith.addf %241, %242 : vector<128x43xf32>
    %cst_93 = arith.constant 0.000000e+00 : f32
    %244 = vector.broadcast %cst_93 : f32 to vector<128x43xf32>
    %245 = arith.maximumf %243, %244 : vector<128x43xf32>
    %c0_94 = arith.constant 0 : index
    %c0_95 = arith.constant 0 : index
    %246 = vector.load %arg6[%c0_94, %c0_95] : memref<320x128xf32, #tpu.memory_space<vmem>>, vector<320x128xf32>
    %c0_96 = arith.constant 0 : index
    %c0_97 = arith.constant 0 : index
    %247 = vector.load %arg7[%c0_96, %c0_97] : memref<64x1xf32, #tpu.memory_space<vmem>>, vector<64x1xf32>
    %cst_98 = arith.constant dense<0.000000e+00> : vector<320x43xf32>
    %248 = tpu.matmul %246, %245, %cst_98 {dimension_numbers = #tpu.dot_dimension_numbers<[1], [0], [0], [1], [0, 0, 1, 1], [], []>} : vector<320x128xf32>, vector<128x43xf32>, vector<320x43xf32> -> vector<320x43xf32>
    %cst_99 = arith.constant 0.000000e+00 : f32
    %249 = vector.broadcast %cst_99 : f32 to vector<64x85xf32>
    %250 = tpu.iota {dimensions = array<i32: 0>} : vector<43x85xi32>
    %251 = tpu.iota {dimensions = array<i32: 1>} : vector<43x85xi32>
    %c2_i32_100 = arith.constant 2 : i32
    %252 = vector.broadcast %c2_i32_100 : i32 to vector<43x85xi32>
    %253 = arith.muli %252, %250 : vector<43x85xi32>
    %c2_i32_101 = arith.constant 2 : i32
    %254 = vector.broadcast %c2_i32_101 : i32 to vector<43x85xi32>
    %255 = arith.addi %253, %254 : vector<43x85xi32>
    %256 = arith.cmpi eq, %251, %255 : vector<43x85xi32>
    %257 = arith.extui %256 : vector<43x85xi1> to vector<43x85xi32>
    %258 = arith.sitofp %257 : vector<43x85xi32> to vector<43x85xf32>
    %259 = vector.extract_strided_slice %248 {offsets = [0, 0], sizes = [64, 43], strides = [1, 1]} : vector<320x43xf32> to vector<64x43xf32>
    %cst_102 = arith.constant dense<0.000000e+00> : vector<64x85xf32>
    %260 = tpu.matmul %259, %258, %cst_102 {dimension_numbers = #tpu.dot_dimension_numbers<[1], [0], [0], [1], [0, 0, 1, 1], [], []>} : vector<64x43xf32>, vector<43x85xf32>, vector<64x85xf32> -> vector<64x85xf32>
    %261 = arith.addf %249, %260 : vector<64x85xf32>
    %262 = tpu.iota {dimensions = array<i32: 0>} : vector<43x85xi32>
    %263 = tpu.iota {dimensions = array<i32: 1>} : vector<43x85xi32>
    %c2_i32_103 = arith.constant 2 : i32
    %264 = vector.broadcast %c2_i32_103 : i32 to vector<43x85xi32>
    %265 = arith.muli %264, %262 : vector<43x85xi32>
    %c1_i32_104 = arith.constant 1 : i32
    %266 = vector.broadcast %c1_i32_104 : i32 to vector<43x85xi32>
    %267 = arith.addi %265, %266 : vector<43x85xi32>
    %268 = arith.cmpi eq, %263, %267 : vector<43x85xi32>
    %269 = arith.extui %268 : vector<43x85xi1> to vector<43x85xi32>
    %270 = arith.sitofp %269 : vector<43x85xi32> to vector<43x85xf32>
    %271 = vector.extract_strided_slice %248 {offsets = [64, 0], sizes = [64, 43], strides = [1, 1]} : vector<320x43xf32> to vector<64x43xf32>
    %cst_105 = arith.constant dense<0.000000e+00> : vector<64x85xf32>
    %272 = tpu.matmul %271, %270, %cst_105 {dimension_numbers = #tpu.dot_dimension_numbers<[1], [0], [0], [1], [0, 0, 1, 1], [], []>} : vector<64x43xf32>, vector<43x85xf32>, vector<64x85xf32> -> vector<64x85xf32>
    %273 = arith.addf %261, %272 : vector<64x85xf32>
    %274 = tpu.iota {dimensions = array<i32: 0>} : vector<43x85xi32>
    %275 = tpu.iota {dimensions = array<i32: 1>} : vector<43x85xi32>
    %c2_i32_106 = arith.constant 2 : i32
    %276 = vector.broadcast %c2_i32_106 : i32 to vector<43x85xi32>
    %277 = arith.muli %276, %274 : vector<43x85xi32>
    %c0_i32_107 = arith.constant 0 : i32
    %278 = vector.broadcast %c0_i32_107 : i32 to vector<43x85xi32>
    %279 = arith.addi %277, %278 : vector<43x85xi32>
    %280 = arith.cmpi eq, %275, %279 : vector<43x85xi32>
    %281 = arith.extui %280 : vector<43x85xi1> to vector<43x85xi32>
    %282 = arith.sitofp %281 : vector<43x85xi32> to vector<43x85xf32>
    %283 = vector.extract_strided_slice %248 {offsets = [128, 0], sizes = [64, 43], strides = [1, 1]} : vector<320x43xf32> to vector<64x43xf32>
    %cst_108 = arith.constant dense<0.000000e+00> : vector<64x85xf32>
    %284 = tpu.matmul %283, %282, %cst_108 {dimension_numbers = #tpu.dot_dimension_numbers<[1], [0], [0], [1], [0, 0, 1, 1], [], []>} : vector<64x43xf32>, vector<43x85xf32>, vector<64x85xf32> -> vector<64x85xf32>
    %285 = arith.addf %273, %284 : vector<64x85xf32>
    %286 = tpu.iota {dimensions = array<i32: 0>} : vector<43x85xi32>
    %287 = tpu.iota {dimensions = array<i32: 1>} : vector<43x85xi32>
    %c2_i32_109 = arith.constant 2 : i32
    %288 = vector.broadcast %c2_i32_109 : i32 to vector<43x85xi32>
    %289 = arith.muli %288, %286 : vector<43x85xi32>
    %c-1_i32_110 = arith.constant -1 : i32
    %290 = vector.broadcast %c-1_i32_110 : i32 to vector<43x85xi32>
    %291 = arith.addi %289, %290 : vector<43x85xi32>
    %292 = arith.cmpi eq, %287, %291 : vector<43x85xi32>
    %293 = arith.extui %292 : vector<43x85xi1> to vector<43x85xi32>
    %294 = arith.sitofp %293 : vector<43x85xi32> to vector<43x85xf32>
    %295 = vector.extract_strided_slice %248 {offsets = [192, 0], sizes = [64, 43], strides = [1, 1]} : vector<320x43xf32> to vector<64x43xf32>
    %cst_111 = arith.constant dense<0.000000e+00> : vector<64x85xf32>
    %296 = tpu.matmul %295, %294, %cst_111 {dimension_numbers = #tpu.dot_dimension_numbers<[1], [0], [0], [1], [0, 0, 1, 1], [], []>} : vector<64x43xf32>, vector<43x85xf32>, vector<64x85xf32> -> vector<64x85xf32>
    %297 = arith.addf %285, %296 : vector<64x85xf32>
    %298 = tpu.iota {dimensions = array<i32: 0>} : vector<43x85xi32>
    %299 = tpu.iota {dimensions = array<i32: 1>} : vector<43x85xi32>
    %c2_i32_112 = arith.constant 2 : i32
    %300 = vector.broadcast %c2_i32_112 : i32 to vector<43x85xi32>
    %301 = arith.muli %300, %298 : vector<43x85xi32>
    %c-2_i32_113 = arith.constant -2 : i32
    %302 = vector.broadcast %c-2_i32_113 : i32 to vector<43x85xi32>
    %303 = arith.addi %301, %302 : vector<43x85xi32>
    %304 = arith.cmpi eq, %299, %303 : vector<43x85xi32>
    %305 = arith.extui %304 : vector<43x85xi1> to vector<43x85xi32>
    %306 = arith.sitofp %305 : vector<43x85xi32> to vector<43x85xf32>
    %307 = vector.extract_strided_slice %248 {offsets = [256, 0], sizes = [64, 43], strides = [1, 1]} : vector<320x43xf32> to vector<64x43xf32>
    %cst_114 = arith.constant dense<0.000000e+00> : vector<64x85xf32>
    %308 = tpu.matmul %307, %306, %cst_114 {dimension_numbers = #tpu.dot_dimension_numbers<[1], [0], [0], [1], [0, 0, 1, 1], [], []>} : vector<64x43xf32>, vector<43x85xf32>, vector<64x85xf32> -> vector<64x85xf32>
    %309 = arith.addf %297, %308 : vector<64x85xf32>
    %310 = vector.broadcast %247 : vector<64x1xf32> to vector<64x85xf32>
    %311 = arith.addf %309, %310 : vector<64x85xf32>
    %cst_115 = arith.constant 0.000000e+00 : f32
    %312 = vector.broadcast %cst_115 : f32 to vector<64x85xf32>
    %313 = arith.maximumf %311, %312 : vector<64x85xf32>
    %c0_116 = arith.constant 0 : index
    %c0_117 = arith.constant 0 : index
    %314 = vector.load %arg8[%c0_116, %c0_117] : memref<160x64xf32, #tpu.memory_space<vmem>>, vector<160x64xf32>
    %c0_118 = arith.constant 0 : index
    %c0_119 = arith.constant 0 : index
    %315 = vector.load %arg9[%c0_118, %c0_119] : memref<32x1xf32, #tpu.memory_space<vmem>>, vector<32x1xf32>
    %cst_120 = arith.constant dense<0.000000e+00> : vector<160x85xf32>
    %316 = tpu.matmul %314, %313, %cst_120 {dimension_numbers = #tpu.dot_dimension_numbers<[1], [0], [0], [1], [0, 0, 1, 1], [], []>} : vector<160x64xf32>, vector<64x85xf32>, vector<160x85xf32> -> vector<160x85xf32>
    %cst_121 = arith.constant 0.000000e+00 : f32
    %317 = vector.broadcast %cst_121 : f32 to vector<32x169xf32>
    %318 = tpu.iota {dimensions = array<i32: 0>} : vector<85x169xi32>
    %319 = tpu.iota {dimensions = array<i32: 1>} : vector<85x169xi32>
    %c2_i32_122 = arith.constant 2 : i32
    %320 = vector.broadcast %c2_i32_122 : i32 to vector<85x169xi32>
    %321 = arith.muli %320, %318 : vector<85x169xi32>
    %c2_i32_123 = arith.constant 2 : i32
    %322 = vector.broadcast %c2_i32_123 : i32 to vector<85x169xi32>
    %323 = arith.addi %321, %322 : vector<85x169xi32>
    %324 = arith.cmpi eq, %319, %323 : vector<85x169xi32>
    %325 = arith.extui %324 : vector<85x169xi1> to vector<85x169xi32>
    %326 = arith.sitofp %325 : vector<85x169xi32> to vector<85x169xf32>
    %327 = vector.extract_strided_slice %316 {offsets = [0, 0], sizes = [32, 85], strides = [1, 1]} : vector<160x85xf32> to vector<32x85xf32>
    %cst_124 = arith.constant dense<0.000000e+00> : vector<32x169xf32>
    %328 = tpu.matmul %327, %326, %cst_124 {dimension_numbers = #tpu.dot_dimension_numbers<[1], [0], [0], [1], [0, 0, 1, 1], [], []>} : vector<32x85xf32>, vector<85x169xf32>, vector<32x169xf32> -> vector<32x169xf32>
    %329 = arith.addf %317, %328 : vector<32x169xf32>
    %330 = tpu.iota {dimensions = array<i32: 0>} : vector<85x169xi32>
    %331 = tpu.iota {dimensions = array<i32: 1>} : vector<85x169xi32>
    %c2_i32_125 = arith.constant 2 : i32
    %332 = vector.broadcast %c2_i32_125 : i32 to vector<85x169xi32>
    %333 = arith.muli %332, %330 : vector<85x169xi32>
    %c1_i32_126 = arith.constant 1 : i32
    %334 = vector.broadcast %c1_i32_126 : i32 to vector<85x169xi32>
    %335 = arith.addi %333, %334 : vector<85x169xi32>
    %336 = arith.cmpi eq, %331, %335 : vector<85x169xi32>
    %337 = arith.extui %336 : vector<85x169xi1> to vector<85x169xi32>
    %338 = arith.sitofp %337 : vector<85x169xi32> to vector<85x169xf32>
    %339 = vector.extract_strided_slice %316 {offsets = [32, 0], sizes = [32, 85], strides = [1, 1]} : vector<160x85xf32> to vector<32x85xf32>
    %cst_127 = arith.constant dense<0.000000e+00> : vector<32x169xf32>
    %340 = tpu.matmul %339, %338, %cst_127 {dimension_numbers = #tpu.dot_dimension_numbers<[1], [0], [0], [1], [0, 0, 1, 1], [], []>} : vector<32x85xf32>, vector<85x169xf32>, vector<32x169xf32> -> vector<32x169xf32>
    %341 = arith.addf %329, %340 : vector<32x169xf32>
    %342 = tpu.iota {dimensions = array<i32: 0>} : vector<85x169xi32>
    %343 = tpu.iota {dimensions = array<i32: 1>} : vector<85x169xi32>
    %c2_i32_128 = arith.constant 2 : i32
    %344 = vector.broadcast %c2_i32_128 : i32 to vector<85x169xi32>
    %345 = arith.muli %344, %342 : vector<85x169xi32>
    %c0_i32_129 = arith.constant 0 : i32
    %346 = vector.broadcast %c0_i32_129 : i32 to vector<85x169xi32>
    %347 = arith.addi %345, %346 : vector<85x169xi32>
    %348 = arith.cmpi eq, %343, %347 : vector<85x169xi32>
    %349 = arith.extui %348 : vector<85x169xi1> to vector<85x169xi32>
    %350 = arith.sitofp %349 : vector<85x169xi32> to vector<85x169xf32>
    %351 = vector.extract_strided_slice %316 {offsets = [64, 0], sizes = [32, 85], strides = [1, 1]} : vector<160x85xf32> to vector<32x85xf32>
    %cst_130 = arith.constant dense<0.000000e+00> : vector<32x169xf32>
    %352 = tpu.matmul %351, %350, %cst_130 {dimension_numbers = #tpu.dot_dimension_numbers<[1], [0], [0], [1], [0, 0, 1, 1], [], []>} : vector<32x85xf32>, vector<85x169xf32>, vector<32x169xf32> -> vector<32x169xf32>
    %353 = arith.addf %341, %352 : vector<32x169xf32>
    %354 = tpu.iota {dimensions = array<i32: 0>} : vector<85x169xi32>
    %355 = tpu.iota {dimensions = array<i32: 1>} : vector<85x169xi32>
    %c2_i32_131 = arith.constant 2 : i32
    %356 = vector.broadcast %c2_i32_131 : i32 to vector<85x169xi32>
    %357 = arith.muli %356, %354 : vector<85x169xi32>
    %c-1_i32_132 = arith.constant -1 : i32
    %358 = vector.broadcast %c-1_i32_132 : i32 to vector<85x169xi32>
    %359 = arith.addi %357, %358 : vector<85x169xi32>
    %360 = arith.cmpi eq, %355, %359 : vector<85x169xi32>
    %361 = arith.extui %360 : vector<85x169xi1> to vector<85x169xi32>
    %362 = arith.sitofp %361 : vector<85x169xi32> to vector<85x169xf32>
    %363 = vector.extract_strided_slice %316 {offsets = [96, 0], sizes = [32, 85], strides = [1, 1]} : vector<160x85xf32> to vector<32x85xf32>
    %cst_133 = arith.constant dense<0.000000e+00> : vector<32x169xf32>
    %364 = tpu.matmul %363, %362, %cst_133 {dimension_numbers = #tpu.dot_dimension_numbers<[1], [0], [0], [1], [0, 0, 1, 1], [], []>} : vector<32x85xf32>, vector<85x169xf32>, vector<32x169xf32> -> vector<32x169xf32>
    %365 = arith.addf %353, %364 : vector<32x169xf32>
    %366 = tpu.iota {dimensions = array<i32: 0>} : vector<85x169xi32>
    %367 = tpu.iota {dimensions = array<i32: 1>} : vector<85x169xi32>
    %c2_i32_134 = arith.constant 2 : i32
    %368 = vector.broadcast %c2_i32_134 : i32 to vector<85x169xi32>
    %369 = arith.muli %368, %366 : vector<85x169xi32>
    %c-2_i32_135 = arith.constant -2 : i32
    %370 = vector.broadcast %c-2_i32_135 : i32 to vector<85x169xi32>
    %371 = arith.addi %369, %370 : vector<85x169xi32>
    %372 = arith.cmpi eq, %367, %371 : vector<85x169xi32>
    %373 = arith.extui %372 : vector<85x169xi1> to vector<85x169xi32>
    %374 = arith.sitofp %373 : vector<85x169xi32> to vector<85x169xf32>
    %375 = vector.extract_strided_slice %316 {offsets = [128, 0], sizes = [32, 85], strides = [1, 1]} : vector<160x85xf32> to vector<32x85xf32>
    %cst_136 = arith.constant dense<0.000000e+00> : vector<32x169xf32>
    %376 = tpu.matmul %375, %374, %cst_136 {dimension_numbers = #tpu.dot_dimension_numbers<[1], [0], [0], [1], [0, 0, 1, 1], [], []>} : vector<32x85xf32>, vector<85x169xf32>, vector<32x169xf32> -> vector<32x169xf32>
    %377 = arith.addf %365, %376 : vector<32x169xf32>
    %378 = vector.broadcast %315 : vector<32x1xf32> to vector<32x169xf32>
    %379 = arith.addf %377, %378 : vector<32x169xf32>
    %cst_137 = arith.constant 0.000000e+00 : f32
    %380 = vector.broadcast %cst_137 : f32 to vector<32x169xf32>
    %381 = arith.maximumf %379, %380 : vector<32x169xf32>
    %c0_138 = arith.constant 0 : index
    %c0_139 = arith.constant 0 : index
    %382 = vector.load %arg10[%c0_138, %c0_139] : memref<80x32xf32, #tpu.memory_space<vmem>>, vector<80x32xf32>
    %c0_140 = arith.constant 0 : index
    %c0_141 = arith.constant 0 : index
    %383 = vector.load %arg11[%c0_140, %c0_141] : memref<16x1xf32, #tpu.memory_space<vmem>>, vector<16x1xf32>
    %cst_142 = arith.constant dense<0.000000e+00> : vector<80x169xf32>
    %384 = tpu.matmul %382, %381, %cst_142 {dimension_numbers = #tpu.dot_dimension_numbers<[1], [0], [0], [1], [0, 0, 1, 1], [], []>} : vector<80x32xf32>, vector<32x169xf32>, vector<80x169xf32> -> vector<80x169xf32>
    %cst_143 = arith.constant 0.000000e+00 : f32
    %385 = vector.broadcast %cst_143 : f32 to vector<16x337xf32>
    %386 = tpu.iota {dimensions = array<i32: 0>} : vector<169x337xi32>
    %387 = tpu.iota {dimensions = array<i32: 1>} : vector<169x337xi32>
    %c2_i32_144 = arith.constant 2 : i32
    %388 = vector.broadcast %c2_i32_144 : i32 to vector<169x337xi32>
    %389 = arith.muli %388, %386 : vector<169x337xi32>
    %c2_i32_145 = arith.constant 2 : i32
    %390 = vector.broadcast %c2_i32_145 : i32 to vector<169x337xi32>
    %391 = arith.addi %389, %390 : vector<169x337xi32>
    %392 = arith.cmpi eq, %387, %391 : vector<169x337xi32>
    %393 = arith.extui %392 : vector<169x337xi1> to vector<169x337xi32>
    %394 = arith.sitofp %393 : vector<169x337xi32> to vector<169x337xf32>
    %395 = vector.extract_strided_slice %384 {offsets = [0, 0], sizes = [16, 169], strides = [1, 1]} : vector<80x169xf32> to vector<16x169xf32>
    %cst_146 = arith.constant dense<0.000000e+00> : vector<16x337xf32>
    %396 = tpu.matmul %395, %394, %cst_146 {dimension_numbers = #tpu.dot_dimension_numbers<[1], [0], [0], [1], [0, 0, 1, 1], [], []>} : vector<16x169xf32>, vector<169x337xf32>, vector<16x337xf32> -> vector<16x337xf32>
    %397 = arith.addf %385, %396 : vector<16x337xf32>
    %398 = tpu.iota {dimensions = array<i32: 0>} : vector<169x337xi32>
    %399 = tpu.iota {dimensions = array<i32: 1>} : vector<169x337xi32>
    %c2_i32_147 = arith.constant 2 : i32
    %400 = vector.broadcast %c2_i32_147 : i32 to vector<169x337xi32>
    %401 = arith.muli %400, %398 : vector<169x337xi32>
    %c1_i32_148 = arith.constant 1 : i32
    %402 = vector.broadcast %c1_i32_148 : i32 to vector<169x337xi32>
    %403 = arith.addi %401, %402 : vector<169x337xi32>
    %404 = arith.cmpi eq, %399, %403 : vector<169x337xi32>
    %405 = arith.extui %404 : vector<169x337xi1> to vector<169x337xi32>
    %406 = arith.sitofp %405 : vector<169x337xi32> to vector<169x337xf32>
    %407 = vector.extract_strided_slice %384 {offsets = [16, 0], sizes = [16, 169], strides = [1, 1]} : vector<80x169xf32> to vector<16x169xf32>
    %cst_149 = arith.constant dense<0.000000e+00> : vector<16x337xf32>
    %408 = tpu.matmul %407, %406, %cst_149 {dimension_numbers = #tpu.dot_dimension_numbers<[1], [0], [0], [1], [0, 0, 1, 1], [], []>} : vector<16x169xf32>, vector<169x337xf32>, vector<16x337xf32> -> vector<16x337xf32>
    %409 = arith.addf %397, %408 : vector<16x337xf32>
    %410 = tpu.iota {dimensions = array<i32: 0>} : vector<169x337xi32>
    %411 = tpu.iota {dimensions = array<i32: 1>} : vector<169x337xi32>
    %c2_i32_150 = arith.constant 2 : i32
    %412 = vector.broadcast %c2_i32_150 : i32 to vector<169x337xi32>
    %413 = arith.muli %412, %410 : vector<169x337xi32>
    %c0_i32_151 = arith.constant 0 : i32
    %414 = vector.broadcast %c0_i32_151 : i32 to vector<169x337xi32>
    %415 = arith.addi %413, %414 : vector<169x337xi32>
    %416 = arith.cmpi eq, %411, %415 : vector<169x337xi32>
    %417 = arith.extui %416 : vector<169x337xi1> to vector<169x337xi32>
    %418 = arith.sitofp %417 : vector<169x337xi32> to vector<169x337xf32>
    %419 = vector.extract_strided_slice %384 {offsets = [32, 0], sizes = [16, 169], strides = [1, 1]} : vector<80x169xf32> to vector<16x169xf32>
    %cst_152 = arith.constant dense<0.000000e+00> : vector<16x337xf32>
    %420 = tpu.matmul %419, %418, %cst_152 {dimension_numbers = #tpu.dot_dimension_numbers<[1], [0], [0], [1], [0, 0, 1, 1], [], []>} : vector<16x169xf32>, vector<169x337xf32>, vector<16x337xf32> -> vector<16x337xf32>
    %421 = arith.addf %409, %420 : vector<16x337xf32>
    %422 = tpu.iota {dimensions = array<i32: 0>} : vector<169x337xi32>
    %423 = tpu.iota {dimensions = array<i32: 1>} : vector<169x337xi32>
    %c2_i32_153 = arith.constant 2 : i32
    %424 = vector.broadcast %c2_i32_153 : i32 to vector<169x337xi32>
    %425 = arith.muli %424, %422 : vector<169x337xi32>
    %c-1_i32_154 = arith.constant -1 : i32
    %426 = vector.broadcast %c-1_i32_154 : i32 to vector<169x337xi32>
    %427 = arith.addi %425, %426 : vector<169x337xi32>
    %428 = arith.cmpi eq, %423, %427 : vector<169x337xi32>
    %429 = arith.extui %428 : vector<169x337xi1> to vector<169x337xi32>
    %430 = arith.sitofp %429 : vector<169x337xi32> to vector<169x337xf32>
    %431 = vector.extract_strided_slice %384 {offsets = [48, 0], sizes = [16, 169], strides = [1, 1]} : vector<80x169xf32> to vector<16x169xf32>
    %cst_155 = arith.constant dense<0.000000e+00> : vector<16x337xf32>
    %432 = tpu.matmul %431, %430, %cst_155 {dimension_numbers = #tpu.dot_dimension_numbers<[1], [0], [0], [1], [0, 0, 1, 1], [], []>} : vector<16x169xf32>, vector<169x337xf32>, vector<16x337xf32> -> vector<16x337xf32>
    %433 = arith.addf %421, %432 : vector<16x337xf32>
    %434 = tpu.iota {dimensions = array<i32: 0>} : vector<169x337xi32>
    %435 = tpu.iota {dimensions = array<i32: 1>} : vector<169x337xi32>
    %c2_i32_156 = arith.constant 2 : i32
    %436 = vector.broadcast %c2_i32_156 : i32 to vector<169x337xi32>
    %437 = arith.muli %436, %434 : vector<169x337xi32>
    %c-2_i32_157 = arith.constant -2 : i32
    %438 = vector.broadcast %c-2_i32_157 : i32 to vector<169x337xi32>
    %439 = arith.addi %437, %438 : vector<169x337xi32>
    %440 = arith.cmpi eq, %435, %439 : vector<169x337xi32>
    %441 = arith.extui %440 : vector<169x337xi1> to vector<169x337xi32>
    %442 = arith.sitofp %441 : vector<169x337xi32> to vector<169x337xf32>
    %443 = vector.extract_strided_slice %384 {offsets = [64, 0], sizes = [16, 169], strides = [1, 1]} : vector<80x169xf32> to vector<16x169xf32>
    %cst_158 = arith.constant dense<0.000000e+00> : vector<16x337xf32>
    %444 = tpu.matmul %443, %442, %cst_158 {dimension_numbers = #tpu.dot_dimension_numbers<[1], [0], [0], [1], [0, 0, 1, 1], [], []>} : vector<16x169xf32>, vector<169x337xf32>, vector<16x337xf32> -> vector<16x337xf32>
    %445 = arith.addf %433, %444 : vector<16x337xf32>
    %446 = vector.broadcast %383 : vector<16x1xf32> to vector<16x337xf32>
    %447 = arith.addf %445, %446 : vector<16x337xf32>
    %cst_159 = arith.constant 0.000000e+00 : f32
    %448 = vector.broadcast %cst_159 : f32 to vector<16x337xf32>
    %449 = arith.maximumf %447, %448 : vector<16x337xf32>
    %c0_160 = arith.constant 0 : index
    %c0_161 = arith.constant 0 : index
    %450 = vector.load %arg12[%c0_160, %c0_161] : memref<6x16xf32, #tpu.memory_space<vmem>>, vector<6x16xf32>
    %cst_162 = arith.constant dense<0.000000e+00> : vector<6x337xf32>
    %451 = tpu.matmul %450, %449, %cst_162 {dimension_numbers = #tpu.dot_dimension_numbers<[1], [0], [0], [1], [0, 0, 1, 1], [], []>} : vector<6x16xf32>, vector<16x337xf32>, vector<6x337xf32> -> vector<6x337xf32>
    %cst_163 = arith.constant 0.000000e+00 : f32
    %452 = vector.broadcast %cst_163 : f32 to vector<1x336xf32>
    %453 = tpu.iota {dimensions = array<i32: 0>} : vector<337x336xi32>
    %454 = tpu.iota {dimensions = array<i32: 1>} : vector<337x336xi32>
    %c1_i32_164 = arith.constant 1 : i32
    %455 = vector.broadcast %c1_i32_164 : i32 to vector<337x336xi32>
    %456 = arith.muli %455, %453 : vector<337x336xi32>
    %c2_i32_165 = arith.constant 2 : i32
    %457 = vector.broadcast %c2_i32_165 : i32 to vector<337x336xi32>
    %458 = arith.addi %456, %457 : vector<337x336xi32>
    %459 = arith.cmpi eq, %454, %458 : vector<337x336xi32>
    %460 = arith.extui %459 : vector<337x336xi1> to vector<337x336xi32>
    %461 = arith.sitofp %460 : vector<337x336xi32> to vector<337x336xf32>
    %462 = vector.extract_strided_slice %451 {offsets = [0, 0], sizes = [1, 337], strides = [1, 1]} : vector<6x337xf32> to vector<1x337xf32>
    %cst_166 = arith.constant dense<0.000000e+00> : vector<1x336xf32>
    %463 = tpu.matmul %462, %461, %cst_166 {dimension_numbers = #tpu.dot_dimension_numbers<[1], [0], [0], [1], [0, 0, 1, 1], [], []>} : vector<1x337xf32>, vector<337x336xf32>, vector<1x336xf32> -> vector<1x336xf32>
    %464 = arith.addf %452, %463 : vector<1x336xf32>
    %465 = tpu.iota {dimensions = array<i32: 0>} : vector<337x336xi32>
    %466 = tpu.iota {dimensions = array<i32: 1>} : vector<337x336xi32>
    %c1_i32_167 = arith.constant 1 : i32
    %467 = vector.broadcast %c1_i32_167 : i32 to vector<337x336xi32>
    %468 = arith.muli %467, %465 : vector<337x336xi32>
    %c1_i32_168 = arith.constant 1 : i32
    %469 = vector.broadcast %c1_i32_168 : i32 to vector<337x336xi32>
    %470 = arith.addi %468, %469 : vector<337x336xi32>
    %471 = arith.cmpi eq, %466, %470 : vector<337x336xi32>
    %472 = arith.extui %471 : vector<337x336xi1> to vector<337x336xi32>
    %473 = arith.sitofp %472 : vector<337x336xi32> to vector<337x336xf32>
    %474 = vector.extract_strided_slice %451 {offsets = [1, 0], sizes = [1, 337], strides = [1, 1]} : vector<6x337xf32> to vector<1x337xf32>
    %cst_169 = arith.constant dense<0.000000e+00> : vector<1x336xf32>
    %475 = tpu.matmul %474, %473, %cst_169 {dimension_numbers = #tpu.dot_dimension_numbers<[1], [0], [0], [1], [0, 0, 1, 1], [], []>} : vector<1x337xf32>, vector<337x336xf32>, vector<1x336xf32> -> vector<1x336xf32>
    %476 = arith.addf %464, %475 : vector<1x336xf32>
    %477 = tpu.iota {dimensions = array<i32: 0>} : vector<337x336xi32>
    %478 = tpu.iota {dimensions = array<i32: 1>} : vector<337x336xi32>
    %c1_i32_170 = arith.constant 1 : i32
    %479 = vector.broadcast %c1_i32_170 : i32 to vector<337x336xi32>
    %480 = arith.muli %479, %477 : vector<337x336xi32>
    %c0_i32_171 = arith.constant 0 : i32
    %481 = vector.broadcast %c0_i32_171 : i32 to vector<337x336xi32>
    %482 = arith.addi %480, %481 : vector<337x336xi32>
    %483 = arith.cmpi eq, %478, %482 : vector<337x336xi32>
    %484 = arith.extui %483 : vector<337x336xi1> to vector<337x336xi32>
    %485 = arith.sitofp %484 : vector<337x336xi32> to vector<337x336xf32>
    %486 = vector.extract_strided_slice %451 {offsets = [2, 0], sizes = [1, 337], strides = [1, 1]} : vector<6x337xf32> to vector<1x337xf32>
    %cst_172 = arith.constant dense<0.000000e+00> : vector<1x336xf32>
    %487 = tpu.matmul %486, %485, %cst_172 {dimension_numbers = #tpu.dot_dimension_numbers<[1], [0], [0], [1], [0, 0, 1, 1], [], []>} : vector<1x337xf32>, vector<337x336xf32>, vector<1x336xf32> -> vector<1x336xf32>
    %488 = arith.addf %476, %487 : vector<1x336xf32>
    %489 = tpu.iota {dimensions = array<i32: 0>} : vector<337x336xi32>
    %490 = tpu.iota {dimensions = array<i32: 1>} : vector<337x336xi32>
    %c1_i32_173 = arith.constant 1 : i32
    %491 = vector.broadcast %c1_i32_173 : i32 to vector<337x336xi32>
    %492 = arith.muli %491, %489 : vector<337x336xi32>
    %c-1_i32_174 = arith.constant -1 : i32
    %493 = vector.broadcast %c-1_i32_174 : i32 to vector<337x336xi32>
    %494 = arith.addi %492, %493 : vector<337x336xi32>
    %495 = arith.cmpi eq, %490, %494 : vector<337x336xi32>
    %496 = arith.extui %495 : vector<337x336xi1> to vector<337x336xi32>
    %497 = arith.sitofp %496 : vector<337x336xi32> to vector<337x336xf32>
    %498 = vector.extract_strided_slice %451 {offsets = [3, 0], sizes = [1, 337], strides = [1, 1]} : vector<6x337xf32> to vector<1x337xf32>
    %cst_175 = arith.constant dense<0.000000e+00> : vector<1x336xf32>
    %499 = tpu.matmul %498, %497, %cst_175 {dimension_numbers = #tpu.dot_dimension_numbers<[1], [0], [0], [1], [0, 0, 1, 1], [], []>} : vector<1x337xf32>, vector<337x336xf32>, vector<1x336xf32> -> vector<1x336xf32>
    %500 = arith.addf %488, %499 : vector<1x336xf32>
    %501 = tpu.iota {dimensions = array<i32: 0>} : vector<337x336xi32>
    %502 = tpu.iota {dimensions = array<i32: 1>} : vector<337x336xi32>
    %c1_i32_176 = arith.constant 1 : i32
    %503 = vector.broadcast %c1_i32_176 : i32 to vector<337x336xi32>
    %504 = arith.muli %503, %501 : vector<337x336xi32>
    %c-2_i32_177 = arith.constant -2 : i32
    %505 = vector.broadcast %c-2_i32_177 : i32 to vector<337x336xi32>
    %506 = arith.addi %504, %505 : vector<337x336xi32>
    %507 = arith.cmpi eq, %502, %506 : vector<337x336xi32>
    %508 = arith.extui %507 : vector<337x336xi1> to vector<337x336xi32>
    %509 = arith.sitofp %508 : vector<337x336xi32> to vector<337x336xf32>
    %510 = vector.extract_strided_slice %451 {offsets = [4, 0], sizes = [1, 337], strides = [1, 1]} : vector<6x337xf32> to vector<1x337xf32>
    %cst_178 = arith.constant dense<0.000000e+00> : vector<1x336xf32>
    %511 = tpu.matmul %510, %509, %cst_178 {dimension_numbers = #tpu.dot_dimension_numbers<[1], [0], [0], [1], [0, 0, 1, 1], [], []>} : vector<1x337xf32>, vector<337x336xf32>, vector<1x336xf32> -> vector<1x336xf32>
    %512 = arith.addf %500, %511 : vector<1x336xf32>
    %513 = tpu.iota {dimensions = array<i32: 0>} : vector<337x336xi32>
    %514 = tpu.iota {dimensions = array<i32: 1>} : vector<337x336xi32>
    %c1_i32_179 = arith.constant 1 : i32
    %515 = vector.broadcast %c1_i32_179 : i32 to vector<337x336xi32>
    %516 = arith.muli %515, %513 : vector<337x336xi32>
    %c-3_i32 = arith.constant -3 : i32
    %517 = vector.broadcast %c-3_i32 : i32 to vector<337x336xi32>
    %518 = arith.addi %516, %517 : vector<337x336xi32>
    %519 = arith.cmpi eq, %514, %518 : vector<337x336xi32>
    %520 = arith.extui %519 : vector<337x336xi1> to vector<337x336xi32>
    %521 = arith.sitofp %520 : vector<337x336xi32> to vector<337x336xf32>
    %522 = vector.extract_strided_slice %451 {offsets = [5, 0], sizes = [1, 337], strides = [1, 1]} : vector<6x337xf32> to vector<1x337xf32>
    %cst_180 = arith.constant dense<0.000000e+00> : vector<1x336xf32>
    %523 = tpu.matmul %522, %521, %cst_180 {dimension_numbers = #tpu.dot_dimension_numbers<[1], [0], [0], [1], [0, 0, 1, 1], [], []>} : vector<1x337xf32>, vector<337x336xf32>, vector<1x336xf32> -> vector<1x336xf32>
    %524 = arith.addf %512, %523 : vector<1x336xf32>
    %c0_181 = arith.constant 0 : index
    %c0_182 = arith.constant 0 : index
    %525 = vector.load %arg13[%c0_181, %c0_182] : memref<1x1xf32, #tpu.memory_space<vmem>>, vector<1x1xf32>
    %526 = vector.broadcast %525 : vector<1x1xf32> to vector<1x336xf32>
    %527 = arith.addf %524, %526 : vector<1x336xf32>
    %528 = math.tanh %527 : vector<1x336xf32>
    %c0_183 = arith.constant 0 : index
    %c0_184 = arith.constant 0 : index
    %c0_185 = arith.constant 0 : index
    %529 = vector.load %arg14[%c0_183, %c0_184, %c0_185] : memref<1x1x336xf32, #tpu.memory_space<vmem>>, vector<1x1x336xf32>
    %530 = vector.shape_cast %529 : vector<1x1x336xf32> to vector<1x336xf32>
    %531 = vector.shape_cast %528 : vector<1x336xf32> to vector<1x1x336xf32>
    tpu.vector_store %arg14[%c0_183, %c0_184, %c0_185], %531 {strides = array<i32>} : memref<1x1x336xf32, #tpu.memory_space<vmem>>, vector<1x1x336xf32>,
    return
  }
  func.func @transform_0(%arg0: i32) -> (i32, i32) {
    %c0_i32 = arith.constant 0 : i32
    %c0_i32_0 = arith.constant 0 : i32
    %c0_i32_1 = arith.constant 0 : i32
    return %c0_i32, %c0_i32_0 : i32, i32
  }
  func.func @transform_1(%arg0: i32) -> (i32, i32, i32) {
    %c0_i32 = arith.constant 0 : i32
    %c0_i32_0 = arith.constant 0 : i32
    %c0_i32_1 = arith.constant 0 : i32
    %c0_i32_2 = arith.constant 0 : i32
    return %c0_i32, %c0_i32_0, %c0_i32_1 : i32, i32, i32
  }
  func.func @transform_2(%arg0: i32) -> (i32, i32) {
    %c0_i32 = arith.constant 0 : i32
    %c0_i32_0 = arith.constant 0 : i32
    %c0_i32_1 = arith.constant 0 : i32
    return %c0_i32, %c0_i32_0 : i32, i32
  }
  func.func @transform_3(%arg0: i32) -> (i32, i32) {
    %c0_i32 = arith.constant 0 : i32
    %c0_i32_0 = arith.constant 0 : i32
    %c0_i32_1 = arith.constant 0 : i32
    return %c0_i32, %c0_i32_0 : i32, i32
  }
  func.func @transform_4(%arg0: i32) -> (i32, i32) {
    %c0_i32 = arith.constant 0 : i32
    %c0_i32_0 = arith.constant 0 : i32
    %c0_i32_1 = arith.constant 0 : i32
    return %c0_i32, %c0_i32_0 : i32, i32
  }
  func.func @transform_5(%arg0: i32) -> (i32, i32) {
    %c0_i32 = arith.constant 0 : i32
    %c0_i32_0 = arith.constant 0 : i32
    %c0_i32_1 = arith.constant 0 : i32
    return %c0_i32, %c0_i32_0 : i32, i32
  }
  func.func @transform_6(%arg0: i32) -> (i32, i32) {
    %c0_i32 = arith.constant 0 : i32
    %c0_i32_0 = arith.constant 0 : i32
    %c0_i32_1 = arith.constant 0 : i32
    return %c0_i32, %c0_i32_0 : i32, i32
  }
  func.func @transform_7(%arg0: i32) -> (i32, i32) {
    %c0_i32 = arith.constant 0 : i32
    %c0_i32_0 = arith.constant 0 : i32
    %c0_i32_1 = arith.constant 0 : i32
    return %c0_i32, %c0_i32_0 : i32, i32
  }
  func.func @transform_8(%arg0: i32) -> (i32, i32) {
    %c0_i32 = arith.constant 0 : i32
    %c0_i32_0 = arith.constant 0 : i32
    %c0_i32_1 = arith.constant 0 : i32
    return %c0_i32, %c0_i32_0 : i32, i32
  }
  func.func @transform_9(%arg0: i32) -> (i32, i32) {
    %c0_i32 = arith.constant 0 : i32
    %c0_i32_0 = arith.constant 0 : i32
    %c0_i32_1 = arith.constant 0 : i32
    return %c0_i32, %c0_i32_0 : i32, i32
  }
  func.func @transform_10(%arg0: i32) -> (i32, i32) {
    %c0_i32 = arith.constant 0 : i32
    %c0_i32_0 = arith.constant 0 : i32
    %c0_i32_1 = arith.constant 0 : i32
    return %c0_i32, %c0_i32_0 : i32, i32
  }
  func.func @transform_11(%arg0: i32) -> (i32, i32) {
    %c0_i32 = arith.constant 0 : i32
    %c0_i32_0 = arith.constant 0 : i32
    %c0_i32_1 = arith.constant 0 : i32
    return %c0_i32, %c0_i32_0 : i32, i32
  }
  func.func @transform_12(%arg0: i32) -> (i32, i32) {
    %c0_i32 = arith.constant 0 : i32
    %c0_i32_0 = arith.constant 0 : i32
    %c0_i32_1 = arith.constant 0 : i32
    return %c0_i32, %c0_i32_0 : i32, i32
  }
  func.func @transform_13(%arg0: i32) -> (i32, i32, i32) {
    %c0_i32 = arith.constant 0 : i32
    %c0_i32_0 = arith.constant 0 : i32
    %c0_i32_1 = arith.constant 0 : i32
    return %arg0, %c0_i32, %c0_i32_0 : i32, i32, i32
  }
}

</mosaic_0001>

<bundles_post_ra>
// kernel: generator_forward.1
= control target key start
LH: loop header
LB: loop body
LE: loop exit
PB: predicated region body
PF: predicated region fallthrough
CT: control target
= control target key end

     0   :  { %s26208_s0 = inlined_call_operand.vmem [shape: f32[2,25], index: 0, kind: input, shape index: {}]   ;;  %s26209_s1 = inlined_call_operand.vmem [shape: f32[25,256,22], index: 1, kind: input, shape index: {}]   ;;  %s26210_s2 = inlined_call_operand.vmem [shape: f32[256,22], index: 2, kind: input, shape index: {}]   ;;  %s26211_s3 = inlined_call_operand.vmem [shape: f32[640,256], index: 3, kind: input, shape index: {}]   ;;  %s26212_s4 = inlined_call_operand.vmem [shape: f32[128,1], index: 4, kind: input, shape index: {}]   ;;  %s26213_s5 = inlined_call_operand.vmem [shape: f32[320,128], index: 5, kind: input, shape index: {}]   ;;  %s26214_s6 = inlined_call_operand.vmem [shape: f32[64,1], index: 6, kind: input, shape index: {}]   ;;  %s26215_s7 = inlined_call_operand.vmem [shape: f32[160,64], index: 7, kind: input, shape index: {}]   ;;  %s26216_s8 = inlined_call_operand.vmem [shape: f32[32,1], index: 8, kind: input, shape index: {}]   ;;  %s26217_s9 = inlined_call_operand.vmem [shape: f32[80,32], index: 9, kind: input, shape index: {}]   ;;  %s26218_s10 = inlined_call_operand.vmem [shape: f32[16,1], index: 10, kind: input, shape index: {}]   ;;  %s26219_s11 = inlined_call_operand.vmem [shape: f32[6,16], index: 11, kind: input, shape index: {}]   ;;  %s26220_s12 = inlined_call_operand.<no memory space> [shape: f32[1,1], index: 12, kind: input, shape index: {}]   ;;  %s26221_s13 = inlined_call_operand.hbm [shape: f32[2,1,336], index: 13, kind: output, shape index: {}]  }
   0x1   :  { %26469 = sst [smem:[#allocation122_spill]] %s26208_s0  ;;  %v18_v0 = vstv %s26220_s12 }
   0x2   :  { %26470 = sst [smem:[#allocation123_spill]] %s26221_s13  ;;  %19 = vst [vmem:[#allocation2] sm:$0x1] %v18_v0 }
   0x3   :  { %20 = vsyncpa [#allocation5], 0 }
   0x4   :  { %21 = vsyncpa [#allocation4], 0 }
   0x5   :  { %23 = vsyncpa [#allocation4 + $0x1], 0  ;;  %s18301_s27 = smov 0   ;;  %s18303_s28 = smov 0  }
   0x6   :  { %s18305_s29 = smov 0   ;;  %s18307_s30 = smov 0  }
   0x7 LB: > { %26471 = sst [smem:[#allocation9_spill]] %s18204_s27  ;;  %s18322_s12 = sadd.s32 4294967295, %s18216_s30   ;;  %s18216_s30 = sphi %s18307_s30, %s26976_s30   ;;  %s18212_s29 = sphi %s18305_s29, %s26978_s29   ;;  %s18208_s28 = sphi %s18303_s28, %s26980_s28   ;;  %s18204_s27 = sphi %s18301_s27, %s26979_s27  }
   0x8   : > { %26472 = sst [smem:[#allocation10_spill]] %s18212_s29  ;;  %s13480_s14 = sadd.s32 4294967294, %s18216_s30  }
   0x9   : > { %26473 = sst [smem:[#allocation11_spill]] %s18216_s30  ;;  %s18326_s15 = sadd.s32 1, %s18216_s30  }
   0xa   : > { %26474 = sst [smem:[#allocation12_spill]] %s18322_s12  ;;  %s309_s16 = sadd.s32 1, %s18212_s29 }
   0xb   : > { %26475 = sst [smem:[#allocation13_spill]] %s18326_s15  ;;  %s306_s17 = ssub.s32 %s18216_s30, %s18326_s15 }
   0xc   : > { %p319_p0 = scmp.ne.s32.totalorder %s18212_s29, %s18208_s28  ;;  %p307_p1 = scmp.eq.s32.totalorder %s306_s17, 0 }
   0xd   : > { %p320_p2 = scmp.eq.s32.totalorder %s18322_s12, 1  ;;  %p325_p3 = scmp.ne.s32.totalorder %s18208_s28, %s18204_s27 }
   0xe   : > { %p326_p4 = scmp.eq.s32.totalorder %s13480_s14, 1  ;;  %p13481_p7 = scmp.ge.s32.totalorder %s18216_s30, 1 }
   0xf   : > { %s18337_s18 = scalar_select %p307_p1, %s18212_s29, %s309_s16  }
  0x10   : > { %p18339_p5 = por %p320_p2, %p319_p0  ;;  %p18343_p6 = por %p326_p4, %p325_p3 }
  0x11   : > { %26476 = sst [smem:[#allocation14_spill]] %s18337_s18  ;;  %p333_p8 = scmp.lt.s32.totalorder %s18216_s30, 3 }
  0x12   : > { %s26477_s19 = scalar_select %p18339_p5, 1, 0 }
  0x13   : > { %s26479_s20 = scalar_select %p18343_p6, 1, 0 }
  0x14   : > { %26478 = sst [smem:[#allocation15_spill]] %s26477_s19  ;;  %p18083_p9 = scmp.eq.s32.totalorder %s18322_s12, 0 }
  0x15   : > { %26480 = sst [smem:[#allocation16_spill]] %s26479_s20  ;;  %p18350_p10 = pnand %p13481_p7, %p333_p8 }
  0x16   : > { %s26482_s0 = sld [smem:[#allocation122_spill]] }
  0x17   : > { %p18075_p11 = pneg %p18350_p10 }
  0x19   : > { %p18076_p12 = pnand %p18083_p9, %p18075_p11 }
  0x1b   : > { %p18137_p0 = pneg %p18076_p12 }
  0x1c   : > { %s346_s24 = sshll.u32 %s26482_s0, 4  ;;  %s347_s24 = int_to_ptr.vmem [resolvable:$true] %s346_s24 }
  0x1d   : > { %s18135_s25 = scalar_lea.vmem %s347_s24, 32  ;;  %p18143_p3 = scmp.lt.s32.totalorder %s347_s24, %s347_s24 }
  0x1e   : > { %p18136_p13 = scmp.ne.s32.totalorder %s347_s24, %s18135_s25  ;;  %p18144_p4 = scmp.lt.s32.totalorder %s18135_s25, %s18135_s25 }
  0x20   : > { %p18138_p1 = pnand %p18137_p0, %p18136_p13  ;;  %p18145_p7 = por %p18144_p4, %p18143_p3 }
  0x22   : > { %p18139_p2 = pneg %p18138_p1 }
  0x24   : > { %p18146_p8 = pnand %p18145_p7, %p18139_p2 }
  0x26   : > { %18149 = shalt.err (!%p18146_p8)
}
  0x27   : > { %s18218_s26 = smov [#allocation3]   ;;  %395 = sbr.rel (%p18350_p10) target bundleno = 3726 (0xe8e), region = 72 }
  0x28   : > { %18078 = dma.vmem_to_smem (!%p18076_p12), %s347_s24, 32, %s18218_s26, [#allocation5]  }
  0x2e   : > { %18195 = dma.done.wait (%p18083_p9), [#allocation5], 32  }
  0x2f   : > { %18197 = vsyncadd (%p18083_p9), [#allocation5], 4294967264 }
  0x30   : > { %401 = sfence }
  0x31   : > { %s18368_s14 = sshll.u32 %s18322_s12, 7  ;;  %v26245_v1 = vmov 0.0|0.0   ;;  %v469_v2 = vld [vmem:[%s26209_s1] sm:$0xff]  ;;  %v470_v3 = vld [vmem:[%s26209_s1 + $0x8] sm:$0xff]  ;;  %vm3721_vm4 = vcmask 1045504   ;;  %vm3672_vm8 = vcmask 179200  }
  0x32   : > { %16792 = vmatprep.subr.bf16.mxu0 %v26245_v1  ;;  %s468_s16 = sld [smem:[#allocation3 + %s18368_s14]]  ;;  %s566_s17 = sadd.s32 1, %s18368_s14  ;;  %v435_v4 = vld [vmem:[%s26210_s2] sm:$0xff]  ;;  %v13487_v6 = vld [vmem:[%s26209_s1 + $0x108] sm:$0xff] }
  0x33   : > { %s567_s21 = sld [smem:[#allocation3 + %s566_s17]]  ;;  %s666_s22 = sadd.s32 2, %s18368_s14  ;;  %v13486_v5 = vld [vmem:[%s26209_s1 + $0x100] sm:$0xff]  ;;  %v436_v7 = vld [vmem:[%s26210_s2 + $0x8] sm:$0xff] }
  0x34   : > { %s667_s23 = sld [smem:[#allocation3 + %s666_s22]]  ;;  %s766_s24 = sadd.s32 3, %s18368_s14  ;;  %v13518_v9 = vld [vmem:[%s26209_s1 + $0x200] sm:$0xff]  ;;  %v13519_v10 = vld [vmem:[%s26209_s1 + $0x208] sm:$0xff] }
  0x35   : > { %s18375_s25 = sld [smem:[#allocation3 + %s766_s24]]  ;;  %s866_s26 = sadd.s32 4, %s18368_s14  ;;  %v13550_v17 = vld [vmem:[%s26209_s1 + $0x300] sm:$0xff]  ;;  %v13551_v18 = vld [vmem:[%s26209_s1 + $0x308] sm:$0xff] }
  0x36   : > { %s18384_s20 = sld [smem:[#allocation3 + %s866_s26]]  ;;  %s966_s27 = sadd.s32 5, %s18368_s14  ;;  %v13582_v23 = vld [vmem:[%s26209_s1 + $0x400] sm:$0xff]  ;;  %v13583_v25 = vld [vmem:[%s26209_s1 + $0x408] sm:$0xff] }
  0x37   : > { %s18396_s0 = sld [smem:[#allocation3 + %s966_s27]]  ;;  %s1066_s29 = sadd.s32 6, %s18368_s14  ;;  %v13614_v31 = vld [vmem:[%s26209_s1 + $0x500] sm:$0xff]  ;;  %v13615_v33 = vld [vmem:[%s26209_s1 + $0x508] sm:$0xff] }
  0x38   : > { %v18402_v8 = vstv %s468_s16  ;;  %s18410_s13 = sld [smem:[#allocation3 + %s1066_s29]]  ;;  %s1166_s27 = sadd.s32 7, %s18368_s14  ;;  %v13646_v38 = vld [vmem:[%s26209_s1 + $0x600] sm:$0xff]  ;;  %v13647_v41 = vld [vmem:[%s26209_s1 + $0x608] sm:$0xff] }
  0x39   : > { %v502_v11 = vmul.f32 %v18402_v8, %v469_v2  ;;  %v503_v12 = vmul.f32 %v18402_v8, %v470_v3  ;;  %v18415_v13 = vstv %s567_s21  ;;  %s18417_s19 = sld [smem:[#allocation3 + %s1166_s27]]  ;;  %s1266_s16 = sadd.s32 8, %s18368_s14  ;;  %v13678_v45 = vld [vmem:[%s26209_s1 + $0x700] sm:$0xff]  ;;  %v13679_v48 = vld [vmem:[%s26209_s1 + $0x708] sm:$0xff] }
  0x3a   : > { %v602_v14 = vmul.f32 %v13486_v5, %v18415_v13  ;;  %v603_v15 = vmul.f32 %v13487_v6, %v18415_v13  ;;  %v18422_v16 = vstv %s667_s23  ;;  %s1366_s21 = sadd.s32 9, %s18368_s14  ;;  %s18436_s23 = sld [smem:[#allocation3 + %s1266_s16]]  ;;  %v13710_v52 = vld [vmem:[%s26209_s1 + $0x800] sm:$0xff]  ;;  %v13711_v53 = vld [vmem:[%s26209_s1 + $0x808] sm:$0xff] }
  0x3b   : > { %v534_v19 = vadd.f32 %v502_v11, %v435_v4  ;;  %v535_v20 = vadd.f32 %v503_v12, %v436_v7  ;;  %v702_v21 = vmul.f32 %v13518_v9, %v18422_v16  ;;  %v703_v22 = vmul.f32 %v13519_v10, %v18422_v16  ;;  %s1466_s27 = sadd.s32 10, %s18368_s14  ;;  %s1566_s24 = sadd.s32 11, %s18368_s14  ;;  %v13742_v59 = vld [vmem:[%s26209_s1 + $0x900] sm:$0xff]  ;;  %v13743_v60 = vld [vmem:[%s26209_s1 + $0x908] sm:$0xff] }
  0x3c   : > { %v18439_v24 = vstv %s18375_s25  ;;  %v18445_v26 = vstv %s18384_s20  ;;  %s18454_s25 = sld [smem:[#allocation3 + %s1366_s21]]  ;;  %s1666_s15 = sadd.s32 12, %s18368_s14  ;;  %v13774_v0 = vld [vmem:[%s26209_s1 + $0xa00] sm:$0xff]  ;;  %v13775_v4 = vld [vmem:[%s26209_s1 + $0xa08] sm:$0xff] }
  0x3d   : > { %v634_v27 = vadd.f32 %v602_v14, %v534_v19  ;;  %v635_v28 = vadd.f32 %v603_v15, %v535_v20  ;;  %v802_v29 = vmul.f32 %v13550_v17, %v18439_v24  ;;  %v803_v30 = vmul.f32 %v13551_v18, %v18439_v24  ;;  %s1766_s30 = sadd.s32 13, %s18368_s14  ;;  %s18472_s17 = sld [smem:[#allocation3 + %s1466_s27]]  ;;  %v13806_v6 = vld [vmem:[%s26209_s1 + $0xb00] sm:$0xff]  ;;  %v13807_v11 = vld [vmem:[%s26209_s1 + $0xb08] sm:$0xff] }
  0x3e   : > { %v902_v32 = vmul.f32 %v13582_v23, %v18445_v26  ;;  %v18462_v34 = vstv %s18396_s0  ;;  %v903_v37 = vmul.f32 %v13583_v25, %v18445_v26  ;;  %v18470_v39 = vstv %s18410_s13  ;;  %s18474_s22 = sld [smem:[#allocation3 + %s1566_s24]]  ;;  %s1866_s20 = sadd.s32 14, %s18368_s14  ;;  %v13838_v12 = vld [vmem:[%s26209_s1 + $0xc00] sm:$0xff]  ;;  %v13839_v17 = vld [vmem:[%s26209_s1 + $0xc08] sm:$0xff] }
  0x3f   : > { %v734_v35 = vadd.f32 %v702_v21, %v634_v27  ;;  %v735_v36 = vadd.f32 %v703_v22, %v635_v28  ;;  %v1002_v40 = vmul.f32 %v13614_v31, %v18462_v34  ;;  %s18480_s29 = sld [smem:[#allocation3 + %s1666_s15]]  ;;  %v1003_v44 = vmul.f32 %v13615_v33, %v18462_v34  ;;  %s1966_s18 = sadd.s32 15, %s18368_s14  ;;  %v13870_v19 = vld [vmem:[%s26209_s1 + $0xd00] sm:$0xff]  ;;  %v13871_v25 = vld [vmem:[%s26209_s1 + $0xd08] sm:$0xff] }
  0x40   : > { %v18488_v46 = vstv %s18417_s19  ;;  %s18490_s24 = sld [smem:[#allocation3 + %s1766_s30]]  ;;  %v1102_v47 = vmul.f32 %v13646_v38, %v18470_v39  ;;  %s2066_s21 = sadd.s32 16, %s18368_s14  ;;  %v1103_v51 = vmul.f32 %v13647_v41, %v18470_v39  ;;  %v18507_v54 = vstv %s18436_s23  ;;  %v13903_v31 = vld [vmem:[%s26209_s1 + $0xe08] sm:$0xff]  ;;  %v13934_v33 = vld [vmem:[%s26209_s1 + $0xf00] sm:$0xff] }
  0x41   : > { %v834_v42 = vadd.f32 %v802_v29, %v734_v35  ;;  %v835_v43 = vadd.f32 %v803_v30, %v735_v36  ;;  %s2166_s0 = sadd.s32 17, %s18368_s14  ;;  %s18509_s27 = sld [smem:[#allocation3 + %s1866_s20]]  ;;  %v1202_v55 = vmul.f32 %v13678_v45, %v18488_v46  ;;  %v1203_v58 = vmul.f32 %v13679_v48, %v18488_v46  ;;  %v13902_v30 = vld [vmem:[%s26209_s1 + $0xe00] sm:$0xff]  ;;  %v13935_v38 = vld [vmem:[%s26209_s1 + $0xf08] sm:$0xff] }
  0x42   : > { %s2266_s15 = sadd.s32 18, %s18368_s14  ;;  %s18513_s26 = sld [smem:[#allocation3 + %s1966_s18]]  ;;  %v18523_v61 = vstv %s18454_s25  ;;  %v1302_v62 = vmul.f32 %v13710_v52, %v18507_v54  ;;  %v1303_v63 = vmul.f32 %v13711_v53, %v18507_v54  ;;  %v13966_v41 = vld [vmem:[%s26209_s1 + $0x1000] sm:$0xff]  ;;  %v13999_v48 = vld [vmem:[%s26209_s1 + $0x1108] sm:$0xff] }
  0x43   : > { %v934_v49 = vadd.f32 %v902_v32, %v834_v42  ;;  %v935_v50 = vadd.f32 %v903_v37, %v835_v43  ;;  %s18525_s20 = sld [smem:[#allocation3 + %s2066_s21]]  ;;  %v18540_v5 = vstv %s18472_s17  ;;  %s2366_s12 = sadd.s32 19, %s18368_s14  ;;  %v1402_v9 = vmul.f32 %v13742_v59, %v18523_v61  ;;  %v13967_v42 = vld [vmem:[%s26209_s1 + $0x1008] sm:$0xff]  ;;  %v14030_v53 = vld [vmem:[%s26209_s1 + $0x1200] sm:$0xff] }
  0x44   : > { %s18527_s18 = sld [smem:[#allocation3 + %s2166_s0]]  ;;  %v18546_v7 = vstv %s18474_s22  ;;  %s2466_s23 = sadd.s32 20, %s18368_s14  ;;  %v1403_v10 = vmul.f32 %v13743_v60, %v18523_v61  ;;  %v1502_v21 = vmul.f32 %v13774_v0, %v18540_v5  ;;  %v1503_v22 = vmul.f32 %v13775_v4, %v18540_v5 }
  0x45   : > { %v1034_v56 = vadd.f32 %v1002_v40, %v934_v49  ;;  %v1035_v57 = vadd.f32 %v1003_v44, %v935_v50  ;;  %s18534_s16 = sld [smem:[#allocation3 + %s2266_s15]]  ;;  %v18562_v18 = vstv %s18480_s29  ;;  %v1602_v23 = vmul.f32 %v13806_v6, %v18546_v7  ;;  %s2666_s22 = sadd.s32 22, %s18368_s14  ;;  %v437_v6 = vld [vmem:[%s26210_s2 + $0x10] sm:$0xff] }
  0x46   : > { %v18568_v20 = vstv %s18490_s24  ;;  %s18576_s19 = sld [smem:[#allocation3 + %s2366_s12]]  ;;  %v1603_v29 = vmul.f32 %v13807_v11, %v18546_v7  ;;  %v1702_v35 = vmul.f32 %v13838_v12, %v18562_v18  ;;  %v1703_v36 = vmul.f32 %v13839_v17, %v18562_v18  ;;  %s2566_s24 = sadd.s32 21, %s18368_s14  ;;  %v438_v17 = vld [vmem:[%s26210_s2 + $0x18] sm:$0xff] }
  0x47   : > { %v1134_v2 = vadd.f32 %v1102_v47, %v1034_v56  ;;  %v1135_v3 = vadd.f32 %v1103_v51, %v1035_v57  ;;  %s18578_s29 = sld [smem:[#allocation3 + %s2466_s23]]  ;;  %v18588_v32 = vstv %s18509_s27  ;;  %v1802_v37 = vmul.f32 %v13870_v19, %v18568_v20  ;;  %v13998_v47 = vld [vmem:[%s26209_s1 + $0x1100] sm:$0xff]  ;;  %v13520_v19 = vld [vmem:[%s26209_s1 + $0x210] sm:$0xff]  ;;  %s2766_s30 = sadd.s32 23, %s18368_s14 }
  0x48   : > { %v18600_v40 = vstv %s18513_s26  ;;  %v1803_v50 = vmul.f32 %v13871_v25, %v18568_v20  ;;  %v1902_v51 = vmul.f32 %v13902_v30, %v18588_v32  ;;  %v1903_v52 = vmul.f32 %v13903_v31, %v18588_v32  ;;  %s18675_s12 = sld [smem:[#allocation3 + %s2666_s22]]  ;;  %s18227_s22 = smov [#allocation6]  }
  0x49   : > { %v1234_v14 = vadd.f32 %v1202_v55, %v1134_v2  ;;  %v1235_v15 = vadd.f32 %v1203_v58, %v1135_v3  ;;  %v18610_v45 = vstv %s18525_s20  ;;  %v14031_v55 = vld [vmem:[%s26209_s1 + $0x1208] sm:$0xff]  ;;  %v18635_v59 = vmul.f32 %v13934_v33, %v18600_v40  ;;  %s2866_s20 = sadd.s32 24, %s18368_s14  ;;  %s18721_s23 = sld [smem:[#allocation3 + %s2766_s30]] }
  0x4a   : > { %v18619_v49 = vstv %s18527_s18  ;;  %v18638_v60 = vmul.f32 %v13935_v38, %v18600_v40  ;;  %s18640_s18 = sld [smem:[#allocation3 + %s2566_s24]]  ;;  %v18649_v0 = vmul.f32 %v13966_v41, %v18610_v45  ;;  %v18652_v2 = vmul.f32 %v13967_v42, %v18610_v45  ;;  %v13552_v41 = vld [vmem:[%s26209_s1 + $0x310] sm:$0xff]  ;;  %v13553_v42 = vld [vmem:[%s26209_s1 + $0x318] sm:$0xff] }
  0x4b   : > { %v1334_v27 = vadd.f32 %v1302_v62, %v1234_v14  ;;  %v1335_v28 = vadd.f32 %v1303_v63, %v1235_v15  ;;  %v18631_v56 = vstv %s18534_s16  ;;  %v471_v62 = vld [vmem:[%s26209_s1 + $0x10] sm:$0xff]  ;;  %v472_v63 = vld [vmem:[%s26209_s1 + $0x18] sm:$0xff]  ;;  %v18655_v3 = vmul.f32 %v13998_v47, %v18619_v49  ;;  %s18740_s24 = sld [smem:[#allocation3 + %s2866_s20]] }
  0x4c   : > { %v18658_v4 = vmul.f32 %v13999_v48, %v18619_v49  ;;  %v18670_v14 = vmul.f32 %v14030_v53, %v18631_v56  ;;  %v18673_v15 = vmul.f32 %v14031_v55, %v18631_v56  ;;  %v18693_v25 = vstv %s18576_s19  ;;  %s26969_s19 = sld [smem:[#allocation12_spill]]  ;;  %s26972_s0 = sld [smem:[#allocation123_spill]] }
  0x4d   : > { %v1434_v43 = vadd.f32 %v1402_v9, %v1334_v27  ;;  %v1435_v44 = vadd.f32 %v1403_v10, %v1335_v28  ;;  %v13488_v9 = vld [vmem:[%s26209_s1 + $0x110] sm:$0xff]  ;;  %v13489_v10 = vld [vmem:[%s26209_s1 + $0x118] sm:$0xff]  ;;  %v18696_v27 = vstv %s18578_s29  ;;  %v504_v28 = vmul.f32 %v18402_v8, %v471_v62  ;;  %s432_s29 = sand.u32 1, %s18208_s28  }
  0x4e   : > { %v604_v33 = vmul.f32 %v13488_v9, %v18415_v13  ;;  %v605_v38 = vmul.f32 %v13489_v10, %v18415_v13  ;;  %v13585_v62 = vld [vmem:[%s26209_s1 + $0x418] sm:$0xff]  ;;  %v805_v9 = vmul.f32 %v13553_v42, %v18439_v24  ;;  %s18067_s25 = smul.u32 3, %s432_s29  ;;  %s13407_s15 = scalar_lea.sflag [#allocation4], %s432_s29 }
  0x4f   : > { %v1534_v57 = vadd.f32 %v1502_v21, %v1434_v43  ;;  %v1535_v58 = vadd.f32 %v1503_v22, %v1435_v44  ;;  %v13521_v21 = vld [vmem:[%s26209_s1 + $0x218] sm:$0xff]  ;;  %v14062_v22 = vld [vmem:[%s26209_s1 + $0x1300] sm:$0xff]  ;;  %v536_v44 = vadd.f32 %v504_v28, %v437_v6  ;;  %v804_v6 = vmul.f32 %v13552_v41, %v18439_v24  ;;  %v13648_v41 = vld [vmem:[%s26209_s1 + $0x610] sm:$0xff] }
  0x50   : > { %v14094_v43 = vld [vmem:[%s26209_s1 + $0x1400] sm:$0xff]  ;;  %v705_v47 = vmul.f32 %v13521_v21, %v18422_v16  ;;  %v18716_v55 = vmul.f32 %v14062_v22, %v18693_v25  ;;  %v13617_v21 = vld [vmem:[%s26209_s1 + $0x518] sm:$0xff]  ;;  %s434_s21 = scalar_lea.vmem [#allocation6], %s18067_s25 }
  0x51   : > { %v1634_v11 = vadd.f32 %v1602_v23, %v1534_v57  ;;  %v1635_v12 = vadd.f32 %v1603_v29, %v1535_v58  ;;  %v14063_v23 = vld [vmem:[%s26209_s1 + $0x1308] sm:$0xff]  ;;  %v505_v29 = vmul.f32 %v18402_v8, %v472_v63  ;;  %v13584_v58 = vld [vmem:[%s26209_s1 + $0x410] sm:$0xff]  ;;  %v13649_v42 = vld [vmem:[%s26209_s1 + $0x618] sm:$0xff] }
  0x52   : > { %v18719_v57 = vmul.f32 %v14063_v23, %v18693_v25  ;;  %v904_v28 = vmul.f32 %v13584_v58, %v18445_v26  ;;  %v13680_v58 = vld [vmem:[%s26209_s1 + $0x710] sm:$0xff]  ;;  %s18068_s20 = smul.u32 48, %s26969_s19 }
  0x53   : > { %v1734_v30 = vadd.f32 %v1702_v35, %v1634_v11  ;;  %v1735_v31 = vadd.f32 %v1703_v36, %v1635_v12  ;;  %v537_v35 = vadd.f32 %v505_v29, %v438_v17  ;;  %v704_v36 = vmul.f32 %v13520_v19, %v18422_v16  ;;  %v13616_v19 = vld [vmem:[%s26209_s1 + $0x510] sm:$0xff] }
  0x54   : > { %v18735_v12 = vmul.f32 %v14094_v43, %v18696_v27  ;;  %v18738_v17 = vstv %s18640_s18  ;;  %v905_v29 = vmul.f32 %v13585_v62, %v18445_v26  ;;  %v14158_v43 = vld [vmem:[%s26209_s1 + $0x1600] sm:$0xff]  ;;  %v13681_v62 = vld [vmem:[%s26209_s1 + $0x718] sm:$0xff] }
  0x55   : > { %v1834_v48 = vadd.f32 %v1802_v37, %v1734_v30  ;;  %v1835_v53 = vadd.f32 %v1803_v50, %v1735_v31  ;;  %v14095_v37 = vld [vmem:[%s26209_s1 + $0x1408] sm:$0xff]  ;;  %v636_v50 = vadd.f32 %v604_v33, %v536_v44  ;;  %v637_v63 = vadd.f32 %v605_v38, %v537_v35 }
  0x56   : > { %v2503_v33 = vmul.f32 %v14095_v37, %v18696_v27  ;;  %v18760_v38 = vstv %s18675_s12  ;;  %v1005_v35 = vmul.f32 %v13617_v21, %v18462_v34  ;;  %v14159_v37 = vld [vmem:[%s26209_s1 + $0x1608] sm:$0xff]  ;;  %v13713_v21 = vld [vmem:[%s26209_s1 + $0x818] sm:$0xff]  ;;  %s26166_s12 = scalar_lea.hbm %s26972_s0, %s18068_s20 }
  0x57   : > { %v1934_v10 = vadd.f32 %v1902_v51, %v1834_v48  ;;  %v1935_v11 = vadd.f32 %v1903_v52, %v1835_v53  ;;  %v14126_v51 = vld [vmem:[%s26209_s1 + $0x1500] sm:$0xff]  ;;  %v14127_v52 = vld [vmem:[%s26209_s1 + $0x1508] sm:$0xff]  ;;  %v736_v22 = vadd.f32 %v704_v36, %v636_v50  ;;  %v737_v23 = vadd.f32 %v705_v47, %v637_v63 }
  0x58   : > { %v2602_v48 = vmul.f32 %v14126_v51, %v18738_v17  ;;  %v2603_v53 = vmul.f32 %v14127_v52, %v18738_v17  ;;  %v1105_v63 = vmul.f32 %v13649_v42, %v18470_v39  ;;  %v14190_v51 = vld [vmem:[%s26209_s1 + $0x1700] sm:$0xff]  ;;  %v13745_v42 = vld [vmem:[%s26209_s1 + $0x918] sm:$0xff] }
  0x59   : > { %v2034_v30 = vadd.f32 %v18635_v59, %v1934_v10  ;;  %v2035_v31 = vadd.f32 %v18638_v60, %v1935_v11  ;;  %v836_v44 = vadd.f32 %v804_v6, %v736_v22  ;;  %v837_v59 = vadd.f32 %v805_v9, %v737_v23 }
  0x5a   : > { %v1004_v60 = vmul.f32 %v13616_v19, %v18462_v34  ;;  %v2702_v10 = vmul.f32 %v14158_v43, %v18760_v38  ;;  %v18792_v11 = vstv %s18721_s23  ;;  %v13712_v19 = vld [vmem:[%s26209_s1 + $0x810] sm:$0xff]  ;;  %v1204_v22 = vmul.f32 %v13680_v58, %v18488_v46  ;;  %v14222_v43 = vld [vmem:[%s26209_s1 + $0x1800] sm:$0xff]  ;;  %s13421_s23 = sshll.u32 %s434_s21, 4  ;;  %s26168_s23 = int_to_ptr.vmem [resolvable:$true] %s13421_s23 }
  0x5b   : > { %v2134_v36 = vadd.f32 %v18649_v0, %v2034_v30  ;;  %v2135_v47 = vadd.f32 %v18652_v2, %v2035_v31  ;;  %v936_v50 = vadd.f32 %v904_v28, %v836_v44  ;;  %v937_v0 = vadd.f32 %v905_v29, %v837_v59  ;;  %s18150_s16 = scalar_lea.vmem %s26168_s23, 48 }
  0x5c   : > { %v1104_v2 = vmul.f32 %v13648_v41, %v18470_v39  ;;  %v1205_v23 = vmul.f32 %v13681_v62, %v18488_v46  ;;  %v2703_v30 = vmul.f32 %v14159_v37, %v18760_v38  ;;  %v18812_v31 = vstv %s18740_s24  ;;  %v13744_v41 = vld [vmem:[%s26209_s1 + $0x910] sm:$0xff]  ;;  %v13777_v37 = vld [vmem:[%s26209_s1 + $0xa18] sm:$0xff]  ;;  %p18151_p9 = scmp.ne.s32.totalorder %s26168_s23, %s18150_s16  ;;  %s18154_s24 = sshll.u32 %s18227_s22, 4  ;;  %s18155_s24 = int_to_ptr.vmem [resolvable:$false] %s18154_s24 }
  0x5d   : > { %v2234_v6 = vadd.f32 %v18655_v3, %v2134_v36  ;;  %v2235_v9 = vadd.f32 %v18658_v4, %v2135_v47  ;;  %v14191_v3 = vld [vmem:[%s26209_s1 + $0x1708] sm:$0xff]  ;;  %v1036_v4 = vadd.f32 %v1004_v60, %v936_v50  ;;  %v1037_v52 = vadd.f32 %v1005_v35, %v937_v0  ;;  %v13776_v62 = vld [vmem:[%s26209_s1 + $0xa10] sm:$0xff]  ;;  %s18156_s30 = scalar_lea.vmem %s18155_s24, 96  ;;  %p18157_p12 = scmp.lt.s32.totalorder %s26168_s23, %s18155_s24 }
  0x5e   : > { %v1304_v59 = vmul.f32 %v13712_v19, %v18507_v54  ;;  %v1305_v60 = vmul.f32 %v13713_v21, %v18507_v54  ;;  %v2802_v47 = vmul.f32 %v14190_v51, %v18792_v11  ;;  %v2803_v58 = vmul.f32 %v14191_v3, %v18792_v11  ;;  %v13840_v51 = vld [vmem:[%s26209_s1 + $0xc10] sm:$0xff]  ;;  %v13841_v3 = vld [vmem:[%s26209_s1 + $0xc18] sm:$0xff]  ;;  %p18152_p10 = pnand %p18151_p9, %p18339_p5  ;;  %p18158_p13 = scmp.lt.s32.totalorder %s18156_s30, %s18150_s16 }
  0x5f   : > { %v2334_v28 = vadd.f32 %v18670_v14, %v2234_v6  ;;  %v2335_v29 = vadd.f32 %v18673_v15, %v2235_v9  ;;  %v14223_v14 = vld [vmem:[%s26209_s1 + $0x1808] sm:$0xff]  ;;  %v1136_v15 = vadd.f32 %v1104_v2, %v1036_v4  ;;  %v1137_v44 = vadd.f32 %v1105_v63, %v1037_v52  ;;  %v13809_v63 = vld [vmem:[%s26209_s1 + $0xb18] sm:$0xff] }
  0x60   : > { %v1404_v2 = vmul.f32 %v13744_v41, %v18523_v61  ;;  %v2902_v19 = vmul.f32 %v14222_v43, %v18812_v31  ;;  %v2903_v21 = vmul.f32 %v14223_v14, %v18812_v31  ;;  %v13904_v43 = vld [vmem:[%s26209_s1 + $0xe10] sm:$0xff]  ;;  %v13905_v14 = vld [vmem:[%s26209_s1 + $0xe18] sm:$0xff]  ;;  %p18153_p11 = pneg %p18152_p10  ;;  %p18159_p0 = por %p18158_p13, %p18157_p12 }
  0x61   : > { %v2434_v35 = vadd.f32 %v18716_v55, %v2334_v28  ;;  %v2435_v36 = vadd.f32 %v18719_v57, %v2335_v29  ;;  %v1236_v50 = vadd.f32 %v1204_v22, %v1136_v15  ;;  %v1237_v0 = vadd.f32 %v1205_v23, %v1137_v44  ;;  %v13808_v57 = vld [vmem:[%s26209_s1 + $0xb10] sm:$0xff] }
  0x62   : > { %v1405_v55 = vmul.f32 %v13745_v42, %v18523_v61  ;;  %v1504_v22 = vmul.f32 %v13776_v62, %v18540_v5  ;;  %v1505_v23 = vmul.f32 %v13777_v37, %v18540_v5  ;;  %v1604_v41 = vmul.f32 %v13808_v57, %v18546_v7  ;;  %p18160_p1 = pnand %p18159_p0, %p18153_p11 }
  0x63   : > { %v2534_v6 = vadd.f32 %v18735_v12, %v2434_v35  ;;  %v2535_v9 = vadd.f32 %v2503_v33, %v2435_v36  ;;  %v1336_v4 = vadd.f32 %v1304_v59, %v1236_v50  ;;  %v1337_v52 = vadd.f32 %v1305_v60, %v1237_v0  ;;  %v13872_v12 = vld [vmem:[%s26209_s1 + $0xd10] sm:$0xff]  ;;  %v13873_v33 = vld [vmem:[%s26209_s1 + $0xd18] sm:$0xff] }
  0x64   : > { %v1605_v42 = vmul.f32 %v13809_v63, %v18546_v7  ;;  %v1704_v59 = vmul.f32 %v13840_v51, %v18562_v18  ;;  %v1705_v60 = vmul.f32 %v13841_v3, %v18562_v18  ;;  %v1804_v62 = vmul.f32 %v13872_v12, %v18568_v20  ;;  %v13968_v50 = vld [vmem:[%s26209_s1 + $0x1010] sm:$0xff]  ;;  %v13969_v0 = vld [vmem:[%s26209_s1 + $0x1018] sm:$0xff] }
  0x65   : > { %v2634_v28 = vadd.f32 %v2602_v48, %v2534_v6  ;;  %v2635_v29 = vadd.f32 %v2603_v53, %v2535_v9  ;;  %v1436_v15 = vadd.f32 %v1404_v2, %v1336_v4  ;;  %v1437_v44 = vadd.f32 %v1405_v55, %v1337_v52  ;;  %v13936_v48 = vld [vmem:[%s26209_s1 + $0xf10] sm:$0xff]  ;;  %v13937_v53 = vld [vmem:[%s26209_s1 + $0xf18] sm:$0xff]  ;;  %v13490_v4 = vld [vmem:[%s26209_s1 + $0x120] sm:$0xff] }
  0x66   : > { %v1805_v37 = vmul.f32 %v13873_v33, %v18568_v20  ;;  %v1904_v57 = vmul.f32 %v13904_v43, %v18588_v32  ;;  %v1905_v63 = vmul.f32 %v13905_v14, %v18588_v32  ;;  %v2004_v51 = vmul.f32 %v13936_v48, %v18600_v40  ;;  %v13491_v52 = vld [vmem:[%s26209_s1 + $0x128] sm:$0xff] }
  0x67   : > { %v2734_v35 = vadd.f32 %v2702_v10, %v2634_v28  ;;  %v2735_v36 = vadd.f32 %v2703_v30, %v2635_v29  ;;  %v1536_v2 = vadd.f32 %v1504_v22, %v1436_v15  ;;  %v1537_v55 = vadd.f32 %v1505_v23, %v1437_v44  ;;  %v473_v10 = vld [vmem:[%s26209_s1 + $0x20] sm:$0xff]  ;;  %v474_v30 = vld [vmem:[%s26209_s1 + $0x28] sm:$0xff] }
  0x68   : > { %v2005_v3 = vmul.f32 %v13937_v53, %v18600_v40  ;;  %v2104_v12 = vmul.f32 %v13968_v50, %v18610_v45  ;;  %v2105_v33 = vmul.f32 %v13969_v0, %v18610_v45  ;;  %v506_v43 = vmul.f32 %v18402_v8, %v473_v10 }
  0x69   : > { %v2834_v6 = vadd.f32 %v2802_v47, %v2734_v35  ;;  %v2835_v9 = vadd.f32 %v2803_v58, %v2735_v36  ;;  %v1636_v22 = vadd.f32 %v1604_v41, %v1536_v2  ;;  %v1637_v23 = vadd.f32 %v1605_v42, %v1537_v55  ;;  %v439_v47 = vld [vmem:[%s26210_s2 + $0x20] sm:$0xff]  ;;  %v440_v58 = vld [vmem:[%s26210_s2 + $0x28] sm:$0xff]  ;;  %v14000_v36 = vld [vmem:[%s26209_s1 + $0x1110] sm:$0xff] }
  0x6a   : > { %v507_v14 = vmul.f32 %v18402_v8, %v474_v30  ;;  %v13522_v41 = vld [vmem:[%s26209_s1 + $0x220] sm:$0xff]  ;;  %v13523_v42 = vld [vmem:[%s26209_s1 + $0x228] sm:$0xff]  ;;  %v606_v48 = vmul.f32 %v13490_v4, %v18415_v13  ;;  %v607_v53 = vmul.f32 %v13491_v52, %v18415_v13  ;;  %v538_v50 = vadd.f32 %v506_v43, %v439_v47  ;;  %v14001_v4 = vld [vmem:[%s26209_s1 + $0x1118] sm:$0xff] }
  0x6b   : > { %v2934_v28 = vadd.f32 %v2902_v19, %v2834_v6  ;;  %v2935_v29 = vadd.f32 %v2903_v21, %v2835_v9  ;;  %v1736_v15 = vadd.f32 %v1704_v59, %v1636_v22  ;;  %v1737_v44 = vadd.f32 %v1705_v60, %v1637_v23  ;;  %v13554_v19 = vld [vmem:[%s26209_s1 + $0x320] sm:$0xff]  ;;  %v13555_v59 = vld [vmem:[%s26209_s1 + $0x328] sm:$0xff] }
  0x6c   : > { %v539_v0 = vadd.f32 %v507_v14, %v440_v58  ;;  %v706_v55 = vmul.f32 %v13522_v41, %v18422_v16  ;;  %v707_v10 = vmul.f32 %v13523_v42, %v18422_v16  ;;  %v13586_v30 = vld [vmem:[%s26209_s1 + $0x420] sm:$0xff]  ;;  %v13587_v6 = vld [vmem:[%s26209_s1 + $0x428] sm:$0xff]  ;;  %v806_v22 = vmul.f32 %v13554_v19, %v18439_v24  ;;  %v14033_v14 = vld [vmem:[%s26209_s1 + $0x1218] sm:$0xff] }
  0x6d   : > { %v2966_v21 = vmax.f32 %v2934_v28, 0.0  ;;  %v2967_v35 = vmax.f32 %v2935_v29, 0.0  ;;  %v1836_v60 = vadd.f32 %v1804_v62, %v1736_v15  ;;  %v1837_v2 = vadd.f32 %v1805_v37, %v1737_v44  ;;  %v14032_v62 = vld [vmem:[%s26209_s1 + $0x1210] sm:$0xff]  ;;  %v13618_v29 = vld [vmem:[%s26209_s1 + $0x520] sm:$0xff]  ;;  %v13619_v43 = vld [vmem:[%s26209_s1 + $0x528] sm:$0xff] }
  0x6e   : > { %v638_v37 = vadd.f32 %v606_v48, %v538_v50  ;;  %v639_v52 = vadd.f32 %v607_v53, %v539_v0  ;;  %v2204_v58 = vmul.f32 %v14000_v36, %v18619_v49  ;;  %v807_v28 = vmul.f32 %v13555_v59, %v18439_v24  ;;  %v14065_v36 = vld [vmem:[%s26209_s1 + $0x1318] sm:$0xff] }
  0x6f   : > { %v16793_v9 = vpack.c.bf16 %v2967_v35, %v2966_v21  ;;  %v1936_v23 = vadd.f32 %v1904_v57, %v1836_v60  ;;  %v1937_v47 = vadd.f32 %v1905_v63, %v1837_v2  ;;  %v14064_v57 = vld [vmem:[%s26209_s1 + $0x1310] sm:$0xff]  ;;  %v906_v42 = vmul.f32 %v13586_v30, %v18445_v26  ;;  %v13650_v21 = vld [vmem:[%s26209_s1 + $0x620] sm:$0xff]  ;;  %v13651_v35 = vld [vmem:[%s26209_s1 + $0x628] sm:$0xff] }
  0x70   : > { %v738_v63 = vadd.f32 %v706_v55, %v638_v37  ;;  %v739_v41 = vadd.f32 %v707_v10, %v639_v52  ;;  %v907_v15 = vmul.f32 %v13587_v6, %v18445_v26  ;;  %v2205_v53 = vmul.f32 %v14001_v4, %v18619_v49  ;;  %v13682_v30 = vld [vmem:[%s26209_s1 + $0x720] sm:$0xff]  ;;  %v13683_v6 = vld [vmem:[%s26209_s1 + $0x728] sm:$0xff] }
  0x71   : > { %16794 = vmatpush1.bf16.msra.mxu0 %v16793_v9  ;;  %v2036_v44 = vadd.f32 %v2004_v51, %v1936_v23  ;;  %v2037_v48 = vadd.f32 %v2005_v3, %v1937_v47  ;;  %v2304_v19 = vmul.f32 %v14032_v62, %v18631_v56  ;;  %v14096_v51 = vld [vmem:[%s26209_s1 + $0x1410] sm:$0xff]  ;;  %v1006_v0 = vmul.f32 %v13618_v29, %v18462_v34  ;;  %v14097_v9 = vld [vmem:[%s26209_s1 + $0x1418] sm:$0xff]  ;;  %v13715_v29 = vld [vmem:[%s26209_s1 + $0x828] sm:$0xff] }
  0x72   : > { %16795 = vmatprep.subr.bf16.mxu0 %v26245_v1  ;;  %v838_v3 = vadd.f32 %v806_v22, %v738_v63  ;;  %v839_v50 = vadd.f32 %v807_v28, %v739_v41  ;;  %v1007_v59 = vmul.f32 %v13619_v43, %v18462_v34  ;;  %v2305_v55 = vmul.f32 %v14033_v14, %v18631_v56  ;;  %v13714_v28 = vld [vmem:[%s26209_s1 + $0x820] sm:$0xff]  ;;  %v14129_v43 = vld [vmem:[%s26209_s1 + $0x1518] sm:$0xff] }
  0x73   : > { %v2136_v60 = vadd.f32 %v2104_v12, %v2036_v44  ;;  %v2137_v2 = vadd.f32 %v2105_v33, %v2037_v48  ;;  %v2404_v10 = vmul.f32 %v14064_v57, %v18693_v25  ;;  %v14128_v12 = vld [vmem:[%s26209_s1 + $0x1510] sm:$0xff]  ;;  %v1106_v62 = vmul.f32 %v13650_v21, %v18470_v39  ;;  %v13747_v21 = vld [vmem:[%s26209_s1 + $0x928] sm:$0xff] }
  0x74   : > { %v938_v33 = vadd.f32 %v906_v42, %v838_v3  ;;  %v939_v4 = vadd.f32 %v907_v15, %v839_v50  ;;  %v1107_v37 = vmul.f32 %v13651_v35, %v18470_v39  ;;  %v2405_v23 = vmul.f32 %v14065_v36, %v18693_v25  ;;  %v14161_v35 = vld [vmem:[%s26209_s1 + $0x1618] sm:$0xff] }
  0x75   : > { %v2236_v52 = vadd.f32 %v2204_v58, %v2136_v60  ;;  %v2237_v22 = vadd.f32 %v2205_v53, %v2137_v2  ;;  %v2504_v47 = vmul.f32 %v14096_v51, %v18696_v27  ;;  %v14160_v58 = vld [vmem:[%s26209_s1 + $0x1610] sm:$0xff]  ;;  %v1206_v63 = vmul.f32 %v13682_v30, %v18488_v46  ;;  %v13746_v53 = vld [vmem:[%s26209_s1 + $0x920] sm:$0xff]  ;;  %v13779_v30 = vld [vmem:[%s26209_s1 + $0xa28] sm:$0xff] }
  0x76   : > { %v1038_v14 = vadd.f32 %v1006_v0, %v938_v33  ;;  %v1039_v57 = vadd.f32 %v1007_v59, %v939_v4  ;;  %v1207_v41 = vmul.f32 %v13683_v6, %v18488_v46  ;;  %v2505_v44 = vmul.f32 %v14097_v9, %v18696_v27  ;;  %v14193_v6 = vld [vmem:[%s26209_s1 + $0x1718] sm:$0xff] }
  0x77   : > { %v2336_v42 = vadd.f32 %v2304_v19, %v2236_v52  ;;  %v2337_v15 = vadd.f32 %v2305_v55, %v2237_v22  ;;  %v2604_v48 = vmul.f32 %v14128_v12, %v18738_v17  ;;  %v14192_v19 = vld [vmem:[%s26209_s1 + $0x1710] sm:$0xff]  ;;  %v1306_v3 = vmul.f32 %v13714_v28, %v18507_v54  ;;  %v13778_v55 = vld [vmem:[%s26209_s1 + $0xa20] sm:$0xff]  ;;  %v13811_v28 = vld [vmem:[%s26209_s1 + $0xb28] sm:$0xff] }
  0x78   : > { %v1138_v36 = vadd.f32 %v1106_v62, %v1038_v14  ;;  %v1139_v51 = vadd.f32 %v1107_v37, %v1039_v57  ;;  %v1307_v50 = vmul.f32 %v13715_v29, %v18507_v54  ;;  %v2605_v60 = vmul.f32 %v14129_v43, %v18738_v17  ;;  %v14225_v29 = vld [vmem:[%s26209_s1 + $0x1818] sm:$0xff]  ;;  %v13842_v57 = vld [vmem:[%s26209_s1 + $0xc20] sm:$0xff] }
  0x79   : > { %v2436_v0 = vadd.f32 %v2404_v10, %v2336_v42  ;;  %v2437_v59 = vadd.f32 %v2405_v23, %v2337_v15  ;;  %v2704_v2 = vmul.f32 %v14160_v58, %v18760_v38  ;;  %v14224_v10 = vld [vmem:[%s26209_s1 + $0x1810] sm:$0xff]  ;;  %v1406_v33 = vmul.f32 %v13746_v53, %v18523_v61  ;;  %v13810_v23 = vld [vmem:[%s26209_s1 + $0xb20] sm:$0xff] }
  0x7a   : > { %v1238_v9 = vadd.f32 %v1206_v63, %v1138_v36  ;;  %v1239_v12 = vadd.f32 %v1207_v41, %v1139_v51  ;;  %v1407_v4 = vmul.f32 %v13747_v21, %v18523_v61  ;;  %v2705_v52 = vmul.f32 %v14161_v35, %v18760_v38  ;;  %v13874_v53 = vld [vmem:[%s26209_s1 + $0xd20] sm:$0xff] }
  0x7b   : > { %v2536_v62 = vadd.f32 %v2504_v47, %v2436_v0  ;;  %v2537_v37 = vadd.f32 %v2505_v44, %v2437_v59  ;;  %v2804_v22 = vmul.f32 %v14192_v19, %v18792_v11  ;;  %v1506_v47 = vmul.f32 %v13778_v55, %v18540_v5  ;;  %v13843_v44 = vld [vmem:[%s26209_s1 + $0xc28] sm:$0xff]  ;;  %v13906_v51 = vld [vmem:[%s26209_s1 + $0xe20] sm:$0xff] }
  0x7c   : > { %v1338_v43 = vadd.f32 %v1306_v3, %v1238_v9  ;;  %v1339_v58 = vadd.f32 %v1307_v50, %v1239_v12  ;;  %v1507_v14 = vmul.f32 %v13779_v30, %v18540_v5  ;;  %v2805_v42 = vmul.f32 %v14193_v6, %v18792_v11  ;;  %v13938_v55 = vld [vmem:[%s26209_s1 + $0xf20] sm:$0xff] }
  0x7d   : > { %v2636_v63 = vadd.f32 %v2604_v48, %v2536_v62  ;;  %v2637_v41 = vadd.f32 %v2605_v60, %v2537_v37  ;;  %v2904_v15 = vmul.f32 %v14224_v10, %v18812_v31  ;;  %v1606_v19 = vmul.f32 %v13810_v23, %v18546_v7  ;;  %v13875_v48 = vld [vmem:[%s26209_s1 + $0xd28] sm:$0xff]  ;;  %v13970_v12 = vld [vmem:[%s26209_s1 + $0x1020] sm:$0xff]  ;;  %v475_v23 = vld [vmem:[%s26209_s1 + $0x30] sm:$0xff] }
  0x7e   : > { %v1438_v21 = vadd.f32 %v1406_v33, %v1338_v43  ;;  %v1439_v35 = vadd.f32 %v1407_v4, %v1339_v58  ;;  %v1607_v36 = vmul.f32 %v13811_v28, %v18546_v7  ;;  %v2905_v0 = vmul.f32 %v14225_v29, %v18812_v31  ;;  %v13907_v60 = vld [vmem:[%s26209_s1 + $0xe28] sm:$0xff] }
  0x7f   : > { %v2736_v3 = vadd.f32 %v2704_v2, %v2636_v63  ;;  %v2737_v50 = vadd.f32 %v2705_v52, %v2637_v41  ;;  %v1706_v59 = vmul.f32 %v13842_v57, %v18562_v18  ;;  %v1707_v10 = vmul.f32 %v13843_v44, %v18562_v18  ;;  %v13939_v2 = vld [vmem:[%s26209_s1 + $0xf28] sm:$0xff]  ;;  %v13493_v44 = vld [vmem:[%s26209_s1 + $0x138] sm:$0xff] }
  0x80   : > { %v1538_v30 = vadd.f32 %v1506_v47, %v1438_v21  ;;  %v1539_v6 = vadd.f32 %v1507_v14, %v1439_v35  ;;  %v1806_v9 = vmul.f32 %v13874_v53, %v18568_v20  ;;  %v1807_v62 = vmul.f32 %v13875_v48, %v18568_v20  ;;  %v13971_v52 = vld [vmem:[%s26209_s1 + $0x1028] sm:$0xff]  ;;  %v13492_v47 = vld [vmem:[%s26209_s1 + $0x130] sm:$0xff]  ;;  %v13525_v48 = vld [vmem:[%s26209_s1 + $0x238] sm:$0xff] }
  0x81   : > { %v2836_v33 = vadd.f32 %v2804_v22, %v2736_v3  ;;  %v2837_v4 = vadd.f32 %v2805_v42, %v2737_v50  ;;  %v1906_v37 = vmul.f32 %v13906_v51, %v18588_v32  ;;  %v1907_v43 = vmul.f32 %v13907_v60, %v18588_v32  ;;  %v476_v22 = vld [vmem:[%s26209_s1 + $0x38] sm:$0xff]  ;;  %v441_v42 = vld [vmem:[%s26210_s2 + $0x30] sm:$0xff] }
  0x82   : > { %v1638_v28 = vadd.f32 %v1606_v19, %v1538_v30  ;;  %v1639_v29 = vadd.f32 %v1607_v36, %v1539_v6  ;;  %v2006_v58 = vmul.f32 %v13938_v55, %v18600_v40  ;;  %v2007_v63 = vmul.f32 %v13939_v2, %v18600_v40  ;;  %v13524_v36 = vld [vmem:[%s26209_s1 + $0x230] sm:$0xff]  ;;  %v14002_v30 = vld [vmem:[%s26209_s1 + $0x1120] sm:$0xff]  ;;  %v14003_v6 = vld [vmem:[%s26209_s1 + $0x1128] sm:$0xff] }
  0x83   : > { %v2936_v14 = vadd.f32 %v2904_v15, %v2836_v33  ;;  %v2937_v57 = vadd.f32 %v2905_v0, %v2837_v4  ;;  %v2106_v41 = vmul.f32 %v13970_v12, %v18610_v45  ;;  %v2107_v35 = vmul.f32 %v13971_v52, %v18610_v45  ;;  %v442_v15 = vld [vmem:[%s26210_s2 + $0x38] sm:$0xff]  ;;  %v13588_v52 = vld [vmem:[%s26209_s1 + $0x430] sm:$0xff] }
  0x84   : > { %v1738_v53 = vadd.f32 %v1706_v59, %v1638_v28  ;;  %v1739_v21 = vadd.f32 %v1707_v10, %v1639_v29  ;;  %v508_v19 = vmul.f32 %v18402_v8, %v475_v23  ;;  %v509_v50 = vmul.f32 %v18402_v8, %v476_v22  ;;  %v13556_v59 = vld [vmem:[%s26209_s1 + $0x330] sm:$0xff]  ;;  %v13557_v12 = vld [vmem:[%s26209_s1 + $0x338] sm:$0xff]  ;;  %v14034_v29 = vld [vmem:[%s26209_s1 + $0x1220] sm:$0xff] }
  0x85   : > { %v2968_v51 = vmax.f32 %v2936_v14, 0.0  ;;  %v2969_v3 = vmax.f32 %v2937_v57, 0.0  ;;  %v608_v0 = vmul.f32 %v13492_v47, %v18415_v13  ;;  %v609_v2 = vmul.f32 %v13493_v44, %v18415_v13  ;;  %v14035_v22 = vld [vmem:[%s26209_s1 + $0x1228] sm:$0xff]  ;;  %v13589_v57 = vld [vmem:[%s26209_s1 + $0x438] sm:$0xff] }
  0x86   : > { %v1838_v60 = vadd.f32 %v1806_v9, %v1738_v53  ;;  %v1839_v55 = vadd.f32 %v1807_v62, %v1739_v21  ;;  %v540_v10 = vadd.f32 %v508_v19, %v441_v42  ;;  %v541_v4 = vadd.f32 %v509_v50, %v442_v15  ;;  %v13620_v53 = vld [vmem:[%s26209_s1 + $0x530] sm:$0xff]  ;;  %v14066_v19 = vld [vmem:[%s26209_s1 + $0x1320] sm:$0xff] }
  0x87   : > { %v16796_v33 = vpack.c.bf16 %v2969_v3, %v2968_v51  ;;  %v708_v9 = vmul.f32 %v13524_v36, %v18422_v16  ;;  %v709_v62 = vmul.f32 %v13525_v48, %v18422_v16  ;;  %v808_v14 = vmul.f32 %v13556_v59, %v18439_v24  ;;  %v14067_v36 = vld [vmem:[%s26209_s1 + $0x1328] sm:$0xff]  ;;  %v13621_v3 = vld [vmem:[%s26209_s1 + $0x538] sm:$0xff]  ;;  %v13652_v59 = vld [vmem:[%s26209_s1 + $0x630] sm:$0xff] }
  0x88   : > { %v1938_v23 = vadd.f32 %v1906_v37, %v1838_v60  ;;  %v1939_v28 = vadd.f32 %v1907_v43, %v1839_v55  ;;  %v640_v47 = vadd.f32 %v608_v0, %v540_v10  ;;  %v2206_v42 = vmul.f32 %v14002_v30, %v18619_v49  ;;  %v14098_v30 = vld [vmem:[%s26209_s1 + $0x1420] sm:$0xff] }
  0x89   : > { %16797 = vmatpush1.bf16.msra.mxu0 %v16796_v33  ;;  %v2207_v37 = vmul.f32 %v14003_v6, %v18619_v49  ;;  %v641_v43 = vadd.f32 %v609_v2, %v541_v4  ;;  %v809_v44 = vmul.f32 %v13557_v12, %v18439_v24  ;;  %v908_v51 = vmul.f32 %v13588_v52, %v18445_v26  ;;  %v14099_v6 = vld [vmem:[%s26209_s1 + $0x1428] sm:$0xff]  ;;  %v13653_v12 = vld [vmem:[%s26209_s1 + $0x638] sm:$0xff] }
  0x8a   : > { %16798 = vmatprep.subr.bf16.mxu0 %v26245_v1  ;;  %v2038_v21 = vadd.f32 %v2006_v58, %v1938_v23  ;;  %v2039_v15 = vadd.f32 %v2007_v63, %v1939_v28  ;;  %v740_v48 = vadd.f32 %v708_v9, %v640_v47  ;;  %v2306_v50 = vmul.f32 %v14034_v29, %v18631_v56  ;;  %v13684_v9 = vld [vmem:[%s26209_s1 + $0x730] sm:$0xff]  ;;  %v14130_v23 = vld [vmem:[%s26209_s1 + $0x1520] sm:$0xff]  ;;  %v14131_v28 = vld [vmem:[%s26209_s1 + $0x1528] sm:$0xff] }
  0x8b   : > { %v2307_v58 = vmul.f32 %v14035_v22, %v18631_v56  ;;  %v741_v63 = vadd.f32 %v709_v62, %v641_v43  ;;  %v909_v0 = vmul.f32 %v13589_v57, %v18445_v26  ;;  %v1008_v2 = vmul.f32 %v13620_v53, %v18462_v34  ;;  %v13685_v47 = vld [vmem:[%s26209_s1 + $0x738] sm:$0xff]  ;;  %v13716_v43 = vld [vmem:[%s26209_s1 + $0x830] sm:$0xff] }
  0x8c   : > { %v2138_v60 = vadd.f32 %v2106_v41, %v2038_v21  ;;  %v2139_v55 = vadd.f32 %v2107_v35, %v2039_v15  ;;  %v840_v10 = vadd.f32 %v808_v14, %v740_v48  ;;  %v2406_v33 = vmul.f32 %v14066_v19, %v18693_v25  ;;  %v14162_v21 = vld [vmem:[%s26209_s1 + $0x1620] sm:$0xff]  ;;  %v14163_v15 = vld [vmem:[%s26209_s1 + $0x1628] sm:$0xff]  ;;  %v13717_v48 = vld [vmem:[%s26209_s1 + $0x838] sm:$0xff] }
  0x8d   : > { %v2407_v41 = vmul.f32 %v14067_v36, %v18693_v25  ;;  %v841_v35 = vadd.f32 %v809_v44, %v741_v63  ;;  %v1009_v4 = vmul.f32 %v13621_v3, %v18462_v34  ;;  %v1108_v22 = vmul.f32 %v13652_v59, %v18470_v39  ;;  %v13748_v63 = vld [vmem:[%s26209_s1 + $0x930] sm:$0xff] }
  0x8e   : > { %v2238_v62 = vadd.f32 %v2206_v42, %v2138_v60  ;;  %v2239_v52 = vadd.f32 %v2207_v37, %v2139_v55  ;;  %v940_v29 = vadd.f32 %v908_v51, %v840_v10  ;;  %v2506_v14 = vmul.f32 %v14098_v30, %v18696_v27  ;;  %v14194_v60 = vld [vmem:[%s26209_s1 + $0x1720] sm:$0xff]  ;;  %v14195_v55 = vld [vmem:[%s26209_s1 + $0x1728] sm:$0xff]  ;;  %v13749_v10 = vld [vmem:[%s26209_s1 + $0x938] sm:$0xff] }
  0x8f   : > { %v2507_v57 = vmul.f32 %v14099_v6, %v18696_v27  ;;  %v941_v42 = vadd.f32 %v909_v0, %v841_v35  ;;  %v1109_v37 = vmul.f32 %v13653_v12, %v18470_v39  ;;  %v1208_v36 = vmul.f32 %v13684_v9, %v18488_v46  ;;  %v13780_v35 = vld [vmem:[%s26209_s1 + $0xa30] sm:$0xff] }
  0x90   : > { %v2338_v44 = vadd.f32 %v2306_v50, %v2238_v62  ;;  %v2339_v53 = vadd.f32 %v2307_v58, %v2239_v52  ;;  %v1040_v19 = vadd.f32 %v1008_v2, %v940_v29  ;;  %v2606_v51 = vmul.f32 %v14130_v23, %v18738_v17  ;;  %v14226_v62 = vld [vmem:[%s26209_s1 + $0x1820] sm:$0xff]  ;;  %v14227_v52 = vld [vmem:[%s26209_s1 + $0x1828] sm:$0xff]  ;;  %v13781_v29 = vld [vmem:[%s26209_s1 + $0xa38] sm:$0xff] }
  0x91   : > { %v2607_v3 = vmul.f32 %v14131_v28, %v18738_v17  ;;  %v1041_v50 = vadd.f32 %v1009_v4, %v941_v42  ;;  %v1209_v58 = vmul.f32 %v13685_v47, %v18488_v46  ;;  %v1308_v6 = vmul.f32 %v13716_v43, %v18507_v54  ;;  %v13812_v42 = vld [vmem:[%s26209_s1 + $0xb30] sm:$0xff] }
  0x92   : > { %v2438_v0 = vadd.f32 %v2406_v33, %v2338_v44  ;;  %v2439_v59 = vadd.f32 %v2407_v41, %v2339_v53  ;;  %v1140_v30 = vadd.f32 %v1108_v22, %v1040_v19  ;;  %v2706_v2 = vmul.f32 %v14162_v21, %v18760_v38  ;;  %v13813_v21 = vld [vmem:[%s26209_s1 + $0xb38] sm:$0xff] }
  0x93   : > { %v2707_v12 = vmul.f32 %v14163_v15, %v18760_v38  ;;  %v1141_v33 = vadd.f32 %v1109_v37, %v1041_v50  ;;  %v1309_v41 = vmul.f32 %v13717_v48, %v18507_v54  ;;  %v1408_v28 = vmul.f32 %v13748_v63, %v18523_v61  ;;  %v13844_v15 = vld [vmem:[%s26209_s1 + $0xc30] sm:$0xff]  ;;  %v13845_v19 = vld [vmem:[%s26209_s1 + $0xc38] sm:$0xff] }
  0x94   : > { %v2538_v4 = vadd.f32 %v2506_v14, %v2438_v0  ;;  %v2539_v9 = vadd.f32 %v2507_v57, %v2439_v59  ;;  %v1240_v23 = vadd.f32 %v1208_v36, %v1140_v30  ;;  %v2806_v22 = vmul.f32 %v14194_v60, %v18792_v11  ;;  %v13876_v50 = vld [vmem:[%s26209_s1 + $0xd30] sm:$0xff]  ;;  %v13877_v60 = vld [vmem:[%s26209_s1 + $0xd38] sm:$0xff] }
  0x95   : > { %v2807_v47 = vmul.f32 %v14195_v55, %v18792_v11  ;;  %v1241_v14 = vadd.f32 %v1209_v58, %v1141_v33  ;;  %v1409_v57 = vmul.f32 %v13749_v10, %v18523_v61  ;;  %v1508_v53 = vmul.f32 %v13780_v35, %v18540_v5  ;;  %v13908_v55 = vld [vmem:[%s26209_s1 + $0xe30] sm:$0xff]  ;;  %v13909_v30 = vld [vmem:[%s26209_s1 + $0xe38] sm:$0xff] }
  0x96   : > { %v2638_v37 = vadd.f32 %v2606_v51, %v2538_v4  ;;  %v2639_v43 = vadd.f32 %v2607_v3, %v2539_v9  ;;  %v1340_v44 = vadd.f32 %v1308_v6, %v1240_v23  ;;  %v2906_v36 = vmul.f32 %v14226_v62, %v18812_v31  ;;  %v13940_v33 = vld [vmem:[%s26209_s1 + $0xf30] sm:$0xff]  ;;  %v13941_v62 = vld [vmem:[%s26209_s1 + $0xf38] sm:$0xff] }
  0x97   : > { %v2907_v48 = vmul.f32 %v14227_v52, %v18812_v31  ;;  %v1341_v51 = vadd.f32 %v1309_v41, %v1241_v14  ;;  %v1509_v3 = vmul.f32 %v13781_v29, %v18540_v5  ;;  %v1608_v59 = vmul.f32 %v13812_v42, %v18546_v7  ;;  %v13972_v52 = vld [vmem:[%s26209_s1 + $0x1030] sm:$0xff]  ;;  %v13973_v23 = vld [vmem:[%s26209_s1 + $0x1038] sm:$0xff]  ;;  %v477_v14 = vld [vmem:[%s26209_s1 + $0x40] sm:$0xff] }
  0x98   : > { %v2738_v58 = vadd.f32 %v2706_v2, %v2638_v37  ;;  %v2739_v63 = vadd.f32 %v2707_v12, %v2639_v43  ;;  %v1440_v0 = vadd.f32 %v1408_v28, %v1340_v44  ;;  %v1609_v10 = vmul.f32 %v13813_v21, %v18546_v7  ;;  %v478_v44 = vld [vmem:[%s26209_s1 + $0x48] sm:$0xff] }
  0x99   : > { %v1441_v6 = vadd.f32 %v1409_v57, %v1341_v51  ;;  %v1708_v2 = vmul.f32 %v13844_v15, %v18562_v18  ;;  %v1709_v12 = vmul.f32 %v13845_v19, %v18562_v18  ;;  %v1808_v9 = vmul.f32 %v13876_v50, %v18568_v20  ;;  %v13495_v21 = vld [vmem:[%s26209_s1 + $0x148] sm:$0xff]  ;;  %v443_v51 = vld [vmem:[%s26210_s2 + $0x40] sm:$0xff] }
  0x9a   : > { %v2838_v41 = vadd.f32 %v2806_v22, %v2738_v58  ;;  %v2839_v35 = vadd.f32 %v2807_v47, %v2739_v63  ;;  %v1540_v4 = vadd.f32 %v1508_v53, %v1440_v0  ;;  %v1809_v29 = vmul.f32 %v13877_v60, %v18568_v20  ;;  %v13494_v53 = vld [vmem:[%s26209_s1 + $0x140] sm:$0xff]  ;;  %v14004_v0 = vld [vmem:[%s26209_s1 + $0x1130] sm:$0xff] }
  0x9b   : > { %v1541_v28 = vadd.f32 %v1509_v3, %v1441_v6  ;;  %v1908_v22 = vmul.f32 %v13908_v55, %v18588_v32  ;;  %v1909_v47 = vmul.f32 %v13909_v30, %v18588_v32  ;;  %v2008_v43 = vmul.f32 %v13940_v33, %v18600_v40  ;;  %v13526_v3 = vld [vmem:[%s26209_s1 + $0x240] sm:$0xff]  ;;  %v13527_v55 = vld [vmem:[%s26209_s1 + $0x248] sm:$0xff]  ;;  %v14005_v6 = vld [vmem:[%s26209_s1 + $0x1138] sm:$0xff] }
  0x9c   : > { %v2938_v57 = vadd.f32 %v2906_v36, %v2838_v41  ;;  %v2939_v42 = vadd.f32 %v2907_v48, %v2839_v35  ;;  %v1640_v37 = vadd.f32 %v1608_v59, %v1540_v4  ;;  %v2009_v19 = vmul.f32 %v13941_v62, %v18600_v40  ;;  %v444_v59 = vld [vmem:[%s26210_s2 + $0x48] sm:$0xff]  ;;  %v13558_v41 = vld [vmem:[%s26209_s1 + $0x340] sm:$0xff] }
  0x9d   : > { %v1641_v15 = vadd.f32 %v1609_v10, %v1541_v28  ;;  %v2108_v36 = vmul.f32 %v13972_v52, %v18610_v45  ;;  %v2109_v48 = vmul.f32 %v13973_v23, %v18610_v45  ;;  %v510_v60 = vmul.f32 %v18402_v8, %v477_v14  ;;  %v13559_v23 = vld [vmem:[%s26209_s1 + $0x348] sm:$0xff] }
  0x9e   : > { %v2970_v50 = vmax.f32 %v2938_v57, 0.0  ;;  %v2971_v58 = vmax.f32 %v2939_v42, 0.0  ;;  %v1740_v63 = vadd.f32 %v1708_v2, %v1640_v37  ;;  %v511_v10 = vmul.f32 %v18402_v8, %v478_v44  ;;  %v14037_v57 = vld [vmem:[%s26209_s1 + $0x1238] sm:$0xff]  ;;  %v13590_v37 = vld [vmem:[%s26209_s1 + $0x440] sm:$0xff] }
  0x9f   : > { %v1741_v30 = vadd.f32 %v1709_v12, %v1641_v15  ;;  %v610_v2 = vmul.f32 %v13494_v53, %v18415_v13  ;;  %v611_v33 = vmul.f32 %v13495_v21, %v18415_v13  ;;  %v14036_v12 = vld [vmem:[%s26209_s1 + $0x1230] sm:$0xff]  ;;  %v542_v62 = vadd.f32 %v510_v60, %v443_v51  ;;  %v13591_v51 = vld [vmem:[%s26209_s1 + $0x448] sm:$0xff] }
  0xa0   : > { %v16799_v35 = vpack.c.bf16 %v2971_v58, %v2970_v50  ;;  %v1840_v4 = vadd.f32 %v1808_v9, %v1740_v63  ;;  %v710_v52 = vmul.f32 %v13526_v3, %v18422_v16  ;;  %v2208_v14 = vmul.f32 %v14004_v0, %v18619_v49  ;;  %v13622_v0 = vld [vmem:[%s26209_s1 + $0x540] sm:$0xff] }
  0xa1   : > { %v1841_v28 = vadd.f32 %v1809_v29, %v1741_v30  ;;  %v543_v42 = vadd.f32 %v511_v10, %v444_v59  ;;  %v711_v9 = vmul.f32 %v13527_v55, %v18422_v16  ;;  %v2209_v53 = vmul.f32 %v14005_v6, %v18619_v49  ;;  %v14068_v29 = vld [vmem:[%s26209_s1 + $0x1330] sm:$0xff]  ;;  %v13623_v6 = vld [vmem:[%s26209_s1 + $0x548] sm:$0xff] }
  0xa2   : > { %16800 = vmatpush1.bf16.msra.mxu0 %v16799_v35  ;;  %v1940_v44 = vadd.f32 %v1908_v22, %v1840_v4  ;;  %v642_v21 = vadd.f32 %v610_v2, %v542_v62  ;;  %v810_v15 = vmul.f32 %v13558_v41, %v18439_v24  ;;  %v2308_v50 = vmul.f32 %v14036_v12, %v18631_v56  ;;  %v14069_v22 = vld [vmem:[%s26209_s1 + $0x1338] sm:$0xff]  ;;  %v13654_v35 = vld [vmem:[%s26209_s1 + $0x640] sm:$0xff] }
  0xa3   : > { %16801 = vmatprep.subr.bf16.mxu0 %v26245_v1  ;;  %v1941_v3 = vadd.f32 %v1909_v47, %v1841_v28  ;;  %v643_v58 = vadd.f32 %v611_v33, %v543_v42  ;;  %v811_v63 = vmul.f32 %v13559_v23, %v18439_v24  ;;  %v2309_v60 = vmul.f32 %v14037_v57, %v18631_v56  ;;  %v14100_v47 = vld [vmem:[%s26209_s1 + $0x1430] sm:$0xff]  ;;  %v13655_v23 = vld [vmem:[%s26209_s1 + $0x648] sm:$0xff] }
  0xa4   : > { %v2040_v59 = vadd.f32 %v2008_v43, %v1940_v44  ;;  %v742_v55 = vadd.f32 %v710_v52, %v642_v21  ;;  %v910_v30 = vmul.f32 %v13590_v37, %v18445_v26  ;;  %v2408_v2 = vmul.f32 %v14068_v29, %v18693_v25  ;;  %v14101_v43 = vld [vmem:[%s26209_s1 + $0x1438] sm:$0xff]  ;;  %v13686_v37 = vld [vmem:[%s26209_s1 + $0x740] sm:$0xff] }
  0xa5   : > { %v2041_v10 = vadd.f32 %v2009_v19, %v1941_v3  ;;  %v743_v33 = vadd.f32 %v711_v9, %v643_v58  ;;  %v911_v41 = vmul.f32 %v13591_v51, %v18445_v26  ;;  %v2409_v12 = vmul.f32 %v14069_v22, %v18693_v25  ;;  %v14132_v19 = vld [vmem:[%s26209_s1 + $0x1530] sm:$0xff]  ;;  %v13687_v51 = vld [vmem:[%s26209_s1 + $0x748] sm:$0xff] }
  0xa6   : > { %v2140_v4 = vadd.f32 %v2108_v36, %v2040_v59  ;;  %v842_v62 = vadd.f32 %v810_v15, %v742_v55  ;;  %v1010_v52 = vmul.f32 %v13622_v0, %v18462_v34  ;;  %v2508_v57 = vmul.f32 %v14100_v47, %v18696_v27  ;;  %v14133_v36 = vld [vmem:[%s26209_s1 + $0x1538] sm:$0xff]  ;;  %v13718_v0 = vld [vmem:[%s26209_s1 + $0x840] sm:$0xff] }
  0xa7   : > { %v2141_v28 = vadd.f32 %v2109_v48, %v2041_v10  ;;  %v843_v42 = vadd.f32 %v811_v63, %v743_v33  ;;  %v1011_v9 = vmul.f32 %v13623_v6, %v18462_v34  ;;  %v2509_v29 = vmul.f32 %v14101_v43, %v18696_v27  ;;  %v14164_v48 = vld [vmem:[%s26209_s1 + $0x1630] sm:$0xff]  ;;  %v13719_v6 = vld [vmem:[%s26209_s1 + $0x848] sm:$0xff] }
  0xa8   : > { %v2240_v44 = vadd.f32 %v2208_v14, %v2140_v4  ;;  %v942_v21 = vadd.f32 %v910_v30, %v842_v62  ;;  %v1110_v15 = vmul.f32 %v13654_v35, %v18470_v39  ;;  %v2608_v22 = vmul.f32 %v14132_v19, %v18738_v17  ;;  %v14165_v14 = vld [vmem:[%s26209_s1 + $0x1638] sm:$0xff]  ;;  %v13750_v35 = vld [vmem:[%s26209_s1 + $0x940] sm:$0xff] }
  0xa9   : > { %v2241_v3 = vadd.f32 %v2209_v53, %v2141_v28  ;;  %v943_v58 = vadd.f32 %v911_v41, %v843_v42  ;;  %v1111_v63 = vmul.f32 %v13655_v23, %v18470_v39  ;;  %v2609_v47 = vmul.f32 %v14133_v36, %v18738_v17  ;;  %v14196_v53 = vld [vmem:[%s26209_s1 + $0x1730] sm:$0xff]  ;;  %v13751_v23 = vld [vmem:[%s26209_s1 + $0x948] sm:$0xff] }
  0xaa   : > { %v2340_v59 = vadd.f32 %v2308_v50, %v2240_v44  ;;  %v1042_v55 = vadd.f32 %v1010_v52, %v942_v21  ;;  %v1210_v30 = vmul.f32 %v13686_v37, %v18488_v46  ;;  %v2708_v43 = vmul.f32 %v14164_v48, %v18760_v38  ;;  %v14197_v50 = vld [vmem:[%s26209_s1 + $0x1738] sm:$0xff]  ;;  %v13782_v37 = vld [vmem:[%s26209_s1 + $0xa40] sm:$0xff] }
  0xab   : > { %v2341_v10 = vadd.f32 %v2309_v60, %v2241_v3  ;;  %v1043_v33 = vadd.f32 %v1011_v9, %v943_v58  ;;  %v1211_v41 = vmul.f32 %v13687_v51, %v18488_v46  ;;  %v2709_v19 = vmul.f32 %v14165_v14, %v18760_v38  ;;  %v14228_v60 = vld [vmem:[%s26209_s1 + $0x1830] sm:$0xff]  ;;  %v13814_v51 = vld [vmem:[%s26209_s1 + $0xb40] sm:$0xff] }
  0xac   : > { %v2440_v4 = vadd.f32 %v2408_v2, %v2340_v59  ;;  %v1142_v62 = vadd.f32 %v1110_v15, %v1042_v55  ;;  %v1310_v52 = vmul.f32 %v13718_v0, %v18507_v54  ;;  %v2808_v36 = vmul.f32 %v14196_v53, %v18792_v11  ;;  %v14229_v2 = vld [vmem:[%s26209_s1 + $0x1838] sm:$0xff]  ;;  %v13846_v0 = vld [vmem:[%s26209_s1 + $0xc40] sm:$0xff] }
  0xad   : > { %v2441_v28 = vadd.f32 %v2409_v12, %v2341_v10  ;;  %v1143_v42 = vadd.f32 %v1111_v63, %v1043_v33  ;;  %v1311_v9 = vmul.f32 %v13719_v6, %v18507_v54  ;;  %v2809_v48 = vmul.f32 %v14197_v50, %v18792_v11  ;;  %v13783_v12 = vld [vmem:[%s26209_s1 + $0xa48] sm:$0xff]  ;;  %v13878_v6 = vld [vmem:[%s26209_s1 + $0xd40] sm:$0xff] }
  0xae   : > { %v2540_v44 = vadd.f32 %v2508_v57, %v2440_v4  ;;  %v1242_v21 = vadd.f32 %v1210_v30, %v1142_v62  ;;  %v1410_v15 = vmul.f32 %v13750_v35, %v18523_v61  ;;  %v2908_v14 = vmul.f32 %v14228_v60, %v18812_v31  ;;  %v13815_v57 = vld [vmem:[%s26209_s1 + $0xb48] sm:$0xff]  ;;  %v13910_v35 = vld [vmem:[%s26209_s1 + $0xe40] sm:$0xff] }
  0xaf   : > { %v2541_v3 = vadd.f32 %v2509_v29, %v2441_v28  ;;  %v1243_v58 = vadd.f32 %v1211_v41, %v1143_v42  ;;  %v1411_v63 = vmul.f32 %v13751_v23, %v18523_v61  ;;  %v2909_v53 = vmul.f32 %v14229_v2, %v18812_v31  ;;  %v13847_v29 = vld [vmem:[%s26209_s1 + $0xc48] sm:$0xff]  ;;  %v13942_v23 = vld [vmem:[%s26209_s1 + $0xf40] sm:$0xff] }
  0xb0   : > { %v2640_v59 = vadd.f32 %v2608_v22, %v2540_v44  ;;  %v1342_v55 = vadd.f32 %v1310_v52, %v1242_v21  ;;  %v1510_v30 = vmul.f32 %v13782_v37, %v18540_v5  ;;  %v1511_v33 = vmul.f32 %v13783_v12, %v18540_v5  ;;  %v13879_v22 = vld [vmem:[%s26209_s1 + $0xd48] sm:$0xff]  ;;  %v13974_v37 = vld [vmem:[%s26209_s1 + $0x1040] sm:$0xff] }
  0xb1   : > { %v2641_v10 = vadd.f32 %v2609_v47, %v2541_v3  ;;  %v1343_v50 = vadd.f32 %v1311_v9, %v1243_v58  ;;  %v1610_v41 = vmul.f32 %v13814_v51, %v18546_v7  ;;  %v1611_v62 = vmul.f32 %v13815_v57, %v18546_v7  ;;  %v13911_v47 = vld [vmem:[%s26209_s1 + $0xe48] sm:$0xff]  ;;  %v479_v51 = vld [vmem:[%s26209_s1 + $0x50] sm:$0xff] }
  0xb2   : > { %v2740_v4 = vadd.f32 %v2708_v43, %v2640_v59  ;;  %v1442_v60 = vadd.f32 %v1410_v15, %v1342_v55  ;;  %v1710_v52 = vmul.f32 %v13846_v0, %v18562_v18  ;;  %v1711_v42 = vmul.f32 %v13847_v29, %v18562_v18  ;;  %v13943_v43 = vld [vmem:[%s26209_s1 + $0xf48] sm:$0xff]  ;;  %v13496_v0 = vld [vmem:[%s26209_s1 + $0x150] sm:$0xff] }
  0xb3   : > { %v2741_v28 = vadd.f32 %v2709_v19, %v2641_v10  ;;  %v1443_v2 = vadd.f32 %v1411_v63, %v1343_v50  ;;  %v1810_v9 = vmul.f32 %v13878_v6, %v18568_v20  ;;  %v1811_v15 = vmul.f32 %v13879_v22, %v18568_v20  ;;  %v13975_v19 = vld [vmem:[%s26209_s1 + $0x1048] sm:$0xff]  ;;  %v13497_v6 = vld [vmem:[%s26209_s1 + $0x158] sm:$0xff]  ;;  %v13528_v22 = vld [vmem:[%s26209_s1 + $0x250] sm:$0xff] }
  0xb4   : > { %v2840_v44 = vadd.f32 %v2808_v36, %v2740_v4  ;;  %v1542_v21 = vadd.f32 %v1510_v30, %v1442_v60  ;;  %v1910_v12 = vmul.f32 %v13910_v35, %v18588_v32  ;;  %v1911_v63 = vmul.f32 %v13911_v47, %v18588_v32  ;;  %v480_v36 = vld [vmem:[%s26209_s1 + $0x58] sm:$0xff]  ;;  %v13560_v47 = vld [vmem:[%s26209_s1 + $0x350] sm:$0xff] }
  0xb5   : > { %v2841_v3 = vadd.f32 %v2809_v48, %v2741_v28  ;;  %v1543_v58 = vadd.f32 %v1511_v33, %v1443_v2  ;;  %v2010_v57 = vmul.f32 %v13942_v23, %v18600_v40  ;;  %v2011_v30 = vmul.f32 %v13943_v43, %v18600_v40  ;;  %v445_v48 = vld [vmem:[%s26210_s2 + $0x50] sm:$0xff]  ;;  %v13529_v35 = vld [vmem:[%s26209_s1 + $0x258] sm:$0xff]  ;;  %v14006_v2 = vld [vmem:[%s26209_s1 + $0x1140] sm:$0xff] }
  0xb6   : > { %v2940_v59 = vadd.f32 %v2908_v14, %v2840_v44  ;;  %v1642_v55 = vadd.f32 %v1610_v41, %v1542_v21  ;;  %v2110_v29 = vmul.f32 %v13974_v37, %v18610_v45  ;;  %v2111_v33 = vmul.f32 %v13975_v19, %v18610_v45  ;;  %v446_v14 = vld [vmem:[%s26210_s2 + $0x58] sm:$0xff]  ;;  %v14007_v21 = vld [vmem:[%s26209_s1 + $0x1148] sm:$0xff] }
  0xb7   : > { %v2941_v10 = vadd.f32 %v2909_v53, %v2841_v3  ;;  %v1643_v50 = vadd.f32 %v1611_v62, %v1543_v58  ;;  %v512_v41 = vmul.f32 %v18402_v8, %v479_v51  ;;  %v513_v53 = vmul.f32 %v18402_v8, %v480_v36  ;;  %v13592_v3 = vld [vmem:[%s26209_s1 + $0x450] sm:$0xff] }
  0xb8   : > { %v2972_v4 = vmax.f32 %v2940_v59, 0.0  ;;  %v1742_v60 = vadd.f32 %v1710_v52, %v1642_v55  ;;  %v612_v62 = vmul.f32 %v13496_v0, %v18415_v13  ;;  %v613_v37 = vmul.f32 %v13497_v6, %v18415_v13  ;;  %v13561_v52 = vld [vmem:[%s26209_s1 + $0x358] sm:$0xff]  ;;  %v14038_v0 = vld [vmem:[%s26209_s1 + $0x1240] sm:$0xff] }
  0xb9   : > { %v2973_v23 = vmax.f32 %v2941_v10, 0.0  ;;  %v1743_v28 = vadd.f32 %v1711_v42, %v1643_v50  ;;  %v544_v43 = vadd.f32 %v512_v41, %v445_v48  ;;  %v545_v19 = vadd.f32 %v513_v53, %v446_v14  ;;  %v13593_v55 = vld [vmem:[%s26209_s1 + $0x458] sm:$0xff]  ;;  %v14039_v10 = vld [vmem:[%s26209_s1 + $0x1248] sm:$0xff]  ;;  %v13624_v14 = vld [vmem:[%s26209_s1 + $0x550] sm:$0xff] }
  0xba   : > { %v1842_v44 = vadd.f32 %v1810_v9, %v1742_v60  ;;  %v712_v51 = vmul.f32 %v13528_v22, %v18422_v16  ;;  %v713_v42 = vmul.f32 %v13529_v35, %v18422_v16  ;;  %v812_v59 = vmul.f32 %v13560_v47, %v18439_v24  ;;  %v13625_v60 = vld [vmem:[%s26209_s1 + $0x558] sm:$0xff] }
  0xbb   : > { %v16802_v58 = vpack.c.bf16 %v2973_v23, %v2972_v4  ;;  %v1843_v36 = vadd.f32 %v1811_v15, %v1743_v28  ;;  %v644_v9 = vadd.f32 %v612_v62, %v544_v43  ;;  %v2210_v6 = vmul.f32 %v14006_v2, %v18619_v49  ;;  %v13656_v28 = vld [vmem:[%s26209_s1 + $0x650] sm:$0xff] }
  0xbc   : > { %v1942_v48 = vadd.f32 %v1910_v12, %v1842_v44  ;;  %v645_v50 = vadd.f32 %v613_v37, %v545_v19  ;;  %v813_v15 = vmul.f32 %v13561_v52, %v18439_v24  ;;  %v2211_v22 = vmul.f32 %v14007_v21, %v18619_v49  ;;  %v14070_v12 = vld [vmem:[%s26209_s1 + $0x1340] sm:$0xff]  ;;  %v13657_v44 = vld [vmem:[%s26209_s1 + $0x658] sm:$0xff] }
  0xbd   : > { %16803 = vmatpush1.bf16.msra.mxu0 %v16802_v58  ;;  %v1943_v41 = vadd.f32 %v1911_v63, %v1843_v36  ;;  %v744_v35 = vadd.f32 %v712_v51, %v644_v9  ;;  %v912_v4 = vmul.f32 %v13592_v3, %v18445_v26  ;;  %v2310_v62 = vmul.f32 %v14038_v0, %v18631_v56  ;;  %v14071_v63 = vld [vmem:[%s26209_s1 + $0x1348] sm:$0xff]  ;;  %v13688_v3 = vld [vmem:[%s26209_s1 + $0x750] sm:$0xff] }
  0xbe   : > { %16804 = vmatprep.subr.bf16.mxu0 %v26245_v1  ;;  %v2042_v53 = vadd.f32 %v2010_v57, %v1942_v48  ;;  %v745_v47 = vadd.f32 %v713_v42, %v645_v50  ;;  %v913_v23 = vmul.f32 %v13593_v55, %v18445_v26  ;;  %v2311_v43 = vmul.f32 %v14039_v10, %v18631_v56  ;;  %v14102_v57 = vld [vmem:[%s26209_s1 + $0x1440] sm:$0xff] }
  0xbf   : > { %v2043_v2 = vadd.f32 %v2011_v30, %v1943_v41  ;;  %v844_v37 = vadd.f32 %v812_v59, %v744_v35  ;;  %v1012_v52 = vmul.f32 %v13624_v14, %v18462_v34  ;;  %v2410_v19 = vmul.f32 %v14070_v12, %v18693_v25  ;;  %v14103_v30 = vld [vmem:[%s26209_s1 + $0x1448] sm:$0xff]  ;;  %v13689_v59 = vld [vmem:[%s26209_s1 + $0x758] sm:$0xff] }
  0xc0   : > { %v2142_v21 = vadd.f32 %v2110_v29, %v2042_v53  ;;  %v845_v51 = vadd.f32 %v813_v15, %v745_v47  ;;  %v1013_v42 = vmul.f32 %v13625_v60, %v18462_v34  ;;  %v2411_v36 = vmul.f32 %v14071_v63, %v18693_v25  ;;  %v14134_v29 = vld [vmem:[%s26209_s1 + $0x1540] sm:$0xff]  ;;  %v13720_v15 = vld [vmem:[%s26209_s1 + $0x850] sm:$0xff] }
  0xc1   : > { %v2143_v58 = vadd.f32 %v2111_v33, %v2043_v2  ;;  %v944_v0 = vadd.f32 %v912_v4, %v844_v37  ;;  %v1112_v9 = vmul.f32 %v13656_v28, %v18470_v39  ;;  %v2510_v48 = vmul.f32 %v14102_v57, %v18696_v27  ;;  %v14135_v33 = vld [vmem:[%s26209_s1 + $0x1548] sm:$0xff]  ;;  %v13721_v4 = vld [vmem:[%s26209_s1 + $0x858] sm:$0xff] }
  0xc2   : > { %v2242_v55 = vadd.f32 %v2210_v6, %v2142_v21  ;;  %v945_v10 = vadd.f32 %v913_v23, %v845_v51  ;;  %v1113_v50 = vmul.f32 %v13657_v44, %v18470_v39  ;;  %v2511_v41 = vmul.f32 %v14103_v30, %v18696_v27  ;;  %v14166_v6 = vld [vmem:[%s26209_s1 + $0x1640] sm:$0xff]  ;;  %v13752_v23 = vld [vmem:[%s26209_s1 + $0x950] sm:$0xff] }
  0xc3   : > { %v2243_v14 = vadd.f32 %v2211_v22, %v2143_v58  ;;  %v1044_v12 = vadd.f32 %v1012_v52, %v944_v0  ;;  %v1212_v35 = vmul.f32 %v13688_v3, %v18488_v46  ;;  %v2610_v53 = vmul.f32 %v14134_v29, %v18738_v17  ;;  %v14167_v22 = vld [vmem:[%s26209_s1 + $0x1648] sm:$0xff]  ;;  %v13753_v52 = vld [vmem:[%s26209_s1 + $0x958] sm:$0xff] }
  0xc4   : > { %v2342_v60 = vadd.f32 %v2310_v62, %v2242_v55  ;;  %v1045_v63 = vadd.f32 %v1013_v42, %v945_v10  ;;  %v1213_v47 = vmul.f32 %v13689_v59, %v18488_v46  ;;  %v2611_v2 = vmul.f32 %v14135_v33, %v18738_v17  ;;  %v14198_v62 = vld [vmem:[%s26209_s1 + $0x1740] sm:$0xff]  ;;  %v13784_v42 = vld [vmem:[%s26209_s1 + $0xa50] sm:$0xff] }
  0xc5   : > { %v2343_v28 = vadd.f32 %v2311_v43, %v2243_v14  ;;  %v1144_v57 = vadd.f32 %v1112_v9, %v1044_v12  ;;  %v1312_v37 = vmul.f32 %v13720_v15, %v18507_v54  ;;  %v2710_v21 = vmul.f32 %v14166_v6, %v18760_v38  ;;  %v14199_v43 = vld [vmem:[%s26209_s1 + $0x1748] sm:$0xff]  ;;  %v13785_v9 = vld [vmem:[%s26209_s1 + $0xa58] sm:$0xff] }
  0xc6   : > { %v2442_v44 = vadd.f32 %v2410_v19, %v2342_v60  ;;  %v1145_v30 = vadd.f32 %v1113_v50, %v1045_v63  ;;  %v1313_v51 = vmul.f32 %v13721_v4, %v18507_v54  ;;  %v2711_v58 = vmul.f32 %v14167_v22, %v18760_v38  ;;  %v14230_v19 = vld [vmem:[%s26209_s1 + $0x1840] sm:$0xff]  ;;  %v13816_v50 = vld [vmem:[%s26209_s1 + $0xb50] sm:$0xff] }
  0xc7   : > { %v2443_v3 = vadd.f32 %v2411_v36, %v2343_v28  ;;  %v1244_v29 = vadd.f32 %v1212_v35, %v1144_v57  ;;  %v1412_v0 = vmul.f32 %v13752_v23, %v18523_v61  ;;  %v2810_v55 = vmul.f32 %v14198_v62, %v18792_v11  ;;  %v14231_v36 = vld [vmem:[%s26209_s1 + $0x1848] sm:$0xff]  ;;  %v13848_v35 = vld [vmem:[%s26209_s1 + $0xc50] sm:$0xff] }
  0xc8   : > { %v2542_v59 = vadd.f32 %v2510_v48, %v2442_v44  ;;  %v1245_v33 = vadd.f32 %v1213_v47, %v1145_v30  ;;  %v1413_v10 = vmul.f32 %v13753_v52, %v18523_v61  ;;  %v2811_v14 = vmul.f32 %v14199_v43, %v18792_v11  ;;  %v13817_v48 = vld [vmem:[%s26209_s1 + $0xb58] sm:$0xff]  ;;  %v13880_v47 = vld [vmem:[%s26209_s1 + $0xd50] sm:$0xff] }
  0xc9   : > { %v2543_v15 = vadd.f32 %v2511_v41, %v2443_v3  ;;  %v1344_v6 = vadd.f32 %v1312_v37, %v1244_v29  ;;  %v1512_v12 = vmul.f32 %v13784_v42, %v18540_v5  ;;  %v2910_v60 = vmul.f32 %v14230_v19, %v18812_v31  ;;  %v13849_v41 = vld [vmem:[%s26209_s1 + $0xc58] sm:$0xff]  ;;  %v13912_v37 = vld [vmem:[%s26209_s1 + $0xe50] sm:$0xff] }
  0xca   : > { %v2642_v4 = vadd.f32 %v2610_v53, %v2542_v59  ;;  %v1345_v22 = vadd.f32 %v1313_v51, %v1245_v33  ;;  %v1513_v63 = vmul.f32 %v13785_v9, %v18540_v5  ;;  %v2911_v28 = vmul.f32 %v14231_v36, %v18812_v31  ;;  %v13881_v53 = vld [vmem:[%s26209_s1 + $0xd58] sm:$0xff]  ;;  %v13944_v51 = vld [vmem:[%s26209_s1 + $0xf50] sm:$0xff] }
  0xcb   : > { %v2643_v23 = vadd.f32 %v2611_v2, %v2543_v15  ;;  %v1444_v62 = vadd.f32 %v1412_v0, %v1344_v6  ;;  %v1612_v57 = vmul.f32 %v13816_v50, %v18546_v7  ;;  %v1613_v43 = vmul.f32 %v13817_v48, %v18546_v7  ;;  %v13913_v2 = vld [vmem:[%s26209_s1 + $0xe58] sm:$0xff]  ;;  %v13976_v0 = vld [vmem:[%s26209_s1 + $0x1050] sm:$0xff]  ;;  %v13498_v48 = vld [vmem:[%s26209_s1 + $0x160] sm:$0xff] }
  0xcc   : > { %v2742_v52 = vadd.f32 %v2710_v21, %v2642_v4  ;;  %v1445_v44 = vadd.f32 %v1413_v10, %v1345_v22  ;;  %v1712_v30 = vmul.f32 %v13848_v35, %v18562_v18  ;;  %v1713_v19 = vmul.f32 %v13849_v41, %v18562_v18  ;;  %v13945_v21 = vld [vmem:[%s26209_s1 + $0xf58] sm:$0xff]  ;;  %v481_v10 = vld [vmem:[%s26209_s1 + $0x60] sm:$0xff]  ;;  %v13499_v41 = vld [vmem:[%s26209_s1 + $0x168] sm:$0xff] }
  0xcd   : > { %v2743_v42 = vadd.f32 %v2711_v58, %v2643_v23  ;;  %v1544_v3 = vadd.f32 %v1512_v12, %v1444_v62  ;;  %v1812_v29 = vmul.f32 %v13880_v47, %v18568_v20  ;;  %v1813_v36 = vmul.f32 %v13881_v53, %v18568_v20  ;;  %v13977_v58 = vld [vmem:[%s26209_s1 + $0x1058] sm:$0xff]  ;;  %v13530_v53 = vld [vmem:[%s26209_s1 + $0x260] sm:$0xff] }
  0xce   : > { %v2842_v9 = vadd.f32 %v2810_v55, %v2742_v52  ;;  %v1545_v59 = vadd.f32 %v1513_v63, %v1445_v44  ;;  %v1912_v33 = vmul.f32 %v13912_v37, %v18588_v32  ;;  %v1913_v6 = vmul.f32 %v13913_v2, %v18588_v32  ;;  %v482_v55 = vld [vmem:[%s26209_s1 + $0x68] sm:$0xff] }
  0xcf   : > { %v2843_v50 = vadd.f32 %v2811_v14, %v2743_v42  ;;  %v1644_v15 = vadd.f32 %v1612_v57, %v1544_v3  ;;  %v2012_v12 = vmul.f32 %v13944_v51, %v18600_v40  ;;  %v2013_v22 = vmul.f32 %v13945_v21, %v18600_v40  ;;  %v447_v14 = vld [vmem:[%s26210_s2 + $0x60] sm:$0xff]  ;;  %v13531_v37 = vld [vmem:[%s26209_s1 + $0x268] sm:$0xff]  ;;  %v14008_v42 = vld [vmem:[%s26209_s1 + $0x1150] sm:$0xff] }
  0xd0   : > { %v2942_v35 = vadd.f32 %v2910_v60, %v2842_v9  ;;  %v1645_v4 = vadd.f32 %v1613_v43, %v1545_v59  ;;  %v2112_v63 = vmul.f32 %v13976_v0, %v18610_v45  ;;  %v2113_v62 = vmul.f32 %v13977_v58, %v18610_v45  ;;  %v448_v60 = vld [vmem:[%s26210_s2 + $0x68] sm:$0xff]  ;;  %v14009_v9 = vld [vmem:[%s26209_s1 + $0x1158] sm:$0xff] }
  0xd1   : > { %v2943_v47 = vadd.f32 %v2911_v28, %v2843_v50  ;;  %v1744_v23 = vadd.f32 %v1712_v30, %v1644_v15  ;;  %v514_v57 = vmul.f32 %v18402_v8, %v481_v10  ;;  %v515_v28 = vmul.f32 %v18402_v8, %v482_v55  ;;  %v13562_v30 = vld [vmem:[%s26209_s1 + $0x360] sm:$0xff]  ;;  %v14040_v55 = vld [vmem:[%s26209_s1 + $0x1250] sm:$0xff] }
  0xd2   : > { %v2974_v52 = vmax.f32 %v2942_v35, 0.0  ;;  %v1745_v44 = vadd.f32 %v1713_v19, %v1645_v4  ;;  %v614_v43 = vmul.f32 %v13498_v48, %v18415_v13  ;;  %v615_v21 = vmul.f32 %v13499_v41, %v18415_v13  ;;  %v13563_v19 = vld [vmem:[%s26209_s1 + $0x368] sm:$0xff]  ;;  %v13594_v10 = vld [vmem:[%s26209_s1 + $0x460] sm:$0xff]  ;;  %v14041_v41 = vld [vmem:[%s26209_s1 + $0x1258] sm:$0xff] }
  0xd3   : > { %v2975_v2 = vmax.f32 %v2943_v47, 0.0  ;;  %v1844_v51 = vadd.f32 %v1812_v29, %v1744_v23  ;;  %v546_v3 = vadd.f32 %v514_v57, %v447_v14  ;;  %v547_v59 = vadd.f32 %v515_v28, %v448_v60  ;;  %v13595_v35 = vld [vmem:[%s26209_s1 + $0x468] sm:$0xff]  ;;  %v13626_v23 = vld [vmem:[%s26209_s1 + $0x560] sm:$0xff] }
  0xd4   : > { %v1845_v0 = vadd.f32 %v1813_v36, %v1745_v44  ;;  %v714_v58 = vmul.f32 %v13530_v53, %v18422_v16  ;;  %v715_v29 = vmul.f32 %v13531_v37, %v18422_v16  ;;  %v814_v48 = vmul.f32 %v13562_v30, %v18439_v24 }
  0xd5   : > { %v16805_v50 = vpack.c.bf16 %v2975_v2, %v2974_v52  ;;  %v1944_v15 = vadd.f32 %v1912_v33, %v1844_v51  ;;  %v646_v36 = vadd.f32 %v614_v43, %v546_v3  ;;  %v2212_v14 = vmul.f32 %v14008_v42, %v18619_v49  ;;  %v13627_v52 = vld [vmem:[%s26209_s1 + $0x568] sm:$0xff]  ;;  %v13658_v2 = vld [vmem:[%s26209_s1 + $0x660] sm:$0xff] }
  0xd6   : > { %v1945_v4 = vadd.f32 %v1913_v6, %v1845_v0  ;;  %v647_v47 = vadd.f32 %v615_v21, %v547_v59  ;;  %v815_v33 = vmul.f32 %v13563_v19, %v18439_v24  ;;  %v2213_v57 = vmul.f32 %v14009_v9, %v18619_v49  ;;  %v14072_v6 = vld [vmem:[%s26209_s1 + $0x1350] sm:$0xff]  ;;  %v13659_v19 = vld [vmem:[%s26209_s1 + $0x668] sm:$0xff] }
  0xd7   : > { %16806 = vmatpush1.bf16.msra.mxu0 %v16805_v50  ;;  %v2044_v60 = vadd.f32 %v2012_v12, %v1944_v15  ;;  %v746_v53 = vadd.f32 %v714_v58, %v646_v36  ;;  %v914_v37 = vmul.f32 %v13594_v10, %v18445_v26  ;;  %v2312_v28 = vmul.f32 %v14040_v55, %v18631_v56  ;;  %v14073_v12 = vld [vmem:[%s26209_s1 + $0x1358] sm:$0xff]  ;;  %v13691_v36 = vld [vmem:[%s26209_s1 + $0x768] sm:$0xff] }
  0xd8   : > { %16807 = vmatprep.subr.bf16.mxu0 %v26245_v1  ;;  %v2045_v44 = vadd.f32 %v2013_v22, %v1945_v4  ;;  %v747_v43 = vadd.f32 %v715_v29, %v647_v47  ;;  %v915_v30 = vmul.f32 %v13595_v35, %v18445_v26  ;;  %v2313_v42 = vmul.f32 %v14041_v41, %v18631_v56  ;;  %v14104_v22 = vld [vmem:[%s26209_s1 + $0x1450] sm:$0xff]  ;;  %v13690_v29 = vld [vmem:[%s26209_s1 + $0x760] sm:$0xff]  ;;  %v14137_v4 = vld [vmem:[%s26209_s1 + $0x1558] sm:$0xff] }
  0xd9   : > { %v2144_v51 = vadd.f32 %v2112_v63, %v2044_v60  ;;  %v846_v3 = vadd.f32 %v814_v48, %v746_v53  ;;  %v1014_v21 = vmul.f32 %v13626_v23, %v18462_v34  ;;  %v2412_v9 = vmul.f32 %v14072_v6, %v18693_v25  ;;  %v14105_v63 = vld [vmem:[%s26209_s1 + $0x1458] sm:$0xff]  ;;  %v13722_v47 = vld [vmem:[%s26209_s1 + $0x860] sm:$0xff]  ;;  %v14168_v60 = vld [vmem:[%s26209_s1 + $0x1650] sm:$0xff] }
  0xda   : > { %v2145_v0 = vadd.f32 %v2113_v62, %v2045_v44  ;;  %v847_v59 = vadd.f32 %v815_v33, %v747_v43  ;;  %v1015_v58 = vmul.f32 %v13627_v52, %v18462_v34  ;;  %v2413_v50 = vmul.f32 %v14073_v12, %v18693_v25  ;;  %v14136_v62 = vld [vmem:[%s26209_s1 + $0x1550] sm:$0xff]  ;;  %v13723_v53 = vld [vmem:[%s26209_s1 + $0x868] sm:$0xff]  ;;  %v14169_v44 = vld [vmem:[%s26209_s1 + $0x1658] sm:$0xff] }
  0xdb   : > { %v2244_v10 = vadd.f32 %v2212_v14, %v2144_v51  ;;  %v946_v15 = vadd.f32 %v914_v37, %v846_v3  ;;  %v1114_v55 = vmul.f32 %v13658_v2, %v18470_v39  ;;  %v2512_v35 = vmul.f32 %v14104_v22, %v18696_v27  ;;  %v13754_v43 = vld [vmem:[%s26209_s1 + $0x960] sm:$0xff]  ;;  %v14200_v51 = vld [vmem:[%s26209_s1 + $0x1750] sm:$0xff]  ;;  %v13755_v3 = vld [vmem:[%s26209_s1 + $0x968] sm:$0xff] }
  0xdc   : > { %v2245_v48 = vadd.f32 %v2213_v57, %v2145_v0  ;;  %v947_v14 = vadd.f32 %v915_v30, %v847_v59  ;;  %v1115_v41 = vmul.f32 %v13659_v19, %v18470_v39  ;;  %v2513_v23 = vmul.f32 %v14105_v63, %v18696_v27  ;;  %v14201_v0 = vld [vmem:[%s26209_s1 + $0x1758] sm:$0xff]  ;;  %v13786_v59 = vld [vmem:[%s26209_s1 + $0xa60] sm:$0xff] }
  0xdd   : > { %v2344_v33 = vadd.f32 %v2312_v28, %v2244_v10  ;;  %v1046_v57 = vadd.f32 %v1014_v21, %v946_v15  ;;  %v1214_v6 = vmul.f32 %v13690_v29, %v18488_v46  ;;  %v2612_v52 = vmul.f32 %v14136_v62, %v18738_v17  ;;  %v14232_v10 = vld [vmem:[%s26209_s1 + $0x1850] sm:$0xff]  ;;  %v13787_v15 = vld [vmem:[%s26209_s1 + $0xa68] sm:$0xff] }
  0xde   : > { %v2345_v37 = vadd.f32 %v2313_v42, %v2245_v48  ;;  %v1047_v28 = vadd.f32 %v1015_v58, %v947_v14  ;;  %v1215_v12 = vmul.f32 %v13691_v36, %v18488_v46  ;;  %v2613_v2 = vmul.f32 %v14137_v4, %v18738_v17  ;;  %v14233_v48 = vld [vmem:[%s26209_s1 + $0x1858] sm:$0xff]  ;;  %v13818_v14 = vld [vmem:[%s26209_s1 + $0xb60] sm:$0xff] }
  0xdf   : > { %v2444_v30 = vadd.f32 %v2412_v9, %v2344_v33  ;;  %v1146_v42 = vadd.f32 %v1114_v55, %v1046_v57  ;;  %v1314_v22 = vmul.f32 %v13722_v47, %v18507_v54  ;;  %v2712_v19 = vmul.f32 %v14168_v60, %v18760_v38  ;;  %v13850_v57 = vld [vmem:[%s26209_s1 + $0xc60] sm:$0xff] }
  0xe0   : > { %v2445_v21 = vadd.f32 %v2413_v50, %v2345_v37  ;;  %v1147_v9 = vadd.f32 %v1115_v41, %v1047_v28  ;;  %v1315_v63 = vmul.f32 %v13723_v53, %v18507_v54  ;;  %v2713_v29 = vmul.f32 %v14169_v44, %v18760_v38  ;;  %v13882_v28 = vld [vmem:[%s26209_s1 + $0xd60] sm:$0xff] }
  0xe1   : > { %v2544_v58 = vadd.f32 %v2512_v35, %v2444_v30  ;;  %v1246_v50 = vadd.f32 %v1214_v6, %v1146_v42  ;;  %v1414_v62 = vmul.f32 %v13754_v43, %v18523_v61  ;;  %v2812_v36 = vmul.f32 %v14200_v51, %v18792_v11  ;;  %v13914_v42 = vld [vmem:[%s26209_s1 + $0xe60] sm:$0xff] }
  0xe2   : > { %v2545_v55 = vadd.f32 %v2513_v23, %v2445_v21  ;;  %v1247_v35 = vadd.f32 %v1215_v12, %v1147_v9  ;;  %v1415_v4 = vmul.f32 %v13755_v3, %v18523_v61  ;;  %v2813_v47 = vmul.f32 %v14201_v0, %v18792_v11  ;;  %v13819_v23 = vld [vmem:[%s26209_s1 + $0xb68] sm:$0xff]  ;;  %v13946_v9 = vld [vmem:[%s26209_s1 + $0xf60] sm:$0xff] }
  0xe3   : > { %v2644_v41 = vadd.f32 %v2612_v52, %v2544_v58  ;;  %v1346_v33 = vadd.f32 %v1314_v22, %v1246_v50  ;;  %v1514_v60 = vmul.f32 %v13786_v59, %v18540_v5  ;;  %v2912_v53 = vmul.f32 %v14232_v10, %v18812_v31  ;;  %v13851_v52 = vld [vmem:[%s26209_s1 + $0xc68] sm:$0xff]  ;;  %v13978_v50 = vld [vmem:[%s26209_s1 + $0x1060] sm:$0xff] }
  0xe4   : > { %v2645_v6 = vadd.f32 %v2613_v2, %v2545_v55  ;;  %v1347_v37 = vadd.f32 %v1315_v63, %v1247_v35  ;;  %v1515_v44 = vmul.f32 %v13787_v15, %v18540_v5  ;;  %v2913_v43 = vmul.f32 %v14233_v48, %v18812_v31  ;;  %v13883_v2 = vld [vmem:[%s26209_s1 + $0xd68] sm:$0xff]  ;;  %v483_v35 = vld [vmem:[%s26209_s1 + $0x70] sm:$0xff] }
  0xe5   : > { %v2744_v12 = vadd.f32 %v2712_v19, %v2644_v41  ;;  %v1446_v30 = vadd.f32 %v1414_v62, %v1346_v33  ;;  %v1614_v51 = vmul.f32 %v13818_v14, %v18546_v7  ;;  %v1615_v21 = vmul.f32 %v13819_v23, %v18546_v7  ;;  %v13915_v19 = vld [vmem:[%s26209_s1 + $0xe68] sm:$0xff] }
  0xe6   : > { %v2745_v22 = vadd.f32 %v2713_v29, %v2645_v6  ;;  %v1447_v3 = vadd.f32 %v1415_v4, %v1347_v37  ;;  %v1714_v0 = vmul.f32 %v13850_v57, %v18562_v18  ;;  %v1715_v58 = vmul.f32 %v13851_v52, %v18562_v18  ;;  %v13947_v29 = vld [vmem:[%s26209_s1 + $0xf68] sm:$0xff]  ;;  %v13532_v52 = vld [vmem:[%s26209_s1 + $0x270] sm:$0xff] }
  0xe7   : > { %v2844_v63 = vadd.f32 %v2812_v36, %v2744_v12  ;;  %v1546_v59 = vadd.f32 %v1514_v60, %v1446_v30  ;;  %v1814_v10 = vmul.f32 %v13882_v28, %v18568_v20  ;;  %v1815_v55 = vmul.f32 %v13883_v2, %v18568_v20  ;;  %v13979_v36 = vld [vmem:[%s26209_s1 + $0x1068] sm:$0xff]  ;;  %v13500_v60 = vld [vmem:[%s26209_s1 + $0x170] sm:$0xff]  ;;  %v450_v30 = vld [vmem:[%s26210_s2 + $0x78] sm:$0xff] }
  0xe8   : > { %v2845_v62 = vadd.f32 %v2813_v47, %v2745_v22  ;;  %v1547_v15 = vadd.f32 %v1515_v44, %v1447_v3  ;;  %v1914_v48 = vmul.f32 %v13914_v42, %v18588_v32  ;;  %v1915_v41 = vmul.f32 %v13915_v19, %v18588_v32  ;;  %v484_v47 = vld [vmem:[%s26209_s1 + $0x78] sm:$0xff]  ;;  %v14010_v3 = vld [vmem:[%s26209_s1 + $0x1160] sm:$0xff]  ;;  %v13564_v19 = vld [vmem:[%s26209_s1 + $0x370] sm:$0xff] }
  0xe9   : > { %v2944_v4 = vadd.f32 %v2912_v53, %v2844_v63  ;;  %v1646_v14 = vadd.f32 %v1614_v51, %v1546_v59  ;;  %v2014_v33 = vmul.f32 %v13946_v9, %v18600_v40  ;;  %v2015_v6 = vmul.f32 %v13947_v29, %v18600_v40  ;;  %v449_v53 = vld [vmem:[%s26210_s2 + $0x70] sm:$0xff]  ;;  %v13501_v44 = vld [vmem:[%s26209_s1 + $0x178] sm:$0xff]  ;;  %v14011_v63 = vld [vmem:[%s26209_s1 + $0x1168] sm:$0xff] }
  0xea   : > { %v2945_v23 = vadd.f32 %v2913_v43, %v2845_v62  ;;  %v1647_v57 = vadd.f32 %v1615_v21, %v1547_v15  ;;  %v2114_v37 = vmul.f32 %v13978_v50, %v18610_v45  ;;  %v2115_v43 = vmul.f32 %v13979_v36, %v18610_v45  ;;  %v13533_v2 = vld [vmem:[%s26209_s1 + $0x278] sm:$0xff]  ;;  %v14042_v36 = vld [vmem:[%s26209_s1 + $0x1260] sm:$0xff] }
  0xeb   : > { %v2976_v28 = vmax.f32 %v2944_v4, 0.0  ;;  %v1746_v12 = vadd.f32 %v1714_v0, %v1646_v14  ;;  %v516_v51 = vmul.f32 %v18402_v8, %v483_v35  ;;  %v517_v21 = vmul.f32 %v18402_v8, %v484_v47  ;;  %v13565_v50 = vld [vmem:[%s26209_s1 + $0x378] sm:$0xff]  ;;  %v13596_v4 = vld [vmem:[%s26209_s1 + $0x470] sm:$0xff] }
  0xec   : > { %v2977_v42 = vmax.f32 %v2945_v23, 0.0  ;;  %v1747_v22 = vadd.f32 %v1715_v58, %v1647_v57  ;;  %v616_v0 = vmul.f32 %v13500_v60, %v18415_v13  ;;  %v617_v58 = vmul.f32 %v13501_v44, %v18415_v13  ;;  %v14043_v60 = vld [vmem:[%s26209_s1 + $0x1268] sm:$0xff]  ;;  %v13597_v57 = vld [vmem:[%s26209_s1 + $0x478] sm:$0xff] }
  0xed   : > { %v1846_v9 = vadd.f32 %v1814_v10, %v1746_v12  ;;  %v548_v59 = vadd.f32 %v516_v51, %v449_v53  ;;  %v716_v29 = vmul.f32 %v13532_v52, %v18422_v16  ;;  %v549_v10 = vadd.f32 %v517_v21, %v450_v30  ;;  %v13628_v12 = vld [vmem:[%s26209_s1 + $0x570] sm:$0xff] }
  0xee   : > { %v16808_v62 = vpack.c.bf16 %v2977_v42, %v2976_v28  ;;  %v1847_v15 = vadd.f32 %v1815_v55, %v1747_v22  ;;  %v717_v35 = vmul.f32 %v13533_v2, %v18422_v16  ;;  %v2214_v47 = vmul.f32 %v14010_v3, %v18619_v49  ;;  %v13629_v22 = vld [vmem:[%s26209_s1 + $0x578] sm:$0xff] }
  0xef   : > { %v1946_v14 = vadd.f32 %v1914_v48, %v1846_v9  ;;  %v648_v23 = vadd.f32 %v616_v0, %v548_v59  ;;  %v816_v55 = vmul.f32 %v13564_v19, %v18439_v24  ;;  %v2215_v44 = vmul.f32 %v14011_v63, %v18619_v49  ;;  %v14074_v48 = vld [vmem:[%s26209_s1 + $0x1360] sm:$0xff]  ;;  %v13660_v9 = vld [vmem:[%s26209_s1 + $0x670] sm:$0xff] }
  0xf0   : > { %16809 = vmatpush1.bf16.msra.mxu0 %v16808_v62  ;;  %v1947_v53 = vadd.f32 %v1915_v41, %v1847_v15  ;;  %v649_v52 = vadd.f32 %v617_v58, %v549_v10  ;;  %v817_v28 = vmul.f32 %v13565_v50, %v18439_v24  ;;  %v2314_v51 = vmul.f32 %v14042_v36, %v18631_v56  ;;  %v14075_v41 = vld [vmem:[%s26209_s1 + $0x1368] sm:$0xff]  ;;  %v13661_v50 = vld [vmem:[%s26209_s1 + $0x678] sm:$0xff] }
  0xf1   : > { %16810 = vmatprep.subr.bf16.mxu0 %v26245_v1  ;;  %v2046_v30 = vadd.f32 %v2014_v33, %v1946_v14  ;;  %v748_v2 = vadd.f32 %v716_v29, %v648_v23  ;;  %v916_v42 = vmul.f32 %v13596_v4, %v18445_v26  ;;  %v2315_v21 = vmul.f32 %v14043_v60, %v18631_v56  ;;  %v14106_v33 = vld [vmem:[%s26209_s1 + $0x1460] sm:$0xff] }
  0xf2   : > { %v2047_v3 = vadd.f32 %v2015_v6, %v1947_v53  ;;  %v749_v0 = vadd.f32 %v717_v35, %v649_v52  ;;  %v917_v19 = vmul.f32 %v13597_v57, %v18445_v26  ;;  %v2414_v59 = vmul.f32 %v14074_v48, %v18693_v25  ;;  %v14107_v6 = vld [vmem:[%s26209_s1 + $0x1468] sm:$0xff]  ;;  %v13692_v35 = vld [vmem:[%s26209_s1 + $0x770] sm:$0xff] }
  0xf3   : > { %v2146_v63 = vadd.f32 %v2114_v37, %v2046_v30  ;;  %v848_v58 = vadd.f32 %v816_v55, %v748_v2  ;;  %v1016_v29 = vmul.f32 %v13628_v12, %v18462_v34  ;;  %v2415_v15 = vmul.f32 %v14075_v41, %v18693_v25  ;;  %v14138_v37 = vld [vmem:[%s26209_s1 + $0x1560] sm:$0xff]  ;;  %v13693_v55 = vld [vmem:[%s26209_s1 + $0x778] sm:$0xff] }
  0xf4   : > { %v2147_v62 = vadd.f32 %v2115_v43, %v2047_v3  ;;  %v849_v36 = vadd.f32 %v817_v28, %v749_v0  ;;  %v1017_v10 = vmul.f32 %v13629_v22, %v18462_v34  ;;  %v2514_v14 = vmul.f32 %v14106_v33, %v18696_v27  ;;  %v14139_v43 = vld [vmem:[%s26209_s1 + $0x1568] sm:$0xff]  ;;  %v13724_v28 = vld [vmem:[%s26209_s1 + $0x870] sm:$0xff] }
  0xf5   : > { %v2246_v4 = vadd.f32 %v2214_v47, %v2146_v63  ;;  %v948_v60 = vadd.f32 %v916_v42, %v848_v58  ;;  %v1116_v23 = vmul.f32 %v13660_v9, %v18470_v39  ;;  %v2515_v53 = vmul.f32 %v14107_v6, %v18696_v27  ;;  %v14170_v47 = vld [vmem:[%s26209_s1 + $0x1660] sm:$0xff]  ;;  %v13725_v42 = vld [vmem:[%s26209_s1 + $0x878] sm:$0xff] }
  0xf6   : > { %v2247_v57 = vadd.f32 %v2215_v44, %v2147_v62  ;;  %v949_v48 = vadd.f32 %v917_v19, %v849_v36  ;;  %v1117_v52 = vmul.f32 %v13661_v50, %v18470_v39  ;;  %v2614_v30 = vmul.f32 %v14138_v37, %v18738_v17  ;;  %v14171_v44 = vld [vmem:[%s26209_s1 + $0x1668] sm:$0xff]  ;;  %v13756_v19 = vld [vmem:[%s26209_s1 + $0x970] sm:$0xff] }
  0xf7   : > { %v2346_v12 = vadd.f32 %v2314_v51, %v2246_v4  ;;  %v1048_v41 = vadd.f32 %v1016_v29, %v948_v60  ;;  %v1216_v2 = vmul.f32 %v13692_v35, %v18488_v46  ;;  %v2615_v3 = vmul.f32 %v14139_v43, %v18738_v17  ;;  %v14202_v51 = vld [vmem:[%s26209_s1 + $0x1760] sm:$0xff]  ;;  %v13757_v29 = vld [vmem:[%s26209_s1 + $0x978] sm:$0xff] }
  0xf8   : > { %v2347_v22 = vadd.f32 %v2315_v21, %v2247_v57  ;;  %v1049_v33 = vadd.f32 %v1017_v10, %v949_v48  ;;  %v1217_v0 = vmul.f32 %v13693_v55, %v18488_v46  ;;  %v2714_v63 = vmul.f32 %v14170_v47, %v18760_v38  ;;  %v14203_v21 = vld [vmem:[%s26209_s1 + $0x1768] sm:$0xff]  ;;  %v13788_v10 = vld [vmem:[%s26209_s1 + $0xa70] sm:$0xff] }
  0xf9   : > { %v2446_v9 = vadd.f32 %v2414_v59, %v2346_v12  ;;  %v1148_v6 = vadd.f32 %v1116_v23, %v1048_v41  ;;  %v1316_v58 = vmul.f32 %v13724_v28, %v18507_v54  ;;  %v2715_v62 = vmul.f32 %v14171_v44, %v18760_v38  ;;  %v14234_v59 = vld [vmem:[%s26209_s1 + $0x1860] sm:$0xff]  ;;  %v13789_v23 = vld [vmem:[%s26209_s1 + $0xa78] sm:$0xff] }
  0xfa   : > { %v2447_v50 = vadd.f32 %v2415_v15, %v2347_v22  ;;  %v1149_v37 = vadd.f32 %v1117_v52, %v1049_v33  ;;  %v1317_v36 = vmul.f32 %v13725_v42, %v18507_v54  ;;  %v2814_v4 = vmul.f32 %v14202_v51, %v18792_v11  ;;  %v14235_v15 = vld [vmem:[%s26209_s1 + $0x1868] sm:$0xff]  ;;  %v13821_v52 = vld [vmem:[%s26209_s1 + $0xb78] sm:$0xff] }
  0xfb   : > { %v2546_v35 = vadd.f32 %v2514_v14, %v2446_v9  ;;  %v1248_v43 = vadd.f32 %v1216_v2, %v1148_v6  ;;  %v1416_v60 = vmul.f32 %v13756_v19, %v18523_v61  ;;  %v2815_v57 = vmul.f32 %v14203_v21, %v18792_v11  ;;  %v13820_v14 = vld [vmem:[%s26209_s1 + $0xb70] sm:$0xff]  ;;  %v13853_v2 = vld [vmem:[%s26209_s1 + $0xc78] sm:$0xff] }
  0xfc   : > { %v2547_v55 = vadd.f32 %v2515_v53, %v2447_v50  ;;  %v1249_v47 = vadd.f32 %v1217_v0, %v1149_v37  ;;  %v1417_v48 = vmul.f32 %v13757_v29, %v18523_v61  ;;  %v2914_v12 = vmul.f32 %v14234_v59, %v18812_v31  ;;  %v13852_v53 = vld [vmem:[%s26209_s1 + $0xc70] sm:$0xff]  ;;  %v13885_v0 = vld [vmem:[%s26209_s1 + $0xd78] sm:$0xff] }
  0xfd   : > { %v2646_v28 = vadd.f32 %v2614_v30, %v2546_v35  ;;  %v1348_v44 = vadd.f32 %v1316_v58, %v1248_v43  ;;  %v1516_v41 = vmul.f32 %v13788_v10, %v18540_v5  ;;  %v2915_v22 = vmul.f32 %v14235_v15, %v18812_v31  ;;  %v13884_v30 = vld [vmem:[%s26209_s1 + $0xd70] sm:$0xff]  ;;  %v13917_v58 = vld [vmem:[%s26209_s1 + $0xe78] sm:$0xff] }
  0xfe   : > { %v2647_v42 = vadd.f32 %v2615_v3, %v2547_v55  ;;  %v1349_v51 = vadd.f32 %v1317_v36, %v1249_v47  ;;  %v1517_v33 = vmul.f32 %v13789_v23, %v18540_v5  ;;  %v1616_v21 = vmul.f32 %v13820_v14, %v18546_v7  ;;  %v13916_v3 = vld [vmem:[%s26209_s1 + $0xe70] sm:$0xff]  ;;  %v13949_v36 = vld [vmem:[%s26209_s1 + $0xf78] sm:$0xff]  ;;  %v486_v14 = vld [vmem:[%s26209_s1 + $0x88] sm:$0xff] }
  0xff   : > { %v2746_v19 = vadd.f32 %v2714_v63, %v2646_v28  ;;  %v1448_v9 = vadd.f32 %v1416_v60, %v1348_v44  ;;  %v1617_v6 = vmul.f32 %v13821_v52, %v18546_v7  ;;  %v1716_v59 = vmul.f32 %v13852_v53, %v18562_v18  ;;  %v13948_v63 = vld [vmem:[%s26209_s1 + $0xf70] sm:$0xff]  ;;  %v13981_v60 = vld [vmem:[%s26209_s1 + $0x1078] sm:$0xff]  ;;  %v13503_v53 = vld [vmem:[%s26209_s1 + $0x188] sm:$0xff] }
 0x100   : > { %v2747_v29 = vadd.f32 %v2715_v62, %v2647_v42  ;;  %v1449_v50 = vadd.f32 %v1417_v48, %v1349_v51  ;;  %v1717_v37 = vmul.f32 %v13853_v2, %v18562_v18  ;;  %v1816_v15 = vmul.f32 %v13884_v30, %v18568_v20  ;;  %v13980_v62 = vld [vmem:[%s26209_s1 + $0x1070] sm:$0xff]  ;;  %v452_v30 = vld [vmem:[%s26210_s2 + $0x88] sm:$0xff] }
 0x101   : > { %v2846_v10 = vadd.f32 %v2814_v4, %v2746_v19  ;;  %v1548_v35 = vadd.f32 %v1516_v41, %v1448_v9  ;;  %v1817_v43 = vmul.f32 %v13885_v0, %v18568_v20  ;;  %v1916_v47 = vmul.f32 %v13916_v3, %v18588_v32  ;;  %v485_v4 = vld [vmem:[%s26209_s1 + $0x80] sm:$0xff] }
 0x102   : > { %v2847_v23 = vadd.f32 %v2815_v57, %v2747_v29  ;;  %v1549_v55 = vadd.f32 %v1517_v33, %v1449_v50  ;;  %v1917_v48 = vmul.f32 %v13917_v58, %v18588_v32  ;;  %v2016_v44 = vmul.f32 %v13948_v63, %v18600_v40  ;;  %v13502_v57 = vld [vmem:[%s26209_s1 + $0x180] sm:$0xff] }
 0x103   : > { %v2946_v52 = vadd.f32 %v2914_v12, %v2846_v10  ;;  %v1648_v28 = vadd.f32 %v1616_v21, %v1548_v35  ;;  %v2017_v41 = vmul.f32 %v13949_v36, %v18600_v40  ;;  %v2116_v51 = vmul.f32 %v13980_v62, %v18610_v45  ;;  %v451_v12 = vld [vmem:[%s26210_s2 + $0x80] sm:$0xff]  ;;  %v14012_v10 = vld [vmem:[%s26209_s1 + $0x1170] sm:$0xff]  ;;  %v14013_v35 = vld [vmem:[%s26209_s1 + $0x1178] sm:$0xff] }
 0x104   : > { %v2947_v2 = vadd.f32 %v2915_v22, %v2847_v23  ;;  %v1649_v42 = vadd.f32 %v1617_v6, %v1549_v55  ;;  %v2117_v33 = vmul.f32 %v13981_v60, %v18610_v45  ;;  %v13534_v0 = vld [vmem:[%s26209_s1 + $0x280] sm:$0xff]  ;;  %v518_v22 = vmul.f32 %v18402_v8, %v485_v4  ;;  %v13535_v6 = vld [vmem:[%s26209_s1 + $0x288] sm:$0xff] }
 0x105   : > { %v2978_v19 = vmax.f32 %v2946_v52, 0.0  ;;  %v1748_v9 = vadd.f32 %v1716_v59, %v1648_v28  ;;  %v519_v21 = vmul.f32 %v18402_v8, %v486_v14  ;;  %v13566_v3 = vld [vmem:[%s26209_s1 + $0x380] sm:$0xff]  ;;  %v618_v50 = vmul.f32 %v13502_v57, %v18415_v13  ;;  %v13567_v59 = vld [vmem:[%s26209_s1 + $0x388] sm:$0xff]  ;;  %v14044_v57 = vld [vmem:[%s26209_s1 + $0x1270] sm:$0xff] }
 0x106   : > { %v2979_v58 = vmax.f32 %v2947_v2, 0.0  ;;  %v1749_v29 = vadd.f32 %v1717_v37, %v1649_v42  ;;  %v619_v63 = vmul.f32 %v13503_v53, %v18415_v13  ;;  %v550_v62 = vadd.f32 %v518_v22, %v451_v12  ;;  %v13598_v23 = vld [vmem:[%s26209_s1 + $0x480] sm:$0xff]  ;;  %v13599_v52 = vld [vmem:[%s26209_s1 + $0x488] sm:$0xff]  ;;  %v14045_v53 = vld [vmem:[%s26209_s1 + $0x1278] sm:$0xff] }
 0x107   : > { %v1848_v36 = vadd.f32 %v1816_v15, %v1748_v9  ;;  %v551_v60 = vadd.f32 %v519_v21, %v452_v30  ;;  %v718_v37 = vmul.f32 %v13534_v0, %v18422_v16  ;;  %v719_v15 = vmul.f32 %v13535_v6, %v18422_v16  ;;  %v13630_v12 = vld [vmem:[%s26209_s1 + $0x580] sm:$0xff]  ;;  %v13631_v9 = vld [vmem:[%s26209_s1 + $0x588] sm:$0xff]  ;;  %v14076_v21 = vld [vmem:[%s26209_s1 + $0x1370] sm:$0xff] }
 0x108   : > { %v16811_v55 = vpack.c.bf16 %v2979_v58, %v2978_v19  ;;  %v1849_v4 = vadd.f32 %v1817_v43, %v1749_v29  ;;  %v818_v14 = vmul.f32 %v13566_v3, %v18439_v24  ;;  %v650_v2 = vadd.f32 %v618_v50, %v550_v62  ;;  %v13662_v29 = vld [vmem:[%s26209_s1 + $0x680] sm:$0xff]  ;;  %v14109_v62 = vld [vmem:[%s26209_s1 + $0x1478] sm:$0xff] }
 0x109   : > { %v1948_v28 = vadd.f32 %v1916_v47, %v1848_v36  ;;  %v651_v42 = vadd.f32 %v619_v63, %v551_v60  ;;  %v819_v43 = vmul.f32 %v13567_v59, %v18439_v24  ;;  %v2216_v47 = vmul.f32 %v14012_v10, %v18619_v49  ;;  %v13663_v36 = vld [vmem:[%s26209_s1 + $0x688] sm:$0xff] }
 0x10a   : > { %16812 = vmatpush1.bf16.msra.mxu0 %v16811_v55  ;;  %v1949_v30 = vadd.f32 %v1917_v48, %v1849_v4  ;;  %v2217_v0 = vmul.f32 %v14013_v35, %v18619_v49  ;;  %v918_v19 = vmul.f32 %v13598_v23, %v18445_v26  ;;  %v14077_v48 = vld [vmem:[%s26209_s1 + $0x1378] sm:$0xff]  ;;  %v750_v6 = vadd.f32 %v718_v37, %v650_v2  ;;  %v14108_v35 = vld [vmem:[%s26209_s1 + $0x1470] sm:$0xff]  ;;  %v13694_v23 = vld [vmem:[%s26209_s1 + $0x780] sm:$0xff] }
 0x10b   : > { %16813 = vmatprep.subr.bf16.mxu0 %v26245_v1  ;;  %v2048_v22 = vadd.f32 %v2016_v44, %v1948_v28  ;;  %v751_v3 = vadd.f32 %v719_v15, %v651_v42  ;;  %v919_v58 = vmul.f32 %v13599_v52, %v18445_v26  ;;  %v2316_v63 = vmul.f32 %v14044_v57, %v18631_v56  ;;  %v13695_v52 = vld [vmem:[%s26209_s1 + $0x788] sm:$0xff]  ;;  %v14141_v57 = vld [vmem:[%s26209_s1 + $0x1578] sm:$0xff]  ;;  %v13726_v42 = vld [vmem:[%s26209_s1 + $0x880] sm:$0xff] }
 0x10c   : > { %v2049_v50 = vadd.f32 %v2017_v41, %v1949_v30  ;;  %v2317_v44 = vmul.f32 %v14045_v53, %v18631_v56  ;;  %v1018_v59 = vmul.f32 %v13630_v12, %v18462_v34  ;;  %v850_v41 = vadd.f32 %v818_v14, %v750_v6  ;;  %v14140_v14 = vld [vmem:[%s26209_s1 + $0x1570] sm:$0xff] }
 0x10d   : > { %v2148_v10 = vadd.f32 %v2116_v51, %v2048_v22  ;;  %v851_v60 = vadd.f32 %v819_v43, %v751_v3  ;;  %v1019_v37 = vmul.f32 %v13631_v9, %v18462_v34  ;;  %v2416_v4 = vmul.f32 %v14076_v21, %v18693_v25  ;;  %v13727_v9 = vld [vmem:[%s26209_s1 + $0x888] sm:$0xff]  ;;  %v14173_v21 = vld [vmem:[%s26209_s1 + $0x1678] sm:$0xff]  ;;  %v13758_v3 = vld [vmem:[%s26209_s1 + $0x980] sm:$0xff] }
 0x10e   : > { %v2149_v55 = vadd.f32 %v2117_v33, %v2049_v50  ;;  %v2417_v51 = vmul.f32 %v14077_v48, %v18693_v25  ;;  %v1118_v15 = vmul.f32 %v13662_v29, %v18470_v39  ;;  %v950_v33 = vadd.f32 %v918_v19, %v850_v41  ;;  %v14172_v19 = vld [vmem:[%s26209_s1 + $0x1670] sm:$0xff] }
 0x10f   : > { %v2248_v28 = vadd.f32 %v2216_v47, %v2148_v10  ;;  %v951_v53 = vadd.f32 %v919_v58, %v851_v60  ;;  %v1119_v2 = vmul.f32 %v13663_v36, %v18470_v39  ;;  %v2516_v12 = vmul.f32 %v14108_v35, %v18696_v27  ;;  %v13759_v36 = vld [vmem:[%s26209_s1 + $0x988] sm:$0xff]  ;;  %v14205_v35 = vld [vmem:[%s26209_s1 + $0x1778] sm:$0xff]  ;;  %v13790_v60 = vld [vmem:[%s26209_s1 + $0xa80] sm:$0xff] }
 0x110   : > { %v2249_v43 = vadd.f32 %v2217_v0, %v2149_v55  ;;  %v2517_v30 = vmul.f32 %v14109_v62, %v18696_v27  ;;  %v1218_v47 = vmul.f32 %v13694_v23, %v18488_v46  ;;  %v1050_v0 = vadd.f32 %v1018_v59, %v950_v33  ;;  %v14204_v59 = vld [vmem:[%s26209_s1 + $0x1770] sm:$0xff] }
 0x111   : > { %v2348_v22 = vadd.f32 %v2316_v63, %v2248_v28  ;;  %v1051_v48 = vadd.f32 %v1019_v37, %v951_v53  ;;  %v1219_v6 = vmul.f32 %v13695_v52, %v18488_v46  ;;  %v2616_v29 = vmul.f32 %v14140_v14, %v18738_v17  ;;  %v13791_v52 = vld [vmem:[%s26209_s1 + $0xa88] sm:$0xff]  ;;  %v14237_v14 = vld [vmem:[%s26209_s1 + $0x1878] sm:$0xff]  ;;  %v13822_v53 = vld [vmem:[%s26209_s1 + $0xb80] sm:$0xff] }
 0x112   : > { %v2349_v58 = vadd.f32 %v2317_v44, %v2249_v43  ;;  %v2617_v50 = vmul.f32 %v14141_v57, %v18738_v17  ;;  %v1318_v63 = vmul.f32 %v13726_v42, %v18507_v54  ;;  %v1150_v44 = vadd.f32 %v1118_v15, %v1050_v0  ;;  %v14236_v15 = vld [vmem:[%s26209_s1 + $0x1870] sm:$0xff]  ;;  %v13854_v0 = vld [vmem:[%s26209_s1 + $0xc80] sm:$0xff] }
 0x113   : > { %v2448_v10 = vadd.f32 %v2416_v4, %v2348_v22  ;;  %v1151_v62 = vadd.f32 %v1119_v2, %v1051_v48  ;;  %v1319_v41 = vmul.f32 %v13727_v9, %v18507_v54  ;;  %v2716_v23 = vmul.f32 %v14172_v19, %v18760_v38  ;;  %v13823_v9 = vld [vmem:[%s26209_s1 + $0xb88] sm:$0xff]  ;;  %v13886_v48 = vld [vmem:[%s26209_s1 + $0xd80] sm:$0xff] }
 0x114   : > { %v2449_v37 = vadd.f32 %v2417_v51, %v2349_v58  ;;  %v2717_v55 = vmul.f32 %v14173_v21, %v18760_v38  ;;  %v1418_v4 = vmul.f32 %v13758_v3, %v18523_v61  ;;  %v1250_v51 = vadd.f32 %v1218_v47, %v1150_v44  ;;  %v13918_v44 = vld [vmem:[%s26209_s1 + $0xe80] sm:$0xff] }
 0x115   : > { %v2548_v28 = vadd.f32 %v2516_v12, %v2448_v10  ;;  %v1251_v57 = vadd.f32 %v1219_v6, %v1151_v62  ;;  %v1419_v33 = vmul.f32 %v13759_v36, %v18523_v61  ;;  %v2816_v42 = vmul.f32 %v14204_v59, %v18792_v11  ;;  %v13950_v62 = vld [vmem:[%s26209_s1 + $0xf80] sm:$0xff] }
 0x116   : > { %v2549_v2 = vadd.f32 %v2517_v30, %v2449_v37  ;;  %v2817_v43 = vmul.f32 %v14205_v35, %v18792_v11  ;;  %v1518_v12 = vmul.f32 %v13790_v60, %v18540_v5  ;;  %v1350_v47 = vadd.f32 %v1318_v63, %v1250_v51  ;;  %v13855_v30 = vld [vmem:[%s26209_s1 + $0xc88] sm:$0xff]  ;;  %v13982_v51 = vld [vmem:[%s26209_s1 + $0x1080] sm:$0xff] }
 0x117   : > { %v2648_v22 = vadd.f32 %v2616_v29, %v2548_v28  ;;  %v1351_v19 = vadd.f32 %v1319_v41, %v1251_v57  ;;  %v1519_v21 = vmul.f32 %v13791_v52, %v18540_v5  ;;  %v2916_v3 = vmul.f32 %v14236_v15, %v18812_v31  ;;  %v13887_v63 = vld [vmem:[%s26209_s1 + $0xd88] sm:$0xff]  ;;  %v487_v57 = vld [vmem:[%s26209_s1 + $0x90] sm:$0xff] }
 0x118   : > { %v2649_v6 = vadd.f32 %v2617_v50, %v2549_v2  ;;  %v2917_v58 = vmul.f32 %v14237_v14, %v18812_v31  ;;  %v1618_v29 = vmul.f32 %v13822_v53, %v18546_v7  ;;  %v1450_v10 = vadd.f32 %v1418_v4, %v1350_v47  ;;  %v13919_v50 = vld [vmem:[%s26209_s1 + $0xe88] sm:$0xff] }
 0x119   : > { %v2748_v36 = vadd.f32 %v2716_v23, %v2648_v22  ;;  %v1451_v59 = vadd.f32 %v1419_v33, %v1351_v19  ;;  %v1619_v35 = vmul.f32 %v13823_v9, %v18546_v7  ;;  %v1718_v60 = vmul.f32 %v13854_v0, %v18562_v18  ;;  %v13951_v4 = vld [vmem:[%s26209_s1 + $0xf88] sm:$0xff]  ;;  %v13505_v0 = vld [vmem:[%s26209_s1 + $0x198] sm:$0xff] }
 0x11a   : > { %v2749_v41 = vadd.f32 %v2717_v55, %v2649_v6  ;;  %v1719_v37 = vmul.f32 %v13855_v30, %v18562_v18  ;;  %v1818_v23 = vmul.f32 %v13886_v48, %v18568_v20  ;;  %v1550_v28 = vadd.f32 %v1518_v12, %v1450_v10  ;;  %v13983_v55 = vld [vmem:[%s26209_s1 + $0x1088] sm:$0xff]  ;;  %v488_v12 = vld [vmem:[%s26209_s1 + $0x98] sm:$0xff] }
 0x11b   : > { %v2848_v52 = vadd.f32 %v2816_v42, %v2748_v36  ;;  %v1551_v15 = vadd.f32 %v1519_v21, %v1451_v59  ;;  %v1819_v14 = vmul.f32 %v13887_v63, %v18568_v20  ;;  %v1918_v53 = vmul.f32 %v13918_v44, %v18588_v32  ;;  %v453_v21 = vld [vmem:[%s26210_s2 + $0x90] sm:$0xff] }
 0x11c   : > { %v2849_v33 = vadd.f32 %v2817_v43, %v2749_v41  ;;  %v1919_v2 = vmul.f32 %v13919_v50, %v18588_v32  ;;  %v2018_v42 = vmul.f32 %v13950_v62, %v18600_v40  ;;  %v1650_v22 = vadd.f32 %v1618_v29, %v1550_v28  ;;  %v13504_v43 = vld [vmem:[%s26209_s1 + $0x190] sm:$0xff]  ;;  %v14014_v28 = vld [vmem:[%s26209_s1 + $0x1180] sm:$0xff] }
 0x11d   : > { %v2948_v9 = vadd.f32 %v2916_v3, %v2848_v52  ;;  %v1651_v47 = vadd.f32 %v1619_v35, %v1551_v15  ;;  %v2019_v19 = vmul.f32 %v13951_v4, %v18600_v40  ;;  %v2118_v48 = vmul.f32 %v13982_v51, %v18610_v45  ;;  %v454_v3 = vld [vmem:[%s26210_s2 + $0x98] sm:$0xff]  ;;  %v13536_v63 = vld [vmem:[%s26209_s1 + $0x290] sm:$0xff]  ;;  %v14015_v15 = vld [vmem:[%s26209_s1 + $0x1188] sm:$0xff] }
 0x11e   : > { %v2949_v30 = vadd.f32 %v2917_v58, %v2849_v33  ;;  %v2119_v6 = vmul.f32 %v13983_v55, %v18610_v45  ;;  %v520_v29 = vmul.f32 %v18402_v8, %v487_v57  ;;  %v1750_v10 = vadd.f32 %v1718_v60, %v1650_v22  ;;  %v13537_v58 = vld [vmem:[%s26209_s1 + $0x298] sm:$0xff]  ;;  %v13568_v44 = vld [vmem:[%s26209_s1 + $0x390] sm:$0xff] }
 0x11f   : > { %v2980_v36 = vmax.f32 %v2948_v9, 0.0  ;;  %v1751_v59 = vadd.f32 %v1719_v37, %v1651_v47  ;;  %v521_v35 = vmul.f32 %v18402_v8, %v488_v12  ;;  %v620_v41 = vmul.f32 %v13504_v43, %v18415_v13  ;;  %v13569_v60 = vld [vmem:[%s26209_s1 + $0x398] sm:$0xff]  ;;  %v13600_v57 = vld [vmem:[%s26209_s1 + $0x490] sm:$0xff]  ;;  %v14047_v43 = vld [vmem:[%s26209_s1 + $0x1288] sm:$0xff] }
 0x120   : > { %v2981_v50 = vmax.f32 %v2949_v30, 0.0  ;;  %v552_v62 = vadd.f32 %v520_v29, %v453_v21  ;;  %v621_v4 = vmul.f32 %v13505_v0, %v18415_v13  ;;  %v1850_v37 = vadd.f32 %v1818_v23, %v1750_v10  ;;  %v13601_v9 = vld [vmem:[%s26209_s1 + $0x498] sm:$0xff]  ;;  %v14046_v21 = vld [vmem:[%s26209_s1 + $0x1280] sm:$0xff] }
 0x121   : > { %v1851_v52 = vadd.f32 %v1819_v14, %v1751_v59  ;;  %v553_v51 = vadd.f32 %v521_v35, %v454_v3  ;;  %v720_v55 = vmul.f32 %v13536_v63, %v18422_v16  ;;  %v721_v23 = vmul.f32 %v13537_v58, %v18422_v16  ;;  %v13632_v3 = vld [vmem:[%s26209_s1 + $0x590] sm:$0xff]  ;;  %v14078_v35 = vld [vmem:[%s26209_s1 + $0x1380] sm:$0xff]  ;;  %v14079_v58 = vld [vmem:[%s26209_s1 + $0x1388] sm:$0xff] }
 0x122   : > { %v16814_v33 = vpack.c.bf16 %v2981_v50, %v2980_v36  ;;  %v652_v12 = vadd.f32 %v620_v41, %v552_v62  ;;  %v820_v14 = vmul.f32 %v13568_v44, %v18439_v24  ;;  %v1950_v22 = vadd.f32 %v1918_v53, %v1850_v37  ;;  %v13633_v36 = vld [vmem:[%s26209_s1 + $0x598] sm:$0xff]  ;;  %v13664_v62 = vld [vmem:[%s26209_s1 + $0x690] sm:$0xff] }
 0x123   : > { %v1951_v47 = vadd.f32 %v1919_v2, %v1851_v52  ;;  %v653_v0 = vadd.f32 %v621_v4, %v553_v51  ;;  %v821_v30 = vmul.f32 %v13569_v60, %v18439_v24  ;;  %v2218_v29 = vmul.f32 %v14014_v28, %v18619_v49  ;;  %v13665_v60 = vld [vmem:[%s26209_s1 + $0x698] sm:$0xff]  ;;  %v14110_v28 = vld [vmem:[%s26209_s1 + $0x1480] sm:$0xff] }
 0x124   : > { %16815 = vmatpush1.bf16.msra.mxu0 %v16814_v33  ;;  %v2219_v53 = vmul.f32 %v14015_v15, %v18619_v49  ;;  %v752_v2 = vadd.f32 %v720_v55, %v652_v12  ;;  %v920_v63 = vmul.f32 %v13600_v57, %v18445_v26  ;;  %v2050_v10 = vadd.f32 %v2018_v42, %v1950_v22  ;;  %v14111_v15 = vld [vmem:[%s26209_s1 + $0x1488] sm:$0xff]  ;;  %v13696_v57 = vld [vmem:[%s26209_s1 + $0x790] sm:$0xff]  ;;  %v14142_v22 = vld [vmem:[%s26209_s1 + $0x1580] sm:$0xff] }
 0x125   : > { %16816 = vmatprep.subr.bf16.mxu0 %v26245_v1  ;;  %v2051_v59 = vadd.f32 %v2019_v19, %v1951_v47  ;;  %v753_v44 = vadd.f32 %v721_v23, %v653_v0  ;;  %v921_v50 = vmul.f32 %v13601_v9, %v18445_v26  ;;  %v2318_v41 = vmul.f32 %v14046_v21, %v18631_v56  ;;  %v13697_v23 = vld [vmem:[%s26209_s1 + $0x798] sm:$0xff]  ;;  %v14143_v47 = vld [vmem:[%s26209_s1 + $0x1588] sm:$0xff]  ;;  %v13728_v0 = vld [vmem:[%s26209_s1 + $0x890] sm:$0xff] }
 0x126   : > { %v2319_v42 = vmul.f32 %v14047_v43, %v18631_v56  ;;  %v852_v19 = vadd.f32 %v820_v14, %v752_v2  ;;  %v1020_v4 = vmul.f32 %v13632_v3, %v18462_v34  ;;  %v2150_v37 = vadd.f32 %v2118_v48, %v2050_v10  ;;  %v13729_v2 = vld [vmem:[%s26209_s1 + $0x898] sm:$0xff]  ;;  %v14174_v10 = vld [vmem:[%s26209_s1 + $0x1680] sm:$0xff] }
 0x127   : > { %v2151_v52 = vadd.f32 %v2119_v6, %v2051_v59  ;;  %v853_v51 = vadd.f32 %v821_v30, %v753_v44  ;;  %v1021_v55 = vmul.f32 %v13633_v36, %v18462_v34  ;;  %v2418_v33 = vmul.f32 %v14078_v35, %v18693_v25  ;;  %v14175_v59 = vld [vmem:[%s26209_s1 + $0x1688] sm:$0xff]  ;;  %v13760_v44 = vld [vmem:[%s26209_s1 + $0x990] sm:$0xff] }
 0x128   : > { %v2419_v48 = vmul.f32 %v14079_v58, %v18693_v25  ;;  %v952_v6 = vadd.f32 %v920_v63, %v852_v19  ;;  %v1120_v12 = vmul.f32 %v13664_v62, %v18470_v39  ;;  %v2250_v14 = vadd.f32 %v2218_v29, %v2150_v37  ;;  %v13761_v19 = vld [vmem:[%s26209_s1 + $0x998] sm:$0xff]  ;;  %v14206_v37 = vld [vmem:[%s26209_s1 + $0x1780] sm:$0xff] }
 0x129   : > { %v2251_v9 = vadd.f32 %v2219_v53, %v2151_v52  ;;  %v953_v21 = vadd.f32 %v921_v50, %v853_v51  ;;  %v1121_v43 = vmul.f32 %v13665_v60, %v18470_v39  ;;  %v2518_v30 = vmul.f32 %v14110_v28, %v18696_v27  ;;  %v14207_v52 = vld [vmem:[%s26209_s1 + $0x1788] sm:$0xff]  ;;  %v13792_v51 = vld [vmem:[%s26209_s1 + $0xa90] sm:$0xff] }
 0x12a   : > { %v2519_v3 = vmul.f32 %v14111_v15, %v18696_v27  ;;  %v1052_v29 = vadd.f32 %v1020_v4, %v952_v6  ;;  %v1220_v53 = vmul.f32 %v13696_v57, %v18488_v46  ;;  %v2350_v63 = vadd.f32 %v2318_v41, %v2250_v14  ;;  %v13793_v6 = vld [vmem:[%s26209_s1 + $0xa98] sm:$0xff]  ;;  %v14238_v14 = vld [vmem:[%s26209_s1 + $0x1880] sm:$0xff] }
 0x12b   : > { %v2351_v36 = vadd.f32 %v2319_v42, %v2251_v9  ;;  %v1053_v35 = vadd.f32 %v1021_v55, %v953_v21  ;;  %v1221_v58 = vmul.f32 %v13697_v23, %v18488_v46  ;;  %v2618_v50 = vmul.f32 %v14142_v22, %v18738_v17  ;;  %v14239_v9 = vld [vmem:[%s26209_s1 + $0x1888] sm:$0xff]  ;;  %v13824_v21 = vld [vmem:[%s26209_s1 + $0xb90] sm:$0xff] }
 0x12c   : > { %v2619_v62 = vmul.f32 %v14143_v47, %v18738_v17  ;;  %v1152_v41 = vadd.f32 %v1120_v12, %v1052_v29  ;;  %v1320_v42 = vmul.f32 %v13728_v0, %v18507_v54  ;;  %v2450_v4 = vadd.f32 %v2418_v33, %v2350_v63  ;;  %v13825_v29 = vld [vmem:[%s26209_s1 + $0xb98] sm:$0xff] }
 0x12d   : > { %v2451_v60 = vadd.f32 %v2419_v48, %v2351_v36  ;;  %v1153_v28 = vadd.f32 %v1121_v43, %v1053_v35  ;;  %v1321_v15 = vmul.f32 %v13729_v2, %v18507_v54  ;;  %v2718_v55 = vmul.f32 %v14174_v10, %v18760_v38  ;;  %v13856_v10 = vld [vmem:[%s26209_s1 + $0xc90] sm:$0xff] }
 0x12e   : > { %v2719_v57 = vmul.f32 %v14175_v59, %v18760_v38  ;;  %v1252_v33 = vadd.f32 %v1220_v53, %v1152_v41  ;;  %v1420_v48 = vmul.f32 %v13760_v44, %v18523_v61  ;;  %v2550_v12 = vadd.f32 %v2518_v30, %v2450_v4  ;;  %v13857_v59 = vld [vmem:[%s26209_s1 + $0xc98] sm:$0xff]  ;;  %v13888_v35 = vld [vmem:[%s26209_s1 + $0xd90] sm:$0xff] }
 0x12f   : > { %v2551_v23 = vadd.f32 %v2519_v3, %v2451_v60  ;;  %v1253_v22 = vadd.f32 %v1221_v58, %v1153_v28  ;;  %v1421_v47 = vmul.f32 %v13761_v19, %v18523_v61  ;;  %v2818_v43 = vmul.f32 %v14206_v37, %v18792_v11  ;;  %v13889_v41 = vld [vmem:[%s26209_s1 + $0xd98] sm:$0xff]  ;;  %v13920_v37 = vld [vmem:[%s26209_s1 + $0xe90] sm:$0xff] }
 0x130   : > { %v2819_v0 = vmul.f32 %v14207_v52, %v18792_v11  ;;  %v1352_v30 = vadd.f32 %v1320_v42, %v1252_v33  ;;  %v1520_v3 = vmul.f32 %v13792_v51, %v18540_v5  ;;  %v2650_v53 = vadd.f32 %v2618_v50, %v2550_v12  ;;  %v13921_v52 = vld [vmem:[%s26209_s1 + $0xe98] sm:$0xff]  ;;  %v13952_v28 = vld [vmem:[%s26209_s1 + $0xf90] sm:$0xff] }
 0x131   : > { %v2651_v2 = vadd.f32 %v2619_v62, %v2551_v23  ;;  %v1353_v63 = vadd.f32 %v1321_v15, %v1253_v22  ;;  %v1521_v36 = vmul.f32 %v13793_v6, %v18540_v5  ;;  %v2918_v58 = vmul.f32 %v14238_v14, %v18812_v31  ;;  %v13953_v33 = vld [vmem:[%s26209_s1 + $0xf98] sm:$0xff]  ;;  %v13984_v14 = vld [vmem:[%s26209_s1 + $0x1090] sm:$0xff]  ;;  %v489_v22 = vld [vmem:[%s26209_s1 + $0xa0] sm:$0xff] }
 0x132   : > { %v2919_v44 = vmul.f32 %v14239_v9, %v18812_v31  ;;  %v1452_v50 = vadd.f32 %v1420_v48, %v1352_v30  ;;  %v1620_v62 = vmul.f32 %v13824_v21, %v18546_v7  ;;  %v2750_v42 = vadd.f32 %v2718_v55, %v2650_v53  ;;  %v13985_v9 = vld [vmem:[%s26209_s1 + $0x1098] sm:$0xff]  ;;  %v490_v30 = vld [vmem:[%s26209_s1 + $0xa8] sm:$0xff] }
 0x133   : > { %v2751_v19 = vadd.f32 %v2719_v57, %v2651_v2  ;;  %v1453_v4 = vadd.f32 %v1421_v47, %v1353_v63  ;;  %v1621_v60 = vmul.f32 %v13825_v29, %v18546_v7  ;;  %v1720_v51 = vmul.f32 %v13856_v10, %v18562_v18  ;;  %v455_v63 = vld [vmem:[%s26210_s2 + $0xa0] sm:$0xff]  ;;  %v13507_v10 = vld [vmem:[%s26209_s1 + $0x1a8] sm:$0xff] }
 0x134   : > { %v1552_v15 = vadd.f32 %v1520_v3, %v1452_v50  ;;  %v1721_v55 = vmul.f32 %v13857_v59, %v18562_v18  ;;  %v1820_v57 = vmul.f32 %v13888_v35, %v18568_v20  ;;  %v2850_v48 = vadd.f32 %v2818_v43, %v2750_v42 }
 0x135   : > { %v2851_v6 = vadd.f32 %v2819_v0, %v2751_v19  ;;  %v1553_v12 = vadd.f32 %v1521_v36, %v1453_v4  ;;  %v1821_v23 = vmul.f32 %v13889_v41, %v18568_v20  ;;  %v1920_v21 = vmul.f32 %v13920_v37, %v18588_v32  ;;  %v13506_v36 = vld [vmem:[%s26209_s1 + $0x1a0] sm:$0xff] }
 0x136   : > { %v1652_v47 = vadd.f32 %v1620_v62, %v1552_v15  ;;  %v1921_v43 = vmul.f32 %v13921_v52, %v18588_v32  ;;  %v2020_v0 = vmul.f32 %v13952_v28, %v18600_v40  ;;  %v2950_v3 = vadd.f32 %v2918_v58, %v2850_v48  ;;  %v13538_v62 = vld [vmem:[%s26209_s1 + $0x2a0] sm:$0xff]  ;;  %v14016_v28 = vld [vmem:[%s26209_s1 + $0x1190] sm:$0xff] }
 0x137   : > { %v2951_v29 = vadd.f32 %v2919_v44, %v2851_v6  ;;  %v1653_v53 = vadd.f32 %v1621_v60, %v1553_v12  ;;  %v2021_v2 = vmul.f32 %v13953_v33, %v18600_v40  ;;  %v2120_v35 = vmul.f32 %v13984_v14, %v18610_v45  ;;  %v456_v44 = vld [vmem:[%s26210_s2 + $0xa8] sm:$0xff]  ;;  %v13570_v37 = vld [vmem:[%s26209_s1 + $0x3a0] sm:$0xff]  ;;  %v14017_v12 = vld [vmem:[%s26209_s1 + $0x1198] sm:$0xff] }
 0x138   : > { %v1752_v59 = vadd.f32 %v1720_v51, %v1652_v47  ;;  %v2121_v58 = vmul.f32 %v13985_v9, %v18610_v45  ;;  %v522_v50 = vmul.f32 %v18402_v8, %v489_v22  ;;  %v2982_v41 = vmax.f32 %v2950_v3, 0.0  ;;  %v13539_v60 = vld [vmem:[%s26209_s1 + $0x2a8] sm:$0xff]  ;;  %v13602_v9 = vld [vmem:[%s26209_s1 + $0x4a0] sm:$0xff]  ;;  %v14048_v47 = vld [vmem:[%s26209_s1 + $0x1290] sm:$0xff] }
 0x139   : > { %v2983_v42 = vmax.f32 %v2951_v29, 0.0  ;;  %v1753_v19 = vadd.f32 %v1721_v55, %v1653_v53  ;;  %v523_v4 = vmul.f32 %v18402_v8, %v490_v30  ;;  %v622_v51 = vmul.f32 %v13506_v36, %v18415_v13  ;;  %v13571_v33 = vld [vmem:[%s26209_s1 + $0x3a8] sm:$0xff] }
 0x13a   : > { %v1852_v52 = vadd.f32 %v1820_v57, %v1752_v59  ;;  %v554_v15 = vadd.f32 %v522_v50, %v455_v63  ;;  %v623_v55 = vmul.f32 %v13507_v10, %v18415_v13  ;;  %v722_v14 = vmul.f32 %v13538_v62, %v18422_v16  ;;  %v13603_v29 = vld [vmem:[%s26209_s1 + $0x4a8] sm:$0xff]  ;;  %v13634_v59 = vld [vmem:[%s26209_s1 + $0x5a0] sm:$0xff] }
 0x13b   : > { %v16817_v48 = vpack.c.bf16 %v2983_v42, %v2982_v41  ;;  %v1853_v6 = vadd.f32 %v1821_v23, %v1753_v19  ;;  %v555_v57 = vadd.f32 %v523_v4, %v456_v44  ;;  %v723_v3 = vmul.f32 %v13539_v60, %v18422_v16  ;;  %v13635_v42 = vld [vmem:[%s26209_s1 + $0x5a8] sm:$0xff] }
 0x13c   : > { %v1952_v22 = vadd.f32 %v1920_v21, %v1852_v52  ;;  %v654_v30 = vadd.f32 %v622_v51, %v554_v15  ;;  %v822_v23 = vmul.f32 %v13570_v37, %v18439_v24  ;;  %v2220_v63 = vmul.f32 %v14016_v28, %v18619_v49  ;;  %v14049_v21 = vld [vmem:[%s26209_s1 + $0x1298] sm:$0xff]  ;;  %v13666_v52 = vld [vmem:[%s26209_s1 + $0x6a0] sm:$0xff] }
 0x13d   : > { %16818 = vmatpush1.bf16.msra.mxu0 %v16817_v48  ;;  %v1953_v53 = vadd.f32 %v1921_v43, %v1853_v6  ;;  %v655_v36 = vadd.f32 %v623_v55, %v555_v57  ;;  %v823_v10 = vmul.f32 %v13571_v33, %v18439_v24  ;;  %v2221_v50 = vmul.f32 %v14017_v12, %v18619_v49  ;;  %v14080_v43 = vld [vmem:[%s26209_s1 + $0x1390] sm:$0xff]  ;;  %v13667_v33 = vld [vmem:[%s26209_s1 + $0x6a8] sm:$0xff] }
 0x13e   : > { %16819 = vmatprep.subr.bf16.mxu0 %v26245_v1  ;;  %v2052_v44 = vadd.f32 %v2020_v0, %v1952_v22  ;;  %v754_v62 = vadd.f32 %v722_v14, %v654_v30  ;;  %v922_v41 = vmul.f32 %v13602_v9, %v18445_v26  ;;  %v2320_v4 = vmul.f32 %v14048_v47, %v18631_v56  ;;  %v14081_v0 = vld [vmem:[%s26209_s1 + $0x1398] sm:$0xff]  ;;  %v13698_v14 = vld [vmem:[%s26209_s1 + $0x7a0] sm:$0xff] }
 0x13f   : > { %v2053_v19 = vadd.f32 %v2021_v2, %v1953_v53  ;;  %v755_v60 = vadd.f32 %v723_v3, %v655_v36  ;;  %v923_v37 = vmul.f32 %v13603_v29, %v18445_v26  ;;  %v2321_v15 = vmul.f32 %v14049_v21, %v18631_v56  ;;  %v14112_v2 = vld [vmem:[%s26209_s1 + $0x1490] sm:$0xff]  ;;  %v13699_v3 = vld [vmem:[%s26209_s1 + $0x7a8] sm:$0xff]  ;;  %v14145_v53 = vld [vmem:[%s26209_s1 + $0x1598] sm:$0xff] }
 0x140   : > { %v2152_v28 = vadd.f32 %v2120_v35, %v2052_v44  ;;  %v854_v51 = vadd.f32 %v822_v23, %v754_v62  ;;  %v1022_v55 = vmul.f32 %v13634_v59, %v18462_v34  ;;  %v2420_v6 = vmul.f32 %v14080_v43, %v18693_v25  ;;  %v14113_v35 = vld [vmem:[%s26209_s1 + $0x1498] sm:$0xff]  ;;  %v13730_v36 = vld [vmem:[%s26209_s1 + $0x8a0] sm:$0xff]  ;;  %v14176_v44 = vld [vmem:[%s26209_s1 + $0x1690] sm:$0xff] }
 0x141   : > { %v2153_v48 = vadd.f32 %v2121_v58, %v2053_v19  ;;  %v855_v12 = vadd.f32 %v823_v10, %v755_v60  ;;  %v1023_v57 = vmul.f32 %v13635_v42, %v18462_v34  ;;  %v2421_v22 = vmul.f32 %v14081_v0, %v18693_v25  ;;  %v14144_v58 = vld [vmem:[%s26209_s1 + $0x1590] sm:$0xff]  ;;  %v13731_v62 = vld [vmem:[%s26209_s1 + $0x8a8] sm:$0xff]  ;;  %v14177_v19 = vld [vmem:[%s26209_s1 + $0x1698] sm:$0xff] }
 0x142   : > { %v2252_v9 = vadd.f32 %v2220_v63, %v2152_v28  ;;  %v954_v47 = vadd.f32 %v922_v41, %v854_v51  ;;  %v1122_v30 = vmul.f32 %v13666_v52, %v18470_v39  ;;  %v2520_v29 = vmul.f32 %v14112_v2, %v18696_v27  ;;  %v13762_v60 = vld [vmem:[%s26209_s1 + $0x9a0] sm:$0xff]  ;;  %v14208_v28 = vld [vmem:[%s26209_s1 + $0x1790] sm:$0xff]  ;;  %v13763_v51 = vld [vmem:[%s26209_s1 + $0x9a8] sm:$0xff] }
 0x143   : > { %v2253_v23 = vadd.f32 %v2221_v50, %v2153_v48  ;;  %v955_v63 = vadd.f32 %v923_v37, %v855_v12  ;;  %v1123_v21 = vmul.f32 %v13667_v33, %v18470_v39  ;;  %v2521_v59 = vmul.f32 %v14113_v35, %v18696_v27  ;;  %v14209_v48 = vld [vmem:[%s26209_s1 + $0x1798] sm:$0xff]  ;;  %v13794_v12 = vld [vmem:[%s26209_s1 + $0xaa0] sm:$0xff] }
 0x144   : > { %v2352_v10 = vadd.f32 %v2320_v4, %v2252_v9  ;;  %v1054_v50 = vadd.f32 %v1022_v55, %v954_v47  ;;  %v1222_v43 = vmul.f32 %v13698_v14, %v18488_v46  ;;  %v2620_v42 = vmul.f32 %v14144_v58, %v18738_v17  ;;  %v14240_v9 = vld [vmem:[%s26209_s1 + $0x1890] sm:$0xff]  ;;  %v13795_v47 = vld [vmem:[%s26209_s1 + $0xaa8] sm:$0xff] }
 0x145   : > { %v2353_v41 = vadd.f32 %v2321_v15, %v2253_v23  ;;  %v1055_v4 = vadd.f32 %v1023_v57, %v955_v63  ;;  %v1223_v0 = vmul.f32 %v13699_v3, %v18488_v46  ;;  %v2621_v52 = vmul.f32 %v14145_v53, %v18738_v17  ;;  %v14241_v23 = vld [vmem:[%s26209_s1 + $0x1898] sm:$0xff]  ;;  %v13826_v63 = vld [vmem:[%s26209_s1 + $0xba0] sm:$0xff] }
 0x146   : > { %v2452_v37 = vadd.f32 %v2420_v6, %v2352_v10  ;;  %v1154_v15 = vadd.f32 %v1122_v30, %v1054_v50  ;;  %v1322_v2 = vmul.f32 %v13730_v36, %v18507_v54  ;;  %v2720_v33 = vmul.f32 %v14176_v44, %v18760_v38  ;;  %v13858_v50 = vld [vmem:[%s26209_s1 + $0xca0] sm:$0xff] }
 0x147   : > { %v2453_v55 = vadd.f32 %v2421_v22, %v2353_v41  ;;  %v1155_v6 = vadd.f32 %v1123_v21, %v1055_v4  ;;  %v1323_v35 = vmul.f32 %v13731_v62, %v18507_v54  ;;  %v2721_v14 = vmul.f32 %v14177_v19, %v18760_v38  ;;  %v13890_v4 = vld [vmem:[%s26209_s1 + $0xda0] sm:$0xff] }
 0x148   : > { %v2552_v57 = vadd.f32 %v2520_v29, %v2452_v37  ;;  %v1254_v22 = vadd.f32 %v1222_v43, %v1154_v15  ;;  %v1422_v58 = vmul.f32 %v13762_v60, %v18523_v61  ;;  %v2820_v3 = vmul.f32 %v14208_v28, %v18792_v11  ;;  %v13922_v15 = vld [vmem:[%s26209_s1 + $0xea0] sm:$0xff] }
 0x149   : > { %v2553_v30 = vadd.f32 %v2521_v59, %v2453_v55  ;;  %v1255_v29 = vadd.f32 %v1223_v0, %v1155_v6  ;;  %v1423_v53 = vmul.f32 %v13763_v51, %v18523_v61  ;;  %v2821_v36 = vmul.f32 %v14209_v48, %v18792_v11  ;;  %v13827_v59 = vld [vmem:[%s26209_s1 + $0xba8] sm:$0xff]  ;;  %v13954_v6 = vld [vmem:[%s26209_s1 + $0xfa0] sm:$0xff] }
 0x14a   : > { %v2652_v21 = vadd.f32 %v2620_v42, %v2552_v57  ;;  %v1354_v10 = vadd.f32 %v1322_v2, %v1254_v22  ;;  %v1522_v44 = vmul.f32 %v13794_v12, %v18540_v5  ;;  %v2920_v62 = vmul.f32 %v14240_v9, %v18812_v31  ;;  %v13859_v42 = vld [vmem:[%s26209_s1 + $0xca8] sm:$0xff]  ;;  %v13986_v22 = vld [vmem:[%s26209_s1 + $0x10a0] sm:$0xff] }
 0x14b   : > { %v2653_v43 = vadd.f32 %v2621_v52, %v2553_v30  ;;  %v1355_v41 = vadd.f32 %v1323_v35, %v1255_v29  ;;  %v1523_v19 = vmul.f32 %v13795_v47, %v18540_v5  ;;  %v2921_v60 = vmul.f32 %v14241_v23, %v18812_v31  ;;  %v13891_v52 = vld [vmem:[%s26209_s1 + $0xda8] sm:$0xff]  ;;  %v491_v29 = vld [vmem:[%s26209_s1 + $0xb0] sm:$0xff] }
 0x14c   : > { %v2752_v0 = vadd.f32 %v2720_v33, %v2652_v21  ;;  %v1454_v37 = vadd.f32 %v1422_v58, %v1354_v10  ;;  %v1622_v28 = vmul.f32 %v13826_v63, %v18546_v7  ;;  %v1623_v55 = vmul.f32 %v13827_v59, %v18546_v7  ;;  %v13923_v33 = vld [vmem:[%s26209_s1 + $0xea8] sm:$0xff] }
 0x14d   : > { %v2753_v2 = vadd.f32 %v2721_v14, %v2653_v43  ;;  %v1455_v51 = vadd.f32 %v1423_v53, %v1355_v41  ;;  %v1722_v48 = vmul.f32 %v13858_v50, %v18562_v18  ;;  %v1723_v57 = vmul.f32 %v13859_v42, %v18562_v18  ;;  %v13955_v14 = vld [vmem:[%s26209_s1 + $0xfa8] sm:$0xff]  ;;  %v13540_v42 = vld [vmem:[%s26209_s1 + $0x2b0] sm:$0xff] }
 0x14e   : > { %v2852_v35 = vadd.f32 %v2820_v3, %v2752_v0  ;;  %v1554_v12 = vadd.f32 %v1522_v44, %v1454_v37  ;;  %v1822_v9 = vmul.f32 %v13890_v4, %v18568_v20  ;;  %v1823_v30 = vmul.f32 %v13891_v52, %v18568_v20  ;;  %v13987_v3 = vld [vmem:[%s26209_s1 + $0x10a8] sm:$0xff]  ;;  %v13508_v44 = vld [vmem:[%s26209_s1 + $0x1b0] sm:$0xff]  ;;  %v458_v37 = vld [vmem:[%s26210_s2 + $0xb8] sm:$0xff] }
 0x14f   : > { %v2853_v58 = vadd.f32 %v2821_v36, %v2753_v2  ;;  %v1555_v47 = vadd.f32 %v1523_v19, %v1455_v51  ;;  %v1922_v23 = vmul.f32 %v13922_v15, %v18588_v32  ;;  %v1923_v21 = vmul.f32 %v13923_v33, %v18588_v32  ;;  %v492_v36 = vld [vmem:[%s26209_s1 + $0xb8] sm:$0xff]  ;;  %v14018_v51 = vld [vmem:[%s26209_s1 + $0x11a0] sm:$0xff]  ;;  %v13572_v33 = vld [vmem:[%s26209_s1 + $0x3b0] sm:$0xff] }
 0x150   : > { %v2952_v53 = vadd.f32 %v2920_v62, %v2852_v35  ;;  %v1654_v63 = vadd.f32 %v1622_v28, %v1554_v12  ;;  %v2022_v10 = vmul.f32 %v13954_v6, %v18600_v40  ;;  %v2023_v43 = vmul.f32 %v13955_v14, %v18600_v40  ;;  %v457_v62 = vld [vmem:[%s26210_s2 + $0xb0] sm:$0xff]  ;;  %v13509_v19 = vld [vmem:[%s26209_s1 + $0x1b8] sm:$0xff]  ;;  %v14019_v35 = vld [vmem:[%s26209_s1 + $0x11a8] sm:$0xff] }
 0x151   : > { %v2953_v59 = vadd.f32 %v2921_v60, %v2853_v58  ;;  %v1655_v50 = vadd.f32 %v1623_v55, %v1555_v47  ;;  %v2122_v41 = vmul.f32 %v13986_v22, %v18610_v45  ;;  %v2123_v60 = vmul.f32 %v13987_v3, %v18610_v45  ;;  %v13541_v52 = vld [vmem:[%s26209_s1 + $0x2b8] sm:$0xff]  ;;  %v14050_v3 = vld [vmem:[%s26209_s1 + $0x12a0] sm:$0xff] }
 0x152   : > { %v2984_v4 = vmax.f32 %v2952_v53, 0.0  ;;  %v1754_v0 = vadd.f32 %v1722_v48, %v1654_v63  ;;  %v524_v28 = vmul.f32 %v18402_v8, %v491_v29  ;;  %v525_v55 = vmul.f32 %v18402_v8, %v492_v36  ;;  %v13573_v22 = vld [vmem:[%s26209_s1 + $0x3b8] sm:$0xff]  ;;  %v13604_v53 = vld [vmem:[%s26209_s1 + $0x4b0] sm:$0xff] }
 0x153   : > { %v2985_v15 = vmax.f32 %v2953_v59, 0.0  ;;  %v1755_v2 = vadd.f32 %v1723_v57, %v1655_v50  ;;  %v624_v48 = vmul.f32 %v13508_v44, %v18415_v13  ;;  %v625_v57 = vmul.f32 %v13509_v19, %v18415_v13  ;;  %v14051_v44 = vld [vmem:[%s26209_s1 + $0x12a8] sm:$0xff]  ;;  %v13605_v50 = vld [vmem:[%s26209_s1 + $0x4b8] sm:$0xff] }
 0x154   : > { %v1854_v6 = vadd.f32 %v1822_v9, %v1754_v0  ;;  %v556_v12 = vadd.f32 %v524_v28, %v457_v62  ;;  %v724_v14 = vmul.f32 %v13540_v42, %v18422_v16  ;;  %v557_v9 = vadd.f32 %v525_v55, %v458_v37  ;;  %v13636_v0 = vld [vmem:[%s26209_s1 + $0x5b0] sm:$0xff] }
 0x155   : > { %v16820_v58 = vpack.c.bf16 %v2985_v15, %v2984_v4  ;;  %v1855_v47 = vadd.f32 %v1823_v30, %v1755_v2  ;;  %v725_v29 = vmul.f32 %v13541_v52, %v18422_v16  ;;  %v2222_v36 = vmul.f32 %v14018_v51, %v18619_v49  ;;  %v13637_v2 = vld [vmem:[%s26209_s1 + $0x5b8] sm:$0xff] }
 0x156   : > { %v1954_v63 = vadd.f32 %v1922_v23, %v1854_v6  ;;  %v656_v59 = vadd.f32 %v624_v48, %v556_v12  ;;  %v824_v30 = vmul.f32 %v13572_v33, %v18439_v24  ;;  %v2223_v19 = vmul.f32 %v14019_v35, %v18619_v49  ;;  %v14082_v23 = vld [vmem:[%s26209_s1 + $0x13a0] sm:$0xff]  ;;  %v13668_v6 = vld [vmem:[%s26209_s1 + $0x6b0] sm:$0xff] }
 0x157   : > { %16821 = vmatpush1.bf16.msra.mxu0 %v16820_v58  ;;  %v1955_v62 = vadd.f32 %v1923_v21, %v1855_v47  ;;  %v657_v42 = vadd.f32 %v625_v57, %v557_v9  ;;  %v825_v4 = vmul.f32 %v13573_v22, %v18439_v24  ;;  %v2322_v28 = vmul.f32 %v14050_v3, %v18631_v56  ;;  %v14083_v21 = vld [vmem:[%s26209_s1 + $0x13a8] sm:$0xff]  ;;  %v13669_v22 = vld [vmem:[%s26209_s1 + $0x6b8] sm:$0xff] }
 0x158   : > { %16822 = vmatprep.subr.bf16.mxu0 %v26245_v1  ;;  %v2054_v37 = vadd.f32 %v2022_v10, %v1954_v63  ;;  %v756_v52 = vadd.f32 %v724_v14, %v656_v59  ;;  %v924_v15 = vmul.f32 %v13604_v53, %v18445_v26  ;;  %v2323_v55 = vmul.f32 %v14051_v44, %v18631_v56  ;;  %v14114_v10 = vld [vmem:[%s26209_s1 + $0x14a0] sm:$0xff] }
 0x159   : > { %v2055_v51 = vadd.f32 %v2023_v43, %v1955_v62  ;;  %v757_v48 = vadd.f32 %v725_v29, %v657_v42  ;;  %v925_v33 = vmul.f32 %v13605_v50, %v18445_v26  ;;  %v2422_v12 = vmul.f32 %v14082_v23, %v18693_v25  ;;  %v14115_v43 = vld [vmem:[%s26209_s1 + $0x14a8] sm:$0xff]  ;;  %v13700_v29 = vld [vmem:[%s26209_s1 + $0x7b0] sm:$0xff] }
 0x15a   : > { %v2154_v35 = vadd.f32 %v2122_v41, %v2054_v37  ;;  %v856_v57 = vadd.f32 %v824_v30, %v756_v52  ;;  %v1024_v14 = vmul.f32 %v13636_v0, %v18462_v34  ;;  %v2423_v47 = vmul.f32 %v14083_v21, %v18693_v25  ;;  %v14146_v41 = vld [vmem:[%s26209_s1 + $0x15a0] sm:$0xff]  ;;  %v13701_v30 = vld [vmem:[%s26209_s1 + $0x7b8] sm:$0xff] }
 0x15b   : > { %v2155_v58 = vadd.f32 %v2123_v60, %v2055_v51  ;;  %v857_v3 = vadd.f32 %v825_v4, %v757_v48  ;;  %v1025_v9 = vmul.f32 %v13637_v2, %v18462_v34  ;;  %v2522_v63 = vmul.f32 %v14114_v10, %v18696_v27  ;;  %v14147_v60 = vld [vmem:[%s26209_s1 + $0x15a8] sm:$0xff]  ;;  %v13732_v4 = vld [vmem:[%s26209_s1 + $0x8b0] sm:$0xff] }
 0x15c   : > { %v2254_v53 = vadd.f32 %v2222_v36, %v2154_v35  ;;  %v956_v44 = vadd.f32 %v924_v15, %v856_v57  ;;  %v1124_v59 = vmul.f32 %v13668_v6, %v18470_v39  ;;  %v2523_v62 = vmul.f32 %v14115_v43, %v18696_v27  ;;  %v14178_v36 = vld [vmem:[%s26209_s1 + $0x16a0] sm:$0xff]  ;;  %v13733_v15 = vld [vmem:[%s26209_s1 + $0x8b8] sm:$0xff] }
 0x15d   : > { %v2255_v50 = vadd.f32 %v2223_v19, %v2155_v58  ;;  %v957_v23 = vadd.f32 %v925_v33, %v857_v3  ;;  %v1125_v42 = vmul.f32 %v13669_v22, %v18470_v39  ;;  %v2622_v37 = vmul.f32 %v14146_v41, %v18738_v17  ;;  %v14179_v19 = vld [vmem:[%s26209_s1 + $0x16a8] sm:$0xff]  ;;  %v13764_v33 = vld [vmem:[%s26209_s1 + $0x9b0] sm:$0xff] }
 0x15e   : > { %v2354_v0 = vadd.f32 %v2322_v28, %v2254_v53  ;;  %v1056_v21 = vadd.f32 %v1024_v14, %v956_v44  ;;  %v1224_v52 = vmul.f32 %v13700_v29, %v18488_v46  ;;  %v2623_v51 = vmul.f32 %v14147_v60, %v18738_v17  ;;  %v14210_v28 = vld [vmem:[%s26209_s1 + $0x17a0] sm:$0xff]  ;;  %v13765_v14 = vld [vmem:[%s26209_s1 + $0x9b8] sm:$0xff] }
 0x15f   : > { %v2355_v2 = vadd.f32 %v2323_v55, %v2255_v50  ;;  %v1057_v10 = vadd.f32 %v1025_v9, %v957_v23  ;;  %v1225_v48 = vmul.f32 %v13701_v30, %v18488_v46  ;;  %v2722_v35 = vmul.f32 %v14178_v36, %v18760_v38  ;;  %v14211_v55 = vld [vmem:[%s26209_s1 + $0x17a8] sm:$0xff]  ;;  %v13796_v9 = vld [vmem:[%s26209_s1 + $0xab0] sm:$0xff] }
 0x160   : > { %v2454_v6 = vadd.f32 %v2422_v12, %v2354_v0  ;;  %v1156_v43 = vadd.f32 %v1124_v59, %v1056_v21  ;;  %v1324_v57 = vmul.f32 %v13732_v4, %v18507_v54  ;;  %v2723_v58 = vmul.f32 %v14179_v19, %v18760_v38  ;;  %v14242_v12 = vld [vmem:[%s26209_s1 + $0x18a0] sm:$0xff]  ;;  %v13797_v59 = vld [vmem:[%s26209_s1 + $0xab8] sm:$0xff] }
 0x161   : > { %v2455_v22 = vadd.f32 %v2423_v47, %v2355_v2  ;;  %v1157_v41 = vadd.f32 %v1125_v42, %v1057_v10  ;;  %v1325_v3 = vmul.f32 %v13733_v15, %v18507_v54  ;;  %v2822_v53 = vmul.f32 %v14210_v28, %v18792_v11  ;;  %v14243_v47 = vld [vmem:[%s26209_s1 + $0x18a8] sm:$0xff]  ;;  %v13829_v42 = vld [vmem:[%s26209_s1 + $0xbb8] sm:$0xff] }
 0x162   : > { %v2554_v29 = vadd.f32 %v2522_v63, %v2454_v6  ;;  %v1256_v60 = vadd.f32 %v1224_v52, %v1156_v43  ;;  %v1424_v44 = vmul.f32 %v13764_v33, %v18523_v61  ;;  %v2823_v50 = vmul.f32 %v14211_v55, %v18792_v11  ;;  %v13828_v63 = vld [vmem:[%s26209_s1 + $0xbb0] sm:$0xff]  ;;  %v13861_v52 = vld [vmem:[%s26209_s1 + $0xcb8] sm:$0xff] }
 0x163   : > { %v2555_v30 = vadd.f32 %v2523_v62, %v2455_v22  ;;  %v1257_v36 = vadd.f32 %v1225_v48, %v1157_v41  ;;  %v1425_v23 = vmul.f32 %v13765_v14, %v18523_v61  ;;  %v2922_v0 = vmul.f32 %v14242_v12, %v18812_v31  ;;  %v13860_v62 = vld [vmem:[%s26209_s1 + $0xcb0] sm:$0xff]  ;;  %v13893_v48 = vld [vmem:[%s26209_s1 + $0xdb8] sm:$0xff] }
 0x164   : > { %v2654_v4 = vadd.f32 %v2622_v37, %v2554_v29  ;;  %v1356_v19 = vadd.f32 %v1324_v57, %v1256_v60  ;;  %v1524_v21 = vmul.f32 %v13796_v9, %v18540_v5  ;;  %v2923_v2 = vmul.f32 %v14243_v47, %v18812_v31  ;;  %v13892_v37 = vld [vmem:[%s26209_s1 + $0xdb0] sm:$0xff]  ;;  %v13925_v57 = vld [vmem:[%s26209_s1 + $0xeb8] sm:$0xff] }
 0x165   : > { %v2655_v15 = vadd.f32 %v2623_v51, %v2555_v30  ;;  %v1357_v28 = vadd.f32 %v1325_v3, %v1257_v36  ;;  %v1525_v10 = vmul.f32 %v13797_v59, %v18540_v5  ;;  %v1624_v55 = vmul.f32 %v13828_v63, %v18546_v7  ;;  %v13924_v51 = vld [vmem:[%s26209_s1 + $0xeb0] sm:$0xff]  ;;  %v13957_v3 = vld [vmem:[%s26209_s1 + $0xfb8] sm:$0xff]  ;;  %v494_v63 = vld [vmem:[%s26209_s1 + $0xc8] sm:$0xff] }
 0x166   : > { %v2754_v33 = vadd.f32 %v2722_v35, %v2654_v4  ;;  %v1456_v6 = vadd.f32 %v1424_v44, %v1356_v19  ;;  %v1625_v43 = vmul.f32 %v13829_v42, %v18546_v7  ;;  %v1724_v12 = vmul.f32 %v13860_v62, %v18562_v18  ;;  %v13956_v35 = vld [vmem:[%s26209_s1 + $0xfb0] sm:$0xff]  ;;  %v13989_v44 = vld [vmem:[%s26209_s1 + $0x10b8] sm:$0xff]  ;;  %v13511_v62 = vld [vmem:[%s26209_s1 + $0x1c8] sm:$0xff] }
 0x167   : > { %v2755_v14 = vadd.f32 %v2723_v58, %v2655_v15  ;;  %v1457_v22 = vadd.f32 %v1425_v23, %v1357_v28  ;;  %v1725_v41 = vmul.f32 %v13861_v52, %v18562_v18  ;;  %v1824_v47 = vmul.f32 %v13892_v37, %v18568_v20  ;;  %v13988_v58 = vld [vmem:[%s26209_s1 + $0x10b0] sm:$0xff]  ;;  %v460_v37 = vld [vmem:[%s26210_s2 + $0xc8] sm:$0xff] }
 0x168   : > { %v2854_v9 = vadd.f32 %v2822_v53, %v2754_v33  ;;  %v1556_v29 = vadd.f32 %v1524_v21, %v1456_v6  ;;  %v1825_v60 = vmul.f32 %v13893_v48, %v18568_v20  ;;  %v1924_v36 = vmul.f32 %v13924_v51, %v18588_v32  ;;  %v493_v53 = vld [vmem:[%s26209_s1 + $0xc0] sm:$0xff] }
 0x169   : > { %v2855_v59 = vadd.f32 %v2823_v50, %v2755_v14  ;;  %v1557_v30 = vadd.f32 %v1525_v10, %v1457_v22  ;;  %v1925_v23 = vmul.f32 %v13925_v57, %v18588_v32  ;;  %v2024_v19 = vmul.f32 %v13956_v35, %v18600_v40  ;;  %v13510_v50 = vld [vmem:[%s26209_s1 + $0x1c0] sm:$0xff] }
 0x16a   : > { %v2954_v42 = vadd.f32 %v2922_v0, %v2854_v9  ;;  %v1656_v4 = vadd.f32 %v1624_v55, %v1556_v29  ;;  %v2025_v21 = vmul.f32 %v13957_v3, %v18600_v40  ;;  %v2124_v28 = vmul.f32 %v13988_v58, %v18610_v45  ;;  %v459_v0 = vld [vmem:[%s26210_s2 + $0xc0] sm:$0xff]  ;;  %v14020_v9 = vld [vmem:[%s26209_s1 + $0x11b0] sm:$0xff]  ;;  %v14021_v29 = vld [vmem:[%s26209_s1 + $0x11b8] sm:$0xff] }
 0x16b   : > { %v2955_v52 = vadd.f32 %v2923_v2, %v2855_v59  ;;  %v1657_v15 = vadd.f32 %v1625_v43, %v1557_v30  ;;  %v2125_v10 = vmul.f32 %v13989_v44, %v18610_v45  ;;  %v13542_v48 = vld [vmem:[%s26209_s1 + $0x2c0] sm:$0xff]  ;;  %v526_v2 = vmul.f32 %v18402_v8, %v493_v53  ;;  %v13543_v43 = vld [vmem:[%s26209_s1 + $0x2c8] sm:$0xff] }
 0x16c   : > { %v2986_v33 = vmax.f32 %v2954_v42, 0.0  ;;  %v1756_v6 = vadd.f32 %v1724_v12, %v1656_v4  ;;  %v527_v55 = vmul.f32 %v18402_v8, %v494_v63  ;;  %v13574_v51 = vld [vmem:[%s26209_s1 + $0x3c0] sm:$0xff]  ;;  %v626_v22 = vmul.f32 %v13510_v50, %v18415_v13  ;;  %v13575_v12 = vld [vmem:[%s26209_s1 + $0x3c8] sm:$0xff]  ;;  %v14052_v50 = vld [vmem:[%s26209_s1 + $0x12b0] sm:$0xff] }
 0x16d   : > { %v2987_v57 = vmax.f32 %v2955_v52, 0.0  ;;  %v1757_v14 = vadd.f32 %v1725_v41, %v1657_v15  ;;  %v627_v35 = vmul.f32 %v13511_v62, %v18415_v13  ;;  %v558_v58 = vadd.f32 %v526_v2, %v459_v0  ;;  %v13606_v59 = vld [vmem:[%s26209_s1 + $0x4c0] sm:$0xff]  ;;  %v13607_v42 = vld [vmem:[%s26209_s1 + $0x4c8] sm:$0xff]  ;;  %v14053_v62 = vld [vmem:[%s26209_s1 + $0x12b8] sm:$0xff] }
 0x16e   : > { %v1856_v3 = vadd.f32 %v1824_v47, %v1756_v6  ;;  %v559_v44 = vadd.f32 %v527_v55, %v460_v37  ;;  %v726_v41 = vmul.f32 %v13542_v48, %v18422_v16  ;;  %v727_v47 = vmul.f32 %v13543_v43, %v18422_v16  ;;  %v13638_v0 = vld [vmem:[%s26209_s1 + $0x5c0] sm:$0xff]  ;;  %v13639_v2 = vld [vmem:[%s26209_s1 + $0x5c8] sm:$0xff] }
 0x16f   : > { %v16823_v30 = vpack.c.bf16 %v2987_v57, %v2986_v33  ;;  %v1857_v53 = vadd.f32 %v1825_v60, %v1757_v14  ;;  %v826_v63 = vmul.f32 %v13574_v51, %v18439_v24  ;;  %v658_v52 = vadd.f32 %v626_v22, %v558_v58  ;;  %v14084_v33 = vld [vmem:[%s26209_s1 + $0x13b0] sm:$0xff]  ;;  %v13670_v14 = vld [vmem:[%s26209_s1 + $0x6c0] sm:$0xff]  ;;  %v2999_v22 = vld [vmem:[%s26211_s3 + $0x8] sm:$0xff] }
 0x170   : > { %v1956_v4 = vadd.f32 %v1924_v36, %v1856_v3  ;;  %v659_v15 = vadd.f32 %v627_v35, %v559_v44  ;;  %v827_v60 = vmul.f32 %v13575_v12, %v18439_v24  ;;  %v2224_v36 = vmul.f32 %v14020_v9, %v18619_v49  ;;  %v13671_v9 = vld [vmem:[%s26209_s1 + $0x6c8] sm:$0xff]  ;;  %3238 = vmatprep.mubr.f32.mxu0 %v2999_v22  ;;  %v14116_v58 = vld [vmem:[%s26209_s1 + $0x14b0] sm:$0xff] }
 0x171   : > { %16824 = vmatpush1.bf16.msra.mxu0 %v16823_v30  ;;  %v1957_v37 = vadd.f32 %v1925_v23, %v1857_v53  ;;  %v2225_v48 = vmul.f32 %v14021_v29, %v18619_v49  ;;  %v926_v6 = vmul.f32 %v13606_v59, %v18445_v26  ;;  %v14085_v23 = vld [vmem:[%s26209_s1 + $0x13b8] sm:$0xff]  ;;  %v758_v43 = vadd.f32 %v726_v41, %v658_v52  ;;  %v13702_v30 = vld [vmem:[%s26209_s1 + $0x7c0] sm:$0xff] }
 0x172   : > { %16825 = vmatprep.subr.bf16.mxu0 %v26245_v1  ;;  %v2056_v55 = vadd.f32 %v2024_v19, %v1956_v4  ;;  %v759_v51 = vadd.f32 %v727_v47, %v659_v15  ;;  %v927_v57 = vmul.f32 %v13607_v42, %v18445_v26  ;;  %v2324_v12 = vmul.f32 %v14052_v50, %v18631_v56  ;;  %v13703_v4 = vld [vmem:[%s26209_s1 + $0x7c8] sm:$0xff] }
 0x173   : > { %v2057_v35 = vadd.f32 %v2025_v21, %v1957_v37  ;;  %v2325_v19 = vmul.f32 %v14053_v62, %v18631_v56  ;;  %v1026_v3 = vmul.f32 %v13638_v0, %v18462_v34  ;;  %v14117_v21 = vld [vmem:[%s26209_s1 + $0x14b8] sm:$0xff]  ;;  %v858_v44 = vadd.f32 %v826_v63, %v758_v43  ;;  %v14148_v63 = vld [vmem:[%s26209_s1 + $0x15b0] sm:$0xff] }
 0x174   : > { %v2156_v29 = vadd.f32 %v2124_v28, %v2056_v55  ;;  %v859_v41 = vadd.f32 %v827_v60, %v759_v51  ;;  %v1027_v59 = vmul.f32 %v13639_v2, %v18462_v34  ;;  %v2424_v47 = vmul.f32 %v14084_v33, %v18693_v25  ;;  %v14149_v62 = vld [vmem:[%s26209_s1 + $0x15b8] sm:$0xff]  ;;  %v13734_v60 = vld [vmem:[%s26209_s1 + $0x8c0] sm:$0xff]  ;;  %v13735_v2 = vld [vmem:[%s26209_s1 + $0x8c8] sm:$0xff] }
 0x175   : > { %v2157_v53 = vadd.f32 %v2125_v10, %v2057_v35  ;;  %v2425_v28 = vmul.f32 %v14085_v23, %v18693_v25  ;;  %v1126_v42 = vmul.f32 %v13670_v14, %v18470_v39  ;;  %v958_v10 = vadd.f32 %v926_v6, %v858_v44  ;;  %v14180_v6 = vld [vmem:[%s26209_s1 + $0x16b0] sm:$0xff]  ;;  %v14181_v23 = vld [vmem:[%s26209_s1 + $0x16b8] sm:$0xff] }
 0x176   : > { %v2256_v50 = vadd.f32 %v2224_v36, %v2156_v29  ;;  %v959_v52 = vadd.f32 %v927_v57, %v859_v41  ;;  %v1127_v15 = vmul.f32 %v13671_v9, %v18470_v39  ;;  %v2524_v37 = vmul.f32 %v14116_v58, %v18696_v27  ;;  %v13766_v57 = vld [vmem:[%s26209_s1 + $0x9c0] sm:$0xff]  ;;  %v13767_v9 = vld [vmem:[%s26209_s1 + $0x9c8] sm:$0xff]  ;;  %v14213_v58 = vld [vmem:[%s26209_s1 + $0x17b8] sm:$0xff] }
 0x177   : > { %v2257_v0 = vadd.f32 %v2225_v48, %v2157_v53  ;;  %v2525_v36 = vmul.f32 %v14117_v21, %v18696_v27  ;;  %v1226_v33 = vmul.f32 %v13702_v30, %v18488_v46  ;;  %v1058_v48 = vadd.f32 %v1026_v3, %v958_v10  ;;  %v14212_v3 = vld [vmem:[%s26209_s1 + $0x17b0] sm:$0xff]  ;;  %v13798_v41 = vld [vmem:[%s26209_s1 + $0xac0] sm:$0xff] }
 0x178   : > { %v2356_v55 = vadd.f32 %v2324_v12, %v2256_v50  ;;  %v1059_v43 = vadd.f32 %v1027_v59, %v959_v52  ;;  %v1227_v51 = vmul.f32 %v13703_v4, %v18488_v46  ;;  %v2624_v22 = vmul.f32 %v14148_v63, %v18738_v17  ;;  %v13799_v4 = vld [vmem:[%s26209_s1 + $0xac8] sm:$0xff]  ;;  %v14245_v63 = vld [vmem:[%s26209_s1 + $0x18b8] sm:$0xff]  ;;  %v13830_v52 = vld [vmem:[%s26209_s1 + $0xbc0] sm:$0xff] }
 0x179   : > { %v2357_v14 = vadd.f32 %v2325_v19, %v2257_v0  ;;  %v2625_v35 = vmul.f32 %v14149_v62, %v18738_v17  ;;  %v1326_v12 = vmul.f32 %v13734_v60, %v18507_v54  ;;  %v1158_v19 = vadd.f32 %v1126_v42, %v1058_v48  ;;  %v14244_v42 = vld [vmem:[%s26209_s1 + $0x18b0] sm:$0xff]  ;;  %v13862_v48 = vld [vmem:[%s26209_s1 + $0xcc0] sm:$0xff] }
 0x17a   : > { %v2456_v29 = vadd.f32 %v2424_v47, %v2356_v55  ;;  %v1159_v21 = vadd.f32 %v1127_v15, %v1059_v43  ;;  %v1327_v44 = vmul.f32 %v13735_v2, %v18507_v54  ;;  %v2724_v30 = vmul.f32 %v14180_v6, %v18760_v38  ;;  %v13831_v2 = vld [vmem:[%s26209_s1 + $0xbc8] sm:$0xff]  ;;  %v13894_v43 = vld [vmem:[%s26209_s1 + $0xdc0] sm:$0xff] }
 0x17b   : > { %v2457_v59 = vadd.f32 %v2425_v28, %v2357_v14  ;;  %v2725_v53 = vmul.f32 %v14181_v23, %v18760_v38  ;;  %v1426_v47 = vmul.f32 %v13766_v57, %v18523_v61  ;;  %v1258_v28 = vadd.f32 %v1226_v33, %v1158_v19  ;;  %v13926_v19 = vld [vmem:[%s26209_s1 + $0xec0] sm:$0xff] }
 0x17c   : > { %v2556_v50 = vadd.f32 %v2524_v37, %v2456_v29  ;;  %v1259_v62 = vadd.f32 %v1227_v51, %v1159_v21  ;;  %v1427_v10 = vmul.f32 %v13767_v9, %v18523_v61  ;;  %v2824_v60 = vmul.f32 %v14212_v3, %v18792_v11  ;;  %v13958_v21 = vld [vmem:[%s26209_s1 + $0xfc0] sm:$0xff] }
 0x17d   : > { %v2557_v15 = vadd.f32 %v2525_v36, %v2457_v59  ;;  %v2825_v0 = vmul.f32 %v14213_v58, %v18792_v11  ;;  %v1526_v37 = vmul.f32 %v13798_v41, %v18540_v5  ;;  %v1358_v33 = vadd.f32 %v1326_v12, %v1258_v28  ;;  %v13863_v36 = vld [vmem:[%s26209_s1 + $0xcc8] sm:$0xff]  ;;  %v13990_v28 = vld [vmem:[%s26209_s1 + $0x10c0] sm:$0xff] }
 0x17e   : > { %v2656_v55 = vadd.f32 %v2624_v22, %v2556_v50  ;;  %v1359_v6 = vadd.f32 %v1327_v44, %v1259_v62  ;;  %v1527_v23 = vmul.f32 %v13799_v4, %v18540_v5  ;;  %v2924_v57 = vmul.f32 %v14244_v42, %v18812_v31  ;;  %v13895_v12 = vld [vmem:[%s26209_s1 + $0xdc8] sm:$0xff]  ;;  %v495_v62 = vld [vmem:[%s26209_s1 + $0xd0] sm:$0xff] }
 0x17f   : > { %v2657_v51 = vadd.f32 %v2625_v35, %v2557_v15  ;;  %v2925_v14 = vmul.f32 %v14245_v63, %v18812_v31  ;;  %v1626_v22 = vmul.f32 %v13830_v52, %v18546_v7  ;;  %v1458_v29 = vadd.f32 %v1426_v47, %v1358_v33  ;;  %v13927_v35 = vld [vmem:[%s26209_s1 + $0xec8] sm:$0xff] }
 0x180   : > { %v2756_v9 = vadd.f32 %v2724_v30, %v2656_v55  ;;  %v1459_v3 = vadd.f32 %v1427_v10, %v1359_v6  ;;  %v1627_v58 = vmul.f32 %v13831_v2, %v18546_v7  ;;  %v1726_v41 = vmul.f32 %v13862_v48, %v18562_v18  ;;  %v13959_v47 = vld [vmem:[%s26209_s1 + $0xfc8] sm:$0xff]  ;;  %v13513_v48 = vld [vmem:[%s26209_s1 + $0x1d8] sm:$0xff] }
 0x181   : > { %v2757_v44 = vadd.f32 %v2725_v53, %v2657_v51  ;;  %v1727_v59 = vmul.f32 %v13863_v36, %v18562_v18  ;;  %v1826_v30 = vmul.f32 %v13894_v43, %v18568_v20  ;;  %v1558_v50 = vadd.f32 %v1526_v37, %v1458_v29  ;;  %v13991_v53 = vld [vmem:[%s26209_s1 + $0x10c8] sm:$0xff]  ;;  %v496_v37 = vld [vmem:[%s26209_s1 + $0xd8] sm:$0xff] }
 0x182   : > { %v2856_v4 = vadd.f32 %v2824_v60, %v2756_v9  ;;  %v1559_v42 = vadd.f32 %v1527_v23, %v1459_v3  ;;  %v1827_v63 = vmul.f32 %v13895_v12, %v18568_v20  ;;  %v1926_v52 = vmul.f32 %v13926_v19, %v18588_v32  ;;  %v461_v23 = vld [vmem:[%s26210_s2 + $0xd0] sm:$0xff] }
 0x183   : > { %v2857_v10 = vadd.f32 %v2825_v0, %v2757_v44  ;;  %v1927_v15 = vmul.f32 %v13927_v35, %v18588_v32  ;;  %v2026_v60 = vmul.f32 %v13958_v21, %v18600_v40  ;;  %v1658_v55 = vadd.f32 %v1626_v22, %v1558_v50  ;;  %v13512_v0 = vld [vmem:[%s26209_s1 + $0x1d0] sm:$0xff]  ;;  %v14022_v50 = vld [vmem:[%s26209_s1 + $0x11c0] sm:$0xff] }
 0x184   : > { %v2956_v2 = vadd.f32 %v2924_v57, %v2856_v4  ;;  %v1659_v33 = vadd.f32 %v1627_v58, %v1559_v42  ;;  %v2027_v6 = vmul.f32 %v13959_v47, %v18600_v40  ;;  %v2126_v43 = vmul.f32 %v13990_v28, %v18610_v45  ;;  %v462_v57 = vld [vmem:[%s26210_s2 + $0xd8] sm:$0xff]  ;;  %v13544_v12 = vld [vmem:[%s26209_s1 + $0x2d0] sm:$0xff]  ;;  %v14023_v42 = vld [vmem:[%s26209_s1 + $0x11c8] sm:$0xff] }
 0x185   : > { %v2957_v36 = vadd.f32 %v2925_v14, %v2857_v10  ;;  %v2127_v51 = vmul.f32 %v13991_v53, %v18610_v45  ;;  %v528_v22 = vmul.f32 %v18402_v8, %v495_v62  ;;  %v1758_v29 = vadd.f32 %v1726_v41, %v1658_v55  ;;  %v13545_v14 = vld [vmem:[%s26209_s1 + $0x2d8] sm:$0xff]  ;;  %v13576_v19 = vld [vmem:[%s26209_s1 + $0x3d0] sm:$0xff] }
 0x186   : > { %v2988_v9 = vmax.f32 %v2956_v2, 0.0  ;;  %v1759_v3 = vadd.f32 %v1727_v59, %v1659_v33  ;;  %v529_v58 = vmul.f32 %v18402_v8, %v496_v37  ;;  %v628_v44 = vmul.f32 %v13512_v0, %v18415_v13  ;;  %v13577_v41 = vld [vmem:[%s26209_s1 + $0x3d8] sm:$0xff]  ;;  %v13608_v62 = vld [vmem:[%s26209_s1 + $0x4d0] sm:$0xff]  ;;  %v14055_v0 = vld [vmem:[%s26209_s1 + $0x12c8] sm:$0xff] }
 0x187   : > { %v2989_v35 = vmax.f32 %v2957_v36, 0.0  ;;  %v560_v21 = vadd.f32 %v528_v22, %v461_v23  ;;  %v629_v47 = vmul.f32 %v13513_v48, %v18415_v13  ;;  %v1858_v59 = vadd.f32 %v1826_v30, %v1758_v29  ;;  %v13609_v2 = vld [vmem:[%s26209_s1 + $0x4d8] sm:$0xff]  ;;  %v14054_v23 = vld [vmem:[%s26209_s1 + $0x12c0] sm:$0xff] }
 0x188   : > { %v1859_v4 = vadd.f32 %v1827_v63, %v1759_v3  ;;  %v561_v28 = vadd.f32 %v529_v58, %v462_v57  ;;  %v728_v53 = vmul.f32 %v13544_v12, %v18422_v16  ;;  %v729_v30 = vmul.f32 %v13545_v14, %v18422_v16  ;;  %v13640_v57 = vld [vmem:[%s26209_s1 + $0x5d0] sm:$0xff]  ;;  %v14086_v58 = vld [vmem:[%s26209_s1 + $0x13c0] sm:$0xff]  ;;  %v14087_v14 = vld [vmem:[%s26209_s1 + $0x13c8] sm:$0xff] }
 0x189   : > { %v16826_v10 = vpack.c.bf16 %v2989_v35, %v2988_v9  ;;  %v660_v37 = vadd.f32 %v628_v44, %v560_v21  ;;  %v828_v63 = vmul.f32 %v13576_v19, %v18439_v24  ;;  %v1958_v55 = vadd.f32 %v1926_v52, %v1858_v59  ;;  %v13641_v9 = vld [vmem:[%s26209_s1 + $0x5d8] sm:$0xff]  ;;  %v13672_v21 = vld [vmem:[%s26209_s1 + $0x6d0] sm:$0xff] }
 0x18a   : > { %v1959_v33 = vadd.f32 %v1927_v15, %v1859_v4  ;;  %v661_v48 = vadd.f32 %v629_v47, %v561_v28  ;;  %v829_v36 = vmul.f32 %v13577_v41, %v18439_v24  ;;  %v2226_v22 = vmul.f32 %v14022_v50, %v18619_v49  ;;  %v13673_v41 = vld [vmem:[%s26209_s1 + $0x6d8] sm:$0xff]  ;;  %v14118_v50 = vld [vmem:[%s26209_s1 + $0x14c0] sm:$0xff] }
 0x18b   : > { %16827 = vmatpush1.bf16.msra.mxu0 %v16826_v10  ;;  %v2227_v52 = vmul.f32 %v14023_v42, %v18619_v49  ;;  %v760_v15 = vadd.f32 %v728_v53, %v660_v37  ;;  %v928_v12 = vmul.f32 %v13608_v62, %v18445_v26  ;;  %v2058_v29 = vadd.f32 %v2026_v60, %v1958_v55  ;;  %v14119_v42 = vld [vmem:[%s26209_s1 + $0x14c8] sm:$0xff]  ;;  %v13704_v62 = vld [vmem:[%s26209_s1 + $0x7d0] sm:$0xff]  ;;  %v14150_v55 = vld [vmem:[%s26209_s1 + $0x15c0] sm:$0xff] }
 0x18c   : > { %16828 = vmatprep.subr.bf16.mxu0 %v26245_v1  ;;  %v2059_v3 = vadd.f32 %v2027_v6, %v1959_v33  ;;  %v761_v19 = vadd.f32 %v729_v30, %v661_v48  ;;  %v929_v35 = vmul.f32 %v13609_v2, %v18445_v26  ;;  %v2326_v44 = vmul.f32 %v14054_v23, %v18631_v56  ;;  %v13705_v30 = vld [vmem:[%s26209_s1 + $0x7d8] sm:$0xff]  ;;  %v14151_v33 = vld [vmem:[%s26209_s1 + $0x15c8] sm:$0xff]  ;;  %v13736_v48 = vld [vmem:[%s26209_s1 + $0x8d0] sm:$0xff] }
 0x18d   : > { %v2327_v60 = vmul.f32 %v14055_v0, %v18631_v56  ;;  %v860_v6 = vadd.f32 %v828_v63, %v760_v15  ;;  %v1028_v47 = vmul.f32 %v13640_v57, %v18462_v34  ;;  %v2158_v59 = vadd.f32 %v2126_v43, %v2058_v29  ;;  %v13737_v15 = vld [vmem:[%s26209_s1 + $0x8d8] sm:$0xff]  ;;  %v14182_v29 = vld [vmem:[%s26209_s1 + $0x16c0] sm:$0xff] }
 0x18e   : > { %v2159_v4 = vadd.f32 %v2127_v51, %v2059_v3  ;;  %v861_v28 = vadd.f32 %v829_v36, %v761_v19  ;;  %v1029_v53 = vmul.f32 %v13641_v9, %v18462_v34  ;;  %v2426_v10 = vmul.f32 %v14086_v58, %v18693_v25  ;;  %v14183_v3 = vld [vmem:[%s26209_s1 + $0x16c8] sm:$0xff]  ;;  %v13768_v19 = vld [vmem:[%s26209_s1 + $0x9d0] sm:$0xff] }
 0x18f   : > { %v2427_v43 = vmul.f32 %v14087_v14, %v18693_v25  ;;  %v960_v51 = vadd.f32 %v928_v12, %v860_v6  ;;  %v1128_v37 = vmul.f32 %v13672_v21, %v18470_v39  ;;  %v2258_v63 = vadd.f32 %v2226_v22, %v2158_v59  ;;  %v13769_v6 = vld [vmem:[%s26209_s1 + $0x9d8] sm:$0xff]  ;;  %v14214_v59 = vld [vmem:[%s26209_s1 + $0x17c0] sm:$0xff] }
 0x190   : > { %v2259_v2 = vadd.f32 %v2227_v52, %v2159_v4  ;;  %v961_v23 = vadd.f32 %v929_v35, %v861_v28  ;;  %v1129_v0 = vmul.f32 %v13673_v41, %v18470_v39  ;;  %v2526_v36 = vmul.f32 %v14118_v50, %v18696_v27  ;;  %v14215_v4 = vld [vmem:[%s26209_s1 + $0x17c8] sm:$0xff]  ;;  %v13800_v28 = vld [vmem:[%s26209_s1 + $0xad0] sm:$0xff] }
 0x191   : > { %v2527_v57 = vmul.f32 %v14119_v42, %v18696_v27  ;;  %v1060_v22 = vadd.f32 %v1028_v47, %v960_v51  ;;  %v1228_v52 = vmul.f32 %v13704_v62, %v18488_v46  ;;  %v2358_v12 = vadd.f32 %v2326_v44, %v2258_v63  ;;  %v13801_v51 = vld [vmem:[%s26209_s1 + $0xad8] sm:$0xff]  ;;  %v14246_v63 = vld [vmem:[%s26209_s1 + $0x18c0] sm:$0xff] }
 0x192   : > { %v2359_v9 = vadd.f32 %v2327_v60, %v2259_v2  ;;  %v1061_v58 = vadd.f32 %v1029_v53, %v961_v23  ;;  %v1229_v14 = vmul.f32 %v13705_v30, %v18488_v46  ;;  %v2626_v35 = vmul.f32 %v14150_v55, %v18738_v17  ;;  %v14247_v2 = vld [vmem:[%s26209_s1 + $0x18c8] sm:$0xff]  ;;  %v13832_v23 = vld [vmem:[%s26209_s1 + $0xbd0] sm:$0xff] }
 0x193   : > { %v2627_v21 = vmul.f32 %v14151_v33, %v18738_v17  ;;  %v1160_v44 = vadd.f32 %v1128_v37, %v1060_v22  ;;  %v1328_v60 = vmul.f32 %v13736_v48, %v18507_v54  ;;  %v2458_v47 = vadd.f32 %v2426_v10, %v2358_v12  ;;  %v13833_v22 = vld [vmem:[%s26209_s1 + $0xbd8] sm:$0xff] }
 0x194   : > { %v2459_v41 = vadd.f32 %v2427_v43, %v2359_v9  ;;  %v1161_v50 = vadd.f32 %v1129_v0, %v1061_v58  ;;  %v1329_v42 = vmul.f32 %v13737_v15, %v18507_v54  ;;  %v2726_v53 = vmul.f32 %v14182_v29, %v18760_v38  ;;  %v13864_v29 = vld [vmem:[%s26209_s1 + $0xcd0] sm:$0xff] }
 0x195   : > { %v2727_v62 = vmul.f32 %v14183_v3, %v18760_v38  ;;  %v1260_v10 = vadd.f32 %v1228_v52, %v1160_v44  ;;  %v1428_v43 = vmul.f32 %v13768_v19, %v18523_v61  ;;  %v2558_v37 = vadd.f32 %v2526_v36, %v2458_v47  ;;  %v13865_v3 = vld [vmem:[%s26209_s1 + $0xcd8] sm:$0xff] }
 0x196   : > { %v2559_v30 = vadd.f32 %v2527_v57, %v2459_v41  ;;  %v1261_v55 = vadd.f32 %v1229_v14, %v1161_v50  ;;  %v1429_v33 = vmul.f32 %v13769_v6, %v18523_v61  ;;  %v2826_v0 = vmul.f32 %v14214_v59, %v18792_v11  ;;  %v13897_v41 = vld [vmem:[%s26209_s1 + $0xdd8] sm:$0xff]  ;;  %v13928_v59 = vld [vmem:[%s26209_s1 + $0xed0] sm:$0xff] }
 0x197   : > { %v2827_v48 = vmul.f32 %v14215_v4, %v18792_v11  ;;  %v1360_v36 = vadd.f32 %v1328_v60, %v1260_v10  ;;  %v1528_v57 = vmul.f32 %v13800_v28, %v18540_v5  ;;  %v2658_v52 = vadd.f32 %v2626_v35, %v2558_v37  ;;  %v13896_v35 = vld [vmem:[%s26209_s1 + $0xdd0] sm:$0xff]  ;;  %v13929_v4 = vld [vmem:[%s26209_s1 + $0xed8] sm:$0xff] }
 0x198   : > { %v2659_v15 = vadd.f32 %v2627_v21, %v2559_v30  ;;  %v1361_v12 = vadd.f32 %v1329_v42, %v1261_v55  ;;  %v1529_v9 = vmul.f32 %v13801_v51, %v18540_v5  ;;  %v2926_v58 = vmul.f32 %v14246_v63, %v18812_v31  ;;  %v13961_v37 = vld [vmem:[%s26209_s1 + $0xfd8] sm:$0xff]  ;;  %v13992_v30 = vld [vmem:[%s26209_s1 + $0x10d0] sm:$0xff]  ;;  %v497_v63 = vld [vmem:[%s26209_s1 + $0xe0] sm:$0xff] }
 0x199   : > { %v2927_v14 = vmul.f32 %v14247_v2, %v18812_v31  ;;  %v1460_v19 = vadd.f32 %v1428_v43, %v1360_v36  ;;  %v1628_v44 = vmul.f32 %v13832_v23, %v18546_v7  ;;  %v2758_v21 = vadd.f32 %v2726_v53, %v2658_v52  ;;  %v13960_v53 = vld [vmem:[%s26209_s1 + $0xfd0] sm:$0xff]  ;;  %v463_v52 = vld [vmem:[%s26210_s2 + $0xe0] sm:$0xff] }
 0x19a   : > { %v2759_v60 = vadd.f32 %v2727_v62, %v2659_v15  ;;  %v1461_v6 = vadd.f32 %v1429_v33, %v1361_v12  ;;  %v1629_v47 = vmul.f32 %v13833_v22, %v18546_v7  ;;  %v1728_v42 = vmul.f32 %v13864_v29, %v18562_v18  ;;  %v13514_v15 = vld [vmem:[%s26209_s1 + $0x1e0] sm:$0xff]  ;;  %v13515_v12 = vld [vmem:[%s26209_s1 + $0x1e8] sm:$0xff] }
 0x19b   : > { %v1560_v50 = vadd.f32 %v1528_v57, %v1460_v19  ;;  %v1729_v28 = vmul.f32 %v13865_v3, %v18562_v18  ;;  %v2858_v62 = vadd.f32 %v2826_v0, %v2758_v21  ;;  %v1828_v51 = vmul.f32 %v13896_v35, %v18568_v20  ;;  %v498_v0 = vld [vmem:[%s26209_s1 + $0xe8] sm:$0xff]  ;;  %v13546_v19 = vld [vmem:[%s26209_s1 + $0x2e0] sm:$0xff] }
 0x19c   : > { %v2859_v10 = vadd.f32 %v2827_v48, %v2759_v60  ;;  %v1561_v43 = vadd.f32 %v1529_v9, %v1461_v6  ;;  %v1829_v55 = vmul.f32 %v13897_v41, %v18568_v20  ;;  %v1928_v33 = vmul.f32 %v13928_v59, %v18588_v32  ;;  %v13547_v6 = vld [vmem:[%s26209_s1 + $0x2e8] sm:$0xff]  ;;  %v13993_v59 = vld [vmem:[%s26209_s1 + $0x10d8] sm:$0xff] }
 0x19d   : > { %v1660_v2 = vadd.f32 %v1628_v44, %v1560_v50  ;;  %v1929_v23 = vmul.f32 %v13929_v4, %v18588_v32  ;;  %v2958_v48 = vadd.f32 %v2926_v58, %v2858_v62  ;;  %v2028_v22 = vmul.f32 %v13960_v53, %v18600_v40  ;;  %v464_v58 = vld [vmem:[%s26210_s2 + $0xe8] sm:$0xff] }
 0x19e   : > { %v2959_v36 = vadd.f32 %v2927_v14, %v2859_v10  ;;  %v1661_v57 = vadd.f32 %v1629_v47, %v1561_v43  ;;  %v2029_v29 = vmul.f32 %v13961_v37, %v18600_v40  ;;  %v2128_v3 = vmul.f32 %v13992_v30, %v18610_v45  ;;  %v13578_v47 = vld [vmem:[%s26209_s1 + $0x3e0] sm:$0xff]  ;;  %v14024_v10 = vld [vmem:[%s26209_s1 + $0x11d0] sm:$0xff] }
 0x19f   : > { %v1760_v9 = vadd.f32 %v1728_v42, %v1660_v2  ;;  %v530_v14 = vmul.f32 %v18402_v8, %v497_v63  ;;  %v2990_v44 = vmax.f32 %v2958_v48, 0.0  ;;  %v531_v60 = vmul.f32 %v18402_v8, %v498_v0  ;;  %v13610_v37 = vld [vmem:[%s26209_s1 + $0x4e0] sm:$0xff]  ;;  %v14025_v63 = vld [vmem:[%s26209_s1 + $0x11d8] sm:$0xff]  ;;  %v13611_v48 = vld [vmem:[%s26209_s1 + $0x4e8] sm:$0xff] }
 0x1a0   : > { %v2991_v35 = vmax.f32 %v2959_v36, 0.0  ;;  %v1761_v21 = vadd.f32 %v1729_v28, %v1661_v57  ;;  %v630_v50 = vmul.f32 %v13514_v15, %v18415_v13  ;;  %v631_v42 = vmul.f32 %v13515_v12, %v18415_v13  ;;  %v13579_v28 = vld [vmem:[%s26209_s1 + $0x3e8] sm:$0xff]  ;;  %v13642_v12 = vld [vmem:[%s26209_s1 + $0x5e0] sm:$0xff] }
 0x1a1   : > { %v1860_v41 = vadd.f32 %v1828_v51, %v1760_v9  ;;  %v562_v4 = vadd.f32 %v530_v14, %v463_v52  ;;  %v563_v43 = vadd.f32 %v531_v60, %v464_v58  ;;  %v730_v51 = vmul.f32 %v13546_v19, %v18422_v16 }
 0x1a2   : > { %v16829_v53 = vpack.c.bf16 %v2991_v35, %v2990_v44  ;;  %v1861_v62 = vadd.f32 %v1829_v55, %v1761_v21  ;;  %v731_v0 = vmul.f32 %v13547_v6, %v18422_v16  ;;  %v830_v55 = vmul.f32 %v13578_v47, %v18439_v24  ;;  %v13643_v44 = vld [vmem:[%s26209_s1 + $0x5e8] sm:$0xff]  ;;  %v13674_v47 = vld [vmem:[%s26209_s1 + $0x6e0] sm:$0xff] }
 0x1a3   : > { %v1960_v30 = vadd.f32 %v1928_v33, %v1860_v41  ;;  %v662_v2 = vadd.f32 %v630_v50, %v562_v4  ;;  %v2129_v57 = vmul.f32 %v13993_v59, %v18610_v45  ;;  %v14056_v33 = vld [vmem:[%s26209_s1 + $0x12d0] sm:$0xff]  ;;  %v663_v52 = vadd.f32 %v631_v42, %v563_v43  ;;  %v13675_v42 = vld [vmem:[%s26209_s1 + $0x6e8] sm:$0xff]  ;;  %v13706_v43 = vld [vmem:[%s26209_s1 + $0x7e0] sm:$0xff] }
 0x1a4   : > { %16830 = vmatpush1.bf16.msra.mxu0 %v16829_v53  ;;  %v1961_v36 = vadd.f32 %v1929_v23, %v1861_v62  ;;  %v831_v15 = vmul.f32 %v13579_v28, %v18439_v24  ;;  %v2228_v58 = vmul.f32 %v14024_v10, %v18619_v49  ;;  %v14057_v23 = vld [vmem:[%s26209_s1 + $0x12d8] sm:$0xff]  ;;  %v930_v19 = vmul.f32 %v13610_v37, %v18445_v26 }
 0x1a5   : > { %16831 = vmatprep.subr.bf16.mxu0 %v26245_v1  ;;  %v2060_v9 = vadd.f32 %v2028_v22, %v1960_v30  ;;  %v762_v14 = vadd.f32 %v730_v51, %v662_v2  ;;  %v2229_v21 = vmul.f32 %v14025_v63, %v18619_v49  ;;  %v14088_v22 = vld [vmem:[%s26209_s1 + $0x13d0] sm:$0xff]  ;;  %v763_v60 = vadd.f32 %v731_v0, %v663_v52  ;;  %v14121_v30 = vld [vmem:[%s26209_s1 + $0x14d8] sm:$0xff]  ;;  %v13707_v0 = vld [vmem:[%s26209_s1 + $0x7e8] sm:$0xff] }
 0x1a6   : > { %v2061_v35 = vadd.f32 %v2029_v29, %v1961_v36  ;;  %v931_v6 = vmul.f32 %v13611_v48, %v18445_v26  ;;  %v2328_v59 = vmul.f32 %v14056_v33, %v18631_v56  ;;  %v14089_v29 = vld [vmem:[%s26209_s1 + $0x13d8] sm:$0xff]  ;;  %v1030_v50 = vmul.f32 %v13642_v12, %v18462_v34  ;;  %v14152_v36 = vld [vmem:[%s26209_s1 + $0x15d0] sm:$0xff]  ;;  %v13738_v52 = vld [vmem:[%s26209_s1 + $0x8e0] sm:$0xff] }
 0x1a7   : > { %v2160_v41 = vadd.f32 %v2128_v3, %v2060_v9  ;;  %v862_v4 = vadd.f32 %v830_v55, %v762_v14  ;;  %v2329_v53 = vmul.f32 %v14057_v23, %v18631_v56  ;;  %v14120_v3 = vld [vmem:[%s26209_s1 + $0x14d0] sm:$0xff]  ;;  %v863_v62 = vadd.f32 %v831_v15, %v763_v60  ;;  %v14153_v9 = vld [vmem:[%s26209_s1 + $0x15d8] sm:$0xff]  ;;  %v13739_v14 = vld [vmem:[%s26209_s1 + $0x8e8] sm:$0xff] }
 0x1a8   : > { %v2161_v28 = vadd.f32 %v2129_v57, %v2061_v35  ;;  %v1031_v10 = vmul.f32 %v13643_v44, %v18462_v34  ;;  %v2428_v37 = vmul.f32 %v14088_v22, %v18693_v25  ;;  %v1130_v2 = vmul.f32 %v13674_v47, %v18470_v39  ;;  %v14184_v35 = vld [vmem:[%s26209_s1 + $0x16d0] sm:$0xff]  ;;  %v13770_v60 = vld [vmem:[%s26209_s1 + $0x9e0] sm:$0xff] }
 0x1a9   : > { %v2260_v51 = vadd.f32 %v2228_v58, %v2160_v41  ;;  %v962_v63 = vadd.f32 %v930_v19, %v862_v4  ;;  %v2429_v48 = vmul.f32 %v14089_v29, %v18693_v25  ;;  %v963_v57 = vadd.f32 %v931_v6, %v863_v62  ;;  %v14185_v41 = vld [vmem:[%s26209_s1 + $0x16d8] sm:$0xff]  ;;  %v13771_v4 = vld [vmem:[%s26209_s1 + $0x9e8] sm:$0xff]  ;;  %v13802_v62 = vld [vmem:[%s26209_s1 + $0xae0] sm:$0xff] }
 0x1aa   : > { %v2261_v55 = vadd.f32 %v2229_v21, %v2161_v28  ;;  %v1131_v33 = vmul.f32 %v13675_v42, %v18470_v39  ;;  %v2528_v12 = vmul.f32 %v14120_v3, %v18696_v27  ;;  %v1230_v23 = vmul.f32 %v13706_v43, %v18488_v46  ;;  %v14216_v28 = vld [vmem:[%s26209_s1 + $0x17d0] sm:$0xff] }
 0x1ab   : > { %v2360_v15 = vadd.f32 %v2328_v59, %v2260_v51  ;;  %v1062_v58 = vadd.f32 %v1030_v50, %v962_v63  ;;  %v2529_v44 = vmul.f32 %v14121_v30, %v18696_v27  ;;  %v1063_v21 = vadd.f32 %v1031_v10, %v963_v57  ;;  %v14217_v51 = vld [vmem:[%s26209_s1 + $0x17d8] sm:$0xff]  ;;  %v13803_v63 = vld [vmem:[%s26209_s1 + $0xae8] sm:$0xff]  ;;  %v13834_v57 = vld [vmem:[%s26209_s1 + $0xbe0] sm:$0xff] }
 0x1ac   : > { %v2361_v19 = vadd.f32 %v2329_v53, %v2261_v55  ;;  %v1231_v22 = vmul.f32 %v13707_v0, %v18488_v46  ;;  %v2628_v47 = vmul.f32 %v14152_v36, %v18738_v17  ;;  %v1330_v29 = vmul.f32 %v13738_v52, %v18507_v54  ;;  %v14248_v55 = vld [vmem:[%s26209_s1 + $0x18d0] sm:$0xff] }
 0x1ad   : > { %v2460_v6 = vadd.f32 %v2428_v37, %v2360_v15  ;;  %v1162_v59 = vadd.f32 %v1130_v2, %v1062_v58  ;;  %v2629_v42 = vmul.f32 %v14153_v9, %v18738_v17  ;;  %v1163_v53 = vadd.f32 %v1131_v33, %v1063_v21  ;;  %v14249_v15 = vld [vmem:[%s26209_s1 + $0x18d8] sm:$0xff]  ;;  %v13835_v58 = vld [vmem:[%s26209_s1 + $0xbe8] sm:$0xff] }
 0x1ae   : > { %v2461_v50 = vadd.f32 %v2429_v48, %v2361_v19  ;;  %v1331_v3 = vmul.f32 %v13739_v14, %v18507_v54  ;;  %v2728_v43 = vmul.f32 %v14184_v35, %v18760_v38  ;;  %v1430_v30 = vmul.f32 %v13770_v60, %v18523_v61  ;;  %v13866_v35 = vld [vmem:[%s26209_s1 + $0xce0] sm:$0xff] }
 0x1af   : > { %v2560_v10 = vadd.f32 %v2528_v12, %v2460_v6  ;;  %v1262_v37 = vadd.f32 %v1230_v23, %v1162_v59  ;;  %v2729_v0 = vmul.f32 %v14185_v41, %v18760_v38  ;;  %v1263_v48 = vadd.f32 %v1231_v22, %v1163_v53  ;;  %v13898_v41 = vld [vmem:[%s26209_s1 + $0xde0] sm:$0xff] }
 0x1b0   : > { %v2561_v2 = vadd.f32 %v2529_v44, %v2461_v50  ;;  %v1431_v36 = vmul.f32 %v13771_v4, %v18523_v61  ;;  %v2828_v52 = vmul.f32 %v14216_v28, %v18792_v11  ;;  %v1530_v9 = vmul.f32 %v13802_v62, %v18540_v5  ;;  %v13930_v28 = vld [vmem:[%s26209_s1 + $0xee0] sm:$0xff] }
 0x1b1   : > { %v2660_v33 = vadd.f32 %v2628_v47, %v2560_v10  ;;  %v1362_v12 = vadd.f32 %v1330_v29, %v1262_v37  ;;  %v2829_v14 = vmul.f32 %v14217_v51, %v18792_v11  ;;  %v1363_v19 = vadd.f32 %v1331_v3, %v1263_v48  ;;  %v13867_v47 = vld [vmem:[%s26209_s1 + $0xce8] sm:$0xff] }
 0x1b2   : > { %v2661_v23 = vadd.f32 %v2629_v42, %v2561_v2  ;;  %v1531_v44 = vmul.f32 %v13803_v63, %v18540_v5  ;;  %v2928_v22 = vmul.f32 %v14248_v55, %v18812_v31  ;;  %v1630_v6 = vmul.f32 %v13834_v57, %v18546_v7  ;;  %v13899_v42 = vld [vmem:[%s26209_s1 + $0xde8] sm:$0xff] }
 0x1b3   : > { %v2760_v21 = vadd.f32 %v2728_v43, %v2660_v33  ;;  %v1462_v60 = vadd.f32 %v1430_v30, %v1362_v12  ;;  %v2929_v29 = vmul.f32 %v14249_v15, %v18812_v31  ;;  %v1463_v4 = vadd.f32 %v1431_v36, %v1363_v19  ;;  %v13931_v10 = vld [vmem:[%s26209_s1 + $0xee8] sm:$0xff]  ;;  %v13962_v43 = vld [vmem:[%s26209_s1 + $0xfe0] sm:$0xff]  ;;  %v500_v33 = vld [vmem:[%s26209_s1 + $0xf8] sm:$0xff] }
 0x1b4   : > { %v2761_v59 = vadd.f32 %v2729_v0, %v2661_v23  ;;  %v1631_v50 = vmul.f32 %v13835_v58, %v18546_v7  ;;  %v1730_v62 = vmul.f32 %v13866_v35, %v18562_v18  ;;  %v1731_v30 = vmul.f32 %v13867_v47, %v18562_v18  ;;  %v13963_v2 = vld [vmem:[%s26209_s1 + $0xfe8] sm:$0xff]  ;;  %v499_v0 = vld [vmem:[%s26209_s1 + $0xf0] sm:$0xff] }
 0x1b5   : > { %v2860_v53 = vadd.f32 %v2828_v52, %v2760_v21  ;;  %v1562_v3 = vadd.f32 %v1530_v9, %v1462_v60  ;;  %v1563_v37 = vadd.f32 %v1531_v44, %v1463_v4  ;;  %v1830_v63 = vmul.f32 %v13898_v41, %v18568_v20  ;;  %v13516_v52 = vld [vmem:[%s26209_s1 + $0x1f0] sm:$0xff] }
 0x1b6   : > { %v2861_v51 = vadd.f32 %v2829_v14, %v2761_v59  ;;  %v1831_v36 = vmul.f32 %v13899_v42, %v18568_v20  ;;  %v1930_v57 = vmul.f32 %v13930_v28, %v18588_v32  ;;  %v1931_v9 = vmul.f32 %v13931_v10, %v18588_v32  ;;  %v465_v23 = vld [vmem:[%s26210_s2 + $0xf0] sm:$0xff]  ;;  %v13517_v14 = vld [vmem:[%s26209_s1 + $0x1f8] sm:$0xff]  ;;  %v13994_v59 = vld [vmem:[%s26209_s1 + $0x10e0] sm:$0xff] }
 0x1b7   : > { %v2960_v55 = vadd.f32 %v2928_v22, %v2860_v53  ;;  %v1662_v48 = vadd.f32 %v1630_v6, %v1562_v3  ;;  %v1663_v12 = vadd.f32 %v1631_v50, %v1563_v37  ;;  %v2030_v58 = vmul.f32 %v13962_v43, %v18600_v40  ;;  %v13548_v19 = vld [vmem:[%s26209_s1 + $0x2f0] sm:$0xff]  ;;  %v466_v22 = vld [vmem:[%s26210_s2 + $0xf8] sm:$0xff]  ;;  %v13995_v28 = vld [vmem:[%s26209_s1 + $0x10e8] sm:$0xff] }
 0x1b8   : > { %v2961_v15 = vadd.f32 %v2929_v29, %v2861_v51  ;;  %v2031_v21 = vmul.f32 %v13963_v2, %v18600_v40  ;;  %v532_v60 = vmul.f32 %v18402_v8, %v499_v0  ;;  %v13549_v6 = vld [vmem:[%s26209_s1 + $0x2f8] sm:$0xff]  ;;  %v533_v29 = vmul.f32 %v18402_v8, %v500_v33  ;;  %v13580_v50 = vld [vmem:[%s26209_s1 + $0x3f0] sm:$0xff]  ;;  %v14026_v51 = vld [vmem:[%s26209_s1 + $0x11e0] sm:$0xff] }
 0x1b9   : > { %v2992_v44 = vmax.f32 %v2960_v55, 0.0  ;;  %v1762_v35 = vadd.f32 %v1730_v62, %v1662_v48  ;;  %v1763_v41 = vadd.f32 %v1731_v30, %v1663_v12  ;;  %v632_v4 = vmul.f32 %v13516_v52, %v18415_v13  ;;  %v13581_v8 = vld [vmem:[%s26209_s1 + $0x3f8] sm:$0xff]  ;;  %v14027_v0 = vld [vmem:[%s26209_s1 + $0x11e8] sm:$0xff]  ;;  %v13644_v12 = vld [vmem:[%s26209_s1 + $0x5f0] sm:$0xff] }
 0x1ba   : > { %v2993_v47 = vmax.f32 %v2961_v15, 0.0  ;;  %v564_v53 = vadd.f32 %v532_v60, %v465_v23  ;;  %v633_v3 = vmul.f32 %v13517_v14, %v18415_v13  ;;  %v732_v62 = vmul.f32 %v13548_v19, %v18422_v16 }
 0x1bb   : > { %v1862_v42 = vadd.f32 %v1830_v63, %v1762_v35  ;;  %v1863_v43 = vadd.f32 %v1831_v36, %v1763_v41  ;;  %v565_v37 = vadd.f32 %v533_v29, %v466_v22  ;;  %v733_v30 = vmul.f32 %v13549_v6, %v18422_v16  ;;  %v13612_v63 = vld [vmem:[%s26209_s1 + $0x4f0] sm:$0xff]  ;;  %v13613_v36 = vld [vmem:[%s26209_s1 + $0x4f8] sm:$0xff] }
 0x1bc   : > { %v16832_v10 = vpack.c.bf16 %v2993_v47, %v2992_v44  ;;  %v2130_v2 = vmul.f32 %v13994_v59, %v18610_v45  ;;  %v664_v55 = vadd.f32 %v632_v4, %v564_v53  ;;  %v832_v48 = vmul.f32 %v13580_v50, %v18439_v24  ;;  %v13676_v47 = vld [vmem:[%s26209_s1 + $0x6f0] sm:$0xff]  ;;  %v13677_v50 = vld [vmem:[%s26209_s1 + $0x6f8] sm:$0xff] }
 0x1bd   : > { %v1962_v13 = vadd.f32 %v1930_v57, %v1862_v42  ;;  %v1963_v16 = vadd.f32 %v1931_v9, %v1863_v43  ;;  %v2131_v33 = vmul.f32 %v13995_v28, %v18610_v45  ;;  %v14058_v57 = vld [vmem:[%s26209_s1 + $0x12e0] sm:$0xff]  ;;  %v665_v52 = vadd.f32 %v633_v3, %v565_v37  ;;  %v14059_v9 = vld [vmem:[%s26209_s1 + $0x12e8] sm:$0xff] }
 0x1be   : > { %16833 = vmatpush1.bf16.msra.mxu0 %v16832_v10  ;;  %v833_v15 = vmul.f32 %v13581_v8, %v18439_v24  ;;  %v2230_v14 = vmul.f32 %v14026_v51, %v18619_v49  ;;  %v764_v19 = vadd.f32 %v732_v62, %v664_v55  ;;  %v932_v44 = vmul.f32 %v13612_v63, %v18445_v26  ;;  %v13645_v24 = vld [vmem:[%s26209_s1 + $0x5f8] sm:$0xff]  ;;  %v14122_v28 = vld [vmem:[%s26209_s1 + $0x14e0] sm:$0xff]  ;;  %v13708_v62 = vld [vmem:[%s26209_s1 + $0x7f0] sm:$0xff] }
 0x1bf   : > { %16834 = vmatprep.subr.bf16.mxu0 %v26245_v1  ;;  %v2062_v23 = vadd.f32 %v2030_v58, %v1962_v13  ;;  %v2063_v35 = vadd.f32 %v2031_v21, %v1963_v16  ;;  %v2231_v22 = vmul.f32 %v14027_v0, %v18619_v49  ;;  %v14090_v58 = vld [vmem:[%s26209_s1 + $0x13e0] sm:$0xff]  ;;  %v765_v60 = vadd.f32 %v733_v30, %v665_v52  ;;  %v14091_v21 = vld [vmem:[%s26209_s1 + $0x13e8] sm:$0xff]  ;;  %v13709_v30 = vld [vmem:[%s26209_s1 + $0x7f8] sm:$0xff] }
 0x1c0   : > { %v933_v6 = vmul.f32 %v13613_v36, %v18445_v26  ;;  %v2330_v59 = vmul.f32 %v14058_v57, %v18631_v56  ;;  %v864_v29 = vadd.f32 %v832_v48, %v764_v19  ;;  %v1032_v4 = vmul.f32 %v13644_v12, %v18462_v34  ;;  %v14123_v43 = vld [vmem:[%s26209_s1 + $0x14e8] sm:$0xff]  ;;  %v14154_v13 = vld [vmem:[%s26209_s1 + $0x15e0] sm:$0xff]  ;;  %v13740_v55 = vld [vmem:[%s26209_s1 + $0x8f0] sm:$0xff] }
 0x1c1   : > { %v2162_v41 = vadd.f32 %v2130_v2, %v2062_v23  ;;  %v2163_v42 = vadd.f32 %v2131_v33, %v2063_v35  ;;  %v2331_v26 = vmul.f32 %v14059_v9, %v18631_v56  ;;  %v865_v53 = vadd.f32 %v833_v15, %v765_v60  ;;  %v14155_v16 = vld [vmem:[%s26209_s1 + $0x15e8] sm:$0xff]  ;;  %v13741_v52 = vld [vmem:[%s26209_s1 + $0x8f8] sm:$0xff]  ;;  %v14186_v12 = vld [vmem:[%s26209_s1 + $0x16e0] sm:$0xff] }
 0x1c2   : > { %v1033_v3 = vmul.f32 %v13645_v24, %v18462_v34  ;;  %v2430_v10 = vmul.f32 %v14090_v58, %v18693_v25  ;;  %v964_v51 = vadd.f32 %v932_v44, %v864_v29  ;;  %v1132_v37 = vmul.f32 %v13676_v47, %v18470_v39  ;;  %v13772_v9 = vld [vmem:[%s26209_s1 + $0x9f0] sm:$0xff]  ;;  %v14187_v24 = vld [vmem:[%s26209_s1 + $0x16e8] sm:$0xff]  ;;  %v13773_v58 = vld [vmem:[%s26209_s1 + $0x9f8] sm:$0xff] }
 0x1c3   : > { %v2262_v8 = vadd.f32 %v2230_v14, %v2162_v41  ;;  %v2263_v63 = vadd.f32 %v2231_v22, %v2163_v42  ;;  %v2431_v34 = vmul.f32 %v14091_v21, %v18693_v25  ;;  %v965_v2 = vadd.f32 %v933_v6, %v865_v53  ;;  %v14218_v6 = vld [vmem:[%s26209_s1 + $0x17e0] sm:$0xff] }
 0x1c4   : > { %v1133_v0 = vmul.f32 %v13677_v50, %v18470_v39  ;;  %v2530_v36 = vmul.f32 %v14122_v28, %v18696_v27  ;;  %v1064_v33 = vadd.f32 %v1032_v4, %v964_v51  ;;  %v1232_v57 = vmul.f32 %v13708_v62, %v18488_v46  ;;  %v14219_v4 = vld [vmem:[%s26209_s1 + $0x17e8] sm:$0xff]  ;;  %v14250_v53 = vld [vmem:[%s26209_s1 + $0x18e0] sm:$0xff] }
 0x1c5   : > { %v2362_v48 = vadd.f32 %v2330_v59, %v2262_v8  ;;  %v2363_v15 = vadd.f32 %v2331_v26, %v2263_v63  ;;  %v2531_v39 = vmul.f32 %v14123_v43, %v18696_v27  ;;  %v1065_v23 = vadd.f32 %v1033_v3, %v965_v2  ;;  %v13804_v59 = vld [vmem:[%s26209_s1 + $0xaf0] sm:$0xff]  ;;  %v13805_v26 = vld [vmem:[%s26209_s1 + $0xaf8] sm:$0xff]  ;;  %v14251_v51 = vld [vmem:[%s26209_s1 + $0x18e8] sm:$0xff] }
 0x1c6   : > { %v1233_v14 = vmul.f32 %v13709_v30, %v18488_v46  ;;  %v2630_v44 = vmul.f32 %v14154_v13, %v18738_v17  ;;  %v1164_v35 = vadd.f32 %v1132_v37, %v1064_v33  ;;  %v1332_v22 = vmul.f32 %v13740_v55, %v18507_v54  ;;  %v13836_v8 = vld [vmem:[%s26209_s1 + $0xbf0] sm:$0xff]  ;;  %v13837_v63 = vld [vmem:[%s26209_s1 + $0xbf8] sm:$0xff] }
 0x1c7   : > { %v2462_v19 = vadd.f32 %v2430_v10, %v2362_v48  ;;  %v2463_v60 = vadd.f32 %v2431_v34, %v2363_v15  ;;  %v2631_v46 = vmul.f32 %v14155_v16, %v18738_v17  ;;  %v1165_v47 = vadd.f32 %v1133_v0, %v1065_v23  ;;  %v13868_v0 = vld [vmem:[%s26209_s1 + $0xcf0] sm:$0xff]  ;;  %v13869_v33 = vld [vmem:[%s26209_s1 + $0xcf8] sm:$0xff] }
 0x1c8   : > { %v1333_v41 = vmul.f32 %v13741_v52, %v18507_v54  ;;  %v2730_v29 = vmul.f32 %v14186_v12, %v18760_v38  ;;  %v1264_v50 = vadd.f32 %v1232_v57, %v1164_v35  ;;  %v1432_v42 = vmul.f32 %v13772_v9, %v18523_v61  ;;  %v13901_v9 = vld [vmem:[%s26209_s1 + $0xdf8] sm:$0xff] }
 0x1c9   : > { %v2562_v21 = vadd.f32 %v2530_v36, %v2462_v19  ;;  %v2563_v28 = vadd.f32 %v2531_v39, %v2463_v60  ;;  %v2731_v54 = vmul.f32 %v14187_v24, %v18760_v38  ;;  %v1265_v3 = vadd.f32 %v1233_v14, %v1165_v47  ;;  %v13900_v39 = vld [vmem:[%s26209_s1 + $0xdf0] sm:$0xff]  ;;  %v13933_v60 = vld [vmem:[%s26209_s1 + $0xef8] sm:$0xff] }
 0x1ca   : > { %v1433_v62 = vmul.f32 %v13773_v58, %v18523_v61  ;;  %v2830_v43 = vmul.f32 %v14218_v6, %v18792_v11  ;;  %v1364_v37 = vadd.f32 %v1332_v22, %v1264_v50  ;;  %v1532_v30 = vmul.f32 %v13804_v59, %v18540_v5 }
 0x1cb   : > { %v2662_v10 = vadd.f32 %v2630_v44, %v2562_v21  ;;  %v2663_v34 = vadd.f32 %v2631_v46, %v2563_v28  ;;  %v2831_v61 = vmul.f32 %v14219_v4, %v18792_v11  ;;  %v1365_v13 = vadd.f32 %v1333_v41, %v1265_v3 }
 0x1cc   : > { %v1533_v2 = vmul.f32 %v13805_v26, %v18540_v5  ;;  %v2930_v48 = vmul.f32 %v14250_v53, %v18812_v31  ;;  %v1464_v36 = vadd.f32 %v1432_v42, %v1364_v37  ;;  %v1632_v16 = vmul.f32 %v13836_v8, %v18546_v7  ;;  %v14028_v8 = vld [vmem:[%s26209_s1 + $0x11f0] sm:$0xff] }
 0x1cd   : > { %v2762_v55 = vadd.f32 %v2730_v29, %v2662_v10  ;;  %v2763_v57 = vadd.f32 %v2731_v54, %v2663_v34  ;;  %v2931_v52 = vmul.f32 %v14251_v51, %v18812_v31  ;;  %v1465_v15 = vadd.f32 %v1433_v62, %v1365_v13  ;;  %v13965_v29 = vld [vmem:[%s26209_s1 + $0xff8] sm:$0xff] }
 0x1ce   : > { %v1633_v5 = vmul.f32 %v13837_v63, %v18546_v7  ;;  %v1564_v23 = vadd.f32 %v1532_v30, %v1464_v36  ;;  %v1732_v14 = vmul.f32 %v13868_v0, %v18562_v18  ;;  %v1733_v24 = vmul.f32 %v13869_v33, %v18562_v18  ;;  %v13932_v7 = vld [vmem:[%s26209_s1 + $0xef0] sm:$0xff]  ;;  %v13997_v54 = vld [vmem:[%s26209_s1 + $0x10f8] sm:$0xff] }
 0x1cf   : > { %v2862_v12 = vadd.f32 %v2830_v43, %v2762_v55  ;;  %v2863_v19 = vadd.f32 %v2831_v61, %v2763_v57  ;;  %v1565_v44 = vadd.f32 %v1533_v2, %v1465_v15  ;;  %v1832_v58 = vmul.f32 %v13900_v39, %v18568_v20  ;;  %v13964_v18 = vld [vmem:[%s26209_s1 + $0xff0] sm:$0xff]  ;;  %v14029_v43 = vld [vmem:[%s26209_s1 + $0x11f8] sm:$0xff] }
 0x1d0   : > { %v1664_v22 = vadd.f32 %v1632_v16, %v1564_v23  ;;  %v1833_v47 = vmul.f32 %v13901_v9, %v18568_v20  ;;  %v1932_v21 = vmul.f32 %v13932_v7, %v18588_v32  ;;  %v1933_v42 = vmul.f32 %v13933_v60, %v18588_v32  ;;  %v13996_v20 = vld [vmem:[%s26209_s1 + $0x10f0] sm:$0xff]  ;;  %v14061_v34 = vld [vmem:[%s26209_s1 + $0x12f8] sm:$0xff] }
 0x1d1   : > { %v2962_v35 = vadd.f32 %v2930_v48, %v2862_v12  ;;  %v2963_v46 = vadd.f32 %v2931_v52, %v2863_v19  ;;  %v1665_v6 = vadd.f32 %v1633_v5, %v1565_v44  ;;  %v2032_v28 = vmul.f32 %v13964_v18, %v18600_v40  ;;  %v14060_v30 = vld [vmem:[%s26209_s1 + $0x12f0] sm:$0xff]  ;;  %v14093_v55 = vld [vmem:[%s26209_s1 + $0x13f8] sm:$0xff] }
 0x1d2   : > { %v1764_v59 = vadd.f32 %v1732_v14, %v1664_v22  ;;  %v2033_v62 = vmul.f32 %v13965_v29, %v18600_v40  ;;  %v2132_v10 = vmul.f32 %v13996_v20, %v18610_v45  ;;  %v2133_v37 = vmul.f32 %v13997_v54, %v18610_v45  ;;  %v14092_v45 = vld [vmem:[%s26209_s1 + $0x13f0] sm:$0xff]  ;;  %v14125_v57 = vld [vmem:[%s26209_s1 + $0x14f8] sm:$0xff] }
 0x1d3   : > { %v2994_v41 = vmax.f32 %v2962_v35, 0.0  ;;  %v2995_v4 = vmax.f32 %v2963_v46, 0.0  ;;  %v1765_v50 = vadd.f32 %v1733_v24, %v1665_v6  ;;  %v2232_v63 = vmul.f32 %v14028_v8, %v18619_v49  ;;  %v14124_v16 = vld [vmem:[%s26209_s1 + $0x14f0] sm:$0xff]  ;;  %v14157_v12 = vld [vmem:[%s26209_s1 + $0x15f8] sm:$0xff]  ;;  %v3002_v8 = vld [vmem:[%s26211_s3 + $0x20] sm:$0xff] }
 0x1d4   : > { %v1864_v26 = vadd.f32 %v1832_v58, %v1764_v59  ;;  %v2233_v13 = vmul.f32 %v14029_v43, %v18619_v49  ;;  %v2332_v0 = vmul.f32 %v14060_v30, %v18631_v56  ;;  %v2333_v36 = vmul.f32 %v14061_v34, %v18631_v56  ;;  %v14156_v5 = vld [vmem:[%s26209_s1 + $0x15f0] sm:$0xff]  ;;  %v14189_v44 = vld [vmem:[%s26209_s1 + $0x16f8] sm:$0xff]  ;;  %v3007_v43 = vld [vmem:[%s26211_s3 + $0x48] sm:$0xff] }
 0x1d5   : > { %v16835_v53 = vpack.c.bf16 %v2995_v4, %v2994_v41  ;;  %v1865_v3 = vadd.f32 %v1833_v47, %v1765_v50  ;;  %v2432_v49 = vmul.f32 %v14092_v45, %v18693_v25  ;;  %v2433_v15 = vmul.f32 %v14093_v55, %v18693_v25  ;;  %v14188_v9 = vld [vmem:[%s26209_s1 + $0x16f0] sm:$0xff]  ;;  %v14221_v58 = vld [vmem:[%s26209_s1 + $0x17f8] sm:$0xff]  ;;  %v3014_v45 = vld [vmem:[%s26211_s3 + $0x80] sm:$0xff] }
 0x1d6   : > { %v1964_v32 = vadd.f32 %v1932_v21, %v1864_v26  ;;  %v2532_v56 = vmul.f32 %v14124_v16, %v18696_v27  ;;  %v2533_v14 = vmul.f32 %v14125_v57, %v18696_v27  ;;  %v2632_v25 = vmul.f32 %v14156_v5, %v18738_v17  ;;  %v14220_v35 = vld [vmem:[%s26209_s1 + $0x17f0] sm:$0xff]  ;;  %v14253_v18 = vld [vmem:[%s26209_s1 + $0x18f8] sm:$0xff]  ;;  %v3019_v55 = vld [vmem:[%s26211_s3 + $0xa8] sm:$0xff] }
 0x1d7   : > { %16836 = vmatpush1.bf16.msra.mxu0 %v16835_v53  ;;  %v1965_v51 = vadd.f32 %v1933_v42, %v1865_v3  ;;  %v2633_v7 = vmul.f32 %v14157_v12, %v18738_v17  ;;  %v2732_v27 = vmul.f32 %v14188_v9, %v18760_v38  ;;  %v2733_v46 = vmul.f32 %v14189_v44, %v18760_v38  ;;  %v14252_v6 = vld [vmem:[%s26209_s1 + $0x18f0] sm:$0xff]  ;;  %v2998_v3 = vld [vmem:[%s26211_s3] sm:$0xff]  ;;  %v3013_v34 = vld [vmem:[%s26211_s3 + $0x78] sm:$0xff] }
 0x1d8   : > { %16837 = vmatprep.subr.bf16.mxu0 %v26245_v1  ;;  %v2064_v40 = vadd.f32 %v2032_v28, %v1964_v32  ;;  %v2832_v17 = vmul.f32 %v14220_v35, %v18792_v11  ;;  %v2833_v59 = vmul.f32 %v14221_v58, %v18792_v11  ;;  %v2932_v29 = vmul.f32 %v14252_v6, %v18812_v31  ;;  %v3001_v11 = vld [vmem:[%s26211_s3 + $0x18] sm:$0xff]  ;;  %v3008_v30 = vld [vmem:[%s26211_s3 + $0x50] sm:$0xff]  ;;  %v3026_v5 = vld [vmem:[%s26211_s3 + $0xe0] sm:$0xff] }
 0x1d9   : > { %v2065_v61 = vadd.f32 %v2033_v62, %v1965_v51  ;;  %v2933_v38 = vmul.f32 %v14253_v18, %v18812_v31  ;;  %v3000_v31 = vld [vmem:[%s26211_s3 + $0x10] sm:$0xff]  ;;  %v3003_v62 = vld [vmem:[%s26211_s3 + $0x28] sm:$0xff]  ;;  %v3005_v32 = vld [vmem:[%s26211_s3 + $0x38] sm:$0xff] }
 0x1da   : > { %v2164_v2 = vadd.f32 %v2132_v10, %v2064_v40  ;;  %v3004_v10 = vld [vmem:[%s26211_s3 + $0x30] sm:$0xff]  ;;  %v3006_v51 = vld [vmem:[%s26211_s3 + $0x40] sm:$0xff]  ;;  %v3011_v40 = vld [vmem:[%s26211_s3 + $0x68] sm:$0xff] }
 0x1db   : > { %v2165_v48 = vadd.f32 %v2133_v37, %v2065_v61  ;;  %v3009_v37 = vld [vmem:[%s26211_s3 + $0x58] sm:$0xff]  ;;  %v3012_v61 = vld [vmem:[%s26211_s3 + $0x70] sm:$0xff]  ;;  %v3031_v12 = vld [vmem:[%s26211_s3 + $0x108] sm:$0xff] }
 0x1dc   : > { %v2264_v33 = vadd.f32 %v2232_v63, %v2164_v2  ;;  %v3010_v63 = vld [vmem:[%s26211_s3 + $0x60] sm:$0xff]  ;;  %v3017_v2 = vld [vmem:[%s26211_s3 + $0x98] sm:$0xff]  ;;  %v3020_v16 = vld [vmem:[%s26211_s3 + $0xb0] sm:$0xff] }
 0x1dd   : > { %v2265_v52 = vadd.f32 %v2233_v13, %v2165_v48  ;;  %v3015_v13 = vld [vmem:[%s26211_s3 + $0x88] sm:$0xff]  ;;  %v3018_v48 = vld [vmem:[%s26211_s3 + $0xa0] sm:$0xff]  ;;  %v3025_v57 = vld [vmem:[%s26211_s3 + $0xd8] sm:$0xff] }
 0x1de   : > { %v2364_v39 = vadd.f32 %v2332_v0, %v2264_v33  ;;  %v3016_v0 = vld [vmem:[%s26211_s3 + $0x90] sm:$0xff]  ;;  %v3023_v33 = vld [vmem:[%s26211_s3 + $0xc8] sm:$0xff]  ;;  %v3037_v44 = vld [vmem:[%s26211_s3 + $0x138] sm:$0xff] }
 0x1df   : > { %v2365_v23 = vadd.f32 %v2333_v36, %v2265_v52  ;;  %v3021_v36 = vld [vmem:[%s26211_s3 + $0xb8] sm:$0xff]  ;;  %v3024_v52 = vld [vmem:[%s26211_s3 + $0xd0] sm:$0xff]  ;;  %v3038_v35 = vld [vmem:[%s26211_s3 + $0x140] sm:$0xff] }
 0x1e0   : > { %v2464_v19 = vadd.f32 %v2432_v49, %v2364_v39  ;;  %v3022_v49 = vld [vmem:[%s26211_s3 + $0xc0] sm:$0xff]  ;;  %v3029_v39 = vld [vmem:[%s26211_s3 + $0xf8] sm:$0xff]  ;;  %v3032_v9 = vld [vmem:[%s26211_s3 + $0x110] sm:$0xff] }
 0x1e1   : > { %v2465_v24 = vadd.f32 %v2433_v15, %v2365_v23  ;;  %v3027_v15 = vld [vmem:[%s26211_s3 + $0xe8] sm:$0xff]  ;;  %v3030_v23 = vld [vmem:[%s26211_s3 + $0x100] sm:$0xff]  ;;  %v3044_v6 = vld [vmem:[%s26211_s3 + $0x170] sm:$0xff] }
 0x1e2   : > { %v2564_v22 = vadd.f32 %v2532_v56, %v2464_v19  ;;  %v3028_v56 = vld [vmem:[%s26211_s3 + $0xf0] sm:$0xff]  ;;  %v3035_v19 = vld [vmem:[%s26211_s3 + $0x128] sm:$0xff]  ;;  %v3049_v18 = vld [vmem:[%s26211_s3 + $0x198] sm:$0xff] }
 0x1e3   : > { %v2565_v60 = vadd.f32 %v2533_v14, %v2465_v24  ;;  %v3033_v14 = vld [vmem:[%s26211_s3 + $0x118] sm:$0xff]  ;;  %v3036_v24 = vld [vmem:[%s26211_s3 + $0x130] sm:$0xff]  ;;  %v3043_v58 = vld [vmem:[%s26211_s3 + $0x168] sm:$0xff] }
 0x1e4   : > { %v2664_v47 = vadd.f32 %v2632_v25, %v2564_v22  ;;  %v3034_v25 = vld [vmem:[%s26211_s3 + $0x120] sm:$0xff]  ;;  %v3041_v22 = vld [vmem:[%s26211_s3 + $0x158] sm:$0xff] }
 0x1e5   : > { %v2665_v41 = vadd.f32 %v2633_v7, %v2565_v60  ;;  %v3039_v7 = vld [vmem:[%s26211_s3 + $0x148] sm:$0xff]  ;;  %v3042_v60 = vld [vmem:[%s26211_s3 + $0x160] sm:$0xff] }
 0x1e6   : > { %v2764_v21 = vadd.f32 %v2732_v27, %v2664_v47  ;;  %v3040_v27 = vld [vmem:[%s26211_s3 + $0x150] sm:$0xff]  ;;  %v3047_v47 = vld [vmem:[%s26211_s3 + $0x188] sm:$0xff] }
 0x1e7   : > { %v2765_v4 = vadd.f32 %v2733_v46, %v2665_v41  ;;  %v3045_v46 = vld [vmem:[%s26211_s3 + $0x178] sm:$0xff]  ;;  %v3048_v41 = vld [vmem:[%s26211_s3 + $0x190] sm:$0xff] }
 0x1e8   : > { %v2864_v50 = vadd.f32 %v2832_v17, %v2764_v21  ;;  %v3046_v17 = vld [vmem:[%s26211_s3 + $0x180] sm:$0xff] }
 0x1e9   : > { %v2865_v42 = vadd.f32 %v2833_v59, %v2765_v4  ;;  %v3051_v59 = vld [vmem:[%s26211_s3 + $0x1a8] sm:$0xff]  ;;  %v3050_v21 = vld [vmem:[%s26211_s3 + $0x1a0] sm:$0xff]  ;;  %v3052_v4 = vld [vmem:[%s26211_s3 + $0x1b0] sm:$0xff] }
 0x1ea   : > { %v2964_v20 = vadd.f32 %v2932_v29, %v2864_v50  ;;  %v3053_v29 = vld [vmem:[%s26211_s3 + $0x1b8] sm:$0xff]  ;;  %v3054_v50 = vld [vmem:[%s26211_s3 + $0x1c0] sm:$0xff] }
 0x1eb   : > { %v2965_v26 = vadd.f32 %v2933_v38, %v2865_v42  ;;  %v3055_v38 = vld [vmem:[%s26211_s3 + $0x1c8] sm:$0xff]  ;;  %v3057_v42 = vld [vmem:[%s26211_s3 + $0x1d8] sm:$0xff] }
 0x1ec   : > { %v2996_v28 = vmax.f32 %v2964_v20, 0.0  ;;  %v3056_v20 = vld [vmem:[%s26211_s3 + $0x1d0] sm:$0xff] }
 0x1ed   : > { %v2997_v54 = vmax.f32 %v2965_v26, 0.0  ;;  %v3059_v26 = vld [vmem:[%s26211_s3 + $0x1e8] sm:$0xff] }
 0x1ef   : > { %v16838_v53 = vpack.c.bf16 %v2997_v54, %v2996_v28  ;;  %v3058_v28 = vld [vmem:[%s26211_s3 + $0x1e0] sm:$0xff]  ;;  %v3061_v54 = vld [vmem:[%s26211_s3 + $0x1f8] sm:$0xff] }
 0x1f1   : > { %16839 = vmatpush1.bf16.msra.mxu0 %v16838_v53  ;;  %v3060_v53 = vld [vmem:[%s26211_s3 + $0x1f0] sm:$0xff] }
 0x1f4   : > { %3239 = vmatmul.mubr.f32.vlgmr.msra.gmra.mrb[0].mxu0 %v2998_v3  ;;  %v3063_v3 = vld [vmem:[%s26211_s3 + $0x208] sm:$0xff] }
 0x1f5   : > { %3243 = vmatprep.mubr.f32.mxu0 %v3001_v11  ;;  %v3062_v11 = vld [vmem:[%s26211_s3 + $0x200] sm:$0xff] }
 0x1f8   : > { %3244 = vmatmul.mubr.f32.gmra.mrb[2].mxu0 %v3000_v31  ;;  %v3065_v31 = vld [vmem:[%s26211_s3 + $0x218] sm:$0xff] }
 0x1f9   : > { %3248 = vmatprep.mubr.f32.mxu0 %v3003_v62  ;;  %v3064_v62 = vld [vmem:[%s26211_s3 + $0x210] sm:$0xff] }
 0x1fc   : > { %3249 = vmatmul.mubr.f32.gmra.mrb[4].mxu0 %v3002_v8  ;;  %v3067_v8 = vld [vmem:[%s26211_s3 + $0x228] sm:$0xff] }
 0x1fd   : > { %3253 = vmatprep.mubr.f32.mxu0 %v3005_v32  ;;  %v3066_v32 = vld [vmem:[%s26211_s3 + $0x220] sm:$0xff] }
 0x200   : > { %3254 = vmatmul.mubr.f32.gmra.mrb[6].mxu0 %v3004_v10  ;;  %v3069_v10 = vld [vmem:[%s26211_s3 + $0x238] sm:$0xff] }
 0x201   : > { %3258 = vmatprep.mubr.f32.mxu0 %v3007_v43  ;;  %v26244_v43 = vlaneseq }
 0x204   : > { %3259 = vmatmul.mubr.f32.gmra.mrb[8].mxu0 %v3006_v51  ;;  %v22070_v51 = vshrl.u32 %v26244_v43, 7 }
 0x205   : > { %3263 = vmatprep.mubr.f32.mxu0 %v3009_v37  ;;  %v3068_v37 = vld [vmem:[%s26211_s3 + $0x230] sm:$0xff] }
 0x206   : > { %26483 = vst [vmem:[#allocation17_spill] sm:$0xff] %v22070_v51 }
 0x208   : > { %3264 = vmatmul.mubr.f32.gmra.mrb[10].mxu0 %v3008_v30  ;;  %v3071_v30 = vld [vmem:[%s26211_s3 + $0x248] sm:$0xff] }
 0x209   : > { %3268 = vmatprep.mubr.f32.mxu0 %v3011_v40  ;;  %v22079_v40 = vadd.s32 8, %v22070_v51 }
 0x20b   : > { %26484 = vst [vmem:[#allocation18_spill] sm:$0xff] %v22079_v40 }
 0x20c   : > { %3269 = vmatmul.mubr.f32.gmra.mrb[12].mxu0 %v3010_v63  ;;  %v22082_v63 = vmul.u32 2, %v22070_v51 }
 0x20d   : > { %3273 = vmatprep.mubr.f32.mxu0 %v3013_v34  ;;  %v22085_v34 = vmul.u32 2, %v22079_v40 }
 0x20e   : > { %26485 = vst [vmem:[#allocation19_spill] sm:$0xff] %v22082_v63 }
 0x20f   : > { %26486 = vst [vmem:[#allocation20_spill] sm:$0xff] %v22085_v34 }
 0x210   : > { %3274 = vmatmul.mubr.f32.gmra.mrb[14].mxu0 %v3012_v61  ;;  %v3070_v61 = vld [vmem:[%s26211_s3 + $0x240] sm:$0xff] }
 0x211   : > { %3278 = vmatprep.mubr.f32.mxu0 %v3015_v13  ;;  %v3073_v13 = vld [vmem:[%s26211_s3 + $0x258] sm:$0xff] }
 0x214   : > { %3279 = vmatmul.mubr.f32.gmra.mrb[16].mxu0 %v3014_v45  ;;  %v22094_v45 = vand.u32 127, %v26244_v43 }
 0x215   : > { %3283 = vmatprep.mubr.f32.mxu0 %v3017_v2  ;;  %v22097_v2 = vadd.s32 1, %v22082_v63 }
 0x216   : > { %vm4066_vm10 = vcmp.eq.s32.totalorder %v22094_v45, %v22082_v63  ;;  %vm4067_vm11 = vcmp.eq.s32.totalorder %v22094_v45, %v22085_v34 }
 0x217   : > { %26487 = vst [vmem:[#allocation21_spill] sm:$0xff] %v22097_v2  ;;  %vm3663_vm0 = vcmp.eq.s32.totalorder %v22094_v45, %v22097_v2  ;;  %vm22411_vm12 = vmpackc.low %vm4067_vm11, %vm4066_vm10 }
 0x218   : > { %3284 = vmatmul.mubr.f32.gmra.mrb[18].mxu0 %v3016_v0  ;;  %v22100_v0 = vadd.s32 1, %v22085_v34 }
 0x219   : > { %3288 = vmatprep.mubr.f32.mxu0 %v3019_v55  ;;  %v22103_v55 = vadd.s32 16, %v22070_v51 }
 0x21a   : > { %26488 = vst [vmem:[#allocation22_spill] sm:$0xff] %v22100_v0  ;;  %vm3664_vm1 = vcmp.eq.s32.totalorder %v22094_v45, %v22100_v0 }
 0x21b   : > { %26489 = vst [vmem:[#allocation23_spill] sm:$0xff] %v22103_v55  ;;  %vm22115_vm2 = vmpackc.low %vm3664_vm1, %vm3663_vm0 }
 0x21c   : > { %3289 = vmatmul.mubr.f32.gmra.mrb[20].mxu0 %v3018_v48  ;;  %v22110_v48 = vmul.u32 2, %v22103_v55 }
 0x21d   : > { %3293 = vmatprep.mubr.f32.mxu0 %v3021_v36  ;;  %v3072_v36 = vld [vmem:[%s26211_s3 + $0x250] sm:$0xff] }
 0x21e   : > { %vm26234_vm13 = vcmp.eq.s32.totalorder %v22094_v45, %v22110_v48 }
 0x220   : > { %3294 = vmatmul.mubr.f32.gmra.mrb[22].mxu0 %v3020_v16  ;;  %v26490_v16 = vmov 0 }
 0x221   : > { %3298 = vmatprep.mubr.f32.mxu0 %v3023_v33  ;;  %v26491_v16 = vsel %vm22115_vm2, 4294967295, %v26490_v16  ;;  %v3075_v33 = vld [vmem:[%s26211_s3 + $0x268] sm:$0xff] }
 0x224   : > { %3299 = vmatmul.mubr.f32.gmra.mrb[24].mxu0 %v3022_v49  ;;  %v26259_v49 = vmov 1.0|1.0  }
 0x225   : > { %3303 = vmatprep.mubr.f32.mxu0 %v3025_v57  ;;  %16841 = vmatprep.subr.msk.bf16.mxu1 %vm22115_vm2, %v26259_v49  ;;  %v22126_v57 = vadd.s32 1, %v22110_v48 }
 0x226   : > { %16843 = vmatpush3.bf16.msk.msra.mxu1 %vm22115_vm2, %v26259_v49 }
 0x227   : > { %26492 = vst [vmem:[#allocation24_spill] sm:$0xff] %v22126_v57  ;;  %vm3665_vm3 = vcmp.eq.s32.totalorder %v22094_v45, %v22126_v57 }
 0x228   : > { %3304 = vmatmul.mubr.f32.gmra.mrb[26].mxu0 %v3024_v52  ;;  %v3074_v52 = vld [vmem:[%s26211_s3 + $0x260] sm:$0xff] }
 0x229   : > { %3308 = vmatprep.mubr.f32.mxu0 %v3027_v15  ;;  %v26255_v15 = vmov 0.0  }
 0x22c   : > { %3309 = vmatmul.mubr.f32.gmra.mrb[28].mxu0 %v3026_v5  ;;  %v14259_v5 = vsel %vm3665_vm3, 1.0, %v26255_v15 }
 0x22d   : > { %3313 = vmatprep.mubr.f32.mxu0 %v3029_v39  ;;  %v3077_v39 = vld [vmem:[%s26211_s3 + $0x278] sm:$0xff]  ;;  %16216 = vmatprep.subr.msk.mxu1 %vm3721_vm4, %v14259_v5 }
 0x22e   : > { %16217 = vmatpush3.msk.msra.mxu1 %vm3721_vm4, %v14259_v5  ;;  %v3112_v5 = vld [vmem:[%s26211_s3 + $0x390] sm:$0xff] }
 0x230   : > { %3314 = vmatmul.mubr.f32.gmra.mrb[30].mxu0 %v3028_v56  ;;  %v3076_v56 = vld [vmem:[%s26211_s3 + $0x270] sm:$0xff] }
 0x231   : > { %3318 = vmatprep.mubr.f32.mxu0 %v3031_v12  ;;  %v3079_v12 = vld [vmem:[%s26211_s3 + $0x288] sm:$0xff] }
 0x234   : > { %3319 = vmatmul.mubr.f32.gmra.mrb[32].mxu0 %v3030_v23  ;;  %v3078_v23 = vld [vmem:[%s26211_s3 + $0x280] sm:$0xff] }
 0x235   : > { %3323 = vmatprep.mubr.f32.mxu0 %v3033_v14  ;;  %v3081_v14 = vld [vmem:[%s26211_s3 + $0x298] sm:$0xff] }
 0x238   : > { %3324 = vmatmul.mubr.f32.gmra.mrb[34].mxu0 %v3032_v9  ;;  %v3080_v9 = vld [vmem:[%s26211_s3 + $0x290] sm:$0xff] }
 0x239   : > { %3328 = vmatprep.mubr.f32.mxu0 %v3035_v19  ;;  %v3083_v19 = vld [vmem:[%s26211_s3 + $0x2a8] sm:$0xff] }
 0x23c   : > { %3329 = vmatmul.mubr.f32.gmra.mrb[36].mxu0 %v3034_v25  ;;  %v3082_v25 = vld [vmem:[%s26211_s3 + $0x2a0] sm:$0xff] }
 0x23d   : > { %3333 = vmatprep.mubr.f32.mxu0 %v3037_v44  ;;  %v3085_v44 = vld [vmem:[%s26211_s3 + $0x2b8] sm:$0xff] }
 0x240   : > { %3334 = vmatmul.mubr.f32.gmra.mrb[38].mxu0 %v3036_v24  ;;  %v3084_v24 = vld [vmem:[%s26211_s3 + $0x2b0] sm:$0xff] }
 0x241   : > { %3338 = vmatprep.mubr.f32.mxu0 %v3039_v7  ;;  %v3087_v7 = vld [vmem:[%s26211_s3 + $0x2c8] sm:$0xff] }
 0x244   : > { %3339 = vmatmul.mubr.f32.gmra.mrb[40].mxu0 %v3038_v35  ;;  %v3086_v35 = vld [vmem:[%s26211_s3 + $0x2c0] sm:$0xff] }
 0x245   : > { %3343 = vmatprep.mubr.f32.mxu0 %v3041_v22  ;;  %v3089_v22 = vld [vmem:[%s26211_s3 + $0x2d8] sm:$0xff] }
 0x248   : > { %3344 = vmatmul.mubr.f32.gmra.mrb[42].mxu0 %v3040_v27  ;;  %v3088_v27 = vld [vmem:[%s26211_s3 + $0x2d0] sm:$0xff] }
 0x249   : > { %3348 = vmatprep.mubr.f32.mxu0 %v3043_v58  ;;  %v3091_v58 = vld [vmem:[%s26211_s3 + $0x2e8] sm:$0xff] }
 0x24c   : > { %3349 = vmatmul.mubr.f32.gmra.mrb[44].mxu0 %v3042_v60  ;;  %v3090_v60 = vld [vmem:[%s26211_s3 + $0x2e0] sm:$0xff] }
 0x24d   : > { %3353 = vmatprep.mubr.f32.mxu0 %v3045_v46  ;;  %v3093_v46 = vld [vmem:[%s26211_s3 + $0x2f8] sm:$0xff] }
 0x250   : > { %3354 = vmatmul.mubr.f32.gmra.mrb[46].mxu0 %v3044_v6  ;;  %v3092_v6 = vld [vmem:[%s26211_s3 + $0x2f0] sm:$0xff] }
 0x251   : > { %3358 = vmatprep.mubr.f32.mxu0 %v3047_v47  ;;  %v3095_v47 = vld [vmem:[%s26211_s3 + $0x308] sm:$0xff] }
 0x254   : > { %3359 = vmatmul.mubr.f32.gmra.mrb[48].mxu0 %v3046_v17  ;;  %v3094_v17 = vld [vmem:[%s26211_s3 + $0x300] sm:$0xff] }
 0x255   : > { %3363 = vmatprep.mubr.f32.mxu0 %v3049_v18  ;;  %v3097_v18 = vld [vmem:[%s26211_s3 + $0x318] sm:$0xff] }
 0x258   : > { %3364 = vmatmul.mubr.f32.gmra.mrb[50].mxu0 %v3048_v41  ;;  %v3096_v41 = vld [vmem:[%s26211_s3 + $0x310] sm:$0xff] }
 0x259   : > { %3368 = vmatprep.mubr.f32.mxu0 %v3051_v59  ;;  %v3099_v59 = vld [vmem:[%s26211_s3 + $0x328] sm:$0xff] }
 0x25c   : > { %3369 = vmatmul.mubr.f32.gmra.mrb[52].mxu0 %v3050_v21  ;;  %v3098_v21 = vld [vmem:[%s26211_s3 + $0x320] sm:$0xff] }
 0x25d   : > { %3373 = vmatprep.mubr.f32.mxu0 %v3053_v29  ;;  %v3101_v29 = vld [vmem:[%s26211_s3 + $0x338] sm:$0xff] }
 0x260   : > { %3374 = vmatmul.mubr.f32.gmra.mrb[54].mxu0 %v3052_v4  ;;  %v3100_v4 = vld [vmem:[%s26211_s3 + $0x330] sm:$0xff] }
 0x261   : > { %3378 = vmatprep.mubr.f32.mxu0 %v3055_v38  ;;  %v3103_v38 = vld [vmem:[%s26211_s3 + $0x348] sm:$0xff] }
 0x264   : > { %3379 = vmatmul.mubr.f32.gmra.mrb[56].mxu0 %v3054_v50  ;;  %v22224_v50 = vadd.s32 2, %v22082_v63 }
 0x265   : > { %3383 = vmatprep.mubr.f32.mxu0 %v3057_v42  ;;  %v22227_v42 = vadd.s32 2, %v22085_v34 }
 0x266   : > { %vm3651_vm5 = vcmp.eq.s32.totalorder %v22094_v45, %v22224_v50 }
 0x267   : > { %vm3652_vm6 = vcmp.eq.s32.totalorder %v22094_v45, %v22227_v42 }
 0x268   : > { %3384 = vmatmul.mubr.f32.gmra.mrb[58].mxu0 %v3056_v20  ;;  %v3102_v20 = vld [vmem:[%s26211_s3 + $0x340] sm:$0xff]  ;;  %vm22236_vm7 = vmpackc.low %vm3652_vm6, %vm3651_vm5 }
 0x269   : > { %3388 = vmatprep.mubr.f32.mxu0 %v3059_v26  ;;  %v26493_v26 = vmov 0  ;;  %16845 = vmatprep.subr.msk.bf16.mxu1 %vm22236_vm7, %v26259_v49 }
 0x26a   : > { %v26494_v26 = vsel %vm22236_vm7, 4294967295, %v26493_v26 }
 0x26b   : > { %26495 = vst [vmem:[#allocation25_spill] sm:$0xff] %v26494_v26 }
 0x26c   : > { %3389 = vmatmul.mubr.f32.gmra.mrb[60].mxu0 %v3058_v28  ;;  %v3105_v28 = vld [vmem:[%s26211_s3 + $0x358] sm:$0xff] }
 0x26d   : > { %3393 = vmatprep.mubr.f32.mxu0 %v3061_v54  ;;  %v3104_v54 = vld [vmem:[%s26211_s3 + $0x350] sm:$0xff] }
 0x270   : > { %3394 = vmatmul.mubr.f32.gmra.mrb[62].mxu0 %v3060_v53  ;;  %v3107_v53 = vld [vmem:[%s26211_s3 + $0x368] sm:$0xff] }
 0x271   : > { %3398 = vmatprep.mubr.f32.mxu0 %v3063_v3 }
 0x274   : > { %3399 = vmatmul.mubr.f32.gmra.mrb[64].mxu0 %v3062_v11 }
 0x275   : > { %3403 = vmatprep.mubr.f32.mxu0 %v3065_v31  ;;  %v3106_v31 = vld [vmem:[%s26211_s3 + $0x360] sm:$0xff] }
 0x278   : > { %3404 = vmatmul.mubr.f32.gmra.mrb[66].mxu0 %v3064_v62  ;;  %v3109_v62 = vld [vmem:[%s26211_s3 + $0x378] sm:$0xff] }
 0x279   : > { %3408 = vmatprep.mubr.f32.mxu0 %v3067_v8 }
 0x27c   : > { %3409 = vmatmul.mubr.f32.gmra.mrb[68].mxu0 %v3066_v32 }
 0x27d   : > { %3413 = vmatprep.mubr.f32.mxu0 %v3069_v10  ;;  %v3108_v10 = vld [vmem:[%s26211_s3 + $0x370] sm:$0xff] }
 0x280   : > { %3414 = vmatmul.mubr.f32.gmra.mrb[70].mxu0 %v3068_v37  ;;  %v3111_v37 = vld [vmem:[%s26211_s3 + $0x388] sm:$0xff] }
 0x281   : > { %3418 = vmatprep.mubr.f32.mxu0 %v3071_v30 }
 0x284   : > { %3419 = vmatmul.mubr.f32.gmra.mrb[72].mxu0 %v3070_v61 }
 0x285   : > { %3423 = vmatprep.mubr.f32.mxu0 %v3073_v13  ;;  %v3110_v13 = vld [vmem:[%s26211_s3 + $0x380] sm:$0xff] }
 0x288   : > { %3424 = vmatmul.mubr.f32.gmra.mrb[74].mxu0 %v3072_v36  ;;  %v3113_v36 = vld [vmem:[%s26211_s3 + $0x398] sm:$0xff] }
 0x289   : > { %3428 = vmatprep.mubr.f32.mxu0 %v3075_v33 }
 0x28c   : > { %3429 = vmatmul.mubr.f32.gmra.mrb[76].mxu0 %v3074_v52 }
 0x28d   : > { %3433 = vmatprep.mubr.f32.mxu0 %v3077_v39  ;;  %v3115_v39 = vld [vmem:[%s26211_s3 + $0x3a8] sm:$0xff] }
 0x290   : > { %3434 = vmatmul.mubr.f32.gmra.mrb[78].mxu0 %v3076_v56 }
 0x291   : > { %3438 = vmatprep.mubr.f32.mxu0 %v3079_v12 }
 0x294   : > { %3439 = vmatmul.mubr.f32.gmra.mrb[80].mxu0 %v3078_v23  ;;  %v3114_v23 = vld [vmem:[%s26211_s3 + $0x3a0] sm:$0xff] }
 0x295   : > { %3443 = vmatprep.mubr.f32.mxu0 %v3081_v14  ;;  %v3117_v14 = vld [vmem:[%s26211_s3 + $0x3b8] sm:$0xff] }
 0x298   : > { %3444 = vmatmul.mubr.f32.gmra.mrb[82].mxu0 %v3080_v9 }
 0x299   : > { %3448 = vmatprep.mubr.f32.mxu0 %v3083_v19 }
 0x29c   : > { %3449 = vmatmul.mubr.f32.gmra.mrb[84].mxu0 %v3082_v25  ;;  %v3116_v25 = vld [vmem:[%s26211_s3 + $0x3b0] sm:$0xff] }
 0x29d   : > { %3453 = vmatprep.mubr.f32.mxu0 %v3085_v44  ;;  %v3119_v44 = vld [vmem:[%s26211_s3 + $0x3c8] sm:$0xff] }
 0x2a0   : > { %3454 = vmatmul.mubr.f32.gmra.mrb[86].mxu0 %v3084_v24 }
 0x2a1   : > { %3458 = vmatprep.mubr.f32.mxu0 %v3087_v7 }
 0x2a4   : > { %3459 = vmatmul.mubr.f32.gmra.mrb[88].mxu0 %v3086_v35  ;;  %v3118_v35 = vld [vmem:[%s26211_s3 + $0x3c0] sm:$0xff] }
 0x2a5   : > { %3463 = vmatprep.mubr.f32.mxu0 %v3089_v22  ;;  %v3121_v22 = vld [vmem:[%s26211_s3 + $0x3d8] sm:$0xff] }
 0x2a8   : > { %3464 = vmatmul.mubr.f32.gmra.mrb[90].mxu0 %v3088_v27 }
 0x2a9   : > { %3468 = vmatprep.mubr.f32.mxu0 %v3091_v58 }
 0x2ac   : > { %3469 = vmatmul.mubr.f32.gmra.mrb[92].mxu0 %v3090_v60  ;;  %v3120_v60 = vld [vmem:[%s26211_s3 + $0x3d0] sm:$0xff] }
 0x2ad   : > { %3473 = vmatprep.mubr.f32.mxu0 %v3093_v46  ;;  %v3123_v46 = vld [vmem:[%s26211_s3 + $0x3e8] sm:$0xff] }
 0x2b0   : > { %3474 = vmatmul.mubr.f32.gmra.mrb[94].mxu0 %v3092_v6 }
 0x2b1   : > { %3478 = vmatprep.mubr.f32.mxu0 %v3095_v47 }
 0x2b4   : > { %3479 = vmatmul.mubr.f32.gmra.mrb[96].mxu0 %v3094_v17  ;;  %v3122_v17 = vld [vmem:[%s26211_s3 + $0x3e0] sm:$0xff] }
 0x2b5   : > { %3483 = vmatprep.mubr.f32.mxu0 %v3097_v18  ;;  %v3125_v18 = vld [vmem:[%s26211_s3 + $0x3f8] sm:$0xff] }
 0x2b8   : > { %3484 = vmatmul.mubr.f32.gmra.mrb[98].mxu0 %v3096_v41 }
 0x2b9   : > { %3488 = vmatprep.mubr.f32.mxu0 %v3099_v59 }
 0x2bc   : > { %3489 = vmatmul.mubr.f32.gmra.mrb[100].mxu0 %v3098_v21  ;;  %v3124_v21 = vld [vmem:[%s26211_s3 + $0x3f0] sm:$0xff] }
 0x2bd   : > { %3493 = vmatprep.mubr.f32.mxu0 %v3101_v29  ;;  %v3127_v29 = vld [vmem:[%s26211_s3 + $0x408] sm:$0xff] }
 0x2c0   : > { %3494 = vmatmul.mubr.f32.gmra.mrb[102].mxu0 %v3100_v4 }
 0x2c1   : > { %3498 = vmatprep.mubr.f32.mxu0 %v3103_v38 }
 0x2c4   : > { %3499 = vmatmul.mubr.f32.gmra.mrb[104].mxu0 %v3102_v20  ;;  %v3126_v20 = vld [vmem:[%s26211_s3 + $0x400] sm:$0xff] }
 0x2c5   : > { %3503 = vmatprep.mubr.f32.mxu0 %v3105_v28  ;;  %v3129_v28 = vld [vmem:[%s26211_s3 + $0x418] sm:$0xff] }
 0x2c7   : > { %v22252_v3 = vpop.f32.mrb[0].mxu0 }
 0x2c8   : > { %v3242_v11 = vpop.f32.mrb[1].mxu0  ;;  %3504 = vmatmul.mubr.f32.gmra.mrb[106].mxu0 %v3104_v54 }
 0x2c9   : > { %3508 = vmatprep.mubr.f32.mxu0 %v3107_v53  ;;  %v3128_v11 = vld [vmem:[%s26211_s3 + $0x410] sm:$0xff] }
 0x2cb   : > { %v22260_v8 = vpop.f32.mrb[2].mxu0 }
 0x2cc   : > { %v3247_v32 = vpop.f32.mrb[3].mxu0  ;;  %3509 = vmatmul.mubr.f32.gmra.mrb[108].mxu0 %v3106_v31  ;;  %v3131_v31 = vld [vmem:[%s26211_s3 + $0x428] sm:$0xff] }
 0x2cd   : > { %3513 = vmatprep.mubr.f32.mxu0 %v3109_v62 }
 0x2cf   : > { %v22268_v30 = vpop.f32.mrb[4].mxu0 }
 0x2d0   : > { %v3252_v61 = vpop.f32.mrb[5].mxu0  ;;  %3514 = vmatmul.mubr.f32.gmra.mrb[110].mxu0 %v3108_v10  ;;  %v3130_v10 = vld [vmem:[%s26211_s3 + $0x420] sm:$0xff] }
 0x2d1   : > { %3518 = vmatprep.mubr.f32.mxu0 %v3111_v37  ;;  %v3133_v37 = vld [vmem:[%s26211_s3 + $0x438] sm:$0xff] }
 0x2d3   : > { %v22276_v33 = vpop.f32.mrb[6].mxu0 }
 0x2d4   : > { %v3257_v52 = vpop.f32.mrb[7].mxu0  ;;  %3519 = vmatmul.mubr.f32.gmra.mrb[112].mxu0 %v3110_v13 }
 0x2d5   : > { %3523 = vmatprep.mubr.f32.mxu0 %v3113_v36  ;;  %v3132_v36 = vld [vmem:[%s26211_s3 + $0x430] sm:$0xff]  ;;  %v3135_v52 = vld [vmem:[%s26211_s3 + $0x448] sm:$0xff] }
 0x2d7   : > { %v22284_v56 = vpop.f32.mrb[8].mxu0 }
 0x2d8   : > { %v3262_v12 = vpop.f32.mrb[9].mxu0  ;;  %3524 = vmatmul.mubr.f32.gmra.mrb[114].mxu0 %v3112_v5 }
 0x2d9   : > { %3528 = vmatprep.mubr.f32.mxu0 %v3115_v39  ;;  %v3134_v12 = vld [vmem:[%s26211_s3 + $0x440] sm:$0xff] }
 0x2db   : > { %v22292_v9 = vpop.f32.mrb[10].mxu0 }
 0x2dc   : > { %v3267_v19 = vpop.f32.mrb[11].mxu0  ;;  %3529 = vmatmul.mubr.f32.gmra.mrb[116].mxu0 %v3114_v23  ;;  %v3137_v23 = vld [vmem:[%s26211_s3 + $0x458] sm:$0xff] }
 0x2dd   : > { %3533 = vmatprep.mubr.f32.mxu0 %v3117_v14 }
 0x2df   : > { %v22300_v24 = vpop.f32.mrb[12].mxu0 }
 0x2e0   : > { %v3272_v7 = vpop.f32.mrb[13].mxu0  ;;  %3534 = vmatmul.mubr.f32.gmra.mrb[118].mxu0 %v3116_v25  ;;  %v22375_v25 = vadd.s32 2, %v22110_v48 }
 0x2e1   : > { %3538 = vmatprep.mubr.f32.mxu0 %v3119_v44  ;;  %v3136_v44 = vld [vmem:[%s26211_s3 + $0x450] sm:$0xff]  ;;  %v3139_v7 = vld [vmem:[%s26211_s3 + $0x468] sm:$0xff] }
 0x2e2   : > { %vm3653_vm9 = vcmp.eq.s32.totalorder %v22094_v45, %v22375_v25 }
 0x2e3   : > { %v22308_v27 = vpop.f32.mrb[14].mxu0 }
 0x2e4   : > { %v3277_v58 = vpop.f32.mrb[15].mxu0  ;;  %3539 = vmatmul.mubr.f32.gmra.mrb[120].mxu0 %v3118_v35 }
 0x2e5   : > { %3543 = vmatprep.mubr.f32.mxu0 %v3121_v22  ;;  %v3138_v58 = vld [vmem:[%s26211_s3 + $0x460] sm:$0xff] }
 0x2e7   : > { %v22316_v6 = vpop.f32.mrb[16].mxu0 }
 0x2e8   : > { %v3282_v47 = vpop.f32.mrb[17].mxu0  ;;  %3544 = vmatmul.mubr.f32.gmra.mrb[122].mxu0 %v3120_v60  ;;  %v3141_v60 = vld [vmem:[%s26211_s3 + $0x478] sm:$0xff] }
 0x2e9   : > { %3548 = vmatprep.mubr.f32.mxu0 %v3123_v46  ;;  %v14256_v47 = vsel %vm3653_vm9, 1.0, %v26255_v15 }
 0x2eb   : > { %v22324_v41 = vpop.f32.mrb[18].mxu0 }
 0x2ec   : > { %v3287_v59 = vpop.f32.mrb[19].mxu0  ;;  %3549 = vmatmul.mubr.f32.gmra.mrb[124].mxu0 %v3122_v17 }
 0x2ed   : > { %3553 = vmatprep.mubr.f32.mxu0 %v3125_v18  ;;  %v3140_v18 = vld [vmem:[%s26211_s3 + $0x470] sm:$0xff]  ;;  %v3143_v59 = vld [vmem:[%s26211_s3 + $0x488] sm:$0xff] }
 0x2ef   : > { %v22332_v4 = vpop.f32.mrb[20].mxu0 }
 0x2f0   : > { %v3292_v38 = vpop.f32.mrb[21].mxu0  ;;  %3554 = vmatmul.mubr.f32.gmra.mrb[126].mxu0 %v3124_v21 }
 0x2f1   : > { %3558 = vmatprep.mubr.f32.mxu0 %v3127_v29  ;;  %v26496_v29 = vmov 0 }
 0x2f2   : > { %v26497_v29 = vsel %vm22411_vm12, 4294967295, %v26496_v29 }
 0x2f3   : > { %v22340_v54 = vpop.f32.mrb[22].mxu0  ;;  %26498 = vst [vmem:[#allocation26_spill] sm:$0xff] %v26497_v29 }
 0x2f4   : > { %v3297_v53 = vpop.f32.mrb[23].mxu0  ;;  %3559 = vmatmul.mubr.f32.gmra.mrb[128].mxu0 %v3126_v20  ;;  %v3142_v20 = vld [vmem:[%s26211_s3 + $0x480] sm:$0xff] }
 0x2f5   : > { %3563 = vmatprep.mubr.f32.mxu0 %v3129_v28  ;;  %v3145_v28 = vld [vmem:[%s26211_s3 + $0x498] sm:$0xff] }
 0x2f7   : > { %v22348_v62 = vpop.f32.mrb[24].mxu0 }
 0x2f8   : > { %v3302_v32 = vpop.f32.mrb[25].mxu0  ;;  %3564 = vmatmul.mubr.f32.gmra.mrb[130].mxu0 %v3128_v11 }
 0x2f9   : > { %3568 = vmatprep.mubr.f32.mxu0 %v3131_v31  ;;  %v3144_v31 = vld [vmem:[%s26211_s3 + $0x490] sm:$0xff]  ;;  %v3147_v32 = vld [vmem:[%s26211_s3 + $0x4a8] sm:$0xff] }
 0x2fb   : > { %v22356_v61 = vpop.f32.mrb[26].mxu0 }
 0x2fc   : > { %v3307_v13 = vpop.f32.mrb[27].mxu0  ;;  %3569 = vmatmul.mubr.f32.gmra.mrb[132].mxu0 %v3130_v10 }
 0x2fd   : > { %3573 = vmatprep.mubr.f32.mxu0 %v3133_v37  ;;  %v3146_v13 = vld [vmem:[%s26211_s3 + $0x4a0] sm:$0xff] }
 0x2ff   : > { %v22364_v5 = vpop.f32.mrb[28].mxu0 }
 0x300   : > { %v3312_v39 = vpop.f32.mrb[29].mxu0  ;;  %3574 = vmatmul.mubr.f32.gmra.mrb[134].mxu0 %v3132_v36  ;;  %v3149_v36 = vld [vmem:[%s26211_s3 + $0x4b8] sm:$0xff] }
 0x301   : > { %3578 = vmatprep.mubr.f32.mxu0 %v3135_v52 }
 0x303   : > { %v22372_v14 = vpop.f32.mrb[30].mxu0 }
 0x304   : > { %v3317_v19 = vpop.f32.mrb[31].mxu0  ;;  %3579 = vmatmul.mubr.f32.gmra.mrb[136].mxu0 %v3134_v12  ;;  %v3148_v12 = vld [vmem:[%s26211_s3 + $0x4b0] sm:$0xff] }
 0x305   : > { %3583 = vmatprep.mubr.f32.mxu0 %v3137_v23  ;;  %v3151_v23 = vld [vmem:[%s26211_s3 + $0x4c8] sm:$0xff] }
 0x307   : > { %v3320_v35 = vpop.f32.mrb[32].mxu0 }
 0x308   : > { %v3322_v22 = vpop.f32.mrb[33].mxu0  ;;  %3584 = vmatmul.mubr.f32.gmra.mrb[138].mxu0 %v3136_v44  ;;  %16218 = vmatprep.mubr.msk.f32.mxu1 %vm3672_vm8, %v3320_v35  ;;  %v3153_v35 = vld [vmem:[%s26211_s3 + $0x4d8] sm:$0xff] }
 0x309   : > { %3588 = vmatprep.mubr.f32.mxu0 %v3139_v7  ;;  %v3150_v7 = vld [vmem:[%s26211_s3 + $0x4c0] sm:$0xff] }
 0x30b   : > { %v3325_v46 = vpop.f32.mrb[34].mxu0 }
 0x30c   : > { %v3327_v17 = vpop.f32.mrb[35].mxu0  ;;  %3589 = vmatmul.mubr.f32.gmra.mrb[140].mxu0 %v3138_v58  ;;  %16219 = vmatmul.mubr.msk.f32.vlgmr.msra.gmra.mrb[0].mxu1 %vm3672_vm8, %v3325_v46  ;;  %v3155_v46 = vld [vmem:[%s26211_s3 + $0x4e8] sm:$0xff] }
 0x30d   : > { %3593 = vmatprep.mubr.f32.mxu0 %v3141_v60  ;;  %16847 = vmatpush3.bf16.msk.msra.mxu1 %vm22236_vm7, %v26259_v49  ;;  %v3152_v60 = vld [vmem:[%s26211_s3 + $0x4d0] sm:$0xff] }
 0x30e   : > { %16246 = vmatprep.subr.msk.mxu1 %vm3721_vm4, %v14256_v47 }
 0x30f   : > { %v3330_v21 = vpop.f32.mrb[36].mxu0 }
 0x310   : > { %v3332_v38 = vpop.f32.mrb[37].mxu0  ;;  %3594 = vmatmul.mubr.f32.gmra.mrb[142].mxu0 %v3140_v18  ;;  %16221 = vmatprep.mubr.msk.f32.mxu1 %vm3672_vm8, %v3330_v21  ;;  %v3154_v18 = vld [vmem:[%s26211_s3 + $0x4e0] sm:$0xff] }
 0x311   : > { %3598 = vmatprep.mubr.f32.mxu0 %v3143_v59  ;;  %16247 = vmatpush3.msk.msra.mxu1 %vm3721_vm4, %v14256_v47  ;;  %v3157_v59 = vld [vmem:[%s26211_s3 + $0x4f8] sm:$0xff] }
 0x312   : > { %16849 = vmatprep.subr.msk.bf16.mxu1 %vm22411_vm12, %v26259_v49 }
 0x313   : > { %v3335_v53 = vpop.f32.mrb[38].mxu0 }
 0x314   : > { %v3337_v11 = vpop.f32.mrb[39].mxu0  ;;  %3599 = vmatmul.mubr.f32.gmra.mrb[144].mxu0 %v3142_v20  ;;  %16222 = vmatmul.mubr.msk.f32.gmra.mrb[2].mxu1 %vm3672_vm8, %v3335_v53  ;;  %v3156_v20 = vld [vmem:[%s26211_s3 + $0x4f0] sm:$0xff] }
 0x315   : > { %3603 = vmatprep.mubr.f32.mxu0 %v3145_v28 }
 0x317   : > { %v3340_v10 = vpop.f32.mrb[40].mxu0 }
 0x318   : > { %v3342_v37 = vpop.f32.mrb[41].mxu0  ;;  %3604 = vmatmul.mubr.f32.gmra.mrb[146].mxu0 %v3144_v31  ;;  %16224 = vmatprep.mubr.msk.f32.mxu1 %vm3672_vm8, %v3340_v10 }
 0x319   : > { %3608 = vmatprep.mubr.f32.mxu0 %v3147_v32 }
 0x31b   : > { %v3345_v52 = vpop.f32.mrb[42].mxu0 }
 0x31c   : > { %v3347_v39 = vpop.f32.mrb[43].mxu0  ;;  %3609 = vmatmul.mubr.f32.gmra.mrb[148].mxu0 %v3146_v13  ;;  %16225 = vmatmul.mubr.msk.f32.gmra.mrb[4].mxu1 %vm3672_vm8, %v3345_v52 }
 0x31d   : > { %3613 = vmatprep.mubr.f32.mxu0 %v3149_v36 }
 0x31f   : > { %v3350_v19 = vpop.f32.mrb[44].mxu0 }
 0x320   : > { %v3352_v44 = vpop.f32.mrb[45].mxu0  ;;  %3614 = vmatmul.mubr.f32.gmra.mrb[150].mxu0 %v3148_v12  ;;  %16227 = vmatprep.mubr.msk.f32.mxu1 %vm3672_vm8, %v3350_v19  ;;  %v22485_v19 = vadd.s32 4294967295, %v22085_v34 }
 0x321   : > { %3618 = vmatprep.mubr.f32.mxu0 %v3151_v23  ;;  %v22482_v23 = vadd.s32 4294967295, %v22082_v63 }
 0x322   : > { %vm4291_vm15 = vcmp.eq.s32.totalorder %v22094_v45, %v22485_v19 }
 0x323   : > { %v3355_v22 = vpop.f32.mrb[46].mxu0  ;;  %vm4290_vm14 = vcmp.eq.s32.totalorder %v22094_v45, %v22482_v23 }
 0x324   : > { %v3357_v58 = vpop.f32.mrb[47].mxu0  ;;  %3619 = vmatmul.mubr.f32.gmra.mrb[152].mxu0 %v3150_v7  ;;  %16228 = vmatmul.mubr.msk.f32.gmra.mrb[6].mxu1 %vm3672_vm8, %v3355_v22  ;;  %v14300_v7 = vsel %vm26234_vm13, 1.0, %v26255_v15  ;;  %vm22505_vm0 = vmpackc.low %vm4291_vm15, %vm4290_vm14  ;;  %v26499_v22 = vmov 0  ;;  %vm26235_vm15 = vcmask 1042432  }
 0x325   : > { %3623 = vmatprep.mubr.f32.mxu0 %v3153_v35  ;;  %v26500_v22 = vsel %vm22505_vm0, 4294967295, %v26499_v22 }
 0x326   : > { %26501 = vst [vmem:[#allocation27_spill] sm:$0xff] %v26500_v22 }
 0x327   : > { %v3360_v47 = vpop.f32.mrb[48].mxu0 }
 0x328   : > { %v3362_v17 = vpop.f32.mrb[49].mxu0  ;;  %3624 = vmatmul.mubr.f32.gmra.mrb[154].mxu0 %v3152_v60  ;;  %16230 = vmatprep.mubr.msk.f32.mxu1 %vm3672_vm8, %v3360_v47 }
 0x329   : > { %3628 = vmatprep.mubr.f32.mxu0 %v3155_v46 }
 0x32b   : > { %v3365_v21 = vpop.f32.mrb[50].mxu0 }
 0x32c   : > { %v3367_v38 = vpop.f32.mrb[51].mxu0  ;;  %3629 = vmatmul.mubr.f32.gmra.mrb[156].mxu0 %v3154_v18  ;;  %16231 = vmatmul.mubr.msk.f32.gmra.mrb[8].mxu1 %vm3672_vm8, %v3365_v21  ;;  %v26504_v18 = vmov 0 }
 0x32d   : > { %3633 = vmatprep.mubr.f32.mxu0 %v3157_v59 }
 0x32f   : > { %v3370_v28 = vpop.f32.mrb[52].mxu0 }
 0x330   : > { %v3372_v53 = vpop.f32.mrb[53].mxu0  ;;  %3634 = vmatmul.mubr.f32.gmra.mrb[158].mxu0 %v3156_v20  ;;  %16233 = vmatprep.mubr.msk.f32.mxu1 %vm3672_vm8, %v3370_v28 }
 0x331   : > { %7190 = vmatprep.mubr.f32.mxu0 %v26255_v15 }
 0x333   : > { %v3375_v11 = vpop.f32.mrb[54].mxu0 }
 0x334   : > { %v3377_v31 = vpop.f32.mrb[55].mxu0  ;;  %16234 = vmatmul.mubr.msk.f32.gmra.mrb[10].mxu1 %vm3672_vm8, %v3375_v11 }
 0x337   : > { %v3380_v32 = vpop.f32.mrb[56].mxu0 }
 0x338   : > { %v3382_v10 = vpop.f32.mrb[57].mxu0  ;;  %16236 = vmatprep.mubr.msk.f32.mxu1 %vm3672_vm8, %v3380_v32 }
 0x339   : > { %v18222_v10 = vmov 0  }
 0x33a   : > { %18127 = vset.pattern.permute.xlu0 %v18222_v10  ;;  %18128 = vset.pattern.permute.xlu1 %v18222_v10  ;;  %v4889_v10 = vld [vmem:[%s26214_s6 + $0x10] sm:$0xff] }
 0x33b   : > { %v3385_v37 = vpop.f32.mrb[58].mxu0 }
 0x33c   : > { %v3387_v13 = vpop.f32.mrb[59].mxu0  ;;  %16237 = vmatmul.mubr.msk.f32.gmra.mrb[12].mxu1 %vm3672_vm8, %v3385_v37  ;;  %v3158_v37 = vld [vmem:[%s26212_s4] sm:$0xff] }
 0x33d   : > { %4737 = vperm.xlu0 %18127, %v3158_v37  }
 0x33f   : > { %v3390_v36 = vpop.f32.mrb[60].mxu0 }
 0x340   : > { %v3392_v52 = vpop.f32.mrb[61].mxu0  ;;  %16239 = vmatprep.mubr.msk.f32.mxu1 %vm3672_vm8, %v3390_v36 }
 0x341   : > { %v3159_v52 = vld [vmem:[%s26212_s4 + $0x8] sm:$0xff] }
 0x342   : > { %4742 = vperm.xlu0 %18127, %v3159_v52   ;;  %v4891_v52 = vld [vmem:[%s26214_s6 + $0x20] sm:$0xff] }
 0x343   : > { %v3395_v39 = vpop.f32.mrb[62].mxu0 }
 0x344   : > { %v3397_v12 = vpop.f32.mrb[63].mxu0  ;;  %16240 = vmatmul.mubr.msk.f32.gmra.mrb[14].mxu1 %vm3672_vm8, %v3395_v39 }
 0x345   : > { %16248 = vmatprep.mubr.msk.f32.mxu1 %vm3672_vm8, %v22252_v3 }
 0x347   : > { %v3400_v44 = vpop.f32.mrb[64].mxu0 }
 0x348   : > { %v3402_v35 = vpop.f32.mrb[65].mxu0  ;;  %16249 = vmatmul.mubr.msk.f32.vlgmr.msra.gmra.mrb[0].mxu1 %vm3672_vm8, %v22260_v8 }
 0x349   : > { %16251 = vmatprep.mubr.msk.f32.mxu1 %vm3672_vm8, %v22268_v30  ;;  %16851 = vmatpush3.bf16.msk.msra.mxu1 %vm22411_vm12, %v26259_v49  ;;  %v3162_v35 = vld [vmem:[%s26212_s4 + $0x20] sm:$0xff] }
 0x34a   : > { %16276 = vmatprep.subr.msk.mxu1 %vm3721_vm4, %v14300_v7  ;;  %4757 = vperm.xlu0 %18127, %v3162_v35   ;;  %v4893_v35 = vld [vmem:[%s26214_s6 + $0x30] sm:$0xff] }
 0x34b   : > { %v3405_v3 = vpop.f32.mrb[66].mxu0 }
 0x34c   : > { %v3407_v8 = vpop.f32.mrb[67].mxu0  ;;  %16252 = vmatmul.mubr.msk.f32.gmra.mrb[2].mxu1 %vm3672_vm8, %v22276_v33 }
 0x34d   : > { %16254 = vmatprep.mubr.msk.f32.mxu1 %vm3672_vm8, %v22284_v56  ;;  %16277 = vmatpush3.msk.msra.mxu1 %vm3721_vm4, %v14300_v7  ;;  %v3160_v7 = vld [vmem:[%s26212_s4 + $0x10] sm:$0xff] }
 0x34e   : > { %16853 = vmatprep.subr.msk.bf16.mxu1 %vm22505_vm0, %v26259_v49  ;;  %4747 = vperm.xlu1 %18128, %v3160_v7   ;;  %v3164_v8 = vld [vmem:[%s26212_s4 + $0x30] sm:$0xff] }
 0x34f   : > { %v3410_v30 = vpop.f32.mrb[68].mxu0  ;;  %4767 = vperm.xlu0 %18127, %v3164_v8   ;;  %v4892_v8 = vld [vmem:[%s26214_s6 + $0x28] sm:$0xff] }
 0x350   : > { %v3412_v58 = vpop.f32.mrb[69].mxu0  ;;  %16255 = vmatmul.mubr.msk.f32.gmra.mrb[4].mxu1 %vm3672_vm8, %v22292_v9 }
 0x351   : > { %16257 = vmatprep.mubr.msk.f32.mxu1 %vm3672_vm8, %v22300_v24 }
 0x353   : > { %v3415_v60 = vpop.f32.mrb[70].mxu0 }
 0x354   : > { %v3417_v46 = vpop.f32.mrb[71].mxu0  ;;  %16258 = vmatmul.mubr.msk.f32.gmra.mrb[6].mxu1 %vm3672_vm8, %v22308_v27 }
 0x355   : > { %16260 = vmatprep.mubr.msk.f32.mxu1 %vm3672_vm8, %v22316_v6  ;;  %v22536_v6 = vadd.s32 4294967295, %v22110_v48 }
 0x357   : > { %v3420_v33 = vpop.f32.mrb[72].mxu0  ;;  %vm26233_vm1 = vcmp.eq.s32.totalorder %v22094_v45, %v22536_v6 }
 0x358   : > { %v3422_v56 = vpop.f32.mrb[73].mxu0  ;;  %16261 = vmatmul.mubr.msk.f32.gmra.mrb[8].mxu1 %vm3672_vm8, %v22324_v41 }
 0x359   : > { %16263 = vmatprep.mubr.msk.f32.mxu1 %vm3672_vm8, %v22332_v4  ;;  %v3166_v56 = vld [vmem:[%s26212_s4 + $0x40] sm:$0xff] }
 0x35a   : > { %4777 = vperm.xlu0 %18127, %v3166_v56   ;;  %v5987_v56 = vld [vmem:[%s26216_s8 + $0x10] sm:$0xff] }
 0x35b   : > { %v3425_v9 = vpop.f32.mrb[74].mxu0 }
 0x35c   : > { %v3427_v47 = vpop.f32.mrb[75].mxu0  ;;  %16264 = vmatmul.mubr.msk.f32.gmra.mrb[10].mxu1 %vm3672_vm8, %v22340_v54  ;;  %v22545_v54 = vadd.s32 4294967294, %v22082_v63 }
 0x35d   : > { %16266 = vmatprep.mubr.msk.f32.mxu1 %vm3672_vm8, %v22348_v62  ;;  %v22548_v62 = vadd.s32 4294967294, %v22085_v34  ;;  %v3165_v47 = vld [vmem:[%s26212_s4 + $0x38] sm:$0xff] }
 0x35e   : > { %26502 = vst [vmem:[#allocation28_spill] sm:$0xff] %v22545_v54  ;;  %vm4514_vm5 = vcmp.eq.s32.totalorder %v22094_v45, %v22545_v54 }
 0x35f   : > { %v3430_v24 = vpop.f32.mrb[76].mxu0  ;;  %26503 = vst [vmem:[#allocation29_spill] sm:$0xff] %v22548_v62  ;;  %vm4515_vm6 = vcmp.eq.s32.totalorder %v22094_v45, %v22548_v62 }
 0x360   : > { %v3432_v27 = vpop.f32.mrb[77].mxu0  ;;  %16267 = vmatmul.mubr.msk.f32.gmra.mrb[12].mxu1 %vm3672_vm8, %v22356_v61  ;;  %vm22565_vm10 = vmpackc.low %vm4515_vm6, %vm4514_vm5 }
 0x361   : > { %16269 = vmatprep.mubr.msk.f32.mxu1 %vm3672_vm8, %v22364_v5  ;;  %v14322_v5 = vsel %vm26233_vm1, 1.0, %v26255_v15  ;;  %v26505_v18 = vsel %vm22565_vm10, 4294967295, %v26504_v18  ;;  %v3168_v27 = vld [vmem:[%s26212_s4 + $0x50] sm:$0xff] }
 0x362   : > { %26506 = vst [vmem:[#allocation30_spill] sm:$0xff] %v26505_v18  ;;  %4787 = vperm.xlu0 %18127, %v3168_v27   ;;  %v7093_v27 = vld [vmem:[%s26218_s10] sm:$0xff] }
 0x363   : > { %v3435_v41 = vpop.f32.mrb[78].mxu0 }
 0x364   : > { %v3437_v4 = vpop.f32.mrb[79].mxu0  ;;  %16270 = vmatmul.mubr.msk.f32.gmra.mrb[14].mxu1 %vm3672_vm8, %v22372_v14 }
 0x365   : > { %16278 = vmatprep.mubr.msk.f32.mxu1 %vm3672_vm8, %v3400_v44  ;;  %v22593_v44 = vadd.s32 4294967294, %v22110_v48  ;;  %v3167_v4 = vld [vmem:[%s26212_s4 + $0x48] sm:$0xff] }
 0x367   : > { %v3440_v61 = vpop.f32.mrb[80].mxu0  ;;  %26507 = vst [vmem:[#allocation31_spill] sm:$0xff] %v22593_v44  ;;  %vm26232_vm11 = vcmp.eq.s32.totalorder %v22094_v45, %v22593_v44 }
 0x368   : > { %v3442_v17 = vpop.f32.mrb[81].mxu0  ;;  %16279 = vmatmul.mubr.msk.f32.vlgmr.msra.gmra.mrb[0].mxu1 %vm3672_vm8, %v3405_v3  ;;  %v3161_v3 = vld [vmem:[%s26212_s4 + $0x18] sm:$0xff] }
 0x369   : > { %16281 = vmatprep.mubr.msk.f32.mxu1 %vm3672_vm8, %v3410_v30  ;;  %16855 = vmatpush3.bf16.msk.msra.mxu1 %vm22505_vm0, %v26259_v49 }
 0x36a   : > { %16306 = vmatprep.subr.msk.mxu1 %vm3721_vm4, %v14322_v5  ;;  %4752 = vperm.xlu1 %18128, %v3161_v3  }
 0x36b   : > { %v3445_v14 = vpop.f32.mrb[82].mxu0 }
 0x36c   : > { %v3447_v59 = vpop.f32.mrb[83].mxu0  ;;  %16282 = vmatmul.mubr.msk.f32.gmra.mrb[2].mxu1 %vm3672_vm8, %v3415_v60  ;;  %v3163_v60 = vld [vmem:[%s26212_s4 + $0x28] sm:$0xff] }
 0x36d   : > { %16284 = vmatprep.mubr.msk.f32.mxu1 %vm3672_vm8, %v3420_v33  ;;  %16307 = vmatpush3.msk.msra.mxu1 %vm3721_vm4, %v14322_v5  ;;  %v14344_v33 = vsel %vm26232_vm11, 1.0, %v26255_v15  ;;  %v3170_v5 = vld [vmem:[%s26212_s4 + $0x60] sm:$0xff] }
 0x36e   : > { %16857 = vmatprep.subr.msk.bf16.mxu1 %vm22565_vm10, %v26259_v49  ;;  %4762 = vperm.xlu1 %18128, %v3163_v60  }
 0x36f   : > { %v3450_v21 = vpop.f32.mrb[84].mxu0  ;;  %4797 = vperm.xlu0 %18127, %v3170_v5   ;;  %v13358_v5 = vld [vmem:[#allocation2] sm:$0x1] }
 0x370   : > { %v3452_v38 = vpop.f32.mrb[85].mxu0  ;;  %16285 = vmatmul.mubr.msk.f32.gmra.mrb[4].mxu1 %vm3672_vm8, %v3425_v9 }
 0x371   : > { %16287 = vmatprep.mubr.msk.f32.mxu1 %vm3672_vm8, %v3430_v24 }
 0x372   : > { %4772 = vperm.xlu1 %18128, %v3165_v47   ;;  %v5986_v47 = vld [vmem:[%s26216_s8 + $0x8] sm:$0xff] }
 0x373   : > { %v3455_v20 = vpop.f32.mrb[86].mxu0 }
 0x374   : > { %v3457_v28 = vpop.f32.mrb[87].mxu0  ;;  %16288 = vmatmul.mubr.msk.f32.gmra.mrb[6].mxu1 %vm3672_vm8, %v3435_v41 }
 0x375   : > { %16290 = vmatprep.mubr.msk.f32.mxu1 %vm3672_vm8, %v3440_v61 }
 0x376   : > { %4782 = vperm.xlu1 %18128, %v3167_v4   ;;  %v5988_v4 = vld [vmem:[%s26216_s8 + $0x18] sm:$0xff] }
 0x377   : > { %v3460_v53 = vpop.f32.mrb[88].mxu0 }
 0x378   : > { %v3462_v11 = vpop.f32.mrb[89].mxu0  ;;  %16291 = vmatmul.mubr.msk.f32.gmra.mrb[8].mxu1 %vm3672_vm8, %v3445_v14  ;;  %v3169_v14 = vld [vmem:[%s26212_s4 + $0x58] sm:$0xff] }
 0x379   : > { %16293 = vmatprep.mubr.msk.f32.mxu1 %vm3672_vm8, %v3450_v21  ;;  %v3172_v21 = vld [vmem:[%s26212_s4 + $0x70] sm:$0xff] }
 0x37a   : > { %4792 = vperm.xlu1 %18128, %v3169_v14   ;;  %4807 = vperm.xlu0 %18127, %v3172_v21   ;;  %v7094_v14 = vld [vmem:[%s26218_s10 + $0x8] sm:$0xff] }
 0x37b   : > { %v3465_v31 = vpop.f32.mrb[90].mxu0 }
 0x37c   : > { %v3467_v32 = vpop.f32.mrb[91].mxu0  ;;  %16294 = vmatmul.mubr.msk.f32.gmra.mrb[10].mxu1 %vm3672_vm8, %v3455_v20  ;;  %v3171_v20 = vld [vmem:[%s26212_s4 + $0x68] sm:$0xff] }
 0x37d   : > { %16296 = vmatprep.mubr.msk.f32.mxu1 %vm3672_vm8, %v3460_v53  ;;  %v4887_v53 = vld [vmem:[%s26214_s6] sm:$0xff] }
 0x37e   : > { %4802 = vperm.xlu1 %18128, %v3171_v20   ;;  %5911 = vperm.xlu0 %18127, %v4887_v53  }
 0x37f   : > { %v3470_v13 = vpop.f32.mrb[92].mxu0 }
 0x380   : > { %v3472_v36 = vpop.f32.mrb[93].mxu0  ;;  %16297 = vmatmul.mubr.msk.f32.gmra.mrb[12].mxu1 %vm3672_vm8, %v3465_v31  ;;  %v3173_v31 = vld [vmem:[%s26212_s4 + $0x78] sm:$0xff] }
 0x381   : > { %16299 = vmatprep.mubr.msk.f32.mxu1 %vm3672_vm8, %v3470_v13  ;;  %v4888_v13 = vld [vmem:[%s26214_s6 + $0x8] sm:$0xff] }
 0x382   : > { %4812 = vperm.xlu1 %18128, %v3173_v31   ;;  %5921 = vperm.xlu0 %18127, %v4889_v10  }
 0x383   : > { %v3475_v39 = vpop.f32.mrb[94].mxu0 }
 0x384   : > { %v3477_v12 = vpop.f32.mrb[95].mxu0  ;;  %16300 = vmatmul.mubr.msk.f32.gmra.mrb[14].mxu1 %vm3672_vm8, %v3475_v39 }
 0x385   : > { %v4890_v12 = vld [vmem:[%s26214_s6 + $0x18] sm:$0xff] }
 0x386   : > { %5916 = vperm.xlu1 %18128, %v4888_v13   ;;  %5931 = vperm.xlu0 %18127, %v4891_v52  }
 0x387   : > { %v3480_v30 = vpop.f32.mrb[96].mxu0 }
 0x388   : > { %v3482_v58 = vpop.f32.mrb[97].mxu0  ;;  %16308 = vmatprep.mubr.msk.f32.mxu1 %vm3672_vm8, %v3480_v30 }
 0x389   : > { %v5985_v58 = vld [vmem:[%s26216_s8] sm:$0xff] }
 0x38a   : > { %5926 = vperm.xlu1 %18128, %v4890_v12   ;;  %5941 = vperm.xlu0 %18127, %v4893_v35  }
 0x38b   : > { %v3485_v46 = vpop.f32.mrb[98].mxu0 }
 0x38c   : > { %v3487_v9 = vpop.f32.mrb[99].mxu0  ;;  %16309 = vmatmul.mubr.msk.f32.vlgmr.msra.gmra.mrb[0].mxu1 %vm3672_vm8, %v3485_v46  ;;  %v4894_v46 = vld [vmem:[%s26214_s6 + $0x38] sm:$0xff] }
 0x38d   : > { %16859 = vmatpush3.bf16.msk.msra.mxu1 %vm22565_vm10, %v26259_v49 }
 0x38e   : > { %16336 = vmatprep.subr.msk.mxu1 %vm3721_vm4, %v14344_v33  ;;  %5936 = vperm.xlu1 %18128, %v4892_v8  }
 0x38f   : > { %v3490_v24 = vpop.f32.mrb[100].mxu0  ;;  %7049 = vperm.xlu0 %18127, %v5985_v58  }
 0x390   : > { %v3492_v41 = vpop.f32.mrb[101].mxu0  ;;  %16311 = vmatprep.mubr.msk.f32.mxu1 %vm3672_vm8, %v3490_v24 }
 0x391   : > { %16337 = vmatpush3.msk.msra.mxu1 %vm3721_vm4, %v14344_v33 }
 0x392   : > { %5946 = vperm.xlu1 %18128, %v4894_v46  }
 0x393   : > { %v3495_v61 = vpop.f32.mrb[102].mxu0  ;;  %7059 = vperm.xlu0 %18127, %v5987_v56  }
 0x394   : > { %v3497_v17 = vpop.f32.mrb[103].mxu0  ;;  %16312 = vmatmul.mubr.msk.f32.gmra.mrb[2].mxu1 %vm3672_vm8, %v3495_v61 }
 0x396   : > { %7054 = vperm.xlu1 %18128, %v5986_v47  }
 0x397   : > { %v3500_v59 = vpop.f32.mrb[104].mxu0  ;;  %8835 = vperm.xlu0 %18127, %v7093_v27  }
 0x398   : > { %v3502_v38 = vpop.f32.mrb[105].mxu0  ;;  %16314 = vmatprep.mubr.msk.f32.mxu1 %vm3672_vm8, %v3500_v59 }
 0x39a   : > { %7064 = vperm.xlu1 %18128, %v5988_v4  }
 0x39b   : > { %v3505_v28 = vpop.f32.mrb[106].mxu0  ;;  %13361 = vperm.xlu0 %18127, %v13358_v5  }
 0x39c   : > { %v3507_v11 = vpop.f32.mrb[107].mxu0  ;;  %16315 = vmatmul.mubr.msk.f32.gmra.mrb[4].mxu1 %vm3672_vm8, %v3505_v28 }
 0x39e   : > { %8840 = vperm.xlu1 %18128, %v7094_v14  }
 0x39f   : > { %v3510_v32 = vpop.f32.mrb[108].mxu0 }
 0x3a0   : > { %v3512_v37 = vpop.f32.mrb[109].mxu0  ;;  %16317 = vmatprep.mubr.msk.f32.mxu1 %vm3672_vm8, %v3510_v32 }
 0x3a3   : > { %v3515_v36 = vpop.f32.mrb[110].mxu0 }
 0x3a4   : > { %v3517_v39 = vpop.f32.mrb[111].mxu0  ;;  %16318 = vmatmul.mubr.msk.f32.gmra.mrb[6].mxu1 %vm3672_vm8, %v3515_v36 }
 0x3a7   : > { %v3520_v7 = vpop.f32.mrb[112].mxu0 }
 0x3a8   : > { %v3522_v3 = vpop.f32.mrb[113].mxu0  ;;  %16320 = vmatprep.mubr.msk.f32.mxu1 %vm3672_vm8, %v3520_v7 }
 0x3ab   : > { %v3525_v30 = vpop.f32.mrb[114].mxu0 }
 0x3ac   : > { %v3527_v60 = vpop.f32.mrb[115].mxu0  ;;  %16321 = vmatmul.mubr.msk.f32.gmra.mrb[8].mxu1 %vm3672_vm8, %v3525_v30 }
 0x3af   : > { %v3530_v33 = vpop.f32.mrb[116].mxu0 }
 0x3b0   : > { %v3532_v9 = vpop.f32.mrb[117].mxu0  ;;  %16323 = vmatprep.mubr.msk.f32.mxu1 %vm3672_vm8, %v3530_v33 }
 0x3b3   : > { %v3535_v24 = vpop.f32.mrb[118].mxu0 }
 0x3b4   : > { %v3537_v41 = vpop.f32.mrb[119].mxu0  ;;  %16324 = vmatmul.mubr.msk.f32.gmra.mrb[10].mxu1 %vm3672_vm8, %v3535_v24 }
 0x3b7   : > { %v3540_v61 = vpop.f32.mrb[120].mxu0 }
 0x3b8   : > { %v3542_v17 = vpop.f32.mrb[121].mxu0  ;;  %16326 = vmatprep.mubr.msk.f32.mxu1 %vm3672_vm8, %v3540_v61 }
 0x3bb   : > { %v3545_v59 = vpop.f32.mrb[122].mxu0 }
 0x3bc   : > { %v3547_v21 = vpop.f32.mrb[123].mxu0  ;;  %16327 = vmatmul.mubr.msk.f32.gmra.mrb[12].mxu1 %vm3672_vm8, %v3545_v59 }
 0x3bf   : > { %v3550_v38 = vpop.f32.mrb[124].mxu0 }
 0x3c0   : > { %v3552_v20 = vpop.f32.mrb[125].mxu0  ;;  %16329 = vmatprep.mubr.msk.f32.mxu1 %vm3672_vm8, %v3550_v38  ;;  %v4847_v38 = vld [vmem:[%s26213_s5] sm:$0xff] }
 0x3c1   : > { %v4738_v20 = vpop.permute.xlu0 %4737 }
 0x3c3   : > { %v3555_v28 = vpop.f32.mrb[126].mxu0 }
 0x3c4   : > { %v3557_v53 = vpop.f32.mrb[127].mxu0  ;;  %16330 = vmatmul.mubr.msk.f32.gmra.mrb[14].mxu1 %vm3672_vm8, %v3555_v28 }
 0x3c5   : > { %v4743_v28 = vpop.permute.xlu0 %4742 }
 0x3c7   : > { %v3560_v11 = vpop.f32.mrb[128].mxu0 }
 0x3c8   : > { %v3562_v31 = vpop.f32.mrb[129].mxu0  ;;  %16338 = vmatprep.mubr.msk.f32.mxu1 %vm3672_vm8, %v3560_v11 }
 0x3cb   : > { %v3565_v32 = vpop.f32.mrb[130].mxu0 }
 0x3cc   : > { %v3567_v10 = vpop.f32.mrb[131].mxu0  ;;  %16339 = vmatmul.mubr.msk.f32.vlgmr.msra.gmra.mrb[0].mxu1 %vm3672_vm8, %v3565_v32 }
 0x3cd   : > { %v4748_v32 = vpop.permute.xlu1 %4747 }
 0x3cf   : > { %v3570_v37 = vpop.f32.mrb[132].mxu0 }
 0x3d0   : > { %v3572_v13 = vpop.f32.mrb[133].mxu0  ;;  %16341 = vmatprep.mubr.msk.f32.mxu1 %vm3672_vm8, %v3570_v37 }
 0x3d3   : > { %v3575_v36 = vpop.f32.mrb[134].mxu0 }
 0x3d4   : > { %v3577_v52 = vpop.f32.mrb[135].mxu0  ;;  %16342 = vmatmul.mubr.msk.f32.gmra.mrb[2].mxu1 %vm3672_vm8, %v3575_v36 }
 0x3d7   : > { %v3580_v39 = vpop.f32.mrb[136].mxu0 }
 0x3d8   : > { %v3582_v12 = vpop.f32.mrb[137].mxu0  ;;  %16344 = vmatprep.mubr.msk.f32.mxu1 %vm3672_vm8, %v3580_v39 }
 0x3db   : > { %v3585_v7 = vpop.f32.mrb[138].mxu0 }
 0x3dc   : > { %v3587_v35 = vpop.f32.mrb[139].mxu0  ;;  %16345 = vmatmul.mubr.msk.f32.gmra.mrb[4].mxu1 %vm3672_vm8, %v3585_v7 }
 0x3df   : > { %v3590_v3 = vpop.f32.mrb[140].mxu0 }
 0x3e0   : > { %v3592_v8 = vpop.f32.mrb[141].mxu0  ;;  %16347 = vmatprep.mubr.msk.f32.mxu1 %vm3672_vm8, %v3590_v3 }
 0x3e3   : > { %v3595_v30 = vpop.f32.mrb[142].mxu0 }
 0x3e4   : > { %v3597_v58 = vpop.f32.mrb[143].mxu0  ;;  %16348 = vmatmul.mubr.msk.f32.gmra.mrb[6].mxu1 %vm3672_vm8, %v3595_v30 }
 0x3e7   : > { %v3600_v60 = vpop.f32.mrb[144].mxu0 }
 0x3e8   : > { %v3602_v46 = vpop.f32.mrb[145].mxu0  ;;  %16350 = vmatprep.mubr.msk.f32.mxu1 %vm3672_vm8, %v3600_v60 }
 0x3e9   : > { %v4753_v52 = vpop.permute.xlu1 %4752  ;;  %v4758_v46 = vpop.permute.xlu0 %4757 }
 0x3eb   : > { %v3605_v33 = vpop.f32.mrb[146].mxu0 }
 0x3ec   : > { %v3607_v56 = vpop.f32.mrb[147].mxu0  ;;  %16351 = vmatmul.mubr.msk.f32.gmra.mrb[8].mxu1 %vm3672_vm8, %v3605_v33 }
 0x3ed   : > { %v4763_v58 = vpop.permute.xlu1 %4762 }
 0x3ef   : > { %v3610_v9 = vpop.f32.mrb[148].mxu0 }
 0x3f0   : > { %v3612_v47 = vpop.f32.mrb[149].mxu0  ;;  %16353 = vmatprep.mubr.msk.f32.mxu1 %vm3672_vm8, %v3610_v9 }
 0x3f3   : > { %v3615_v24 = vpop.f32.mrb[150].mxu0 }
 0x3f4   : > { %v3617_v27 = vpop.f32.mrb[151].mxu0  ;;  %16354 = vmatmul.mubr.msk.f32.gmra.mrb[10].mxu1 %vm3672_vm8, %v3615_v24 }
 0x3f7   : > { %v3620_v41 = vpop.f32.mrb[152].mxu0 }
 0x3f8   : > { %v3622_v4 = vpop.f32.mrb[153].mxu0  ;;  %16356 = vmatprep.mubr.msk.f32.mxu1 %vm3672_vm8, %v3620_v41  ;;  %v4773_v41 = vpop.permute.xlu1 %4772 }
 0x3fb   : > { %v3625_v61 = vpop.f32.mrb[154].mxu0 }
 0x3fc   : > { %v3627_v5 = vpop.f32.mrb[155].mxu0  ;;  %16357 = vmatmul.mubr.msk.f32.gmra.mrb[12].mxu1 %vm3672_vm8, %v3625_v61  ;;  %v4768_v61 = vpop.permute.xlu0 %4767 }
 0x3ff   : > { %v3630_v17 = vpop.f32.mrb[156].mxu0 }
 0x400   : > { %v3632_v14 = vpop.f32.mrb[157].mxu0  ;;  %16359 = vmatprep.mubr.msk.f32.mxu1 %vm3672_vm8, %v3630_v17 }
 0x403   : > { %v3635_v59 = vpop.f32.mrb[158].mxu0 }
 0x404   : > { %v3637_v21 = vpop.f32.mrb[159].mxu0  ;;  %16360 = vmatmul.mubr.msk.f32.gmra.mrb[14].mxu1 %vm3672_vm8, %v3635_v59 }
 0x405   : > { %16394 = vmatprep.mubr.f32.mxu1 %v4847_v38 }
 0x49f   : > { %v16340_v53 = vpop.f32.mrb[0].mxu1 }
 0x4a0   : > { %v4816_v11 = vadd.f32 %v16340_v53, %v4743_v28  ;;  %v4640_v31 = vpop.f32.mrb[1].mxu1  ;;  %v4778_v53 = vpop.permute.xlu0 %4777 }
 0x4a1   : > { %v4815_v10 = vadd.f32 %v4738_v20, %v4640_v31  ;;  %v4783_v20 = vpop.permute.xlu1 %4782 }
 0x4a2   : > { %v4832_v37 = vmax.f32 %v4816_v11, 0.0 }
 0x4a3   : > { %v4831_v13 = vmax.f32 %v4815_v10, 0.0 }
 0x4a5   : > { %v16860_v36 = vpack.c.bf16 %v4832_v37, %v4831_v13 }
 0x4a7   : > { %v16343_v39 = vpop.f32.mrb[2].mxu1  ;;  %16861 = vmatprep.subr.bf16.mxu1 %v16860_v36 }
 0x4a8   : > { %v4818_v12 = vadd.f32 %v16343_v39, %v4753_v52  ;;  %v4650_v7 = vpop.f32.mrb[3].mxu1  ;;  %16863 = vmatpush3.bf16.msra.mxu1 %v16860_v36  ;;  %v4793_v36 = vpop.permute.xlu1 %4792 }
 0x4a9   : > { %v4817_v35 = vadd.f32 %v4748_v32, %v4650_v7  ;;  %v4788_v39 = vpop.permute.xlu0 %4787 }
 0x4aa   : > { %v4834_v3 = vmax.f32 %v4818_v12, 0.0 }
 0x4ab   : > { %v4833_v8 = vmax.f32 %v4817_v35, 0.0 }
 0x4ad   : > { %v16864_v30 = vpack.c.bf16 %v4834_v3, %v4833_v8 }
 0x4af   : > { %v16346_v60 = vpop.f32.mrb[4].mxu1  ;;  %16865 = vmatprep.subr.bf16.mxu1 %v16864_v30 }
 0x4b0   : > { %v4820_v33 = vadd.f32 %v16346_v60, %v4763_v58  ;;  %v4660_v56 = vpop.f32.mrb[5].mxu1  ;;  %16867 = vmatpush3.bf16.msra.mxu1 %v16864_v30  ;;  %v4803_v58 = vpop.permute.xlu1 %4802 }
 0x4b1   : > { %v4819_v9 = vadd.f32 %v4758_v46, %v4660_v56  ;;  %v4798_v46 = vpop.permute.xlu0 %4797 }
 0x4b2   : > { %v4836_v47 = vmax.f32 %v4820_v33, 0.0 }
 0x4b3   : > { %v4835_v24 = vmax.f32 %v4819_v9, 0.0 }
 0x4b5   : > { %v16868_v27 = vpack.c.bf16 %v4836_v47, %v4835_v24 }
 0x4b7   : > { %v16349_v4 = vpop.f32.mrb[6].mxu1  ;;  %16869 = vmatprep.subr.bf16.mxu1 %v16868_v27 }
 0x4b8   : > { %v4822_v5 = vadd.f32 %v16349_v4, %v4773_v41  ;;  %v4670_v17 = vpop.f32.mrb[7].mxu1  ;;  %16871 = vmatpush3.bf16.msra.mxu1 %v16868_v27  ;;  %v4813_v41 = vpop.permute.xlu1 %4812 }
 0x4b9   : > { %v4821_v14 = vadd.f32 %v4768_v61, %v4670_v17  ;;  %v4808_v61 = vpop.permute.xlu0 %4807 }
 0x4ba   : > { %v4838_v59 = vmax.f32 %v4822_v5, 0.0 }
 0x4bb   : > { %v4837_v21 = vmax.f32 %v4821_v14, 0.0 }
 0x4bd   : > { %v16872_v38 = vpack.c.bf16 %v4838_v59, %v4837_v21 }
 0x4bf   : > { %v16352_v28 = vpop.f32.mrb[8].mxu1  ;;  %16873 = vmatprep.subr.bf16.mxu1 %v16872_v38 }
 0x4c0   : > { %v4824_v11 = vadd.f32 %v16352_v28, %v4783_v20  ;;  %v4680_v31 = vpop.f32.mrb[9].mxu1  ;;  %16875 = vmatpush3.bf16.msra.mxu1 %v16872_v38  ;;  %v4848_v20 = vld [vmem:[%s26213_s5 + $0x8] sm:$0xff]  ;;  %v4849_v28 = vld [vmem:[%s26213_s5 + $0x10] sm:$0xff] }
 0x4c1   : > { %v4823_v32 = vadd.f32 %v4778_v53, %v4680_v31  ;;  %v4850_v53 = vld [vmem:[%s26213_s5 + $0x18] sm:$0xff]  ;;  %v4852_v31 = vld [vmem:[%s26213_s5 + $0x28] sm:$0xff] }
 0x4c2   : > { %v4840_v10 = vmax.f32 %v4824_v11, 0.0  ;;  %v4851_v11 = vld [vmem:[%s26213_s5 + $0x20] sm:$0xff] }
 0x4c3   : > { %v4839_v37 = vmax.f32 %v4823_v32, 0.0  ;;  %v4853_v32 = vld [vmem:[%s26213_s5 + $0x30] sm:$0xff] }
 0x4c5   : > { %v16876_v13 = vpack.c.bf16 %v4840_v10, %v4839_v37  ;;  %v4854_v10 = vld [vmem:[%s26213_s5 + $0x38] sm:$0xff]  ;;  %v4855_v37 = vld [vmem:[%s26213_s5 + $0x40] sm:$0xff] }
 0x4c7   : > { %v16355_v52 = vpop.f32.mrb[10].mxu1  ;;  %16877 = vmatprep.subr.bf16.mxu1 %v16876_v13 }
 0x4c8   : > { %v4826_v12 = vadd.f32 %v16355_v52, %v4793_v36  ;;  %v4690_v7 = vpop.f32.mrb[11].mxu1  ;;  %16879 = vmatpush3.bf16.msra.mxu1 %v16876_v13  ;;  %v4856_v13 = vld [vmem:[%s26213_s5 + $0x48] sm:$0xff]  ;;  %v4857_v36 = vld [vmem:[%s26213_s5 + $0x50] sm:$0xff]  ;;  %v4858_v52 = vld [vmem:[%s26213_s5 + $0x58] sm:$0xff] }
 0x4c9   : > { %v4825_v35 = vadd.f32 %v4788_v39, %v4690_v7  ;;  %v4859_v39 = vld [vmem:[%s26213_s5 + $0x60] sm:$0xff]  ;;  %v4861_v7 = vld [vmem:[%s26213_s5 + $0x70] sm:$0xff] }
 0x4ca   : > { %v4842_v3 = vmax.f32 %v4826_v12, 0.0  ;;  %v4860_v12 = vld [vmem:[%s26213_s5 + $0x68] sm:$0xff] }
 0x4cb   : > { %v4841_v8 = vmax.f32 %v4825_v35, 0.0  ;;  %v4862_v35 = vld [vmem:[%s26213_s5 + $0x78] sm:$0xff] }
 0x4cd   : > { %v16880_v30 = vpack.c.bf16 %v4842_v3, %v4841_v8  ;;  %v4863_v3 = vld [vmem:[%s26213_s5 + $0x80] sm:$0xff]  ;;  %v4864_v8 = vld [vmem:[%s26213_s5 + $0x88] sm:$0xff] }
 0x4cf   : > { %v16358_v60 = vpop.f32.mrb[12].mxu1  ;;  %16881 = vmatprep.subr.bf16.mxu1 %v16880_v30 }
 0x4d0   : > { %v4828_v33 = vadd.f32 %v16358_v60, %v4803_v58  ;;  %v4700_v56 = vpop.f32.mrb[13].mxu1  ;;  %16883 = vmatpush3.bf16.msra.mxu1 %v16880_v30  ;;  %v4865_v30 = vld [vmem:[%s26213_s5 + $0x90] sm:$0xff]  ;;  %v4866_v58 = vld [vmem:[%s26213_s5 + $0x98] sm:$0xff]  ;;  %v4867_v60 = vld [vmem:[%s26213_s5 + $0xa0] sm:$0xff] }
 0x4d1   : > { %v4827_v9 = vadd.f32 %v4798_v46, %v4700_v56  ;;  %v4868_v46 = vld [vmem:[%s26213_s5 + $0xa8] sm:$0xff]  ;;  %v4870_v56 = vld [vmem:[%s26213_s5 + $0xb8] sm:$0xff] }
 0x4d2   : > { %v4844_v47 = vmax.f32 %v4828_v33, 0.0  ;;  %v4869_v33 = vld [vmem:[%s26213_s5 + $0xb0] sm:$0xff] }
 0x4d3   : > { %v4843_v24 = vmax.f32 %v4827_v9, 0.0  ;;  %v4871_v9 = vld [vmem:[%s26213_s5 + $0xc0] sm:$0xff] }
 0x4d5   : > { %v16884_v27 = vpack.c.bf16 %v4844_v47, %v4843_v24  ;;  %v4872_v47 = vld [vmem:[%s26213_s5 + $0xc8] sm:$0xff]  ;;  %v4873_v24 = vld [vmem:[%s26213_s5 + $0xd0] sm:$0xff] }
 0x4d7   : > { %v16361_v4 = vpop.f32.mrb[14].mxu1  ;;  %16885 = vmatprep.subr.bf16.mxu1 %v16884_v27 }
 0x4d8   : > { %v4830_v5 = vadd.f32 %v16361_v4, %v4813_v41  ;;  %v4710_v17 = vpop.f32.mrb[15].mxu1  ;;  %16887 = vmatpush3.bf16.msra.mxu1 %v16884_v27  ;;  %v4874_v27 = vld [vmem:[%s26213_s5 + $0xd8] sm:$0xff]  ;;  %v4875_v41 = vld [vmem:[%s26213_s5 + $0xe0] sm:$0xff]  ;;  %v4876_v4 = vld [vmem:[%s26213_s5 + $0xe8] sm:$0xff] }
 0x4d9   : > { %v4829_v14 = vadd.f32 %v4808_v61, %v4710_v17  ;;  %v4877_v61 = vld [vmem:[%s26213_s5 + $0xf0] sm:$0xff]  ;;  %v4879_v17 = vld [vmem:[%s26213_s5 + $0x100] sm:$0xff] }
 0x4da   : > { %v4846_v59 = vmax.f32 %v4830_v5, 0.0  ;;  %v4878_v5 = vld [vmem:[%s26213_s5 + $0xf8] sm:$0xff] }
 0x4db   : > { %v4845_v21 = vmax.f32 %v4829_v14, 0.0  ;;  %v4880_v14 = vld [vmem:[%s26213_s5 + $0x108] sm:$0xff] }
 0x4dd   : > { %v16888_v38 = vpack.c.bf16 %v4846_v59, %v4845_v21  ;;  %v4881_v59 = vld [vmem:[%s26213_s5 + $0x110] sm:$0xff]  ;;  %v4882_v21 = vld [vmem:[%s26213_s5 + $0x118] sm:$0xff] }
 0x4df   : > { %16889 = vmatprep.subr.bf16.mxu1 %v16888_v38 }
 0x4e0   : > { %16891 = vmatpush3.bf16.msra.mxu1 %v16888_v38  ;;  %v4883_v38 = vld [vmem:[%s26213_s5 + $0x120] sm:$0xff] }
 0x4e1   : > { %16893 = vmatprep.subr.msk.bf16.mxu1 %vm22115_vm2, %v26259_v49 }
 0x4e3   : > { %16395 = vmatmul.mubr.f32.vlgmr.msra.gmra.mrb[16].mxu1 %v4848_v20  ;;  %v4884_v20 = vld [vmem:[%s26213_s5 + $0x128] sm:$0xff] }
 0x4e4   : > { %16397 = vmatprep.mubr.f32.mxu1 %v4849_v28  ;;  %16895 = vmatpush3.bf16.msk.msra.mxu1 %vm22115_vm2, %v26259_v49  ;;  %v4885_v28 = vld [vmem:[%s26213_s5 + $0x130] sm:$0xff] }
 0x4e7   : > { %16398 = vmatmul.mubr.f32.gmra.mrb[18].mxu1 %v4850_v53  ;;  %v4886_v53 = vld [vmem:[%s26213_s5 + $0x138] sm:$0xff] }
 0x4e8   : > { %16400 = vmatprep.mubr.f32.mxu1 %v4851_v11  ;;  %v22849_v11 = vadd.s32 24, %v22070_v51 }
 0x4ea   : > { %26508 = vst [vmem:[#allocation32_spill] sm:$0xff] %v22849_v11 }
 0x4eb   : > { %16401 = vmatmul.mubr.f32.gmra.mrb[20].mxu1 %v4852_v31  ;;  %v22852_v31 = vmul.u32 2, %v22849_v11 }
 0x4ec   : > { %16403 = vmatprep.mubr.f32.mxu1 %v4853_v32  ;;  %v22855_v32 = vadd.s32 40, %v22070_v51 }
 0x4ed   : > { %26509 = vst [vmem:[#allocation33_spill] sm:$0xff] %v22852_v31 }
 0x4ee   : > { %26510 = vst [vmem:[#allocation34_spill] sm:$0xff] %v22855_v32 }
 0x4ef   : > { %16404 = vmatmul.mubr.f32.gmra.mrb[22].mxu1 %v4854_v10  ;;  %v22858_v10 = vadd.s32 1, %v22852_v31 }
 0x4f0   : > { %16406 = vmatprep.mubr.f32.mxu1 %v4855_v37  ;;  %v22861_v37 = vadd.s32 32, %v22070_v51 }
 0x4f1   : > { %26511 = vst [vmem:[#allocation35_spill] sm:$0xff] %v22858_v10  ;;  %vm5181_vm4 = vcmp.eq.s32.totalorder %v22094_v45, %v22858_v10 }
 0x4f2   : > { %26512 = vst [vmem:[#allocation36_spill] sm:$0xff] %v22861_v37  ;;  %vm22877_vm8 = vmpackc.low %vm5181_vm4, %vm3665_vm3 }
 0x4f3   : > { %16407 = vmatmul.mubr.f32.gmra.mrb[24].mxu1 %v4856_v13  ;;  %v22864_v13 = vmul.u32 2, %v22855_v32  ;;  %16897 = vmatprep.subr.msk.bf16.mxu1 %vm22877_vm8, %v26259_v49 }
 0x4f4   : > { %16409 = vmatprep.mubr.f32.mxu1 %v4857_v36  ;;  %v22869_v36 = vmul.u32 2, %v22861_v37  ;;  %16899 = vmatpush3.bf16.msk.msra.mxu1 %vm22877_vm8, %v26259_v49 }
 0x4f5   : > { %vm26237_vm11 = vcmp.eq.s32.totalorder %v22094_v45, %v22864_v13 }
 0x4f7   : > { %16410 = vmatmul.mubr.f32.gmra.mrb[26].mxu1 %v4858_v52  ;;  %v22872_v52 = vadd.s32 1, %v22864_v13 }
 0x4f8   : > { %16412 = vmatprep.mubr.f32.mxu1 %v4859_v39 }
 0x4f9   : > { %26513 = vst [vmem:[#allocation37_spill] sm:$0xff] %v22872_v52  ;;  %vm5183_vm14 = vcmp.eq.s32.totalorder %v22094_v45, %v22872_v52 }
 0x4fb   : > { %16413 = vmatmul.mubr.f32.gmra.mrb[28].mxu1 %v4860_v12  ;;  %v22885_v12 = vadd.s32 1, %v22869_v36 }
 0x4fc   : > { %16415 = vmatprep.mubr.f32.mxu1 %v4861_v7  ;;  %v14369_v7 = vsel %vm5183_vm14, 1.0, %v26255_v15 }
 0x4fd   : > { %26516 = vst [vmem:[#allocation38_spill] sm:$0xff] %v22885_v12  ;;  %vm5182_vm3 = vcmp.eq.s32.totalorder %v22094_v45, %v22885_v12 }
 0x4fe   : > { %vm16901_vm5 = vmpackc.low %vm26235_vm15, %vm5182_vm3 }
 0x4ff   : > { %16416 = vmatmul.mubr.f32.gmra.mrb[30].mxu1 %v4862_v35  ;;  %v26248_v35 = vmov 1.0   ;;  %vm22897_vm6 = vmpackc.low %vm5183_vm14, %vm5182_vm3 }
 0x500   : > { %16418 = vmatprep.mubr.f32.mxu1 %v4863_v3  ;;  %v16900_v3 = vpack.c.bf16 %v14369_v7, %v26248_v35 }
 0x502   : > { %16902 = vmatprep.subr.msk.bf16.mxu1 %vm16901_vm5, %v16900_v3 }
 0x503   : > { %16419 = vmatmul.mubr.f32.gmra.mrb[32].mxu1 %v4864_v8  ;;  %v26517_v8 = vmov 0 }
 0x504   : > { %16421 = vmatprep.mubr.f32.mxu1 %v4865_v30  ;;  %v26518_v8 = vsel %vm22897_vm6, 4294967295, %v26517_v8  ;;  %16905 = vmatpush3.bf16.msk.msra.mxu1 %vm16901_vm5, %v16900_v3  ;;  %v22905_v30 = vadd.s32 2, %v22864_v13  ;;  %vm26236_vm5 = vcmp.eq.s32.totalorder %v22094_v45, %v22869_v36 }
 0x505   : > { %16907 = vmatprep.subr.msk.bf16.mxu1 %vm22236_vm7, %v26259_v49  ;;  %vm22934_vm1 = vmpackc.low %vm26237_vm11, %vm26236_vm5 }
 0x506   : > { %vm26241_vm14 = vcmp.eq.s32.totalorder %v22094_v45, %v22905_v30 }
 0x507   : > { %16422 = vmatmul.mubr.f32.gmra.mrb[34].mxu1 %v4866_v58  ;;  %v22908_v58 = vadd.s32 2, %v22869_v36 }
 0x508   : > { %16424 = vmatprep.mubr.f32.mxu1 %v4867_v60  ;;  %v26519_v60 = vmov 0 }
 0x509   : > { %vm26238_vm4 = vcmp.eq.s32.totalorder %v22094_v45, %v22908_v58 }
 0x50a   : > { %vm22920_vm3 = vmpackc.low %vm26241_vm14, %vm26238_vm4 }
 0x50b   : > { %16425 = vmatmul.mubr.f32.gmra.mrb[36].mxu1 %v4868_v46  ;;  %v26520_v60 = vsel %vm22920_vm3, 4294967295, %v26519_v60  ;;  %v26522_v46 = vmov 0 }
 0x50c   : > { %16427 = vmatprep.mubr.f32.mxu1 %v4869_v33  ;;  %26521 = vst [vmem:[#allocation39_spill] sm:$0xff] %v26520_v60  ;;  %v26523_v46 = vsel %vm22934_vm1, 4294967295, %v26522_v46  ;;  %v22939_v33 = vadd.s32 4294967295, %v22864_v13 }
 0x50d   : > { %26524 = vst [vmem:[#allocation40_spill] sm:$0xff] %v26523_v46 }
 0x50e   : > { %26525 = vst [vmem:[#allocation41_spill] sm:$0xff] %v22939_v33  ;;  %vm26240_vm15 = vcmp.eq.s32.totalorder %v22094_v45, %v22939_v33 }
 0x50f   : > { %16428 = vmatmul.mubr.f32.gmra.mrb[38].mxu1 %v4870_v56  ;;  %v22942_v56 = vadd.s32 4294967295, %v22869_v36 }
 0x510   : > { %16430 = vmatprep.mubr.f32.mxu1 %v4871_v9  ;;  %v26527_v9 = vmov 0 }
 0x511   : > { %26526 = vst [vmem:[#allocation42_spill] sm:$0xff] %v22942_v56  ;;  %vm26239_vm13 = vcmp.eq.s32.totalorder %v22094_v45, %v22942_v56 }
 0x512   : > { %vm22954_vm5 = vmpackc.low %vm26240_vm15, %vm26239_vm13  ;;  %vm5190_vm15 = vcmask 351232  }
 0x513   : > { %16431 = vmatmul.mubr.f32.gmra.mrb[40].mxu1 %v4872_v47  ;;  %v26528_v9 = vsel %vm22954_vm5, 4294967295, %v26527_v9  ;;  %v22959_v47 = vadd.s32 4294967294, %v22864_v13 }
 0x514   : > { %16433 = vmatprep.mubr.f32.mxu1 %v4873_v24  ;;  %26529 = vst [vmem:[#allocation43_spill] sm:$0xff] %v26528_v9  ;;  %v22962_v24 = vadd.s32 4294967294, %v22869_v36 }
 0x515   : > { %26530 = vst [vmem:[#allocation44_spill] sm:$0xff] %v22959_v47  ;;  %vm26243_vm4 = vcmp.eq.s32.totalorder %v22094_v45, %v22959_v47 }
 0x516   : > { %26531 = vst [vmem:[#allocation45_spill] sm:$0xff] %v22962_v24  ;;  %vm26242_vm11 = vcmp.eq.s32.totalorder %v22094_v45, %v22962_v24 }
 0x517   : > { %16434 = vmatmul.mubr.f32.gmra.mrb[42].mxu1 %v4874_v27  ;;  %vm22974_vm13 = vmpackc.low %vm26243_vm4, %vm26242_vm11  ;;  %v26532_v27 = vmov 0  ;;  %vm26538_vm4 = vcmp.eq.s32.totalorder %v22094_v45, %v22905_v30 }
 0x518   : > { %16436 = vmatprep.mubr.f32.mxu1 %v4875_v41  ;;  %v26533_v27 = vsel %vm22974_vm13, 4294967295, %v26532_v27  ;;  %v14366_v7 = vsel %vm26538_vm4, 1.0, %v26255_v15  ;;  %vm26540_vm4 = vcmask 1042432   ;;  %vm26545_vm13 = vcmp.eq.s32.totalorder %v22094_v45, %v22864_v13 }
 0x519   : > { %26534 = vst [vmem:[#allocation46_spill] sm:$0xff] %v26533_v27  ;;  %v16914_v43 = vpack.c.bf16 %v14366_v7, %v26248_v35 }
 0x51b   : > { %16437 = vmatmul.mubr.f32.gmra.mrb[44].mxu1 %v4876_v4 }
 0x51c   : > { %16439 = vmatprep.mubr.f32.mxu1 %v4877_v61 }
 0x51f   : > { %16440 = vmatmul.mubr.f32.gmra.mrb[46].mxu1 %v4878_v5 }
 0x520   : > { %16442 = vmatprep.mubr.f32.mxu1 %v4879_v17 }
 0x523   : > { %16443 = vmatmul.mubr.f32.gmra.mrb[48].mxu1 %v4880_v14 }
 0x524   : > { %16445 = vmatprep.mubr.f32.mxu1 %v4881_v59  ;;  %v22979_v59 = vadd.s32 2, %v22852_v31 }
 0x526   : > { %vm5169_vm14 = vcmp.eq.s32.totalorder %v22094_v45, %v22979_v59 }
 0x527   : > { %16446 = vmatmul.mubr.f32.gmra.mrb[50].mxu1 %v4882_v21  ;;  %vm22987_vm11 = vmpackc.low %vm5169_vm14, %vm3653_vm9  ;;  %vm26539_vm9 = vcmp.eq.s32.totalorder %v22094_v45, %v22908_v58 }
 0x528   : > { %16448 = vmatprep.mubr.f32.mxu1 %v4883_v38  ;;  %vm16915_vm14 = vmpackc.low %vm26540_vm4, %vm26539_vm9  ;;  %vm5456_vm9 = vcmp.eq.s32.totalorder %v22094_v45, %v22852_v31  ;;  %vm26541_vm4 = vcmp.eq.s32.totalorder %v22094_v45, %v22110_v48 }
 0x52b   : > { %16449 = vmatmul.mubr.f32.gmra.mrb[52].mxu1 %v4884_v20 }
 0x52c   : > { %16451 = vmatprep.mubr.f32.mxu1 %v4885_v28 }
 0x52f   : > { %16452 = vmatmul.mubr.f32.gmra.mrb[54].mxu1 %v4886_v53  ;;  %v26535_v53 = vmov 0 }
 0x530   : > { %v26536_v53 = vsel %vm22987_vm11, 4294967295, %v26535_v53 }
 0x531   : > { %26537 = vst [vmem:[#allocation47_spill] sm:$0xff] %v26536_v53 }
 0x5b6   : > { %v16396_v41 = vpop.f32.mrb[16].mxu1 }
 0x5b7   : > { %v4961_v4 = vpop.f32.mrb[17].mxu1 }
 0x5ba   : > { %v16399_v61 = vpop.f32.mrb[18].mxu1 }
 0x5bb   : > { %v4971_v5 = vpop.f32.mrb[19].mxu1 }
 0x5be   : > { %v16402_v17 = vpop.f32.mrb[20].mxu1 }
 0x5bf   : > { %v4981_v14 = vpop.f32.mrb[21].mxu1 }
 0x5c2   : > { %v16405_v21 = vpop.f32.mrb[22].mxu1 }
 0x5c3   : > { %v4991_v38 = vpop.f32.mrb[23].mxu1 }
 0x5c6   : > { %v16408_v20 = vpop.f32.mrb[24].mxu1 }
 0x5c7   : > { %v5001_v28 = vpop.f32.mrb[25].mxu1 }
 0x5c8   : > { %16466 = vmatprep.mubr.msk.f32.mxu1 %vm5190_vm15, %v5001_v28 }
 0x5c9   : > { %16467 = vmatmul.mubr.msk.f32.vlgmr.msra.gmra.mrb[56].mxu1 %vm5190_vm15, %v16408_v20 }
 0x5ca   : > { %v16411_v3 = vpop.f32.mrb[26].mxu1  ;;  %16909 = vmatpush3.bf16.msk.msra.mxu1 %vm22236_vm7, %v26259_v49 }
 0x5cb   : > { %v5011_v28 = vpop.f32.mrb[27].mxu1  ;;  %16911 = vmatprep.subr.msk.bf16.mxu1 %vm22987_vm11, %v26259_v49 }
 0x5cc   : > { %16469 = vmatprep.mubr.msk.f32.mxu1 %vm5190_vm15, %v5011_v28 }
 0x5cd   : > { %16470 = vmatmul.mubr.msk.f32.gmra.mrb[58].mxu1 %vm5190_vm15, %v16411_v3 }
 0x5ce   : > { %v16414_v20 = vpop.f32.mrb[28].mxu1  ;;  %16913 = vmatpush3.bf16.msk.msra.mxu1 %vm22987_vm11, %v26259_v49 }
 0x5cf   : > { %v5021_v1 = vpop.f32.mrb[29].mxu1  ;;  %16916 = vmatprep.subr.msk.bf16.mxu1 %vm16915_vm14, %v16914_v43 }
 0x5d0   : > { %16472 = vmatprep.mubr.msk.f32.mxu1 %vm5190_vm15, %v5021_v1 }
 0x5d1   : > { %16473 = vmatmul.mubr.msk.f32.gmra.mrb[60].mxu1 %vm5190_vm15, %v16414_v20  ;;  %v14400_v20 = vsel %vm26545_vm13, 1.0, %v26255_v15  ;;  %vm26547_vm13 = vcmask 1042432  }
 0x5d2   : > { %v16417_v7 = vpop.f32.mrb[30].mxu1  ;;  %16919 = vmatpush3.bf16.msk.msra.mxu1 %vm16915_vm14, %v16914_v43  ;;  %vm23025_vm14 = vmpackc.low %vm5456_vm9, %vm26541_vm4  ;;  %v26542_v43 = vmov 0  ;;  %vm26546_vm9 = vcmp.eq.s32.totalorder %v22094_v45, %v22869_v36 }
 0x5d3   : > { %v5031_v28 = vpop.f32.mrb[31].mxu1  ;;  %16921 = vmatprep.subr.msk.bf16.mxu1 %vm22411_vm12, %v26259_v49  ;;  %v26543_v43 = vsel %vm23025_vm14, 4294967295, %v26542_v43  ;;  %vm16929_vm4 = vmpackc.low %vm26547_vm13, %vm26546_vm9  ;;  %vm26548_vm13 = vcmp.eq.s32.totalorder %v22094_v45, %v22536_v6 }
 0x5d4   : > { %16475 = vmatprep.mubr.msk.f32.mxu1 %vm5190_vm15, %v5031_v28  ;;  %26544 = vst [vmem:[#allocation48_spill] sm:$0xff] %v26543_v43  ;;  %v26702_v43 = vld [vmem:[#allocation44_spill] sm:$0xff] }
 0x5d5   : > { %16476 = vmatmul.mubr.msk.f32.gmra.mrb[62].mxu1 %vm5190_vm15, %v16417_v7  ;;  %v16928_v7 = vpack.c.bf16 %v14400_v20, %v26248_v35  ;;  %v23053_v20 = vadd.s32 4294967295, %v22852_v31 }
 0x5d6   : > { %16490 = vmatprep.mubr.msk.f32.mxu1 %vm5190_vm15, %v4961_v4  ;;  %v16420_v3 = vpop.f32.mrb[32].mxu1 }
 0x5d7   : > { %v5041_v1 = vpop.f32.mrb[33].mxu1  ;;  %vm5608_vm9 = vcmp.eq.s32.totalorder %v22094_v45, %v23053_v20 }
 0x5d8   : > { %vm23066_vm5 = vmpackc.low %vm5608_vm9, %vm26548_vm13  ;;  %vm26554_vm9 = vcmp.eq.s32.totalorder %v22094_v45, %v22942_v56  ;;  %vm26555_vm13 = vcmask 1042432  }
 0x5d9   : > { %16491 = vmatmul.mubr.msk.f32.vlgmr.msra.gmra.mrb[56].mxu1 %vm5190_vm15, %v16396_v41 }
 0x5da   : > { %16493 = vmatprep.mubr.msk.f32.mxu1 %vm5190_vm15, %v4971_v5  ;;  %16923 = vmatpush3.bf16.msk.msra.mxu1 %vm22411_vm12, %v26259_v49  ;;  %v16423_v4 = vpop.f32.mrb[34].mxu1 }
 0x5db   : > { %16925 = vmatprep.subr.msk.bf16.mxu1 %vm23025_vm14, %v26259_v49  ;;  %v5051_v28 = vpop.f32.mrb[35].mxu1 }
 0x5dd   : > { %16494 = vmatmul.mubr.msk.f32.gmra.mrb[58].mxu1 %vm5190_vm15, %v16399_v61 }
 0x5de   : > { %16496 = vmatprep.mubr.msk.f32.mxu1 %vm5190_vm15, %v4981_v14  ;;  %16927 = vmatpush3.bf16.msk.msra.mxu1 %vm23025_vm14, %v26259_v49  ;;  %v16426_v41 = vpop.f32.mrb[36].mxu1 }
 0x5df   : > { %16930 = vmatprep.subr.msk.bf16.mxu1 %vm16929_vm4, %v16928_v7  ;;  %v5061_v5 = vpop.f32.mrb[37].mxu1 }
 0x5e1   : > { %16497 = vmatmul.mubr.msk.f32.gmra.mrb[60].mxu1 %vm5190_vm15, %v16402_v17 }
 0x5e2   : > { %16499 = vmatprep.mubr.msk.f32.mxu1 %vm5190_vm15, %v4991_v38  ;;  %16933 = vmatpush3.bf16.msk.msra.mxu1 %vm16929_vm4, %v16928_v7  ;;  %v16429_v35 = vpop.f32.mrb[38].mxu1  ;;  %v26549_v38 = vmov 0  ;;  %vm26552_vm4 = vcmp.eq.s32.totalorder %v22094_v45, %v22939_v33 }
 0x5e3   : > { %16935 = vmatprep.subr.msk.bf16.mxu1 %vm22505_vm0, %v26259_v49  ;;  %v5071_v61 = vpop.f32.mrb[39].mxu1  ;;  %v26550_v38 = vsel %vm23066_vm5, 4294967295, %v26549_v38  ;;  %v14417_v7 = vsel %vm26552_vm4, 1.0, %v26255_v15  ;;  %vm16943_vm4 = vmpackc.low %vm26555_vm13, %vm26554_vm9  ;;  %vm26557_vm13 = vcmp.eq.s32.totalorder %v22094_v45, %v22593_v44 }
 0x5e4   : > { %26551 = vst [vmem:[#allocation49_spill] sm:$0xff] %v26550_v38 }
 0x5e5   : > { %16500 = vmatmul.mubr.msk.f32.gmra.mrb[62].mxu1 %vm5190_vm15, %v16405_v21 }
 0x5e6   : > { %16514 = vmatprep.mubr.msk.f32.mxu1 %vm5190_vm15, %v5041_v1  ;;  %v16432_v17 = vpop.f32.mrb[40].mxu1  ;;  %v26553_v1 = vmov 1.0  }
 0x5e7   : > { %v5081_v14 = vpop.f32.mrb[41].mxu1  ;;  %v16942_v32 = vpack.c.bf16 %v14417_v7, %v26553_v1  ;;  %v23094_v7 = vadd.s32 4294967294, %v22852_v31 }
 0x5e9   : > { %16515 = vmatmul.mubr.msk.f32.vlgmr.msra.gmra.mrb[56].mxu1 %vm5190_vm15, %v16420_v3  ;;  %26556 = vst [vmem:[#allocation50_spill] sm:$0xff] %v23094_v7  ;;  %vm5760_vm9 = vcmp.eq.s32.totalorder %v22094_v45, %v23094_v7 }
 0x5ea   : > { %16517 = vmatprep.mubr.msk.f32.mxu1 %vm5190_vm15, %v5051_v28  ;;  %16937 = vmatpush3.bf16.msk.msra.mxu1 %vm22505_vm0, %v26259_v49  ;;  %v16435_v21 = vpop.f32.mrb[42].mxu1 }
 0x5eb   : > { %16939 = vmatprep.subr.msk.bf16.mxu1 %vm23066_vm5, %v26259_v49  ;;  %v5091_v37 = vpop.f32.mrb[43].mxu1 }
 0x5ed   : > { %16518 = vmatmul.mubr.msk.f32.gmra.mrb[58].mxu1 %vm5190_vm15, %v16423_v4 }
 0x5ee   : > { %16520 = vmatprep.mubr.msk.f32.mxu1 %vm5190_vm15, %v5061_v5  ;;  %16941 = vmatpush3.bf16.msk.msra.mxu1 %vm23066_vm5, %v26259_v49  ;;  %v16438_v3 = vpop.f32.mrb[44].mxu1  ;;  %vm23107_vm5 = vmpackc.low %vm5760_vm9, %vm26557_vm13  ;;  %vm26564_vm9 = vcmp.eq.s32.totalorder %v22094_v45, %v22962_v24  ;;  %vm26565_vm13 = vcmask 1042432  }
 0x5ef   : > { %16944 = vmatprep.subr.msk.bf16.mxu1 %vm16943_vm4, %v16942_v32  ;;  %v5101_v28 = vpop.f32.mrb[45].mxu1 }
 0x5f1   : > { %16521 = vmatmul.mubr.msk.f32.gmra.mrb[60].mxu1 %vm5190_vm15, %v16426_v41 }
 0x5f2   : > { %16523 = vmatprep.mubr.msk.f32.mxu1 %vm5190_vm15, %v5071_v61  ;;  %16947 = vmatpush3.bf16.msk.msra.mxu1 %vm16943_vm4, %v16942_v32  ;;  %v16441_v15 = vpop.f32.mrb[46].mxu1  ;;  %v26558_v32 = vmov 0  ;;  %v26561_v61 = vmov 0.0   ;;  %vm26562_vm4 = vcmp.eq.s32.totalorder %v22094_v45, %v22959_v47 }
 0x5f3   : > { %16949 = vmatprep.subr.msk.bf16.mxu1 %vm22565_vm10, %v26259_v49  ;;  %v5111_v4 = vpop.f32.mrb[47].mxu1  ;;  %v26559_v32 = vsel %vm23107_vm5, 4294967295, %v26558_v32  ;;  %v14434_v49 = vsel %vm26562_vm4, 1.0, %v26561_v61  ;;  %vm16957_vm4 = vmpackc.low %vm26565_vm13, %vm26564_vm9  ;;  %vm26284_vm9 = vcmask 523264  }
 0x5f4   : > { %26560 = vst [vmem:[#allocation51_spill] sm:$0xff] %v26559_v32  ;;  %v16956_v11 = vpack.c.bf16 %v14434_v49, %v26553_v1 }
 0x5f5   : > { %16524 = vmatmul.mubr.msk.f32.gmra.mrb[62].mxu1 %vm5190_vm15, %v16429_v35  ;;  %v26563_v35 = vmov 1.0|1.0  }
 0x5f6   : > { %16538 = vmatprep.mubr.msk.f32.mxu1 %vm5190_vm15, %v5081_v14  ;;  %v16444_v41 = vpop.f32.mrb[48].mxu1 }
 0x5f7   : > { %v5121_v5 = vpop.f32.mrb[49].mxu1 }
 0x5f9   : > { %16539 = vmatmul.mubr.msk.f32.vlgmr.msra.gmra.mrb[56].mxu1 %vm5190_vm15, %v16432_v17 }
 0x5fa   : > { %16541 = vmatprep.mubr.msk.f32.mxu1 %vm5190_vm15, %v5091_v37  ;;  %16951 = vmatpush3.bf16.msk.msra.mxu1 %vm22565_vm10, %v26563_v35  ;;  %v16447_v14 = vpop.f32.mrb[50].mxu1 }
 0x5fb   : > { %16953 = vmatprep.subr.msk.bf16.mxu1 %vm23107_vm5, %v26563_v35  ;;  %v5131_v55 = vpop.f32.mrb[51].mxu1 }
 0x5fd   : > { %16542 = vmatmul.mubr.msk.f32.gmra.mrb[58].mxu1 %vm5190_vm15, %v16435_v21  ;;  %v5912_v21 = vpop.permute.xlu0 %5911 }
 0x5fe   : > { %16544 = vmatprep.mubr.msk.f32.mxu1 %vm5190_vm15, %v5101_v28  ;;  %16955 = vmatpush3.bf16.msk.msra.mxu1 %vm23107_vm5, %v26563_v35  ;;  %v16450_v37 = vpop.f32.mrb[52].mxu1 }
 0x5ff   : > { %16958 = vmatprep.subr.msk.bf16.mxu1 %vm16957_vm4, %v16956_v11  ;;  %v5141_v17 = vpop.f32.mrb[53].mxu1 }
 0x601   : > { %16545 = vmatmul.mubr.msk.f32.gmra.mrb[60].mxu1 %vm5190_vm15, %v16438_v3  ;;  %v5922_v28 = vpop.permute.xlu0 %5921 }
 0x602   : > { %16547 = vmatprep.mubr.msk.f32.mxu1 %vm5190_vm15, %v5111_v4  ;;  %16961 = vmatpush3.bf16.msk.msra.mxu1 %vm16957_vm4, %v16956_v11  ;;  %v16453_v49 = vpop.f32.mrb[54].mxu1  ;;  %v5917_v11 = vpop.permute.xlu1 %5916 }
 0x603   : > { %v5151_v40 = vpop.f32.mrb[55].mxu1 }
 0x605   : > { %16548 = vmatmul.mubr.msk.f32.gmra.mrb[62].mxu1 %vm5190_vm15, %v16441_v15  ;;  %v5965_v15 = vld [vmem:[%s26215_s7] sm:$0xff]  ;;  %v5932_v18 = vpop.permute.xlu0 %5931 }
 0x606   : > { %16562 = vmatprep.mubr.msk.f32.mxu1 %vm5190_vm15, %v5121_v5 }
 0x609   : > { %16563 = vmatmul.mubr.msk.f32.vlgmr.msra.gmra.mrb[56].mxu1 %vm5190_vm15, %v16444_v41 }
 0x60a   : > { %16565 = vmatprep.mubr.msk.f32.mxu1 %vm5190_vm15, %v5131_v55  ;;  %v5927_v55 = vpop.permute.xlu1 %5926 }
 0x60d   : > { %16566 = vmatmul.mubr.msk.f32.gmra.mrb[58].mxu1 %vm5190_vm15, %v16447_v14 }
 0x60e   : > { %16568 = vmatprep.mubr.msk.f32.mxu1 %vm5190_vm15, %v5141_v17  ;;  %v5937_v1 = vpop.permute.xlu1 %5936 }
 0x611   : > { %16569 = vmatmul.mubr.msk.f32.gmra.mrb[60].mxu1 %vm5190_vm15, %v16450_v37 }
 0x612   : > { %16571 = vmatprep.mubr.msk.f32.mxu1 %vm5190_vm15, %v5151_v40 }
 0x615   : > { %16572 = vmatmul.mubr.msk.f32.gmra.mrb[62].mxu1 %vm5190_vm15, %v16453_v49 }
 0x616   : > { %16590 = vmatprep.mubr.msk.f32.mxu1 %vm26284_vm9, %v5965_v15 }
 0x6dc   : > { %v16564_v3 = vpop.f32.mrb[56].mxu1 }
 0x6dd   : > { %v5950_v4 = vadd.f32 %v16564_v3, %v5917_v11  ;;  %v5862_v41 = vpop.f32.mrb[57].mxu1 }
 0x6de   : > { %v5949_v5 = vadd.f32 %v5912_v21, %v5862_v41  ;;  %v5947_v21 = vpop.permute.xlu1 %5946 }
 0x6df   : > { %v5958_v14 = vmax.f32 %v5950_v4, 0.0 }
 0x6e0   : > { %v5957_v37 = vmax.f32 %v5949_v5, 0.0  ;;  %v16567_v40 = vpop.f32.mrb[58].mxu1  ;;  %v5942_v5 = vpop.permute.xlu0 %5941 }
 0x6e1   : > { %v5952_v17 = vadd.f32 %v16567_v40, %v5927_v55  ;;  %v5872_v49 = vpop.f32.mrb[59].mxu1  ;;  %v23149_v55 = vadd.s32 128, %v22094_v45 }
 0x6e2   : > { %v16962_v27 = vpack.c.bf16 %v5958_v14, %v5957_v37  ;;  %v5951_v32 = vadd.f32 %v5922_v28, %v5872_v49 }
 0x6e3   : > { %v5960_v47 = vmax.f32 %v5952_v17, 0.0  ;;  %vm6284_vm15 = vcmp.eq.s32.totalorder %v23149_v55, %v22097_v2  ;;  %vm6285_vm13 = vcmp.eq.s32.totalorder %v23149_v55, %v22100_v0  ;;  %vm6286_vm9 = vcmp.eq.s32.totalorder %v23149_v55, %v22126_v57  ;;  %v5967_v17 = vld [vmem:[%s26215_s7 + $0x10] sm:$0xff] }
 0x6e4   : > { %v5959_v24 = vmax.f32 %v5951_v32, 0.0  ;;  %v16570_v15 = vpop.f32.mrb[60].mxu1  ;;  %16963 = vmatprep.subr.bf16.mxu1 %v16962_v27  ;;  %vm23161_vm4 = vmpackc.low %vm6285_vm13, %vm6284_vm15  ;;  %vm6287_vm5 = vcmp.eq.s32.totalorder %v23149_v55, %v22858_v10  ;;  %vm26572_vm13 = vcmask 523264   ;;  %vm6288_vm10 = vcmp.eq.s32.totalorder %v23149_v55, %v22885_v12 }
 0x6e5   : > { %v5954_v7 = vadd.f32 %v16570_v15, %v5937_v1  ;;  %v5882_v44 = vpop.f32.mrb[61].mxu1  ;;  %16965 = vmatpush3.bf16.msra.mxu1 %v16962_v27  ;;  %v23152_v1 = vadd.s32 48, %v22070_v51  ;;  %vm23184_vm15 = vmpackc.low %vm6287_vm5, %vm6286_vm9  ;;  %vm6289_vm0 = vcmp.eq.s32.totalorder %v23149_v55, %v22872_v52  ;;  %v26610_v52 = vmov 0 }
 0x6e6   : > { %v16966_v62 = vpack.c.bf16 %v5960_v47, %v5959_v24  ;;  %v5953_v11 = vadd.f32 %v5932_v18, %v5882_v44  ;;  %v23159_v18 = vadd.s32 56, %v22070_v51  ;;  %vm26575_vm1 = vmmov %vm26572_vm13  ;;  %v26613_v10 = vmov 0 }
 0x6e7   : > { %v5962_v3 = vmax.f32 %v5954_v7, 0.0  ;;  %26566 = vst [vmem:[#allocation52_spill] sm:$0xff] %v23152_v1  ;;  %v23170_v24 = vmul.u32 2, %v23152_v1  ;;  %v5966_v7 = vld [vmem:[%s26215_s7 + $0x8] sm:$0xff]  ;;  %vm23212_vm5 = vmpackc.low %vm6289_vm0, %vm6288_vm10  ;;  %v26621_v0 = vmov 0 }
 0x6e8   : > { %v5961_v4 = vmax.f32 %v5953_v11, 0.0  ;;  %v16573_v41 = vpop.f32.mrb[62].mxu1  ;;  %16967 = vmatprep.subr.bf16.mxu1 %v16966_v62  ;;  %26567 = vst [vmem:[#allocation53_spill] sm:$0xff] %v23159_v18  ;;  %v23173_v27 = vmul.u32 2, %v23159_v18  ;;  %vm26582_vm10 = vmmov %vm26575_vm1 }
 0x6e9   : > { %v5956_v28 = vadd.f32 %v16573_v41, %v5947_v21  ;;  %v5892_v14 = vpop.f32.mrb[63].mxu1  ;;  %16969 = vmatpush3.bf16.msra.mxu1 %v16966_v62  ;;  %v23194_v15 = vadd.s32 1, %v23170_v24  ;;  %v5969_v21 = vld [vmem:[%s26215_s7 + $0x20] sm:$0xff]  ;;  %v5970_v41 = vld [vmem:[%s26215_s7 + $0x28] sm:$0xff] }
 0x6ea   : > { %v16970_v32 = vpack.c.bf16 %v5962_v3, %v5961_v4  ;;  %v5955_v37 = vadd.f32 %v5942_v5, %v5892_v14  ;;  %v23197_v11 = vadd.s32 1, %v23173_v27  ;;  %v5968_v3 = vld [vmem:[%s26215_s7 + $0x18] sm:$0xff]  ;;  %v5971_v5 = vld [vmem:[%s26215_s7 + $0x30] sm:$0xff] }
 0x6eb   : > { %v5964_v40 = vmax.f32 %v5956_v28, 0.0  ;;  %26573 = vst [vmem:[#allocation54_spill] sm:$0xff] %v23194_v15  ;;  %vm6291_vm9 = vcmp.eq.s32.totalorder %v23149_v55, %v23194_v15  ;;  %v26579_v28 = vmov 0  ;;  %v5972_v14 = vld [vmem:[%s26215_s7 + $0x38] sm:$0xff] }
 0x6ec   : > { %v5963_v47 = vmax.f32 %v5955_v37, 0.0  ;;  %16971 = vmatprep.subr.bf16.mxu1 %v16970_v32  ;;  %26574 = vst [vmem:[#allocation55_spill] sm:$0xff] %v23197_v11  ;;  %v5974_v37 = vld [vmem:[%s26215_s7 + $0x48] sm:$0xff] }
 0x6ed   : > { %16973 = vmatpush3.bf16.msra.mxu1 %v16970_v32  ;;  %v5973_v32 = vld [vmem:[%s26215_s7 + $0x40] sm:$0xff] }
 0x6ee   : > { %v16974_v44 = vpack.c.bf16 %v5964_v40, %v5963_v47  ;;  %v5975_v40 = vld [vmem:[%s26215_s7 + $0x50] sm:$0xff]  ;;  %v5976_v47 = vld [vmem:[%s26215_s7 + $0x58] sm:$0xff] }
 0x6f0   : > { %16975 = vmatprep.subr.bf16.mxu1 %v16974_v44 }
 0x6f1   : > { %16977 = vmatpush3.bf16.msra.mxu1 %v16974_v44  ;;  %v5977_v44 = vld [vmem:[%s26215_s7 + $0x60] sm:$0xff] }
 0x6f2   : > { %16979 = vmatprep.subr.msk.bf16.mxu1 %vm23161_vm4, %v26563_v35 }
 0x6f4   : > { %16591 = vmatmul.mubr.msk.f32.vlgmr.msra.gmra.mrb[64].mxu1 %vm26572_vm13, %v5966_v7  ;;  %vm6293_vm13 = vcmp.eq.s32.totalorder %v23149_v55, %v23197_v11  ;;  %v5978_v7 = vld [vmem:[%s26215_s7 + $0x68] sm:$0xff] }
 0x6f5   : > { %16593 = vmatprep.mubr.msk.f32.mxu1 %vm26575_vm1, %v5967_v17  ;;  %16981 = vmatpush1.bf16.msk.msra.mxu1 %vm22115_vm2, %v26563_v35  ;;  %vm26578_vm2 = vmmov %vm26575_vm1  ;;  %v5979_v17 = vld [vmem:[%s26215_s7 + $0x70] sm:$0xff] }
 0x6f6   : > { %16983 = vmatprep.subr.msk.bf16.mxu1 %vm23184_vm15, %v26563_v35  ;;  %vm23234_vm0 = vmpackc.low %vm6293_vm13, %vm6291_vm9 }
 0x6f7   : > { %v26580_v28 = vsel %vm23234_vm0, 4294967295, %v26579_v28  ;;  %vm26583_vm9 = vmmov %vm26575_vm1 }
 0x6f8   : > { %16594 = vmatmul.mubr.msk.f32.gmra.mrb[66].mxu1 %vm26575_vm1, %v5968_v3  ;;  %vm26584_vm13 = vmmov %vm26575_vm1  ;;  %v5980_v3 = vld [vmem:[%s26215_s7 + $0x78] sm:$0xff] }
 0x6f9   : > { %16596 = vmatprep.mubr.msk.f32.mxu1 %vm26578_vm2, %v5969_v21  ;;  %16985 = vmatpush1.bf16.msk.msra.mxu1 %vm22877_vm8, %v26563_v35  ;;  %vm26581_vm2 = vmmov %vm26575_vm1  ;;  %v5981_v21 = vld [vmem:[%s26215_s7 + $0x80] sm:$0xff] }
 0x6fa   : > { %16987 = vmatprep.subr.msk.bf16.mxu1 %vm23212_vm5, %v26563_v35 }
 0x6fc   : > { %16597 = vmatmul.mubr.msk.f32.gmra.mrb[68].mxu1 %vm26581_vm2, %v5970_v41  ;;  %vm26585_vm2 = vmmov %vm26575_vm1  ;;  %v5982_v41 = vld [vmem:[%s26215_s7 + $0x88] sm:$0xff] }
 0x6fd   : > { %16599 = vmatprep.mubr.msk.f32.mxu1 %vm26582_vm10, %v5971_v5  ;;  %16989 = vmatpush1.bf16.msk.msra.mxu1 %vm22897_vm6, %v26563_v35  ;;  %vm26586_vm10 = vmmov %vm26575_vm1  ;;  %v5983_v5 = vld [vmem:[%s26215_s7 + $0x90] sm:$0xff]  ;;  %vm26624_vm6 = vcmask 695296  }
 0x6fe   : > { %16991 = vmatprep.subr.msk.bf16.mxu1 %vm23234_vm0, %v26563_v35 }
 0x700   : > { %16600 = vmatmul.mubr.msk.f32.gmra.mrb[70].mxu1 %vm26575_vm1, %v5972_v14  ;;  %v5984_v14 = vld [vmem:[%s26215_s7 + $0x98] sm:$0xff] }
 0x701   : > { %16602 = vmatprep.mubr.msk.f32.mxu1 %vm26583_vm9, %v5973_v32  ;;  %vm26587_vm9 = vmmov %vm26575_vm1  ;;  %v23300_v32 = vadd.s32 64, %v22070_v51 }
 0x703   : > { %26593 = vst [vmem:[#allocation56_spill] sm:$0xff] %v23300_v32 }
 0x704   : > { %16603 = vmatmul.mubr.msk.f32.gmra.mrb[72].mxu1 %vm26584_vm13, %v5974_v37  ;;  %vm26588_vm13 = vmmov %vm26575_vm1  ;;  %v23303_v37 = vadd.s32 72, %v22070_v51 }
 0x705   : > { %16605 = vmatprep.mubr.msk.f32.mxu1 %vm26585_vm2, %v5975_v40  ;;  %vm26589_vm2 = vmmov %vm26575_vm1  ;;  %v23306_v40 = vmul.u32 2, %v23300_v32  ;;  %v26604_v32 = vmov 0 }
 0x706   : > { %26594 = vst [vmem:[#allocation57_spill] sm:$0xff] %v23303_v37 }
 0x707   : > { %v23428_v26 = vadd.s32 2, %v23306_v40 }
 0x708   : > { %16606 = vmatmul.mubr.msk.f32.gmra.mrb[74].mxu1 %vm26586_vm10, %v5976_v47  ;;  %vm26590_vm10 = vmmov %vm26575_vm1  ;;  %v23309_v47 = vmul.u32 2, %v23303_v37 }
 0x709   : > { %16608 = vmatprep.mubr.msk.f32.mxu1 %vm26575_vm1, %v5977_v44  ;;  %v26595_v44 = vmov 0 }
 0x70c   : > { %16609 = vmatmul.mubr.msk.f32.gmra.mrb[76].mxu1 %vm26587_vm9, %v5978_v7  ;;  %vm26591_vm9 = vmmov %vm26575_vm1  ;;  %v23320_v7 = vadd.s32 1, %v23306_v40 }
 0x70d   : > { %16611 = vmatprep.mubr.msk.f32.mxu1 %vm26588_vm13, %v5979_v17  ;;  %vm26592_vm13 = vmmov %vm26575_vm1  ;;  %v23323_v17 = vadd.s32 1, %v23309_v47 }
 0x70e   : > { %26597 = vst [vmem:[#allocation58_spill] sm:$0xff] %v23320_v7 }
 0x70f   : > { %26598 = vst [vmem:[#allocation59_spill] sm:$0xff] %v23323_v17  ;;  %vm6296_vm0 = vcmp.eq.s32.totalorder %v22094_v45, %v23323_v17 }
 0x710   : > { %16612 = vmatmul.mubr.msk.f32.gmra.mrb[78].mxu1 %vm26589_vm2, %v5980_v3  ;;  %vm6290_vm2 = vcmp.eq.s32.totalorder %v22094_v45, %v23194_v15  ;;  %v23326_v3 = vadd.s32 80, %v22070_v51  ;;  %v23409_v15 = vadd.s32 2, %v23173_v27 }
 0x711   : > { %16614 = vmatprep.mubr.msk.f32.mxu1 %vm26590_vm10, %v5981_v21  ;;  %vm6292_vm10 = vcmp.eq.s32.totalorder %v22094_v45, %v23197_v11  ;;  %v23406_v11 = vadd.s32 2, %v23170_v24 }
 0x712   : > { %26599 = vst [vmem:[#allocation60_spill] sm:$0xff] %v23326_v3  ;;  %v23336_v21 = vmul.u32 2, %v23326_v3 }
 0x714   : > { %16615 = vmatmul.mubr.msk.f32.gmra.mrb[80].mxu1 %vm26575_vm1, %v5982_v41  ;;  %vm23315_vm1 = vmpackc.low %vm6292_vm10, %vm6290_vm2  ;;  %v26600_v41 = vmov 0  ;;  %vm6294_vm10 = vcmp.eq.s32.totalorder %v22094_v45, %v23320_v7 }
 0x715   : > { %16617 = vmatprep.mubr.msk.f32.mxu1 %vm26591_vm9, %v5983_v5  ;;  %v26596_v44 = vsel %vm23315_vm1, 4294967295, %v26595_v44  ;;  %16993 = vmatpush1.bf16.msk.msra.mxu1 %vm23315_vm1, %v26563_v35  ;;  %vm6295_vm9 = vcmp.eq.s32.totalorder %v23149_v55, %v23320_v7  ;;  %vm23349_vm1 = vmpackc.low %vm6296_vm0, %vm6294_vm10  ;;  %v26602_v5 = vmov 0  ;;  %vm6231_vm10 = vcmp.eq.s32.totalorder %v23149_v55, %v22224_v50 }
 0x716   : > { %v26603_v5 = vsel %vm23349_vm1, 4294967295, %v26602_v5 }
 0x718   : > { %16618 = vmatmul.mubr.msk.f32.gmra.mrb[82].mxu1 %vm26592_vm13, %v5984_v14  ;;  %vm6297_vm13 = vcmp.eq.s32.totalorder %v23149_v55, %v23323_v17  ;;  %v23354_v14 = vadd.s32 1, %v23336_v21 }
 0x719   : > { %6416 = vmatprep.mubr.f32.mxu1 %v26561_v61  ;;  %vm23338_vm2 = vmpackc.low %vm6297_vm13, %vm6295_vm9  ;;  %vm26312_vm13 = vcmask 1044480  }
 0x71a   : > { %v26601_v41 = vsel %vm23338_vm2, 4294967295, %v26600_v41  ;;  %16995 = vmatprep.subr.msk.bf16.mxu1 %vm23338_vm2, %v26563_v35  ;;  %vm26310_vm9 = vcmp.eq.s32.totalorder %v23149_v55, %v23354_v14  ;;  %vm26308_vm0 = vcmp.eq.s32.totalorder %v22094_v45, %v23354_v14 }
 0x71b   : > { %16997 = vmatpush1.bf16.msk.msra.mxu1 %vm23349_vm1, %v26563_v35  ;;  %v14500_v3 = vsel %vm26310_vm9, 1.0, %v26561_v61  ;;  %v14499_v37 = vsel %vm26308_vm0, 1.0, %v26561_v61  ;;  %vm6232_vm1 = vcmp.eq.s32.totalorder %v23149_v55, %v22227_v42  ;;  %vm6233_vm0 = vcmp.eq.s32.totalorder %v23149_v55, %v22375_v25 }
 0x71c   : > { %14521 = vmatprep.subr.msk.mxu1 %vm26312_vm13, %v14500_v3  ;;  %vm23377_vm2 = vmpackc.low %vm6232_vm1, %vm6231_vm10  ;;  %vm6234_vm1 = vcmp.eq.s32.totalorder %v23149_v55, %v22979_v59  ;;  %vm26322_vm10 = vcmask 695296  }
 0x71d   : > { %v26605_v32 = vsel %vm23377_vm2, 4294967295, %v26604_v32  ;;  %vm23396_vm9 = vmpackc.low %vm6234_vm1, %vm6233_vm0  ;;  %vm6238_vm1 = vcmp.eq.s32.totalorder %v23149_v55, %v23406_v11 }
 0x71e   : > { %26606 = vst [vmem:[#allocation61_spill] sm:$0xff] %v26605_v32  ;;  %v26607_v32 = vmov 0 }
 0x71f   : > { %14522 = vmatpush1.msk.msra.mxu1 %vm26312_vm13, %v14499_v37  ;;  %v26608_v32 = vsel %vm23396_vm9, 4294967295, %v26607_v32  ;;  %vm6235_vm13 = vcmp.eq.s32.totalorder %v23149_v55, %v22908_v58 }
 0x720   : > { %16999 = vmatprep.subr.msk.bf16.mxu1 %vm23377_vm2, %v26563_v35  ;;  %26609 = vst [vmem:[#allocation62_spill] sm:$0xff] %v26608_v32  ;;  %vm6236_vm2 = vcmp.eq.s32.totalorder %v23149_v55, %v22905_v30  ;;  %v23431_v32 = vadd.s32 2, %v23309_v47 }
 0x721   : > { %vm23418_vm0 = vmpackc.low %vm6236_vm2, %vm6235_vm13  ;;  %vm6237_vm13 = vcmp.eq.s32.totalorder %v22094_v45, %v23406_v11 }
 0x722   : > { %v26611_v52 = vsel %vm23418_vm0, 4294967295, %v26610_v52 }
 0x723   : > { %26612 = vst [vmem:[#allocation63_spill] sm:$0xff] %v26611_v52  ;;  %v23458_v52 = vadd.s32 2, %v23336_v21 }
 0x725   : > { %26617 = vst [vmem:[#allocation65_spill] sm:$0xff] %v23458_v52 }
 0x7c7   : > { %v23384_v3 = vpop.f32.mrb[64].mxu1 }
 0x7c8   : > { %v23386_v18 = vpop.f32.mrb[65].mxu1 }
 0x7cb   : > { %v23388_v1 = vpop.f32.mrb[66].mxu1 }
 0x7cc   : > { %v23390_v17 = vpop.f32.mrb[67].mxu1 }
 0x7cf   : > { %v16598_v37 = vpop.f32.mrb[68].mxu1 }
 0x7d0   : > { %v6136_v7 = vpop.f32.mrb[69].mxu1 }
 0x7d1   : > { %14523 = vmatmul.mubr.msk.f32.vlgmr.msra.gmra.mrb[84].mxu1 %vm26322_vm10, %v6136_v7 }
 0x7d2   : > { %17001 = vmatpush1.bf16.msk.msra.mxu1 %vm22236_vm7, %v26563_v35  ;;  %6422 = vmatprep.mubr.f32.mxu1 %v26561_v61  ;;  %vm6240_vm7 = vcmp.eq.s32.totalorder %v23149_v55, %v23409_v15 }
 0x7d3   : > { %17003 = vmatprep.subr.msk.bf16.mxu1 %vm23396_vm9, %v26563_v35  ;;  %v16601_v7 = vpop.f32.mrb[70].mxu1  ;;  %vm23442_vm2 = vmpackc.low %vm6240_vm7, %vm6238_vm1  ;;  %vm6242_vm9 = vcmp.eq.s32.totalorder %v23149_v55, %v23428_v26  ;;  %vm6241_vm1 = vcmp.eq.s32.totalorder %v22094_v45, %v23428_v26 }
 0x7d4   : > { %v6146_v12 = vpop.f32.mrb[71].mxu1  ;;  %v26614_v10 = vsel %vm23442_vm2, 4294967295, %v26613_v10 }
 0x7d5   : > { %14524 = vmatmul.mubr.msk.f32.gmra.mrb[86].mxu1 %vm26322_vm10, %v16598_v37  ;;  %26615 = vst [vmem:[#allocation64_spill] sm:$0xff] %v26614_v10  ;;  %vm6239_vm10 = vcmp.eq.s32.totalorder %v22094_v45, %v23409_v15  ;;  %v26625_v10 = vmov 0 }
 0x7d6   : > { %17005 = vmatpush1.bf16.msk.msra.mxu1 %vm22987_vm11, %v26563_v35  ;;  %6428 = vmatprep.mubr.f32.mxu1 %v26561_v61  ;;  %vm26616_vm11 = vcmask 695296   ;;  %vm23467_vm7 = vmpackc.low %vm6239_vm10, %vm6237_vm13  ;;  %vm26337_vm10 = vcmp.eq.s32.totalorder %v23149_v55, %v23458_v52  ;;  %vm26628_vm13 = vcmask 1044480  }
 0x7d7   : > { %17007 = vmatprep.subr.msk.bf16.mxu1 %vm23418_vm0, %v26563_v35  ;;  %v23440_v37 = vpop.f32.mrb[72].mxu1  ;;  %vm6244_vm0 = vcmp.eq.s32.totalorder %v23149_v55, %v23431_v32 }
 0x7d8   : > { %v23450_v53 = vpop.f32.mrb[73].mxu1 }
 0x7d9   : > { %14525 = vmatmul.mubr.msk.f32.gmra.mrb[88].mxu1 %vm26616_vm11, %v6146_v12  ;;  %v26618_v12 = vmov 0  ;;  %vm23473_vm11 = vmpackc.low %vm6244_vm0, %vm6242_vm9  ;;  %vm6548_vm0 = vcmp.eq.s32.totalorder %v23149_v55, %v22082_v63 }
 0x7da   : > { %17009 = vmatpush1.bf16.msk.msra.mxu1 %vm22920_vm3, %v26563_v35  ;;  %6434 = vmatprep.mubr.f32.mxu1 %v26561_v61  ;;  %v26619_v12 = vsel %vm23467_vm7, 4294967295, %v26618_v12  ;;  %v26622_v0 = vsel %vm23473_vm11, 4294967295, %v26621_v0  ;;  %vm6243_vm3 = vcmp.eq.s32.totalorder %v22094_v45, %v23431_v32 }
 0x7db   : > { %17011 = vmatprep.subr.msk.bf16.mxu1 %vm23442_vm2, %v26563_v35  ;;  %26620 = vst [vmem:[#allocation66_spill] sm:$0xff] %v26619_v12  ;;  %v23471_v57 = vpop.f32.mrb[74].mxu1  ;;  %26623 = vst [vmem:[#allocation67_spill] sm:$0xff] %v26622_v0 }
 0x7dc   : > { %v23481_v60 = vpop.f32.mrb[75].mxu1  ;;  %vm23493_vm9 = vmpackc.low %vm6243_vm3, %vm6241_vm1  ;;  %vm6549_vm3 = vcmp.eq.s32.totalorder %v23149_v55, %v22085_v34  ;;  %vm6550_vm1 = vcmp.eq.s32.totalorder %v23149_v55, %v22110_v48  ;;  %v26629_v34 = vmov 0 }
 0x7dd   : > { %14526 = vmatmul.mubr.msk.f32.gmra.mrb[90].mxu1 %vm26624_vm6, %v16601_v7  ;;  %v26626_v10 = vsel %vm23493_vm9, 4294967295, %v26625_v10  ;;  %v14484_v7 = vsel %vm26337_vm10, 1.0, %v26561_v61  ;;  %vm26343_vm6 = vcmp.eq.s32.totalorder %v22094_v45, %v23458_v52  ;;  %vm6551_vm10 = vcmp.eq.s32.totalorder %v23149_v55, %v22852_v31 }
 0x7de   : > { %17013 = vmatpush1.bf16.msk.msra.mxu1 %vm23467_vm7, %v26563_v35  ;;  %6523 = vmatprep.mubr.f32.mxu1 %v26561_v61  ;;  %26627 = vst [vmem:[#allocation68_spill] sm:$0xff] %v26626_v10  ;;  %v14483_v0 = vsel %vm26343_vm6, 1.0, %v26561_v61  ;;  %vm26635_vm6 = vcmask 695296  }
 0x7df   : > { %17015 = vmatprep.subr.msk.bf16.mxu1 %vm23473_vm11, %v26563_v35  ;;  %v23497_v2 = vpop.f32.mrb[76].mxu1  ;;  %vm23525_vm11 = vmpackc.low %vm6549_vm3, %vm6548_vm0  ;;  %vm6552_vm0 = vcmp.eq.s32.totalorder %v23149_v55, %v22869_v36  ;;  %vm6553_vm3 = vcmp.eq.s32.totalorder %v23149_v55, %v22864_v13 }
 0x7e0   : > { %v23505_v12 = vpop.f32.mrb[77].mxu1  ;;  %v26630_v34 = vsel %vm23525_vm11, 4294967295, %v26629_v34 }
 0x7e1   : > { %26631 = vst [vmem:[#allocation69_spill] sm:$0xff] %v26630_v34  ;;  %v23793_v34 = vadd.s32 4294967294, %v23170_v24 }
 0x7e2   : > { %17017 = vmatpush1.bf16.msk.msra.mxu1 %vm23493_vm9, %v26563_v35  ;;  %vm23532_vm9 = vmpackc.low %vm6551_vm10, %vm6550_vm1  ;;  %vm6555_vm1 = vcmp.eq.s32.totalorder %v23149_v55, %v23170_v24 }
 0x7e3   : > { %14547 = vmatprep.subr.msk.mxu1 %vm26628_vm13, %v14484_v7  ;;  %v23523_v63 = vpop.f32.mrb[78].mxu1  ;;  %v26632_v7 = vmov 0  ;;  %vm23556_vm10 = vmpackc.low %vm6553_vm3, %vm6552_vm0  ;;  %vm6554_vm3 = vcmp.eq.s32.totalorder %v22094_v45, %v23170_v24  ;;  %26703 = vst [vmem:[#allocation90_spill] sm:$0xff] %v23793_v34 }
 0x7e4   : > { %v23529_v10 = vpop.f32.mrb[79].mxu1  ;;  %v26633_v7 = vsel %vm23532_vm9, 4294967295, %v26632_v7 }
 0x7e5   : > { %26634 = vst [vmem:[#allocation70_spill] sm:$0xff] %v26633_v7 }
 0x7e6   : > { %14548 = vmatpush1.msk.msra.mxu1 %vm26628_vm13, %v14483_v0  ;;  %vm6557_vm13 = vcmp.eq.s32.totalorder %v23149_v55, %v23173_v27 }
 0x7e7   : > { %14549 = vmatmul.mubr.msk.f32.vlgmr.msra.gmra.mrb[84].mxu1 %vm26635_vm6, %v23386_v18  ;;  %17019 = vmatprep.subr.msk.bf16.mxu1 %vm23525_vm11, %v26563_v35  ;;  %v23545_v31 = vpop.f32.mrb[80].mxu1  ;;  %v26636_v18 = vmov 0  ;;  %vm23577_vm0 = vmpackc.low %vm6557_vm13, %vm6555_vm1  ;;  %vm26643_vm1 = vnez %v26523_v46  ;;  %vm26650_vm11 = vcmask 695296   ;;  %v26693_v46 = vmov 0 }
 0x7e8   : > { %17021 = vmatpush1.bf16.msk.msra.mxu1 %vm22411_vm12, %v26563_v35  ;;  %6529 = vmatprep.mubr.f32.mxu1 %v26561_v61  ;;  %v23551_v0 = vpop.f32.mrb[81].mxu1  ;;  %v26637_v18 = vsel %vm23556_vm10, 4294967295, %v26636_v18  ;;  %vm6561_vm12 = vcmp.eq.s32.totalorder %v23149_v55, %v23309_v47 }
 0x7e9   : > { %17023 = vmatprep.subr.msk.bf16.mxu1 %vm23532_vm9, %v26563_v35  ;;  %26638 = vst [vmem:[#allocation71_spill] sm:$0xff] %v26637_v18  ;;  %vm6559_vm9 = vcmp.eq.s32.totalorder %v23149_v55, %v23306_v40  ;;  %v26644_v18 = vmov 0 }
 0x7eb   : > { %14550 = vmatmul.mubr.msk.f32.gmra.mrb[86].mxu1 %vm26635_vm6, %v23384_v3  ;;  %v23566_v29 = vpop.f32.mrb[82].mxu1  ;;  %v26639_v3 = vmov 0  ;;  %vm6556_vm6 = vcmp.eq.s32.totalorder %v22094_v45, %v23173_v27 }
 0x7ec   : > { %17025 = vmatpush1.bf16.msk.msra.mxu1 %vm23025_vm14, %v26563_v35  ;;  %6535 = vmatprep.mubr.f32.mxu1 %v26561_v61  ;;  %v23572_v7 = vpop.f32.mrb[83].mxu1  ;;  %v26640_v3 = vsel %vm23577_vm0, 4294967295, %v26639_v3  ;;  %vm26642_vm14 = vcmask 695296   ;;  %vm23598_vm13 = vmpackc.low %vm6556_vm6, %vm6554_vm3  ;;  %vm6717_vm3 = vcmp.eq.s32.totalorder %v23149_v55, %v22485_v19  ;;  %vm6718_vm6 = vcmp.eq.s32.totalorder %v23149_v55, %v22536_v6 }
 0x7ed   : > { %17027 = vmatprep.subr.msk.bf16.mxu1 %vm23556_vm10, %v26563_v35  ;;  %26641 = vst [vmem:[#allocation72_spill] sm:$0xff] %v26640_v3  ;;  %v26645_v18 = vsel %vm23598_vm13, 4294967295, %v26644_v18  ;;  %vm6558_vm10 = vcmp.eq.s32.totalorder %v22094_v45, %v23306_v40  ;;  %v26651_v3 = vmov 0 }
 0x7ee   : > { %26646 = vst [vmem:[#allocation73_spill] sm:$0xff] %v26645_v18  ;;  %v26655_v18 = vmov 0 }
 0x7ef   : > { %14551 = vmatmul.mubr.msk.f32.gmra.mrb[88].mxu1 %vm26642_vm14, %v23390_v17  ;;  %vm23602_vm14 = vmpackc.low %vm6561_vm12, %vm6559_vm9  ;;  %v26647_v17 = vmov 0  ;;  %vm6716_vm9 = vcmp.eq.s32.totalorder %v23149_v55, %v22482_v23 }
 0x7f0   : > { %17029 = vmatpush1.bf16.msk.msra.mxu1 %vm26643_vm1, %v26563_v35  ;;  %6541 = vmatprep.mubr.f32.mxu1 %v26561_v61  ;;  %v26648_v17 = vsel %vm23602_vm14, 4294967295, %v26647_v17  ;;  %vm6560_vm1 = vcmp.eq.s32.totalorder %v22094_v45, %v23309_v47 }
 0x7f1   : > { %17031 = vmatprep.subr.msk.bf16.mxu1 %vm23577_vm0, %v26563_v35  ;;  %26649 = vst [vmem:[#allocation74_spill] sm:$0xff] %v26648_v17  ;;  %vm26356_vm0 = vcmp.eq.s32.totalorder %v23149_v55, %v23336_v21  ;;  %vm23621_vm12 = vmpackc.low %vm6560_vm1, %vm6558_vm10  ;;  %vm26654_vm10 = vcmask 1044480   ;;  %vm6719_vm1 = vcmp.eq.s32.totalorder %v23149_v55, %v23053_v20 }
 0x7f2   : > { %v26652_v3 = vsel %vm23621_vm12, 4294967295, %v26651_v3 }
 0x7f3   : > { %14552 = vmatmul.mubr.msk.f32.gmra.mrb[90].mxu1 %vm26650_vm11, %v23388_v1  ;;  %26653 = vst [vmem:[#allocation75_spill] sm:$0xff] %v26652_v3  ;;  %v14568_v1 = vsel %vm26356_vm0, 1.0, %v26561_v61  ;;  %vm26361_vm11 = vcmp.eq.s32.totalorder %v22094_v45, %v23336_v21  ;;  %vm23647_vm0 = vmpackc.low %vm6717_vm3, %vm6716_vm9  ;;  %v26659_v3 = vmov 0  ;;  %vm6721_vm9 = vcmp.eq.s32.totalorder %v23149_v55, %v22939_v33 }
 0x7f4   : > { %17033 = vmatpush1.bf16.msk.msra.mxu1 %vm23598_vm13, %v26563_v35  ;;  %6678 = vmatprep.mubr.f32.mxu1 %v26561_v61  ;;  %v14567_v17 = vsel %vm26361_vm11, 1.0, %v26561_v61  ;;  %v26656_v18 = vsel %vm23647_vm0, 4294967295, %v26655_v18  ;;  %vm6720_vm11 = vcmp.eq.s32.totalorder %v23149_v55, %v22942_v56  ;;  %vm26685_vm13 = vcmask 695296  }
 0x7f5   : > { %17035 = vmatprep.subr.msk.bf16.mxu1 %vm23602_vm14, %v26563_v35  ;;  %26657 = vst [vmem:[#allocation76_spill] sm:$0xff] %v26656_v18  ;;  %vm26658_vm14 = vmmov %vm26654_vm10  ;;  %v23692_v18 = vadd.s32 4294967295, %v23309_v47 }
 0x7f6   : > { %vm23678_vm3 = vmpackc.low %vm6721_vm9, %vm6720_vm11  ;;  %vm26672_vm11 = vnez %v26550_v38  ;;  %v26682_v38 = vmov 0 }
 0x7f7   : > { %26671 = vst [vmem:[#allocation82_spill] sm:$0xff] %v23692_v18 }
 0x7f8   : > { %17037 = vmatpush1.bf16.msk.msra.mxu1 %vm23621_vm12, %v26563_v35  ;;  %vm23652_vm12 = vmpackc.low %vm6719_vm1, %vm6718_vm6 }
 0x7f9   : > { %14589 = vmatprep.subr.msk.mxu1 %vm26654_vm10, %v14568_v1  ;;  %v26660_v3 = vsel %vm23652_vm12, 4294967295, %v26659_v3  ;;  %vm26662_vm10 = vcmask 695296   ;;  %v23666_v1 = vadd.s32 4294967295, %v23170_v24 }
 0x7fa   : > { %26661 = vst [vmem:[#allocation77_spill] sm:$0xff] %v26660_v3  ;;  %vm26669_vm6 = vmmov %vm26662_vm10  ;;  %v26692_v3 = vld [vmem:[#allocation50_spill] sm:$0xff] }
 0x7fb   : > { %26663 = vst [vmem:[#allocation78_spill] sm:$0xff] %v23666_v1  ;;  %vm6723_vm1 = vcmp.eq.s32.totalorder %v23149_v55, %v23666_v1 }
 0x7fc   : > { %14590 = vmatpush1.msk.msra.mxu1 %vm26658_vm14, %v14567_v17  ;;  %v23669_v17 = vadd.s32 4294967295, %v23173_v27  ;;  %vm26665_vm14 = vnez %v26500_v22  ;;  %v23689_v22 = vadd.s32 4294967295, %v23306_v40 }
 0x7fd   : > { %14591 = vmatmul.mubr.msk.f32.vlgmr.msra.gmra.mrb[84].mxu1 %vm26662_vm10, %v23450_v53  ;;  %17039 = vmatprep.subr.msk.bf16.mxu1 %vm23647_vm0, %v26563_v35  ;;  %v26666_v53 = vmov 0  ;;  %vm6729_vm0 = vcmp.eq.s32.totalorder %v23149_v55, %v23692_v18 }
 0x7fe   : > { %26664 = vst [vmem:[#allocation79_spill] sm:$0xff] %v23669_v17  ;;  %17041 = vmatpush1.bf16.msk.msra.mxu1 %vm26665_vm14, %v26563_v35  ;;  %6684 = vmatprep.mubr.f32.mxu1 %v26561_v61  ;;  %v26667_v53 = vsel %vm23678_vm3, 4294967295, %v26666_v53  ;;  %vm6725_vm10 = vcmp.eq.s32.totalorder %v23149_v55, %v23669_v17  ;;  %26670 = vst [vmem:[#allocation81_spill] sm:$0xff] %v23689_v22  ;;  %vm26676_vm14 = vcmask 695296  }
 0x7ff   : > { %17043 = vmatprep.subr.msk.bf16.mxu1 %vm23652_vm12, %v26563_v35  ;;  %26668 = vst [vmem:[#allocation80_spill] sm:$0xff] %v26667_v53  ;;  %vm23701_vm9 = vmpackc.low %vm6725_vm10, %vm6723_vm1  ;;  %vm6724_vm12 = vcmp.eq.s32.totalorder %v22094_v45, %v23669_v17  ;;  %v23716_v53 = vadd.s32 4294967295, %v23336_v21  ;;  %vm26678_vm1 = vnez %v26528_v9  ;;  %v26691_v9 = vld [vmem:[#allocation31_spill] sm:$0xff] }
 0x801   : > { %14592 = vmatmul.mubr.msk.f32.gmra.mrb[86].mxu1 %vm26669_vm6, %v23440_v37  ;;  %v26673_v37 = vmov 0  ;;  %vm6722_vm6 = vcmp.eq.s32.totalorder %v22094_v45, %v23666_v1  ;;  %26677 = vst [vmem:[#allocation84_spill] sm:$0xff] %v23716_v53 }
 0x802   : > { %17045 = vmatpush1.bf16.msk.msra.mxu1 %vm26672_vm11, %v26563_v35  ;;  %6690 = vmatprep.mubr.f32.mxu1 %v26561_v61  ;;  %v26674_v37 = vsel %vm23701_vm9, 4294967295, %v26673_v37  ;;  %vm6727_vm11 = vcmp.eq.s32.totalorder %v23149_v55, %v23689_v22 }
 0x803   : > { %17047 = vmatprep.subr.msk.bf16.mxu1 %vm23678_vm3, %v26563_v35  ;;  %26675 = vst [vmem:[#allocation83_spill] sm:$0xff] %v26674_v37  ;;  %vm23729_vm10 = vmpackc.low %vm6729_vm0, %vm6727_vm11  ;;  %vm6726_vm3 = vcmp.eq.s32.totalorder %v22094_v45, %v23689_v22  ;;  %v26686_v37 = vmov 0 }
 0x804   : > { %v26683_v38 = vsel %vm23729_vm10, 4294967295, %v26682_v38 }
 0x805   : > { %14593 = vmatmul.mubr.msk.f32.gmra.mrb[88].mxu1 %vm26676_vm14, %v23481_v60  ;;  %vm23725_vm14 = vmpackc.low %vm6724_vm12, %vm6722_vm6  ;;  %v26679_v60 = vmov 0  ;;  %26684 = vst [vmem:[#allocation86_spill] sm:$0xff] %v26683_v38  ;;  %vm6884_vm12 = vcmp.eq.s32.totalorder %v23149_v55, %v22545_v54  ;;  %vm6886_vm6 = vcmp.eq.s32.totalorder %v23149_v55, %v26691_v9 }
 0x806   : > { %17049 = vmatpush1.bf16.msk.msra.mxu1 %vm26678_vm1, %v26563_v35  ;;  %6696 = vmatprep.mubr.f32.mxu1 %v26561_v61  ;;  %v26680_v60 = vsel %vm23725_vm14, 4294967295, %v26679_v60  ;;  %vm6728_vm1 = vcmp.eq.s32.totalorder %v22094_v45, %v23692_v18 }
 0x807   : > { %17051 = vmatprep.subr.msk.bf16.mxu1 %vm23701_vm9, %v26563_v35  ;;  %26681 = vst [vmem:[#allocation85_spill] sm:$0xff] %v26680_v60  ;;  %vm26376_vm9 = vcmp.eq.s32.totalorder %v23149_v55, %v23716_v53  ;;  %vm23748_vm0 = vmpackc.low %vm6728_vm1, %vm6726_vm3  ;;  %v26689_v60 = vld [vmem:[#allocation29_spill] sm:$0xff]  ;;  %vm26690_vm3 = vcmask 1044480   ;;  %vm6887_vm1 = vcmp.eq.s32.totalorder %v23149_v55, %v26692_v3  ;;  %v26705_v3 = vld [vmem:[#allocation30_spill] sm:$0xff] }
 0x808   : > { %v26687_v37 = vsel %vm23748_vm0, 4294967295, %v26686_v37  ;;  %vm6885_vm11 = vcmp.eq.s32.totalorder %v23149_v55, %v26689_v60 }
 0x809   : > { %14594 = vmatmul.mubr.msk.f32.gmra.mrb[90].mxu1 %vm26685_vm13, %v23471_v57  ;;  %26688 = vst [vmem:[#allocation87_spill] sm:$0xff] %v26687_v37  ;;  %v14610_v57 = vsel %vm26376_vm9, 1.0, %v26561_v61  ;;  %vm26381_vm13 = vcmp.eq.s32.totalorder %v22094_v45, %v23716_v53  ;;  %vm23774_vm9 = vmpackc.low %vm6885_vm11, %vm6884_vm12  ;;  %v26697_v37 = vmov 0  ;;  %vm6889_vm12 = vcmp.eq.s32.totalorder %v23149_v55, %v26702_v43 }
 0x80a   : > { %17053 = vmatpush1.bf16.msk.msra.mxu1 %vm23725_vm14, %v26563_v35  ;;  %6846 = vmatprep.mubr.f32.mxu1 %v26561_v61  ;;  %v14609_v38 = vsel %vm26381_vm13, 1.0, %v26561_v61  ;;  %v26694_v46 = vsel %vm23774_vm9, 4294967295, %v26693_v46  ;;  %vm26728_vm14 = vcmask 695296  }
 0x80b   : > { %17055 = vmatprep.subr.msk.bf16.mxu1 %vm23729_vm10, %v26563_v35  ;;  %26695 = vst [vmem:[#allocation88_spill] sm:$0xff] %v26694_v46  ;;  %vm26696_vm10 = vmmov %vm26690_vm3  ;;  %v23819_v46 = vadd.s32 4294967294, %v23309_v47 }
 0x80d   : > { %26712 = vst [vmem:[#allocation94_spill] sm:$0xff] %v23819_v46 }
 0x80e   : > { %17057 = vmatpush1.bf16.msk.msra.mxu1 %vm23748_vm0, %v26563_v35  ;;  %vm23779_vm0 = vmpackc.low %vm6887_vm1, %vm6886_vm6  ;;  %vm6891_vm1 = vcmp.eq.s32.totalorder %v23149_v55, %v23793_v34 }
 0x80f   : > { %14631 = vmatprep.subr.msk.mxu1 %vm26690_vm3, %v14610_v57  ;;  %v26698_v37 = vsel %vm23779_vm0, 4294967295, %v26697_v37  ;;  %vm26700_vm3 = vcmask 695296   ;;  %v26701_v57 = vld [vmem:[#allocation45_spill] sm:$0xff] }
 0x810   : > { %26699 = vst [vmem:[#allocation89_spill] sm:$0xff] %v26698_v37  ;;  %vm6888_vm13 = vcmp.eq.s32.totalorder %v23149_v55, %v26701_v57  ;;  %vm26710_vm6 = vmmov %vm26700_vm3  ;;  %v26713_v37 = vld [vmem:[#allocation51_spill] sm:$0xff]  ;;  %v26761_v57 = vmov 1.0  }
 0x811   : > { %vm23805_vm11 = vmpackc.low %vm6889_vm12, %vm6888_vm13  ;;  %vm26714_vm13 = vnez %v26713_v37  ;;  %v26720_v37 = vld [vmem:[#allocation46_spill] sm:$0xff] }
 0x812   : > { %14632 = vmatpush1.msk.msra.mxu1 %vm26696_vm10, %v14609_v38  ;;  %v23796_v38 = vadd.s32 4294967294, %v23173_v27  ;;  %vm26706_vm10 = vnez %v26705_v3  ;;  %v23816_v3 = vadd.s32 4294967294, %v23306_v40 }
 0x813   : > { %14633 = vmatmul.mubr.msk.f32.vlgmr.msra.gmra.mrb[84].mxu1 %vm26700_vm3, %v23505_v12  ;;  %17059 = vmatprep.subr.msk.bf16.mxu1 %vm23774_vm9, %v26563_v35  ;;  %v26707_v12 = vmov 0  ;;  %vm6897_vm9 = vcmp.eq.s32.totalorder %v23149_v55, %v23819_v46 }
 0x814   : > { %26704 = vst [vmem:[#allocation91_spill] sm:$0xff] %v23796_v38  ;;  %17061 = vmatpush1.bf16.msk.msra.mxu1 %vm26706_vm10, %v26563_v35  ;;  %6852 = vmatprep.mubr.f32.mxu1 %v26561_v61  ;;  %v26708_v12 = vsel %vm23805_vm11, 4294967295, %v26707_v12  ;;  %vm6893_vm3 = vcmp.eq.s32.totalorder %v23149_v55, %v23796_v38  ;;  %26711 = vst [vmem:[#allocation93_spill] sm:$0xff] %v23816_v3  ;;  %vm26718_vm10 = vcmask 695296  }
 0x815   : > { %17063 = vmatprep.subr.msk.bf16.mxu1 %vm23779_vm0, %v26563_v35  ;;  %26709 = vst [vmem:[#allocation92_spill] sm:$0xff] %v26708_v12  ;;  %vm23828_vm12 = vmpackc.low %vm6893_vm3, %vm6891_vm1  ;;  %vm6892_vm0 = vcmp.eq.s32.totalorder %v22094_v45, %v23796_v38  ;;  %v23843_v12 = vadd.s32 4294967294, %v23336_v21  ;;  %vm26721_vm1 = vnez %v26720_v37  ;;  %v26725_v38 = vmov 0 }
 0x816   : > { %v24011_v37 = vadd.s32 168, %v22070_v51 }
 0x817   : > { %14634 = vmatmul.mubr.msk.f32.gmra.mrb[86].mxu1 %vm26710_vm6, %v23497_v2  ;;  %v26715_v2 = vmov 0  ;;  %vm6890_vm6 = vcmp.eq.s32.totalorder %v22094_v45, %v23793_v34  ;;  %26719 = vst [vmem:[#allocation96_spill] sm:$0xff] %v23843_v12 }
 0x818   : > { %17065 = vmatpush1.bf16.msk.msra.mxu1 %vm26714_vm13, %v26563_v35  ;;  %6858 = vmatprep.mubr.f32.mxu1 %v26561_v61  ;;  %v26716_v2 = vsel %vm23828_vm12, 4294967295, %v26715_v2  ;;  %vm6895_vm13 = vcmp.eq.s32.totalorder %v23149_v55, %v23816_v3  ;;  %26753 = vst [vmem:[#allocation114_spill] sm:$0xff] %v24011_v37  ;;  %v24035_v34 = vmul.u32 2, %v24011_v37 }
 0x819   : > { %17067 = vmatprep.subr.msk.bf16.mxu1 %vm23805_vm11, %v26563_v35  ;;  %26717 = vst [vmem:[#allocation95_spill] sm:$0xff] %v26716_v2  ;;  %vm23856_vm3 = vmpackc.low %vm6897_vm9, %vm6895_vm13  ;;  %vm6894_vm11 = vcmp.eq.s32.totalorder %v22094_v45, %v23816_v3  ;;  %v26729_v2 = vmov 0  ;;  %vm26734_vm13 = vcmask 695296   ;;  %v24032_v3 = vadd.s32 160, %v22070_v51 }
 0x81a   : > { %v26726_v38 = vsel %vm23856_vm3, 4294967295, %v26725_v38 }
 0x81b   : > { %14635 = vmatmul.mubr.msk.f32.gmra.mrb[88].mxu1 %vm26718_vm10, %v23529_v10  ;;  %vm23852_vm10 = vmpackc.low %vm6892_vm0, %vm6890_vm6  ;;  %v26722_v10 = vmov 0  ;;  %26727 = vst [vmem:[#allocation98_spill] sm:$0xff] %v26726_v38  ;;  %vm26732_vm0 = vcmask 1044480   ;;  %v24050_v37 = vmul.u32 2, %v24032_v3 }
 0x81c   : > { %17069 = vmatpush1.bf16.msk.msra.mxu1 %vm26721_vm1, %v26563_v35  ;;  %6864 = vmatprep.mubr.f32.mxu1 %v26561_v61  ;;  %v26723_v10 = vsel %vm23852_vm10, 4294967295, %v26722_v10  ;;  %vm6896_vm1 = vcmp.eq.s32.totalorder %v22094_v45, %v23819_v46  ;;  %vm26736_vm6 = vmmov %vm26734_vm13  ;;  %26756 = vst [vmem:[#allocation117_spill] sm:$0xff] %v24032_v3 }
 0x81d   : > { %17071 = vmatprep.subr.msk.bf16.mxu1 %vm23828_vm12, %v26563_v35  ;;  %26724 = vst [vmem:[#allocation97_spill] sm:$0xff] %v26723_v10  ;;  %vm26397_vm12 = vcmp.eq.s32.totalorder %v23149_v55, %v23843_v12  ;;  %vm23875_vm9 = vmpackc.low %vm6896_vm1, %vm6894_vm11  ;;  %v26735_v10 = vmov 0.0|0.0   ;;  %v24062_v43 = vadd.s32 2, %v24050_v37 }
 0x81e   : > { %v26730_v2 = vsel %vm23875_vm9, 4294967295, %v26729_v2  ;;  %vm26733_vm11 = vmmov %vm26732_vm0 }
 0x81f   : > { %14636 = vmatmul.mubr.msk.f32.gmra.mrb[90].mxu1 %vm26728_vm14, %v23523_v63  ;;  %26731 = vst [vmem:[#allocation99_spill] sm:$0xff] %v26730_v2  ;;  %v14652_v63 = vsel %vm26397_vm12, 1.0, %v26561_v61  ;;  %vm26396_vm14 = vcmp.eq.s32.totalorder %v22094_v45, %v23843_v12  ;;  %vm26737_vm1 = vmmov %vm26736_vm6 }
 0x820   : > { %17073 = vmatpush1.bf16.msk.msra.mxu1 %vm23852_vm10, %v26563_v35  ;;  %7014 = vmatprep.mubr.f32.mxu1 %v26561_v61  ;;  %v14651_v38 = vsel %vm26396_vm14, 1.0, %v26561_v61  ;;  %26760 = vst [vmem:[#allocation121_spill] sm:$0xff] %v24062_v43 }
 0x821   : > { %17075 = vmatprep.subr.msk.bf16.mxu1 %vm23856_vm3, %v26563_v35 }
 0x824   : > { %17077 = vmatpush1.bf16.msk.msra.mxu1 %vm23875_vm9, %v26563_v35 }
 0x825   : > { %14673 = vmatprep.subr.msk.mxu1 %vm26732_vm0, %v14652_v63  ;;  %vm26738_vm0 = vmmov %vm26737_vm1  ;;  %v23984_v63 = vadd.s32 136, %v22070_v51 }
 0x827   : > { %26748 = vst [vmem:[#allocation109_spill] sm:$0xff] %v23984_v63  ;;  %v24008_v2 = vmul.u32 2, %v23984_v63 }
 0x828   : > { %14674 = vmatpush1.msk.msra.mxu1 %vm26733_vm11, %v14651_v38  ;;  %v23907_v38 = vadd.s32 256, %v22094_v45 }
 0x829   : > { %14675 = vmatmul.mubr.msk.f32.vlgmr.msra.gmra.mrb[84].mxu1 %vm26734_vm13, %v23551_v0  ;;  %17212 = vmatprep.subr.bf16.mxu1 %v26735_v10  ;;  %v24029_v46 = vadd.s32 2, %v24008_v2 }
 0x82a   : > { %7020 = vmatprep.mubr.f32.mxu1 %v26561_v61  ;;  %vm7285_vm11 = vcmp.eq.s32.totalorder %v23907_v38, %v22224_v50  ;;  %vm7286_vm13 = vcmp.eq.s32.totalorder %v23907_v38, %v22227_v42  ;;  %vm7289_vm12 = vcmp.eq.s32.totalorder %v23907_v38, %v22908_v58  ;;  %vm7290_vm9 = vcmp.eq.s32.totalorder %v23907_v38, %v22905_v30 }
 0x82b   : > { %vm17213_vm14 = vmpackc.low %vm7286_vm13, %vm7285_vm11  ;;  %v23924_v50 = vadd.s32 88, %v22070_v51  ;;  %v23929_v42 = vadd.s32 96, %v22070_v51  ;;  %vm7292_vm11 = vcmp.eq.s32.totalorder %v23907_v38, %v23409_v15  ;;  %v23947_v30 = vadd.s32 112, %v22070_v51  ;;  %26755 = vst [vmem:[#allocation116_spill] sm:$0xff] %v24029_v46 }
 0x82c   : > { %17214 = vmatpush1.bf16.msk.msra.mxu1 %vm17213_vm14, %v26563_v35  ;;  %vm17219_vm3 = vmpackc.low %vm7290_vm9, %vm7289_vm12  ;;  %vm7291_vm14 = vcmp.eq.s32.totalorder %v23907_v38, %v23406_v11  ;;  %v23950_v58 = vadd.s32 120, %v22070_v51  ;;  %vm7293_vm9 = vcmp.eq.s32.totalorder %v23907_v38, %v23428_v26  ;;  %vm7294_vm13 = vcmp.eq.s32.totalorder %v23907_v38, %v23431_v32 }
 0x82d   : > { %14676 = vmatmul.mubr.msk.f32.gmra.mrb[86].mxu1 %vm26736_vm6, %v23545_v31  ;;  %vm7287_vm6 = vcmp.eq.s32.totalorder %v23907_v38, %v22375_v25  ;;  %17215 = vmatprep.subr.bf16.mxu1 %v26735_v10  ;;  %26739 = vst [vmem:[#allocation100_spill] sm:$0xff] %v23924_v50  ;;  %26740 = vst [vmem:[#allocation101_spill] sm:$0xff] %v23929_v42  ;;  %v23936_v25 = vmul.u32 2, %v23924_v50  ;;  %v23944_v31 = vmul.u32 2, %v23929_v42  ;;  %v23974_v32 = vadd.s32 128, %v22070_v51 }
 0x82e   : > { %7026 = vmatprep.mubr.f32.mxu1 %v26561_v61  ;;  %vm17222_vm12 = vmpackc.low %vm7292_vm11, %vm7291_vm14  ;;  %26742 = vst [vmem:[#allocation103_spill] sm:$0xff] %v23947_v30  ;;  %v23971_v26 = vmul.u32 2, %v23950_v58  ;;  %v24000_v42 = vadd.s32 152, %v22070_v51 }
 0x82f   : > { %26743 = vst [vmem:[#allocation104_spill] sm:$0xff] %v23950_v58  ;;  %v23965_v11 = vadd.s32 2, %v23944_v31  ;;  %26746 = vst [vmem:[#allocation107_spill] sm:$0xff] %v23974_v32  ;;  %v24005_v50 = vmul.u32 2, %v23974_v32  ;;  %v24122_v39 = vadd.s32 1, %v23944_v31 }
 0x830   : > { %26752 = vst [vmem:[#allocation113_spill] sm:$0xff] %v24000_v42  ;;  %v24023_v63 = vmul.u32 2, %v24000_v42  ;;  %v24151_v4 = vadd.s32 1, %v23971_v26 }
 0x831   : > { %14677 = vmatmul.mubr.msk.f32.gmra.mrb[88].mxu1 %vm26737_vm1, %v23572_v7  ;;  %vm7288_vm1 = vcmp.eq.s32.totalorder %v23907_v38, %v22979_v59  ;;  %v23957_v59 = vadd.s32 2, %v23936_v25  ;;  %26745 = vst [vmem:[#allocation106_spill] sm:$0xff] %v23965_v11  ;;  %v23968_v7 = vmul.u32 2, %v23947_v30  ;;  %v23988_v30 = vadd.s32 144, %v22070_v51 }
 0x832   : > { %7032 = vmatprep.mubr.f32.mxu1 %v26561_v61  ;;  %vm7301_vm14 = vcmp.eq.s32.totalorder %v23907_v38, %v23965_v11  ;;  %v24026_v12 = vadd.s32 2, %v24005_v50 }
 0x833   : > { %26744 = vst [vmem:[#allocation105_spill] sm:$0xff] %v23957_v59  ;;  %26749 = vst [vmem:[#allocation110_spill] sm:$0xff] %v23988_v30  ;;  %v23994_v58 = vadd.s32 2, %v23968_v7  ;;  %v24020_v32 = vmul.u32 2, %v23988_v30  ;;  %v24043_v30 = vadd.s32 2, %v24023_v63  ;;  %v24148_v49 = vadd.s32 1, %v23968_v7 }
 0x834   : > { %26754 = vst [vmem:[#allocation115_spill] sm:$0xff] %v24026_v12 }
 0x835   : > { %14678 = vmatmul.mubr.msk.f32.gmra.mrb[90].mxu1 %vm26738_vm0, %v23566_v29  ;;  %vm17216_vm0 = vmpackc.low %vm7288_vm1, %vm7287_vm6  ;;  %v23939_v29 = vadd.s32 104, %v22070_v51  ;;  %vm7295_vm6 = vcmp.eq.s32.totalorder %v23907_v38, %v23458_v52  ;;  %vm7298_vm1 = vcmp.eq.s32.totalorder %v23907_v38, %v23957_v59  ;;  %26750 = vst [vmem:[#allocation111_spill] sm:$0xff] %v23994_v58  ;;  %v24040_v42 = vadd.s32 2, %v24020_v32 }
 0x836   : > { %17217 = vmatpush1.bf16.msk.msra.mxu1 %vm17216_vm0, %v26563_v35  ;;  %vm17228_vm0 = vmpackc.low %vm7298_vm1, %vm7295_vm6  ;;  %26758 = vst [vmem:[#allocation119_spill] sm:$0xff] %v24043_v30  ;;  %vm7313_vm6 = vcmp.eq.s32.totalorder %v23907_v38, %v24026_v12  ;;  %vm7316_vm1 = vcmp.eq.s32.totalorder %v23907_v38, %v24029_v46  ;;  %v24053_v51 = vadd.s32 2, %v24035_v34 }
 0x837   : > { %17218 = vmatprep.subr.bf16.mxu1 %v26735_v10  ;;  %26741 = vst [vmem:[#allocation102_spill] sm:$0xff] %v23939_v29  ;;  %v23960_v15 = vmul.u32 2, %v23939_v29  ;;  %v23997_v29 = vadd.s32 2, %v23971_v26  ;;  %26757 = vst [vmem:[#allocation118_spill] sm:$0xff] %v24040_v42 }
 0x838   : > { %26759 = vst [vmem:[#allocation120_spill] sm:$0xff] %v24053_v51 }
 0x839   : > { %v23981_v0 = vadd.s32 2, %v23960_v15  ;;  %26751 = vst [vmem:[#allocation112_spill] sm:$0xff] %v23997_v29  ;;  %v24125_v62 = vadd.s32 1, %v23960_v15 }
 0x83a   : > { %17220 = vmatpush1.bf16.msk.msra.mxu1 %vm17219_vm3, %v26563_v35  ;;  %vm17225_vm3 = vmpackc.low %vm7294_vm13, %vm7293_vm9  ;;  %vm7307_vm9 = vcmp.eq.s32.totalorder %v23907_v38, %v23994_v58  ;;  %vm7310_vm13 = vcmp.eq.s32.totalorder %v23907_v38, %v23997_v29 }
 0x83b   : > { %17221 = vmatprep.subr.bf16.mxu1 %v26735_v10  ;;  %26747 = vst [vmem:[#allocation108_spill] sm:$0xff] %v23981_v0  ;;  %vm7304_vm11 = vcmp.eq.s32.totalorder %v23907_v38, %v23981_v0 }
 0x83e   : > { %17223 = vmatpush1.bf16.msk.msra.mxu1 %vm17222_vm12, %v26563_v35  ;;  %vm17231_vm12 = vmpackc.low %vm7304_vm11, %vm7301_vm14  ;;  %vm7319_vm14 = vcmp.eq.s32.totalorder %v23907_v38, %v24040_v42  ;;  %vm7322_vm11 = vcmp.eq.s32.totalorder %v23907_v38, %v24043_v30  ;;  %v7055_v42 = vpop.permute.xlu1 %7054 }
 0x83f   : > { %17224 = vmatprep.subr.bf16.mxu1 %v26735_v10 }
 0x842   : > { %17226 = vmatpush1.bf16.msk.msra.mxu1 %vm17225_vm3, %v26563_v35  ;;  %vm17234_vm3 = vmpackc.low %vm7310_vm13, %vm7307_vm9  ;;  %vm7325_vm13 = vcmp.eq.s32.totalorder %v23907_v38, %v24062_v43  ;;  %v7065_v1 = vpop.permute.xlu1 %7064 }
 0x843   : > { %17227 = vmatprep.subr.bf16.mxu1 %v26735_v10  ;;  %vm17240_vm9 = vmpackc.low %vm7322_vm11, %vm7319_vm14  ;;  %vm26766_vm14 = vnez %v26601_v41  ;;  %vm26767_vm11 = vcmp.eq.s32.totalorder %v23149_v55, %v23354_v14  ;;  %v24177_v41 = vadd.s32 1, %v24008_v2 }
 0x846   : > { %17229 = vmatpush1.bf16.msk.msra.mxu1 %vm17228_vm0, %v26563_v35  ;;  %vm17237_vm0 = vmpackc.low %vm7316_vm1, %vm7313_vm6  ;;  %vm7095_vm1 = vcmask 261120  }
 0x847   : > { %17230 = vmatprep.subr.bf16.mxu1 %v26735_v10 }
 0x84a   : > { %17232 = vmatpush1.bf16.msk.msra.mxu1 %vm17231_vm12, %v26563_v35  ;;  %vm7328_vm12 = vcmp.eq.s32.totalorder %v23907_v38, %v24053_v51  ;;  %v7050_v51 = vpop.permute.xlu0 %7049 }
 0x84b   : > { %17233 = vmatprep.subr.bf16.mxu1 %v26735_v10  ;;  %v14732_v3 = vsel %vm7328_vm12, 1.0, %v26561_v61 }
 0x84c   : > { %v17243_v9 = vpack.c.bf16 %v14732_v3, %v26761_v57 }
 0x84e   : > { %17235 = vmatpush1.bf16.msk.msra.mxu1 %vm17234_vm3, %v26563_v35  ;;  %vm26463_vm3 = vcmask 1040384  }
 0x84f   : > { %17236 = vmatprep.subr.bf16.mxu1 %v26735_v10  ;;  %vm17244_vm6 = vmpackc.low %vm26463_vm3, %vm7325_vm13  ;;  %vm7443_vm13 = vcmp.eq.s32.totalorder %v23149_v55, %v24122_v39  ;;  %vm7458_vm3 = vcmp.eq.s32.totalorder %v23149_v55, %v24177_v41 }
 0x852   : > { %17238 = vmatpush1.bf16.msk.msra.mxu1 %vm17237_vm0, %v26563_v35  ;;  %vm26762_vm0 = vnez %v26491_v16  ;;  %v24106_v16 = vadd.s32 1, %v23936_v25 }
 0x853   : > { %17239 = vmatprep.subr.bf16.mxu1 %v26735_v10 }
 0x856   : > { %17241 = vmatpush1.bf16.msk.msra.mxu1 %vm17240_vm9, %v26563_v35  ;;  %vm7439_vm9 = vcmp.eq.s32.totalorder %v22094_v45, %v24106_v16 }
 0x857   : > { %17242 = vmatprep.subr.bf16.mxu1 %v26735_v10 }
 0x85a   : > { %17245 = vmatpush1.bf16.msk.msra.mxu1 %vm17244_vm6, %v17243_v9  ;;  %v7060_v9 = vpop.permute.xlu0 %7059  ;;  %vm7446_vm6 = vcmp.eq.s32.totalorder %v23149_v55, %v24125_v62 }
 0x85b   : > { %17292 = vmatprep.subr.bf16.mxu1 %v26735_v10 }
 0x8fc   : > { %v7016_v60 = vpop.f32.mrb[84].mxu1 }
 0x8fd   : > { %v7018_v54 = vpop.f32.mrb[85].mxu1  ;;  %v7067_v30 = vadd.f32 %v7050_v51, %v7016_v60 }
 0x8fe   : > { %v7068_v46 = vadd.f32 %v7050_v51, %v7018_v54 }
 0x8ff   : > { %v7075_v0 = vmax.f32 %v7067_v30, 0.0 }
 0x900   : > { %v7022_v12 = vpop.f32.mrb[86].mxu1  ;;  %v7076_v3 = vmax.f32 %v7068_v46, 0.0 }
 0x901   : > { %v7069_v43 = vadd.f32 %v7055_v42, %v7022_v12  ;;  %v7024_v29 = vpop.f32.mrb[87].mxu1 }
 0x902   : > { %v7070_v58 = vadd.f32 %v7055_v42, %v7024_v29 }
 0x903   : > { %v7077_v11 = vmax.f32 %v7069_v43, 0.0 }
 0x904   : > { %v7078_v52 = vmax.f32 %v7070_v58, 0.0  ;;  %v7028_v59 = vpop.f32.mrb[88].mxu1  ;;  %v7425_v58 = vadd.s32 1, %v24023_v63 }
 0x905   : > { %v17080_v53 = vpack.c.bf16 %v7077_v11, %v7075_v0  ;;  %v7030_v18 = vpop.f32.mrb[89].mxu1  ;;  %v7071_v17 = vadd.f32 %v7060_v9, %v7028_v59  ;;  %v24226_v59 = vadd.s32 1, %v24035_v34  ;;  %v24230_v11 = vadd.s32 1, %v24050_v37 }
 0x906   : > { %v17078_v22 = vpack.c.bf16 %v7078_v52, %v7076_v3  ;;  %v7072_v33 = vadd.f32 %v7060_v9, %v7030_v18  ;;  %v7083_v52 = vld [vmem:[%s26217_s9] sm:$0xff]  ;;  %v7090_v18 = vld [vmem:[%s26217_s9 + $0x38] sm:$0xff] }
 0x907   : > { %v7079_v12 = vmax.f32 %v7071_v17, 0.0  ;;  %v7092_v17 = vld [vmem:[%s26217_s9 + $0x48] sm:$0xff] }
 0x908   : > { %v7034_v56 = vpop.f32.mrb[90].mxu1  ;;  %17079 = vmatprep.subr.bf16.mxu0 %v17078_v22  ;;  %v7080_v29 = vmax.f32 %v7072_v33, 0.0  ;;  %v7084_v22 = vld [vmem:[%s26217_s9 + $0x8] sm:$0xff]  ;;  %v7085_v33 = vld [vmem:[%s26217_s9 + $0x10] sm:$0xff] }
 0x909   : > { %v7073_v60 = vadd.f32 %v7065_v1, %v7034_v56  ;;  %v7036_v51 = vpop.f32.mrb[91].mxu1  ;;  %17081 = vmatpush1.bf16.msra.mxu0 %v17080_v53  ;;  %v7086_v56 = vld [vmem:[%s26217_s9 + $0x18] sm:$0xff]  ;;  %v7424_v53 = vadd.s32 1, %v24020_v32 }
 0x90a   : > { %v7074_v54 = vadd.f32 %v7065_v1, %v7036_v51  ;;  %v7091_v1 = vld [vmem:[%s26217_s9 + $0x40] sm:$0xff] }
 0x90b   : > { %v7081_v42 = vmax.f32 %v7073_v60, 0.0  ;;  %v26799_v51 = vld [vmem:[#allocation81_spill] sm:$0xff] }
 0x90c   : > { %v7082_v43 = vmax.f32 %v7074_v54, 0.0  ;;  %v26774_v54 = vld [vmem:[#allocation19_spill] sm:$0xff] }
 0x90d   : > { %v17084_v46 = vpack.c.bf16 %v7081_v42, %v7079_v12  ;;  %v26775_v12 = vld [vmem:[#allocation20_spill] sm:$0xff] }
 0x90e   : > { %v17082_v30 = vpack.c.bf16 %v7082_v43, %v7080_v29  ;;  %v26776_v43 = vld [vmem:[#allocation33_spill] sm:$0xff] }
 0x910   : > { %17083 = vmatprep.subr.bf16.mxu0 %v17082_v30 }
 0x911   : > { %17085 = vmatpush1.bf16.msra.mxu0 %v17084_v46 }
 0x912   : > { %17087 = vmatprep.subr.msk.bf16.mxu0 %vm23161_vm4, %v26563_v35  ;;  %vm26763_vm4 = vnez %v26518_v8  ;;  %v7087_v8 = vld [vmem:[%s26217_s9 + $0x20] sm:$0xff] }
 0x914   : > { %14679 = vmatmul.mubr.msk.f32.vlgmr.msra.gmra.mrb[160].mxu0 %vm7095_vm1, %v7083_v52  ;;  %v26777_v52 = vld [vmem:[#allocation21_spill] sm:$0xff] }
 0x915   : > { %7196 = vmatprep.mubr.f32.mxu0 %v26561_v61  ;;  %17089 = vmatpush1.bf16.msk.msra.mxu0 %vm26762_vm0, %v26563_v35  ;;  %vm26768_vm0 = vnez %v26603_v5  ;;  %v7089_v5 = vld [vmem:[%s26217_s9 + $0x30] sm:$0xff] }
 0x916   : > { %17091 = vmatprep.subr.msk.bf16.mxu0 %vm23184_vm15, %v26563_v35  ;;  %vm7440_vm15 = vcmp.eq.s32.totalorder %v23149_v55, %v24106_v16 }
 0x917   : > { %vm17106_vm12 = vmpackc.low %vm7440_vm15, %vm26767_vm11  ;;  %vm7449_vm11 = vcmp.eq.s32.totalorder %v23149_v55, %v24148_v49 }
 0x918   : > { %14680 = vmatmul.mubr.msk.f32.gmra.mrb[162].mxu0 %vm7095_vm1, %v7084_v22  ;;  %vm17110_vm15 = vmpackc.low %vm7446_vm6, %vm7443_vm13  ;;  %vm7448_vm13 = vcmp.eq.s32.totalorder %v22094_v45, %v24148_v49  ;;  %vm7451_vm6 = vcmp.eq.s32.totalorder %v22094_v45, %v24151_v4  ;;  %v26778_v22 = vld [vmem:[#allocation22_spill] sm:$0xff] }
 0x919   : > { %7202 = vmatprep.mubr.f32.mxu0 %v26561_v61  ;;  %17093 = vmatpush1.bf16.msk.msra.mxu0 %vm22877_vm8, %v26563_v35  ;;  %vm26764_vm8 = vnez %v26580_v28  ;;  %v7088_v28 = vld [vmem:[%s26217_s9 + $0x28] sm:$0xff] }
 0x91a   : > { %17095 = vmatprep.subr.msk.bf16.mxu0 %vm23212_vm5, %v26563_v35  ;;  %vm26765_vm5 = vnez %v26596_v44  ;;  %v24174_v44 = vadd.s32 1, %v24005_v50 }
 0x91c   : > { %14681 = vmatmul.mubr.msk.f32.gmra.mrb[164].mxu0 %vm7095_vm1, %v7085_v33 }
 0x91d   : > { %7208 = vmatprep.mubr.f32.mxu0 %v26561_v61  ;;  %17097 = vmatpush1.bf16.msk.msra.mxu0 %vm26763_vm4, %v26563_v35  ;;  %vm26769_vm4 = vcmp.eq.s32.totalorder %v22094_v45, %v23354_v14 }
 0x91e   : > { %17099 = vmatprep.subr.msk.bf16.mxu0 %vm26764_vm8, %v26563_v35  ;;  %vm17108_vm8 = vmpackc.low %vm7439_vm9, %vm26769_vm4  ;;  %vm7455_vm4 = vcmp.eq.s32.totalorder %v23149_v55, %v24174_v44 }
 0x920   : > { %14682 = vmatmul.mubr.msk.f32.gmra.mrb[166].mxu0 %vm7095_vm1, %v7086_v56  ;;  %v26779_v56 = vld [vmem:[#allocation24_spill] sm:$0xff] }
 0x921   : > { %7214 = vmatprep.mubr.f32.mxu0 %v26561_v61  ;;  %17101 = vmatpush1.bf16.msk.msra.mxu0 %vm26765_vm5, %v26563_v35  ;;  %vm7442_vm5 = vcmp.eq.s32.totalorder %v22094_v45, %v24122_v39 }
 0x922   : > { %17103 = vmatprep.subr.msk.bf16.mxu0 %vm26766_vm14, %v26563_v35  ;;  %vm7445_vm14 = vcmp.eq.s32.totalorder %v22094_v45, %v24125_v62 }
 0x924   : > { %14683 = vmatmul.mubr.msk.f32.gmra.mrb[168].mxu0 %vm7095_vm1, %v7087_v8  ;;  %v26781_v8 = vld [vmem:[#allocation38_spill] sm:$0xff] }
 0x925   : > { %7220 = vmatprep.mubr.f32.mxu0 %v26561_v61  ;;  %17105 = vmatpush1.bf16.msk.msra.mxu0 %vm26768_vm0, %v26563_v35  ;;  %vm7452_vm0 = vcmp.eq.s32.totalorder %v23149_v55, %v24151_v4 }
 0x926   : > { %17107 = vmatprep.subr.msk.bf16.mxu0 %vm17106_vm12, %v26563_v35  ;;  %vm17112_vm12 = vmpackc.low %vm7445_vm14, %vm7442_vm5  ;;  %vm7454_vm5 = vcmp.eq.s32.totalorder %v22094_v45, %v24174_v44  ;;  %vm7457_vm14 = vcmp.eq.s32.totalorder %v22094_v45, %v24177_v41 }
 0x927   : > { %vm17114_vm9 = vmpackc.low %vm7452_vm0, %vm7449_vm11  ;;  %vm7464_vm0 = vcmp.eq.s32.totalorder %v23149_v55, %v7425_v58 }
 0x928   : > { %14684 = vmatmul.mubr.msk.f32.gmra.mrb[170].mxu0 %vm7095_vm1, %v7088_v28  ;;  %vm17120_vm11 = vmpackc.low %vm7457_vm14, %vm7454_vm5  ;;  %vm26770_vm5 = vcmask 1040384  }
 0x929   : > { %7226 = vmatprep.mubr.f32.mxu0 %v26561_v61  ;;  %17109 = vmatpush1.bf16.msk.msra.mxu0 %vm17108_vm8, %v26563_v35  ;;  %vm17116_vm8 = vmpackc.low %vm7451_vm6, %vm7448_vm13  ;;  %vm7463_vm13 = vcmp.eq.s32.totalorder %v22094_v45, %v7425_v58 }
 0x92a   : > { %17111 = vmatprep.subr.msk.bf16.mxu0 %vm17110_vm15, %v26563_v35  ;;  %vm17118_vm15 = vmpackc.low %vm7458_vm3, %vm7455_vm4  ;;  %vm7461_vm3 = vcmp.eq.s32.totalorder %v23149_v55, %v7424_v53  ;;  %vm7469_vm4 = vcmp.eq.s32.totalorder %v22094_v45, %v24226_v59 }
 0x92b   : > { %v14774_v3 = vsel %vm7469_vm4, 1.0, %v26561_v61 }
 0x92c   : > { %14685 = vmatmul.mubr.msk.f32.gmra.mrb[172].mxu0 %vm7095_vm1, %v7089_v5  ;;  %v17129_v60 = vpack.c.bf16 %v14774_v3, %v26761_v57 }
 0x92d   : > { %7232 = vmatprep.mubr.f32.mxu0 %v26561_v61  ;;  %17113 = vmatpush1.bf16.msk.msra.mxu0 %vm17112_vm12, %v26563_v35  ;;  %vm17122_vm12 = vmpackc.low %vm7464_vm0, %vm7461_vm3  ;;  %vm7462_vm0 = vcmp.eq.s32.totalorder %v23907_v38, %v7424_v53 }
 0x92e   : > { %17115 = vmatprep.subr.msk.bf16.mxu0 %vm17114_vm9, %v26563_v35  ;;  %vm7460_vm9 = vcmp.eq.s32.totalorder %v22094_v45, %v7424_v53 }
 0x92f   : > { %vm17124_vm6 = vmpackc.low %vm7463_vm13, %vm7460_vm9  ;;  %vm7896_vm13 = vcmp.eq.s32.totalorder %v23907_v38, %v26774_v54  ;;  %v26800_v54 = vld [vmem:[#allocation82_spill] sm:$0xff] }
 0x930   : > { %14686 = vmatmul.mubr.msk.f32.gmra.mrb[174].mxu0 %vm7095_vm1, %v7090_v18 }
 0x931   : > { %7238 = vmatprep.mubr.f32.mxu0 %v26561_v61  ;;  %17117 = vmatpush1.bf16.msk.msra.mxu0 %vm17116_vm8, %v26563_v35  ;;  %vm7467_vm8 = vcmp.eq.s32.totalorder %v23149_v55, %v24230_v11 }
 0x932   : > { %17119 = vmatprep.subr.msk.bf16.mxu0 %vm17118_vm15, %v26563_v35  ;;  %vm7466_vm15 = vcmp.eq.s32.totalorder %v22094_v45, %v24230_v11  ;;  %vm17127_vm14 = vmpackc.low %vm26770_vm5, %vm7467_vm8  ;;  %vm7898_vm8 = vcmp.eq.s32.totalorder %v23907_v38, %v22110_v48 }
 0x934   : > { %14687 = vmatmul.mubr.msk.f32.gmra.mrb[176].mxu0 %vm7095_vm1, %v7091_v1  ;;  %v26785_v1 = vld [vmem:[#allocation58_spill] sm:$0xff] }
 0x935   : > { %7244 = vmatprep.mubr.f32.mxu0 %v26561_v61  ;;  %17121 = vmatpush1.bf16.msk.msra.mxu0 %vm17120_vm11, %v26563_v35  ;;  %vm26771_vm11 = vmmov %vm26770_vm5 }
 0x936   : > { %17123 = vmatprep.subr.msk.bf16.mxu0 %vm17122_vm12, %v26563_v35  ;;  %vm17130_vm3 = vmpackc.low %vm26771_vm11, %vm7466_vm15  ;;  %vm7465_vm12 = vcmp.eq.s32.totalorder %v23907_v38, %v7425_v58  ;;  %vm7899_vm15 = vcmp.eq.s32.totalorder %v23907_v38, %v26776_v43  ;;  %vm7429_vm11 = vcmp.eq.s32.totalorder %v23907_v38, %v26778_v22  ;;  %v26801_v43 = vld [vmem:[#allocation47_spill] sm:$0xff]  ;;  %v26805_v22 = vld [vmem:[#allocation84_spill] sm:$0xff] }
 0x937   : > { %vm24249_vm9 = vmpackc.low %vm7465_vm12, %vm7462_vm0  ;;  %vm7901_vm0 = vcmp.eq.s32.totalorder %v23907_v38, %v22864_v13 }
 0x938   : > { %14688 = vmatmul.mubr.msk.f32.gmra.mrb[178].mxu0 %vm7095_vm1, %v7092_v17  ;;  %vm7470_vm1 = vcmp.eq.s32.totalorder %v23149_v55, %v24226_v59  ;;  %vm17296_vm5 = vmpackc.low %vm7899_vm15, %vm7898_vm8  ;;  %vm7902_vm8 = vcmp.eq.s32.totalorder %v23907_v38, %v23170_v24  ;;  %vm7903_vm15 = vcmp.eq.s32.totalorder %v23907_v38, %v23173_v27  ;;  %v26782_v24 = vld [vmem:[#allocation37_spill] sm:$0xff]  ;;  %v26786_v17 = vld [vmem:[#allocation59_spill] sm:$0xff] }
 0x939   : > { %17125 = vmatpush1.bf16.msk.msra.mxu0 %vm17124_vm6, %v26563_v35  ;;  %v14775_v0 = vsel %vm7470_vm1, 1.0, %v26561_v61  ;;  %vm7897_vm6 = vcmp.eq.s32.totalorder %v23907_v38, %v26775_v12  ;;  %vm26464_vm1 = vcmask 334848   ;;  %v24481_v12 = vadd.s32 4294967295, %v23936_v25 }
 0x93a   : > { %v17126_v9 = vpack.c.bf16 %v14775_v0, %v26761_v57  ;;  %vm17293_vm4 = vmpackc.low %vm7897_vm6, %vm7896_vm13  ;;  %vm7430_vm6 = vcmp.eq.s32.totalorder %v23907_v38, %v26779_v56  ;;  %v26806_v56 = vld [vmem:[#allocation39_spill] sm:$0xff] }
 0x93c   : > { %17128 = vmatprep.subr.msk.bf16.mxu0 %vm17127_vm14, %v17126_v9  ;;  %vm7428_vm14 = vcmp.eq.s32.totalorder %v23907_v38, %v26777_v52  ;;  %v26803_v52 = vld [vmem:[#allocation63_spill] sm:$0xff] }
 0x93d   : > { %17131 = vmatpush1.bf16.msk.msra.mxu0 %vm17130_vm3, %v17129_v60  ;;  %vm7900_vm3 = vcmp.eq.s32.totalorder %v23907_v38, %v22869_v36  ;;  %vm17133_vm12 = vmpackc.low %vm7429_vm11, %vm7428_vm14  ;;  %v26780_v36 = vld [vmem:[#allocation35_spill] sm:$0xff]  ;;  %vm7432_vm11 = vcmp.eq.s32.totalorder %v23907_v38, %v26781_v8  ;;  %v26797_v60 = vld [vmem:[#allocation62_spill] sm:$0xff] }
 0x93e   : > { %17132 = vmatprep.subr.bf16.mxu0 %v26735_v10  ;;  %vm17299_vm13 = vmpackc.low %vm7901_vm0, %vm7900_vm3  ;;  %vm7433_vm3 = vcmp.eq.s32.totalorder %v23907_v38, %v26782_v24  ;;  %vm7904_vm0 = vcmp.eq.s32.totalorder %v23907_v38, %v23306_v40  ;;  %v26783_v40 = vld [vmem:[#allocation54_spill] sm:$0xff]  ;;  %v26809_v8 = vld [vmem:[#allocation105_spill] sm:$0xff] }
 0x93f   : > { %vm17302_vm14 = vmpackc.low %vm7903_vm15, %vm7902_vm8  ;;  %vm7906_vm15 = vcmp.eq.s32.totalorder %v23907_v38, %v23336_v21  ;;  %v26830_v24 = vld [vmem:[#allocation121_spill] sm:$0xff] }
 0x9e7   : > { %v24257_v42 = vpop.f32.mrb[160].mxu0 }
 0x9e8   : > { %v24259_v29 = vpop.f32.mrb[161].mxu0 }
 0x9e9   : > { %14915 = vmatprep.mubr.msk.f32.mxu1 %vm26464_vm1, %v24259_v29 }
 0x9ea   : > { %7886 = vmatmul.mubr.f32.vlgmr.msra.gmra.mrb[92].mxu1 %v24257_v42 }
 0x9eb   : > { %17294 = vmatpush1.bf16.msk.msra.mxu1 %vm17293_vm4, %v26563_v35  ;;  %v24269_v46 = vpop.f32.mrb[162].mxu0  ;;  %vm7431_vm4 = vcmp.eq.s32.totalorder %v23907_v38, %v26780_v36  ;;  %v26829_v36 = vld [vmem:[#allocation29_spill] sm:$0xff] }
 0x9ec   : > { %17295 = vmatprep.subr.bf16.mxu1 %v26735_v10  ;;  %v24272_v30 = vpop.f32.mrb[163].mxu0 }
 0x9ed   : > { %14916 = vmatprep.mubr.msk.f32.mxu1 %vm26464_vm1, %v24272_v30 }
 0x9ee   : > { %7891 = vmatmul.mubr.f32.gmra.mrb[94].mxu1 %v24269_v46 }
 0x9ef   : > { %17297 = vmatpush1.bf16.msk.msra.mxu1 %vm17296_vm5, %v26563_v35  ;;  %v24286_v48 = vpop.f32.mrb[164].mxu0  ;;  %vm17136_vm5 = vmpackc.low %vm7431_vm4, %vm7430_vm6  ;;  %vm7434_vm4 = vcmp.eq.s32.totalorder %v23907_v38, %v26783_v40  ;;  %v24537_v40 = vadd.s32 4294967295, %v24005_v50 }
 0x9f0   : > { %v7206_v33 = vpop.f32.mrb[165].mxu0  ;;  %17298 = vmatprep.subr.bf16.mxu1 %v26735_v10 }
 0x9f1   : > { %14821 = vmatprep.mubr.msk.f32.mxu0 %vm26464_vm1, %v7206_v33 }
 0x9f2   : > { %7642 = vmatmul.mubr.f32.vlgmr.msra.gmra.mrb[180].mxu0 %v24286_v48 }
 0x9f3   : > { %17134 = vmatpush1.bf16.msk.msra.mxu0 %vm17133_vm12, %v26563_v35  ;;  %17300 = vmatpush1.bf16.msk.msra.mxu1 %vm17299_vm13, %v26563_v35  ;;  %v24301_v13 = vpop.f32.mrb[166].mxu0  ;;  %vm7905_vm12 = vcmp.eq.s32.totalorder %v23907_v38, %v23309_v47  ;;  %vm17139_vm13 = vmpackc.low %vm7433_vm3, %vm7432_vm11  ;;  %v26784_v47 = vld [vmem:[#allocation55_spill] sm:$0xff]  ;;  %vm7436_vm3 = vcmp.eq.s32.totalorder %v23907_v38, %v26785_v1  ;;  %v24547_v1 = vadd.s32 4294967295, %v24008_v2 }
 0x9f4   : > { %17135 = vmatprep.subr.bf16.mxu0 %v26735_v10  ;;  %17301 = vmatprep.subr.bf16.mxu1 %v26735_v10  ;;  %v24309_v27 = vpop.f32.mrb[167].mxu0  ;;  %vm17305_vm6 = vmpackc.low %vm7905_vm12, %vm7904_vm0  ;;  %vm7435_vm8 = vcmp.eq.s32.totalorder %v23907_v38, %v26784_v47  ;;  %vm7437_vm0 = vcmp.eq.s32.totalorder %v23907_v38, %v26786_v17  ;;  %vm7912_vm12 = vcmp.eq.s32.totalorder %v23907_v38, %v23944_v31  ;;  %v26813_v47 = vld [vmem:[#allocation65_spill] sm:$0xff]  ;;  %v26815_v17 = vld [vmem:[#allocation106_spill] sm:$0xff] }
 0x9f5   : > { %14822 = vmatprep.mubr.msk.f32.mxu0 %vm26464_vm1, %v24309_v27 }
 0x9f6   : > { %7648 = vmatmul.mubr.f32.gmra.mrb[182].mxu0 %v24301_v13 }
 0x9f7   : > { %17137 = vmatpush1.bf16.msk.msra.mxu0 %vm17136_vm5, %v26563_v35  ;;  %17303 = vmatpush1.bf16.msk.msra.mxu1 %vm17302_vm14, %v26563_v35  ;;  %v24320_v28 = vpop.f32.mrb[168].mxu0  ;;  %vm7909_vm5 = vcmp.eq.s32.totalorder %v23907_v38, %v23936_v25  ;;  %vm17142_vm14 = vmpackc.low %vm7435_vm8, %vm7434_vm4  ;;  %vm7438_vm8 = vcmp.eq.s32.totalorder %v23907_v38, %v23354_v14 }
 0x9f8   : > { %17138 = vmatprep.subr.bf16.mxu0 %v26735_v10  ;;  %17304 = vmatprep.subr.bf16.mxu1 %v26735_v10  ;;  %v24328_v5 = vpop.f32.mrb[169].mxu0  ;;  %vm17308_vm11 = vmpackc.low %vm7909_vm5, %vm7906_vm15  ;;  %vm7441_vm15 = vcmp.eq.s32.totalorder %v23907_v38, %v24106_v16  ;;  %vm7918_vm5 = vcmp.eq.s32.totalorder %v23907_v38, %v23968_v7 }
 0x9f9   : > { %15029 = vmatprep.mubr.msk.f32.mxu1 %vm26464_vm1, %v24328_v5  ;;  %14845 = vmatprep.mubr.msk.f32.mxu0 %vm26464_vm1, %v7206_v33  ;;  %v24502_v33 = vadd.s32 4294967295, %v23960_v15 }
 0x9fb   : > { %17140 = vmatpush1.bf16.msk.msra.mxu0 %vm17139_vm13, %v26563_v35  ;;  %17306 = vmatpush1.bf16.msk.msra.mxu1 %vm17305_vm6, %v26563_v35  ;;  %v24339_v18 = vpop.f32.mrb[170].mxu0  ;;  %vm7915_vm13 = vcmp.eq.s32.totalorder %v23907_v38, %v23960_v15  ;;  %vm17145_vm6 = vmpackc.low %vm7437_vm0, %vm7436_vm3  ;;  %vm7444_vm0 = vcmp.eq.s32.totalorder %v23907_v38, %v24122_v39 }
 0x9fc   : > { %17141 = vmatprep.subr.bf16.mxu0 %v26735_v10  ;;  %17307 = vmatprep.subr.bf16.mxu1 %v26735_v10  ;;  %v24347_v53 = vpop.f32.mrb[171].mxu0  ;;  %vm17311_vm4 = vmpackc.low %vm7915_vm13, %vm7912_vm12  ;;  %vm7447_vm12 = vcmp.eq.s32.totalorder %v23907_v38, %v24125_v62  ;;  %vm7924_vm13 = vcmp.eq.s32.totalorder %v23907_v38, %v24005_v50 }
 0x9ff   : > { %17143 = vmatpush1.bf16.msk.msra.mxu0 %vm17142_vm14, %v26563_v35  ;;  %17309 = vmatpush1.bf16.msk.msra.mxu1 %vm17308_vm11, %v26563_v35  ;;  %v24355_v58 = vpop.f32.mrb[172].mxu0  ;;  %vm7921_vm14 = vcmp.eq.s32.totalorder %v23907_v38, %v23971_v26  ;;  %vm17148_vm11 = vmpackc.low %vm7441_vm15, %vm7438_vm8  ;;  %vm7450_vm15 = vcmp.eq.s32.totalorder %v23907_v38, %v24148_v49 }
 0xa00   : > { %17144 = vmatprep.subr.bf16.mxu0 %v26735_v10  ;;  %17310 = vmatprep.subr.bf16.mxu1 %v26735_v10  ;;  %v24363_v0 = vpop.f32.mrb[173].mxu0  ;;  %vm17314_vm3 = vmpackc.low %vm7921_vm14, %vm7918_vm5  ;;  %vm7453_vm5 = vcmp.eq.s32.totalorder %v23907_v38, %v24151_v4  ;;  %vm7930_vm14 = vcmp.eq.s32.totalorder %v23907_v38, %v24020_v32 }
 0xa03   : > { %17146 = vmatpush1.bf16.msk.msra.mxu0 %vm17145_vm6, %v26563_v35  ;;  %17312 = vmatpush1.bf16.msk.msra.mxu1 %vm17311_vm4, %v26563_v35  ;;  %v24371_v3 = vpop.f32.mrb[174].mxu0  ;;  %vm7927_vm6 = vcmp.eq.s32.totalorder %v23907_v38, %v24008_v2  ;;  %vm17151_vm4 = vmpackc.low %vm7447_vm12, %vm7444_vm0 }
 0xa04   : > { %17147 = vmatprep.subr.bf16.mxu0 %v26735_v10  ;;  %17313 = vmatprep.subr.bf16.mxu1 %v26735_v10  ;;  %v24379_v14 = vpop.f32.mrb[175].mxu0  ;;  %vm17317_vm8 = vmpackc.low %vm7927_vm6, %vm7924_vm13  ;;  %vm7456_vm13 = vcmp.eq.s32.totalorder %v23907_v38, %v24174_v44  ;;  %vm7459_vm6 = vcmp.eq.s32.totalorder %v23907_v38, %v24177_v41  ;;  %v26793_v41 = vld [vmem:[#allocation78_spill] sm:$0xff] }
 0xa05   : > { %vm17154_vm0 = vmpackc.low %vm7453_vm5, %vm7450_vm15  ;;  %vm26787_vm15 = vcmask 1040384  }
 0xa07   : > { %17149 = vmatpush1.bf16.msk.msra.mxu0 %vm17148_vm11, %v26563_v35  ;;  %17315 = vmatpush1.bf16.msk.msra.mxu1 %vm17314_vm3, %v26563_v35  ;;  %v24387_v16 = vpop.f32.mrb[176].mxu0  ;;  %vm7933_vm11 = vcmp.eq.s32.totalorder %v23907_v38, %v24023_v63  ;;  %vm7939_vm3 = vcmp.eq.s32.totalorder %v23907_v38, %v24035_v34 }
 0xa08   : > { %17150 = vmatprep.subr.bf16.mxu0 %v26735_v10  ;;  %17316 = vmatprep.subr.bf16.mxu1 %v26735_v10  ;;  %v24395_v39 = vpop.f32.mrb[177].mxu0  ;;  %vm17320_vm12 = vmpackc.low %vm7933_vm11, %vm7930_vm14  ;;  %v14960_v49 = vsel %vm7939_vm3, 1.0, %v26561_v61  ;;  %vm8212_vm14 = vcmp.eq.s32.totalorder %v23907_v38, %v22482_v23  ;;  %vm8213_vm11 = vcmp.eq.s32.totalorder %v23907_v38, %v22485_v19  ;;  %vm7471_vm3 = vcmp.eq.s32.totalorder %v23907_v38, %v24226_v59  ;;  %v26789_v19 = vld [vmem:[#allocation42_spill] sm:$0xff]  ;;  %v26794_v59 = vld [vmem:[#allocation79_spill] sm:$0xff] }
 0xa09   : > { %v17323_v9 = vpack.c.bf16 %v14960_v49, %v26761_v57  ;;  %v14776_v44 = vsel %vm7471_vm3, 1.0, %v26561_v61  ;;  %vm8218_vm3 = vcmp.eq.s32.totalorder %v23907_v38, %v26793_v41  ;;  %v26816_v49 = vld [vmem:[#allocation108_spill] sm:$0xff]  ;;  %v24596_v41 = vadd.s32 4294967295, %v24050_v37 }
 0xa0a   : > { %v17163_v23 = vpack.c.bf16 %v14776_v44, %v26761_v57  ;;  %v24571_v44 = vadd.s32 4294967295, %v24020_v32 }
 0xa0b   : > { %17152 = vmatpush1.bf16.msk.msra.mxu0 %vm17151_vm4, %v26563_v35  ;;  %17318 = vmatpush1.bf16.msk.msra.mxu1 %vm17317_vm8, %v26563_v35  ;;  %v24405_v62 = vpop.f32.mrb[178].mxu0  ;;  %vm7936_vm4 = vcmp.eq.s32.totalorder %v23907_v38, %v24050_v37  ;;  %vm17157_vm8 = vmpackc.low %vm7459_vm6, %vm7456_vm13  ;;  %vm8214_vm13 = vcmp.eq.s32.totalorder %v23907_v38, %v22536_v6  ;;  %vm8215_vm6 = vcmp.eq.s32.totalorder %v23907_v38, %v23053_v20  ;;  %v26790_v6 = vld [vmem:[#allocation41_spill] sm:$0xff] }
 0xa0c   : > { %17153 = vmatprep.subr.bf16.mxu0 %v26735_v10  ;;  %17319 = vmatprep.subr.bf16.mxu1 %v26735_v10  ;;  %v24414_v4 = vpop.f32.mrb[179].mxu0  ;;  %vm17324_vm5 = vmpackc.low %vm26787_vm15, %vm7936_vm4  ;;  %v26791_v20 = vld [vmem:[#allocation61_spill] sm:$0xff] }
 0xa0d   : > { %vm26788_vm4 = vmmov %vm26787_vm15 }
 0xa0e   : > { %vm17376_vm15 = vmpackc.low %vm8215_vm6, %vm8214_vm13  ;;  %vm26798_vm13 = vnez %v26797_v60 }
 0xa0f   : > { %17155 = vmatpush1.bf16.msk.msra.mxu0 %vm17154_vm0, %v26563_v35  ;;  %17321 = vmatpush1.bf16.msk.msra.mxu1 %vm17320_vm12, %v26563_v35  ;;  %vm17373_vm0 = vmpackc.low %vm8213_vm11, %vm8212_vm14  ;;  %vm7468_vm12 = vcmp.eq.s32.totalorder %v23907_v38, %v24230_v11  ;;  %vm8217_vm14 = vcmp.eq.s32.totalorder %v23907_v38, %v26790_v6  ;;  %v26795_v11 = vld [vmem:[#allocation25_spill] sm:$0xff]  ;;  %v26820_v6 = vld [vmem:[#allocation111_spill] sm:$0xff] }
 0xa10   : > { %17156 = vmatprep.subr.bf16.mxu0 %v26735_v10  ;;  %17322 = vmatprep.subr.bf16.mxu1 %v26735_v10 }
 0xa13   : > { %17158 = vmatpush1.bf16.msk.msra.mxu0 %vm17157_vm8, %v26563_v35  ;;  %17325 = vmatpush1.bf16.msk.msra.mxu1 %vm17324_vm5, %v17323_v9  ;;  %vm17164_vm8 = vmpackc.low %vm26788_vm4, %vm7468_vm12  ;;  %vm8216_vm5 = vcmp.eq.s32.totalorder %v23907_v38, %v26789_v19  ;;  %vm26796_vm12 = vnez %v26795_v11  ;;  %vm8220_vm4 = vcmp.eq.s32.totalorder %v23907_v38, %v26799_v51  ;;  %v26817_v9 = vld [vmem:[#allocation68_spill] sm:$0xff]  ;;  %v24577_v19 = vadd.s32 4294967295, %v24035_v34  ;;  %v26824_v51 = vld [vmem:[#allocation118_spill] sm:$0xff] }
 0xa14   : > { %17159 = vmatprep.subr.bf16.mxu0 %v26735_v10  ;;  %17372 = vmatprep.subr.bf16.mxu1 %v26735_v10  ;;  %vm17379_vm11 = vmpackc.low %vm8217_vm14, %vm8216_vm5  ;;  %vm26804_vm5 = vnez %v26803_v52  ;;  %v26823_v11 = vld [vmem:[#allocation116_spill] sm:$0xff] }
 0xa16   : > { %8185 = vmatmul.mubr.f32.vlgmr.msra.gmra.mrb[96].mxu1 %v24320_v28 }
 0xa17   : > { %17161 = vmatpush1.bf16.msk.msra.mxu0 %vm24249_vm9, %v26563_v35  ;;  %17374 = vmatpush1.bf16.msk.msra.mxu1 %vm17373_vm0, %v26563_v35  ;;  %vm26792_vm9 = vnez %v26791_v20  ;;  %vm8219_vm0 = vcmp.eq.s32.totalorder %v23907_v38, %v26794_v59  ;;  %v26821_v20 = vld [vmem:[#allocation112_spill] sm:$0xff]  ;;  %v26822_v59 = vld [vmem:[#allocation115_spill] sm:$0xff] }
 0xa18   : > { %17162 = vmatprep.subr.bf16.mxu0 %v26735_v10  ;;  %17375 = vmatprep.subr.bf16.mxu1 %v26735_v10  ;;  %vm17382_vm6 = vmpackc.low %vm8219_vm0, %vm8218_vm3  ;;  %vm26807_vm3 = vnez %v26806_v56  ;;  %v26828_v56 = vld [vmem:[#allocation28_spill] sm:$0xff] }
 0xa19   : > { %15030 = vmatprep.mubr.msk.f32.mxu1 %vm26464_vm1, %v24347_v53 }
 0xa1a   : > { %8190 = vmatmul.mubr.f32.gmra.mrb[98].mxu1 %v24339_v18 }
 0xa1b   : > { %17165 = vmatpush1.bf16.msk.msra.mxu0 %vm17164_vm8, %v17163_v23  ;;  %17377 = vmatpush1.bf16.msk.msra.mxu1 %vm17376_vm15, %v26563_v35  ;;  %vm8221_vm8 = vcmp.eq.s32.totalorder %v23907_v38, %v26800_v54  ;;  %vm26802_vm15 = vnez %v26801_v43  ;;  %v24574_v23 = vadd.s32 4294967295, %v24023_v63  ;;  %v26825_v54 = vld [vmem:[#allocation119_spill] sm:$0xff]  ;;  %v26826_v43 = vld [vmem:[#allocation120_spill] sm:$0xff] }
 0xa1c   : > { %17167 = vmatprep.subr.msk.bf16.mxu0 %vm26792_vm9, %v26563_v35  ;;  %17378 = vmatprep.subr.bf16.mxu1 %v26735_v10  ;;  %vm17385_vm14 = vmpackc.low %vm8221_vm8, %vm8220_vm4  ;;  %vm8222_vm9 = vcmp.eq.s32.totalorder %v23907_v38, %v26805_v22  ;;  %vm7296_vm8 = vcmp.eq.s32.totalorder %v22094_v45, %v26809_v8 }
 0xa1d   : > { %15143 = vmatprep.mubr.msk.f32.mxu1 %vm26464_vm1, %v24363_v0 }
 0xa1e   : > { %7719 = vmatmul.mubr.f32.vlgmr.msra.gmra.mrb[184].mxu0 %v24286_v48  ;;  %v24499_v48 = vadd.s32 4294967295, %v23944_v31 }
 0xa1f   : > { %17169 = vmatpush1.bf16.msk.msra.mxu0 %vm26796_vm12, %v26563_v35  ;;  %17380 = vmatpush1.bf16.msk.msra.mxu1 %vm17379_vm11, %v26563_v35  ;;  %vm8225_vm11 = vcmp.eq.s32.totalorder %v23907_v38, %v24481_v12 }
 0xa20   : > { %17171 = vmatprep.subr.msk.bf16.mxu0 %vm26798_vm13, %v26563_v35  ;;  %17381 = vmatprep.subr.bf16.mxu1 %v26735_v10  ;;  %vm17388_vm0 = vmpackc.low %vm8225_vm11, %vm8222_vm9  ;;  %vm8228_vm12 = vcmp.eq.s32.totalorder %v23907_v38, %v24499_v48  ;;  %vm8231_vm13 = vcmp.eq.s32.totalorder %v23907_v38, %v24502_v33  ;;  %vm7300_vm9 = vcmp.eq.s32.totalorder %v23149_v55, %v26815_v17 }
 0xa21   : > { %14846 = vmatprep.mubr.msk.f32.mxu0 %vm26464_vm1, %v24309_v27  ;;  %v26811_v27 = vld [vmem:[#allocation67_spill] sm:$0xff]  ;;  %vm17391_vm4 = vmpackc.low %vm8231_vm13, %vm8228_vm12  ;;  %vm7303_vm11 = vcmp.eq.s32.totalorder %v23149_v55, %v26816_v49 }
 0xa22   : > { %7724 = vmatmul.mubr.f32.gmra.mrb[186].mxu0 %v24301_v13  ;;  %v24522_v13 = vadd.s32 4294967295, %v23971_v26 }
 0xa23   : > { %17173 = vmatpush1.bf16.msk.msra.mxu0 %vm26802_vm15, %v26563_v35  ;;  %17383 = vmatpush1.bf16.msk.msra.mxu1 %vm17382_vm6, %v26563_v35  ;;  %vm7297_vm6 = vcmp.eq.s32.totalorder %v23149_v55, %v26809_v8  ;;  %vm26814_vm15 = vcmp.eq.s32.totalorder %v23149_v55, %v26813_v47 }
 0xa24   : > { %17175 = vmatprep.subr.msk.bf16.mxu0 %vm26804_vm5, %v26563_v35  ;;  %17384 = vmatprep.subr.bf16.mxu1 %v26735_v10  ;;  %vm17186_vm5 = vmpackc.low %vm7297_vm6, %vm26814_vm15  ;;  %vm7299_vm6 = vcmp.eq.s32.totalorder %v22094_v45, %v26815_v17  ;;  %vm8240_vm15 = vcmp.eq.s32.totalorder %v23907_v38, %v24537_v40  ;;  %v26832_v17 = vld [vmem:[#allocation31_spill] sm:$0xff] }
 0xa25   : > { %14891 = vmatprep.mubr.msk.f32.mxu0 %vm26464_vm1, %v24259_v29  ;;  %v24519_v29 = vadd.s32 4294967295, %v23968_v7  ;;  %vm8246_vm1 = vcmp.eq.s32.totalorder %v23907_v38, %v24571_v44 }
 0xa27   : > { %17177 = vmatpush1.bf16.msk.msra.mxu0 %vm26807_vm3, %v26563_v35  ;;  %17386 = vmatpush1.bf16.msk.msra.mxu1 %vm17385_vm14, %v26563_v35  ;;  %vm8237_vm14 = vcmp.eq.s32.totalorder %v23907_v38, %v24522_v13  ;;  %vm26818_vm3 = vnez %v26817_v9 }
 0xa28   : > { %17179 = vmatprep.subr.msk.bf16.mxu0 %vm23442_vm2, %v26563_v35  ;;  %17387 = vmatprep.subr.bf16.mxu1 %v26735_v10  ;;  %vm26812_vm2 = vnez %v26811_v27 }
 0xa2b   : > { %17181 = vmatpush1.bf16.msk.msra.mxu0 %vm23467_vm7, %v26563_v35  ;;  %17389 = vmatpush1.bf16.msk.msra.mxu1 %vm17388_vm0, %v26563_v35  ;;  %vm8234_vm7 = vcmp.eq.s32.totalorder %v23907_v38, %v24519_v29  ;;  %vm26819_vm0 = vcmp.eq.s32.totalorder %v22094_v45, %v26813_v47 }
 0xa2c   : > { %17183 = vmatprep.subr.msk.bf16.mxu0 %vm26812_vm2, %v26563_v35  ;;  %17390 = vmatprep.subr.bf16.mxu1 %v26735_v10  ;;  %vm17188_vm12 = vmpackc.low %vm7296_vm8, %vm26819_vm0  ;;  %vm7302_vm2 = vcmp.eq.s32.totalorder %v22094_v45, %v26816_v49  ;;  %vm7306_vm8 = vcmp.eq.s32.totalorder %v23149_v55, %v26820_v6  ;;  %v26833_v49 = vld [vmem:[#allocation50_spill] sm:$0xff] }
 0xa2d   : > { %vm17394_vm13 = vmpackc.low %vm8237_vm14, %vm8234_vm7 }
 0xa2e   : > { %vm17192_vm7 = vmpackc.low %vm7302_vm2, %vm7299_vm6  ;;  %vm7312_vm6 = vcmp.eq.s32.totalorder %v23149_v55, %v26822_v59  ;;  %vm7315_vm2 = vcmp.eq.s32.totalorder %v23149_v55, %v26823_v11 }
 0xa2f   : > { %17185 = vmatpush1.bf16.msk.msra.mxu0 %vm26818_vm3, %v26563_v35  ;;  %17392 = vmatpush1.bf16.msk.msra.mxu1 %vm17391_vm4, %v26563_v35  ;;  %vm17190_vm3 = vmpackc.low %vm7303_vm11, %vm7300_vm9  ;;  %vm8243_vm4 = vcmp.eq.s32.totalorder %v23907_v38, %v24547_v1  ;;  %vm7305_vm9 = vcmp.eq.s32.totalorder %v22094_v45, %v26820_v6  ;;  %vm7308_vm11 = vcmp.eq.s32.totalorder %v22094_v45, %v26821_v20  ;;  %v26835_v6 = vld [vmem:[#allocation45_spill] sm:$0xff] }
 0xa30   : > { %17187 = vmatprep.subr.msk.bf16.mxu0 %vm17186_vm5, %v26563_v35  ;;  %17393 = vmatprep.subr.bf16.mxu1 %v26735_v10  ;;  %vm7309_vm5 = vcmp.eq.s32.totalorder %v23149_v55, %v26821_v20  ;;  %vm17397_vm14 = vmpackc.low %vm8243_vm4, %vm8240_vm15  ;;  %vm7311_vm4 = vcmp.eq.s32.totalorder %v22094_v45, %v26822_v59  ;;  %v26836_v20 = vld [vmem:[#allocation44_spill] sm:$0xff]  ;;  %v26838_v59 = vld [vmem:[#allocation69_spill] sm:$0xff] }
 0xa31   : > { %vm17194_vm0 = vmpackc.low %vm7309_vm5, %vm7306_vm8  ;;  %vm7314_vm8 = vcmp.eq.s32.totalorder %v22094_v45, %v26823_v11  ;;  %v26840_v11 = vld [vmem:[#allocation90_spill] sm:$0xff] }
 0xa32   : > { %vm17196_vm15 = vmpackc.low %vm7308_vm11, %vm7305_vm9  ;;  %vm7321_vm9 = vcmp.eq.s32.totalorder %v23149_v55, %v26825_v54 }
 0xa33   : > { %17189 = vmatpush1.bf16.msk.msra.mxu0 %vm17188_vm12, %v26563_v35  ;;  %17395 = vmatpush1.bf16.msk.msra.mxu1 %vm17394_vm13, %v26563_v35  ;;  %vm8249_vm12 = vcmp.eq.s32.totalorder %v23907_v38, %v24574_v23  ;;  %vm8255_vm13 = vcmp.eq.s32.totalorder %v23907_v38, %v24577_v19  ;;  %vm17198_vm5 = vmpackc.low %vm7315_vm2, %vm7312_vm6  ;;  %vm7320_vm6 = vcmp.eq.s32.totalorder %v22094_v45, %v26825_v54  ;;  %v26845_v54 = vld [vmem:[#allocation70_spill] sm:$0xff] }
 0xa34   : > { %17191 = vmatprep.subr.msk.bf16.mxu0 %vm17190_vm3, %v26563_v35  ;;  %17396 = vmatprep.subr.bf16.mxu1 %v26735_v10  ;;  %vm17400_vm3 = vmpackc.low %vm8249_vm12, %vm8246_vm1  ;;  %v15074_v60 = vsel %vm8255_vm13, 1.0, %v26561_v61  ;;  %vm7327_vm1 = vcmp.eq.s32.totalorder %v23149_v55, %v26826_v43  ;;  %vm7317_vm13 = vcmp.eq.s32.totalorder %v22094_v45, %v26824_v51 }
 0xa35   : > { %vm17200_vm11 = vmpackc.low %vm7314_vm8, %vm7311_vm4  ;;  %v17403_v52 = vpack.c.bf16 %v15074_v60, %v26761_v57  ;;  %v14731_v8 = vsel %vm7327_vm1, 1.0, %v26561_v61  ;;  %vm7326_vm4 = vcmp.eq.s32.totalorder %v22094_v45, %v26826_v43  ;;  %vm7324_vm8 = vcmp.eq.s32.totalorder %v23149_v55, %v26830_v24  ;;  %v26841_v60 = vld [vmem:[#allocation91_spill] sm:$0xff]  ;;  %v26847_v43 = vld [vmem:[#allocation93_spill] sm:$0xff] }
 0xa36   : > { %v17206_v27 = vpack.c.bf16 %v14731_v8, %v26761_v57  ;;  %v14730_v47 = vsel %vm7326_vm4, 1.0, %v26561_v61  ;;  %vm26839_vm4 = vnez %v26838_v59  ;;  %v26854_v8 = vld [vmem:[#allocation96_spill] sm:$0xff]  ;;  %v24786_v59 = vadd.s32 4294967294, %v24035_v34 }
 0xa37   : > { %17193 = vmatpush1.bf16.msk.msra.mxu0 %vm17192_vm7, %v26563_v35  ;;  %17398 = vmatpush1.bf16.msk.msra.mxu1 %vm17397_vm14, %v26563_v35  ;;  %vm8252_vm7 = vcmp.eq.s32.totalorder %v23907_v38, %v24596_v41  ;;  %vm7318_vm14 = vcmp.eq.s32.totalorder %v23149_v55, %v26824_v51  ;;  %v17209_v9 = vpack.c.bf16 %v14730_v47, %v26761_v57  ;;  %v26843_v51 = vld [vmem:[#allocation26_spill] sm:$0xff]  ;;  %v24731_v47 = vadd.s32 4294967294, %v23971_v26 }
 0xa38   : > { %17195 = vmatprep.subr.msk.bf16.mxu0 %vm17194_vm0, %v26563_v35  ;;  %17399 = vmatprep.subr.bf16.mxu1 %v26735_v10  ;;  %vm26827_vm0 = vcmask 1040384   ;;  %vm17202_vm2 = vmpackc.low %vm7321_vm9, %vm7318_vm14  ;;  %vm7323_vm14 = vcmp.eq.s32.totalorder %v22094_v45, %v26830_v24  ;;  %v26856_v24 = vld [vmem:[#allocation40_spill] sm:$0xff] }
 0xa39   : > { %vm17404_vm12 = vmpackc.low %vm26827_vm0, %vm8252_vm7 }
 0xa3a   : > { %vm26831_vm9 = vmmov %vm26827_vm0  ;;  %vm8530_vm0 = vcmp.eq.s32.totalorder %v23907_v38, %v26832_v17  ;;  %v26860_v17 = vld [vmem:[#allocation73_spill] sm:$0xff] }
 0xa3b   : > { %17197 = vmatpush1.bf16.msk.msra.mxu0 %vm17196_vm15, %v26563_v35  ;;  %17401 = vmatpush1.bf16.msk.msra.mxu1 %vm17400_vm3, %v26563_v35  ;;  %vm8528_vm15 = vcmp.eq.s32.totalorder %v23907_v38, %v26828_v56  ;;  %vm8529_vm3 = vcmp.eq.s32.totalorder %v23907_v38, %v26829_v36  ;;  %vm17207_vm1 = vmpackc.low %vm26831_vm9, %vm7324_vm8  ;;  %v26850_v56 = vld [vmem:[#allocation48_spill] sm:$0xff]  ;;  %v26852_v36 = vld [vmem:[#allocation71_spill] sm:$0xff] }
 0xa3c   : > { %17199 = vmatprep.subr.msk.bf16.mxu0 %vm17198_vm5, %v26563_v35  ;;  %17402 = vmatprep.subr.bf16.mxu1 %v26735_v10  ;;  %vm17204_vm5 = vmpackc.low %vm7320_vm6, %vm7317_vm13 }
 0xa3d   : > { %vm17453_vm7 = vmpackc.low %vm8529_vm3, %vm8528_vm15  ;;  %vm8533_vm15 = vcmp.eq.s32.totalorder %v23907_v38, %v26836_v20  ;;  %vm26837_vm3 = vcmask 334848   ;;  %v24783_v20 = vadd.s32 4294967294, %v24023_v63 }
 0xa3f   : > { %17201 = vmatpush1.bf16.msk.msra.mxu0 %vm17200_vm11, %v26563_v35  ;;  %17405 = vmatpush1.bf16.msk.msra.mxu1 %vm17404_vm12, %v17403_v52  ;;  %vm8531_vm11 = vcmp.eq.s32.totalorder %v23907_v38, %v26833_v49  ;;  %vm26834_vm12 = vmmov %vm26831_vm9  ;;  %vm26844_vm9 = vnez %v26843_v51  ;;  %v26848_v52 = vld [vmem:[#allocation94_spill] sm:$0xff]  ;;  %v26893_v51 = vld [vmem:[#allocation87_spill] sm:$0xff] }
 0xa40   : > { %17203 = vmatprep.subr.msk.bf16.mxu0 %vm17202_vm2, %v26563_v35  ;;  %17452 = vmatprep.subr.bf16.mxu1 %v26735_v10  ;;  %vm17210_vm13 = vmpackc.low %vm26834_vm12, %vm7323_vm14  ;;  %vm8532_vm2 = vcmp.eq.s32.totalorder %v23907_v38, %v26835_v6  ;;  %vm8537_vm12 = vcmp.eq.s32.totalorder %v23907_v38, %v26848_v52  ;;  %v26862_v49 = vld [vmem:[#allocation74_spill] sm:$0xff]  ;;  %v24756_v6 = vadd.s32 4294967294, %v24008_v2 }
 0xa41   : > { %vm17456_vm6 = vmpackc.low %vm8531_vm11, %vm8530_vm0  ;;  %vm8536_vm11 = vcmp.eq.s32.totalorder %v23907_v38, %v26847_v43 }
 0xa42   : > { %8501 = vmatmul.mubr.f32.vlgmr.msra.gmra.mrb[100].mxu1 %v24355_v58  ;;  %vm17459_vm8 = vmpackc.low %vm8533_vm15, %vm8532_vm2  ;;  %vm26853_vm2 = vnez %v26852_v36 }
 0xa43   : > { %17205 = vmatpush1.bf16.msk.msra.mxu0 %vm17204_vm5, %v26563_v35  ;;  %17454 = vmatpush1.bf16.msk.msra.mxu1 %vm17453_vm7, %v26563_v35  ;;  %vm8534_vm5 = vcmp.eq.s32.totalorder %v23907_v38, %v26840_v11  ;;  %vm8535_vm7 = vcmp.eq.s32.totalorder %v23907_v38, %v26841_v60  ;;  %vm26842_vm14 = vmmov %vm26837_vm3  ;;  %v26879_v11 = vld [vmem:[#allocation49_spill] sm:$0xff]  ;;  %v26884_v60 = vld [vmem:[#allocation43_spill] sm:$0xff] }
 0xa44   : > { %17208 = vmatprep.subr.msk.bf16.mxu0 %vm17207_vm1, %v17206_v27  ;;  %17455 = vmatprep.subr.bf16.mxu1 %v26735_v10  ;;  %vm26846_vm1 = vnez %v26845_v54  ;;  %vm17462_vm0 = vmpackc.low %vm8535_vm7, %vm8534_vm5  ;;  %vm26857_vm5 = vnez %v26856_v24  ;;  %v26858_v27 = vld [vmem:[#allocation72_spill] sm:$0xff] }
 0xa45   : > { %15144 = vmatprep.mubr.msk.f32.mxu1 %vm26837_vm3, %v24379_v14  ;;  %vm17465_vm15 = vmpackc.low %vm8537_vm12, %vm8536_vm11  ;;  %vm26859_vm7 = vnez %v26858_v27  ;;  %vm26861_vm11 = vnez %v26860_v17  ;;  %vm26863_vm12 = vnez %v26862_v49 }
 0xa46   : > { %8506 = vmatmul.mubr.f32.gmra.mrb[102].mxu1 %v24371_v3 }
 0xa47   : > { %17211 = vmatpush1.bf16.msk.msra.mxu0 %vm17210_vm13, %v17209_v9  ;;  %17457 = vmatpush1.bf16.msk.msra.mxu1 %vm17456_vm6, %v26563_v35  ;;  %vm26849_vm13 = vmmov %vm26837_vm3  ;;  %vm26851_vm6 = vnez %v26850_v56  ;;  %vm8538_vm3 = vcmp.eq.s32.totalorder %v23907_v38, %v26854_v8  ;;  %v24746_v9 = vadd.s32 4294967294, %v24005_v50 }
 0xa48   : > { %17247 = vmatprep.subr.msk.bf16.mxu0 %vm26839_vm4, %v26563_v35  ;;  %17458 = vmatprep.subr.bf16.mxu1 %v26735_v10 }
 0xa49   : > { %15257 = vmatprep.mubr.msk.f32.mxu1 %vm26842_vm14, %v24395_v39 }
 0xa4a   : > { %7809 = vmatmul.mubr.f32.vlgmr.msra.gmra.mrb[180].mxu0 %v24257_v42  ;;  %v24690_v42 = vadd.s32 4294967294, %v23936_v25 }
 0xa4b   : > { %17249 = vmatpush1.bf16.msk.msra.mxu0 %vm26844_vm9, %v26563_v35  ;;  %17460 = vmatpush1.bf16.msk.msra.mxu1 %vm17459_vm8, %v26563_v35  ;;  %vm26855_vm8 = vmmov %vm26849_vm13 }
 0xa4c   : > { %17251 = vmatprep.subr.msk.bf16.mxu0 %vm26846_vm1, %v26563_v35  ;;  %17461 = vmatprep.subr.bf16.mxu1 %v26735_v10  ;;  %vm8541_vm4 = vcmp.eq.s32.totalorder %v23907_v38, %v24690_v42 }
 0xa4d   : > { %14892 = vmatprep.mubr.msk.f32.mxu0 %vm26849_vm13, %v24272_v30  ;;  %v24711_v30 = vadd.s32 4294967294, %v23960_v15  ;;  %vm17468_vm14 = vmpackc.low %vm8541_vm4, %vm8538_vm3  ;;  %vm8553_vm4 = vcmp.eq.s32.totalorder %v23907_v38, %v24731_v47 }
 0xa4e   : > { %7815 = vmatmul.mubr.f32.gmra.mrb[182].mxu0 %v24269_v46  ;;  %v24708_v46 = vadd.s32 4294967294, %v23944_v31 }
 0xa4f   : > { %17253 = vmatpush1.bf16.msk.msra.mxu0 %vm26851_vm6, %v26563_v35  ;;  %17463 = vmatpush1.bf16.msk.msra.mxu1 %vm17462_vm0, %v26563_v35  ;;  %vm8547_vm1 = vcmp.eq.s32.totalorder %v23907_v38, %v24711_v30  ;;  %vm7908_vm0 = vcmp.eq.s32.totalorder %v23149_v55, %v23936_v25  ;;  %vm7907_vm6 = vcmp.eq.s32.totalorder %v22094_v45, %v23936_v25  ;;  %v26865_v25 = vld [vmem:[#allocation75_spill] sm:$0xff] }
 0xa50   : > { %17255 = vmatprep.subr.msk.bf16.mxu0 %vm26853_vm2, %v26563_v35  ;;  %17464 = vmatprep.subr.bf16.mxu1 %v26735_v10  ;;  %vm8544_vm9 = vcmp.eq.s32.totalorder %v23907_v38, %v24708_v46  ;;  %vm26864_vm2 = vcmp.eq.s32.totalorder %v23149_v55, %v23336_v21 }
 0xa51   : > { %15005 = vmatprep.mubr.msk.f32.mxu0 %vm26855_vm8, %v24328_v5  ;;  %v24728_v5 = vadd.s32 4294967294, %v23968_v7  ;;  %vm17471_vm13 = vmpackc.low %vm8547_vm1, %vm8544_vm9  ;;  %vm7911_vm8 = vcmp.eq.s32.totalorder %v23149_v55, %v23944_v31 }
 0xa53   : > { %17257 = vmatpush1.bf16.msk.msra.mxu0 %vm26857_vm5, %v26563_v35  ;;  %17466 = vmatpush1.bf16.msk.msra.mxu1 %vm17465_vm15, %v26563_v35  ;;  %vm17266_vm15 = vmpackc.low %vm7908_vm0, %vm26864_vm2  ;;  %vm8550_vm3 = vcmp.eq.s32.totalorder %v23907_v38, %v24728_v5  ;;  %vm7914_vm5 = vcmp.eq.s32.totalorder %v23149_v55, %v23960_v15  ;;  %vm7910_vm0 = vcmp.eq.s32.totalorder %v22094_v45, %v23944_v31  ;;  %v24805_v31 = vadd.s32 4294967294, %v24050_v37 }
 0xa54   : > { %17259 = vmatprep.subr.msk.bf16.mxu0 %vm26859_vm7, %v26563_v35  ;;  %17467 = vmatprep.subr.bf16.mxu1 %v26735_v10  ;;  %vm26866_vm7 = vnez %v26865_v25  ;;  %vm17474_vm1 = vmpackc.low %vm8553_vm4, %vm8550_vm3 }
 0xa55   : > { %vm17270_vm2 = vmpackc.low %vm7914_vm5, %vm7911_vm8  ;;  %vm7916_vm8 = vcmp.eq.s32.totalorder %v22094_v45, %v23968_v7  ;;  %vm7919_vm5 = vcmp.eq.s32.totalorder %v22094_v45, %v23971_v26 }
 0xa57   : > { %17261 = vmatpush1.bf16.msk.msra.mxu0 %vm26861_vm11, %v26563_v35  ;;  %17469 = vmatpush1.bf16.msk.msra.mxu1 %vm17468_vm14, %v26563_v35  ;;  %vm26867_vm14 = vcmp.eq.s32.totalorder %v22094_v45, %v23336_v21  ;;  %vm7913_vm11 = vcmp.eq.s32.totalorder %v22094_v45, %v23960_v15  ;;  %v24780_v21 = vadd.s32 4294967294, %v24020_v32 }
 0xa58   : > { %17263 = vmatprep.subr.msk.bf16.mxu0 %vm26863_vm12, %v26563_v35  ;;  %17470 = vmatprep.subr.bf16.mxu1 %v26735_v10  ;;  %vm17268_vm9 = vmpackc.low %vm7907_vm6, %vm26867_vm14  ;;  %vm8556_vm12 = vcmp.eq.s32.totalorder %v23907_v38, %v24746_v9  ;;  %vm7917_vm6 = vcmp.eq.s32.totalorder %v23149_v55, %v23968_v7 }
 0xa59   : > { %vm17272_vm3 = vmpackc.low %vm7913_vm11, %vm7910_vm0  ;;  %vm8562_vm14 = vcmp.eq.s32.totalorder %v23907_v38, %v24780_v21  ;;  %vm7923_vm0 = vcmp.eq.s32.totalorder %v23149_v55, %v24005_v50  ;;  %vm7926_vm11 = vcmp.eq.s32.totalorder %v23149_v55, %v24008_v2 }
 0xa5b   : > { %17265 = vmatpush1.bf16.msk.msra.mxu0 %vm26866_vm7, %v26563_v35  ;;  %17472 = vmatpush1.bf16.msk.msra.mxu1 %vm17471_vm13, %v26563_v35  ;;  %vm8559_vm13 = vcmp.eq.s32.totalorder %v23907_v38, %v24756_v6 }
 0xa5c   : > { %17267 = vmatprep.subr.msk.bf16.mxu0 %vm17266_vm15, %v26563_v35  ;;  %17473 = vmatprep.subr.bf16.mxu1 %v26735_v10  ;;  %vm7920_vm15 = vcmp.eq.s32.totalorder %v23149_v55, %v23971_v26  ;;  %vm17477_vm4 = vmpackc.low %vm8559_vm13, %vm8556_vm12  ;;  %vm7922_vm13 = vcmp.eq.s32.totalorder %v22094_v45, %v24005_v50 }
 0xa5d   : > { %vm17274_vm7 = vmpackc.low %vm7920_vm15, %vm7917_vm6  ;;  %vm7925_vm6 = vcmp.eq.s32.totalorder %v22094_v45, %v24008_v2 }
 0xa5e   : > { %vm17276_vm12 = vmpackc.low %vm7919_vm5, %vm7916_vm8  ;;  %vm7932_vm8 = vcmp.eq.s32.totalorder %v23149_v55, %v24023_v63  ;;  %vm7938_vm5 = vcmp.eq.s32.totalorder %v23149_v55, %v24035_v34 }
 0xa5f   : > { %17269 = vmatpush1.bf16.msk.msra.mxu0 %vm17268_vm9, %v26563_v35  ;;  %17475 = vmatpush1.bf16.msk.msra.mxu1 %vm17474_vm1, %v26563_v35  ;;  %vm8565_vm9 = vcmp.eq.s32.totalorder %v23907_v38, %v24783_v20  ;;  %vm8571_vm1 = vcmp.eq.s32.totalorder %v23907_v38, %v24786_v59  ;;  %vm17278_vm15 = vmpackc.low %vm7926_vm11, %vm7923_vm0  ;;  %vm7928_vm0 = vcmp.eq.s32.totalorder %v22094_v45, %v24020_v32  ;;  %v14959_v50 = vsel %vm7938_vm5, 1.0, %v26561_v61 }
 0xa60   : > { %17271 = vmatprep.subr.msk.bf16.mxu0 %vm17270_vm2, %v26563_v35  ;;  %17476 = vmatprep.subr.bf16.mxu1 %v26735_v10  ;;  %vm17480_vm2 = vmpackc.low %vm8565_vm9, %vm8562_vm14  ;;  %v15188_v15 = vsel %vm8571_vm1, 1.0, %v26561_v61  ;;  %vm26868_vm14 = vcmask 1040384   ;;  %vm7931_vm11 = vcmp.eq.s32.totalorder %v22094_v45, %v24023_v63  ;;  %v17286_v7 = vpack.c.bf16 %v14959_v50, %v26761_v57  ;;  %v26877_v63 = vld [vmem:[#allocation77_spill] sm:$0xff]  ;;  %v25071_v50 = vpop.permute.xlu0 %8835 }
 0xa61   : > { %v17483_v2 = vpack.c.bf16 %v15188_v15, %v26761_v57 }
 0xa63   : > { %17273 = vmatpush1.bf16.msk.msra.mxu0 %vm17272_vm3, %v26563_v35  ;;  %17478 = vmatpush1.bf16.msk.msra.mxu1 %vm17477_vm4, %v26563_v35  ;;  %vm8568_vm3 = vcmp.eq.s32.totalorder %v23907_v38, %v24805_v31  ;;  %vm7929_vm4 = vcmp.eq.s32.totalorder %v23149_v55, %v24020_v32  ;;  %v26872_v32 = vld [vmem:[#allocation76_spill] sm:$0xff] }
 0xa64   : > { %17275 = vmatprep.subr.msk.bf16.mxu0 %vm17274_vm7, %v26563_v35  ;;  %17479 = vmatprep.subr.bf16.mxu1 %v26735_v10  ;;  %vm17280_vm7 = vmpackc.low %vm7925_vm6, %vm7922_vm13 }
 0xa65   : > { %vm17484_vm9 = vmpackc.low %vm26868_vm14, %vm8568_vm3  ;;  %vm7934_vm3 = vcmp.eq.s32.totalorder %v22094_v45, %v24050_v37 }
 0xa66   : > { %vm17282_vm1 = vmpackc.low %vm7932_vm8, %vm7929_vm4  ;;  %vm26870_vm4 = vcmask 334848  }
 0xa67   : > { %17277 = vmatpush1.bf16.msk.msra.mxu0 %vm17276_vm12, %v26563_v35  ;;  %17481 = vmatpush1.bf16.msk.msra.mxu1 %vm17480_vm2, %v26563_v35  ;;  %vm7937_vm12 = vcmp.eq.s32.totalorder %v22094_v45, %v24035_v34  ;;  %vm7935_vm2 = vcmp.eq.s32.totalorder %v23149_v55, %v24050_v37  ;;  %vm17284_vm13 = vmpackc.low %vm7931_vm11, %vm7928_vm0  ;;  %v26874_v37 = vld [vmem:[#allocation27_spill] sm:$0xff]  ;;  %vm26880_vm0 = vnez %v26879_v11  ;;  %v26924_v11 = vld [vmem:[#allocation17_spill] sm:$0xff] }
 0xa68   : > { %17279 = vmatprep.subr.msk.bf16.mxu0 %vm17278_vm15, %v26563_v35  ;;  %17482 = vmatprep.subr.bf16.mxu1 %v26735_v10  ;;  %v14958_v26 = vsel %vm7937_vm12, 1.0, %v26561_v61  ;;  %vm26869_vm6 = vmmov %vm26868_vm14  ;;  %vm26875_vm14 = vnez %v26874_v37  ;;  %v25074_v37 = vpop.permute.xlu1 %8840 }
 0xa69   : > { %vm17287_vm15 = vmpackc.low %vm26869_vm6, %vm7935_vm2  ;;  %v17289_v34 = vpack.c.bf16 %v14958_v26, %v26761_v57  ;;  %vm26885_vm2 = vnez %v26884_v60  ;;  %v26925_v60 = vld [vmem:[#allocation18_spill] sm:$0xff] }
 0xa6a   : > { %vm26871_vm8 = vmmov %vm26869_vm6  ;;  %vm8224_vm6 = vcmp.eq.s32.totalorder %v23149_v55, %v24481_v12 }
 0xa6b   : > { %17281 = vmatpush1.bf16.msk.msra.mxu0 %vm17280_vm7, %v26563_v35  ;;  %17485 = vmatpush1.bf16.msk.msra.mxu1 %vm17484_vm9, %v17483_v2  ;;  %vm17290_vm5 = vmpackc.low %vm26871_vm8, %vm7934_vm3  ;;  %vm26873_vm7 = vnez %v26872_v32 }
 0xa6c   : > { %17283 = vmatprep.subr.msk.bf16.mxu0 %vm17282_vm1, %v26563_v35  ;;  %17490 = vmatprep.subr.bf16.mxu1 %v26735_v10  ;;  %vm26876_vm9 = vmmov %vm26870_vm4  ;;  %vm26878_vm1 = vnez %v26877_v63 }
 0xa6d   : > { %vm26881_vm11 = vmmov %vm26870_vm4 }
 0xa6e   : > { %8817 = vmatmul.mubr.f32.vlgmr.msra.gmra.mrb[104].mxu1 %v24387_v16 }
 0xa6f   : > { %17285 = vmatpush1.bf16.msk.msra.mxu0 %vm17284_vm13, %v26563_v35  ;;  %15258 = vmatprep.mubr.msk.f32.mxu1 %vm26870_vm4, %v24414_v4  ;;  %vm26892_vm4 = vcmp.eq.s32.totalorder %v23149_v55, %v26805_v22 }
 0xa70   : > { %17288 = vmatprep.subr.msk.bf16.mxu0 %vm17287_vm15, %v17286_v7  ;;  %vm17346_vm8 = vmpackc.low %vm8224_vm6, %vm26892_vm4  ;;  %vm8236_vm6 = vcmp.eq.s32.totalorder %v23149_v55, %v24522_v13  ;;  %vm8232_vm4 = vcmp.eq.s32.totalorder %v22094_v45, %v24519_v29 }
 0xa72   : > { %8822 = vmatmul.mubr.f32.gmra.mrb[106].mxu1 %v24405_v62 }
 0xa73   : > { %17291 = vmatpush1.bf16.msk.msra.mxu0 %vm17290_vm5, %v17289_v34  ;;  %vm8223_vm5 = vcmp.eq.s32.totalorder %v22094_v45, %v24481_v12 }
 0xa74   : > { %17327 = vmatprep.subr.msk.bf16.mxu0 %vm26873_vm7, %v26563_v35  ;;  %vm8227_vm7 = vcmp.eq.s32.totalorder %v23149_v55, %v24499_v48 }
 0xa76   : > { %8108 = vmatmul.mubr.f32.vlgmr.msra.gmra.mrb[180].mxu0 %v24320_v28  ;;  %v26882_v28 = vld [vmem:[#allocation80_spill] sm:$0xff] }
 0xa77   : > { %17329 = vmatpush1.bf16.msk.msra.mxu0 %vm26875_vm14, %v26563_v35  ;;  %15006 = vmatprep.mubr.msk.f32.mxu0 %vm26876_vm9, %v24347_v53  ;;  %vm26883_vm12 = vnez %v26882_v28  ;;  %v26886_v53 = vld [vmem:[#allocation83_spill] sm:$0xff]  ;;  %vm8230_vm14 = vcmp.eq.s32.totalorder %v23149_v55, %v24502_v33  ;;  %vm26894_vm9 = vnez %v26893_v51  ;;  %v9452_v28 = vadd.s32 1, %v26924_v11 }
 0xa78   : > { %17331 = vmatprep.subr.msk.bf16.mxu0 %vm26878_vm1, %v26563_v35  ;;  %vm26887_vm13 = vnez %v26886_v53  ;;  %vm26895_vm1 = vcmp.eq.s32.totalorder %v22094_v45, %v26805_v22  ;;  %v9453_v53 = vadd.s32 1, %v26925_v60  ;;  %v26926_v51 = vld [vmem:[#allocation23_spill] sm:$0xff] }
 0xa7a   : > { %8114 = vmatmul.mubr.f32.gmra.mrb[182].mxu0 %v24339_v18  ;;  %v26888_v18 = vld [vmem:[#allocation85_spill] sm:$0xff] }
 0xa7b   : > { %17333 = vmatpush1.bf16.msk.msra.mxu0 %vm26880_vm0, %v26563_v35  ;;  %15119 = vmatprep.mubr.msk.f32.mxu0 %vm26881_vm11, %v24363_v0  ;;  %vm26889_vm15 = vnez %v26888_v18  ;;  %v26890_v0 = vld [vmem:[#allocation86_spill] sm:$0xff]  ;;  %vm17348_vm0 = vmpackc.low %vm8223_vm5, %vm26895_vm1  ;;  %vm8239_vm5 = vcmp.eq.s32.totalorder %v23149_v55, %v24537_v40  ;;  %vm8238_vm1 = vcmp.eq.s32.totalorder %v22094_v45, %v24537_v40  ;;  %v26903_v40 = vld [vmem:[#allocation89_spill] sm:$0xff] }
 0xa7c   : > { %17335 = vmatprep.subr.msk.bf16.mxu0 %vm26883_vm12, %v26563_v35  ;;  %vm26891_vm3 = vnez %v26890_v0  ;;  %vm17350_vm11 = vmpackc.low %vm8230_vm14, %vm8227_vm7  ;;  %vm8226_vm12 = vcmp.eq.s32.totalorder %v22094_v45, %v24499_v48  ;;  %vm8242_vm7 = vcmp.eq.s32.totalorder %v23149_v55, %v24547_v1 }
 0xa7f   : > { %17337 = vmatpush1.bf16.msk.msra.mxu0 %vm26885_vm2, %v26563_v35  ;;  %vm8229_vm2 = vcmp.eq.s32.totalorder %v22094_v45, %v24502_v33 }
 0xa80   : > { %17339 = vmatprep.subr.msk.bf16.mxu0 %vm26887_vm13, %v26563_v35  ;;  %vm8233_vm13 = vcmp.eq.s32.totalorder %v23149_v55, %v24519_v29  ;;  %v26898_v29 = vld [vmem:[#allocation88_spill] sm:$0xff] }
 0xa83   : > { %17341 = vmatpush1.bf16.msk.msra.mxu0 %vm26889_vm15, %v26563_v35  ;;  %vm17352_vm15 = vmpackc.low %vm8229_vm2, %vm8226_vm12  ;;  %vm8248_vm12 = vcmp.eq.s32.totalorder %v23149_v55, %v24574_v23  ;;  %vm8254_vm2 = vcmp.eq.s32.totalorder %v23149_v55, %v24577_v19 }
 0xa84   : > { %17343 = vmatprep.subr.msk.bf16.mxu0 %vm26891_vm3, %v26563_v35  ;;  %vm17354_vm3 = vmpackc.low %vm8236_vm6, %vm8233_vm13  ;;  %v15073_v12 = vsel %vm8254_vm2, 1.0, %v26561_v61  ;;  %vm26902_vm2 = vcmask 334848  }
 0xa85   : > { %v17366_v22 = vpack.c.bf16 %v15073_v12, %v26761_v57  ;;  %v9454_v12 = vadd.s32 1, %v26926_v51 }
 0xa87   : > { %17345 = vmatpush1.bf16.msk.msra.mxu0 %vm26894_vm9, %v26563_v35  ;;  %vm17358_vm9 = vmpackc.low %vm8242_vm7, %vm8239_vm5  ;;  %vm26896_vm7 = vcmask 1040384  }
 0xa88   : > { %17347 = vmatprep.subr.msk.bf16.mxu0 %vm17346_vm8, %v26563_v35  ;;  %vm8235_vm8 = vcmp.eq.s32.totalorder %v22094_v45, %v24522_v13  ;;  %v26900_v13 = vld [vmem:[#allocation30_spill] sm:$0xff] }
 0xa89   : > { %vm17356_vm14 = vmpackc.low %vm8235_vm8, %vm8232_vm4  ;;  %vm8253_vm4 = vcmp.eq.s32.totalorder %v22094_v45, %v24577_v19  ;;  %vm8251_vm8 = vcmp.eq.s32.totalorder %v23149_v55, %v24596_v41 }
 0xa8a   : > { %v15072_v48 = vsel %vm8253_vm4, 1.0, %v26561_v61 }
 0xa8b   : > { %17349 = vmatpush1.bf16.msk.msra.mxu0 %vm17348_vm0, %v26563_v35  ;;  %vm8241_vm0 = vcmp.eq.s32.totalorder %v22094_v45, %v24547_v1  ;;  %v17369_v33 = vpack.c.bf16 %v15072_v48, %v26761_v57  ;;  %v26905_v1 = vld [vmem:[#allocation51_spill] sm:$0xff]  ;;  %v26927_v48 = vld [vmem:[#allocation32_spill] sm:$0xff] }
 0xa8c   : > { %17351 = vmatprep.subr.msk.bf16.mxu0 %vm17350_vm11, %v26563_v35  ;;  %vm8245_vm11 = vcmp.eq.s32.totalorder %v23149_v55, %v24571_v44  ;;  %vm17360_vm13 = vmpackc.low %vm8241_vm0, %vm8238_vm1 }
 0xa8d   : > { %vm17362_vm6 = vmpackc.low %vm8248_vm12, %vm8245_vm11  ;;  %vm26899_vm11 = vnez %v26898_v29  ;;  %vm26901_vm12 = vnez %v26900_v13  ;;  %v25086_v29 = vld [vmem:[%s26219_s11] sm:$0x3f] }
 0xa8e   : > { %vm26897_vm1 = vmmov %vm26896_vm7  ;;  %v26928_v13 = vld [vmem:[#allocation36_spill] sm:$0xff] }
 0xa8f   : > { %17353 = vmatpush1.bf16.msk.msra.mxu0 %vm17352_vm15, %v26563_v35  ;;  %vm8244_vm15 = vcmp.eq.s32.totalorder %v22094_v45, %v24571_v44  ;;  %v26910_v44 = vld [vmem:[#allocation46_spill] sm:$0xff] }
 0xa90   : > { %17355 = vmatprep.subr.msk.bf16.mxu0 %vm17354_vm3, %v26563_v35  ;;  %vm8247_vm3 = vcmp.eq.s32.totalorder %v22094_v45, %v24574_v23  ;;  %vm26911_vm4 = vnez %v26910_v44  ;;  %v26918_v23 = vld [vmem:[#allocation99_spill] sm:$0xff]  ;;  %v26930_v44 = vld [vmem:[#allocation52_spill] sm:$0xff] }
 0xa91   : > { %vm17364_vm5 = vmpackc.low %vm8247_vm3, %vm8244_vm15 }
 0xa92   : > { %vm26907_vm15 = vmmov %vm26902_vm2 }
 0xa93   : > { %17357 = vmatpush1.bf16.msk.msra.mxu0 %vm17356_vm14, %v26563_v35  ;;  %vm17367_vm14 = vmpackc.low %vm26896_vm7, %vm8251_vm8 }
 0xa94   : > { %17359 = vmatprep.subr.msk.bf16.mxu0 %vm17358_vm9, %v26563_v35  ;;  %vm8250_vm9 = vcmp.eq.s32.totalorder %v22094_v45, %v24596_v41 }
 0xa95   : > { %vm17370_vm0 = vmpackc.low %vm26897_vm1, %vm8250_vm9  ;;  %vm8539_vm1 = vcmp.eq.s32.totalorder %v22094_v45, %v24690_v42 }
 0xa97   : > { %17361 = vmatpush1.bf16.msk.msra.mxu0 %vm17360_vm13, %v26563_v35  ;;  %vm26904_vm13 = vnez %v26903_v40  ;;  %v9456_v40 = vadd.s32 1, %v26928_v13 }
 0xa98   : > { %17363 = vmatprep.subr.msk.bf16.mxu0 %vm17362_vm6, %v26563_v35  ;;  %vm26906_vm6 = vnez %v26905_v1  ;;  %v26929_v1 = vld [vmem:[#allocation34_spill] sm:$0xff] }
 0xa9b   : > { %17365 = vmatpush1.bf16.msk.msra.mxu0 %vm17364_vm5, %v26563_v35  ;;  %vm8540_vm5 = vcmp.eq.s32.totalorder %v23149_v55, %v24690_v42 }
 0xa9c   : > { %17368 = vmatprep.subr.msk.bf16.mxu0 %vm17367_vm14, %v17366_v22  ;;  %vm26917_vm14 = vcmp.eq.s32.totalorder %v23149_v55, %v26854_v8 }
 0xa9d   : > { %vm17426_vm9 = vmpackc.low %vm8540_vm5, %vm26917_vm14  ;;  %vm8551_vm14 = vcmp.eq.s32.totalorder %v22094_v45, %v24731_v47 }
 0xa9f   : > { %17371 = vmatpush1.bf16.msk.msra.mxu0 %vm17370_vm0, %v17369_v33  ;;  %vm8543_vm0 = vcmp.eq.s32.totalorder %v23149_v55, %v24708_v46  ;;  %v9455_v33 = vadd.s32 1, %v26927_v48 }
 0xaa0   : > { %17407 = vmatprep.subr.msk.bf16.mxu0 %vm26899_vm11, %v26563_v35  ;;  %vm8546_vm11 = vcmp.eq.s32.totalorder %v23149_v55, %v24711_v30 }
 0xaa2   : > { %8424 = vmatmul.mubr.f32.vlgmr.msra.gmra.mrb[180].mxu0 %v24355_v58  ;;  %v26908_v58 = vld [vmem:[#allocation92_spill] sm:$0xff] }
 0xaa3   : > { %17409 = vmatpush1.bf16.msk.msra.mxu0 %vm26901_vm12, %v26563_v35  ;;  %15120 = vmatprep.mubr.msk.f32.mxu0 %vm26902_vm2, %v24379_v14  ;;  %vm26909_vm3 = vnez %v26908_v58  ;;  %v26912_v14 = vld [vmem:[#allocation95_spill] sm:$0xff]  ;;  %vm26920_vm12 = vcmp.eq.s32.totalorder %v22094_v45, %v26854_v8  ;;  %v9457_v58 = vadd.s32 1, %v26929_v1 }
 0xaa4   : > { %17411 = vmatprep.subr.msk.bf16.mxu0 %vm26904_vm13, %v26563_v35  ;;  %vm26913_vm8 = vnez %v26912_v14  ;;  %vm17428_vm2 = vmpackc.low %vm8539_vm1, %vm26920_vm12  ;;  %vm8558_vm1 = vcmp.eq.s32.totalorder %v23149_v55, %v24756_v6  ;;  %vm8557_vm12 = vcmp.eq.s32.totalorder %v22094_v45, %v24756_v6  ;;  %v9458_v14 = vadd.s32 1, %v26930_v44 }
 0xaa5   : > { %vm17430_vm13 = vmpackc.low %vm8546_vm11, %vm8543_vm0 }
 0xaa6   : > { %8430 = vmatmul.mubr.f32.gmra.mrb[182].mxu0 %v24371_v3  ;;  %v26931_v3 = vld [vmem:[#allocation53_spill] sm:$0xff] }
 0xaa7   : > { %17413 = vmatpush1.bf16.msk.msra.mxu0 %vm26906_vm6, %v26563_v35  ;;  %15233 = vmatprep.mubr.msk.f32.mxu0 %vm26907_vm15, %v24395_v39  ;;  %v26915_v39 = vld [vmem:[#allocation98_spill] sm:$0xff]  ;;  %vm8542_vm6 = vcmp.eq.s32.totalorder %v22094_v45, %v24708_v46  ;;  %vm8545_vm15 = vcmp.eq.s32.totalorder %v22094_v45, %v24711_v30 }
 0xaa8   : > { %17415 = vmatprep.subr.msk.bf16.mxu0 %vm26909_vm3, %v26563_v35  ;;  %vm26916_vm7 = vnez %v26915_v39  ;;  %vm8549_vm3 = vcmp.eq.s32.totalorder %v23149_v55, %v24728_v5  ;;  %v9459_v39 = vadd.s32 1, %v26931_v3 }
 0xaab   : > { %17417 = vmatpush1.bf16.msk.msra.mxu0 %vm26911_vm4, %v26563_v35  ;;  %vm8552_vm4 = vcmp.eq.s32.totalorder %v23149_v55, %v24731_v47 }
 0xaac   : > { %17419 = vmatprep.subr.msk.bf16.mxu0 %vm26913_vm8, %v26563_v35  ;;  %vm17432_vm8 = vmpackc.low %vm8545_vm15, %vm8542_vm6  ;;  %vm8570_vm6 = vcmp.eq.s32.totalorder %v23149_v55, %v24786_v59 }
 0xaad   : > { %vm17434_vm5 = vmpackc.low %vm8552_vm4, %vm8549_vm3  ;;  %vm8560_vm4 = vcmp.eq.s32.totalorder %v22094_v45, %v24780_v21  ;;  %v15187_v54 = vsel %vm8570_vm6, 1.0, %v26561_v61  ;;  %vm9498_vm6 = vcmp.eq.s32.totalorder %v22094_v45, %v9453_v53 }
 0xaae   : > { %v17446_v42 = vpack.c.bf16 %v15187_v54, %v26761_v57 }
 0xaaf   : > { %17421 = vmatpush1.bf16.msk.msra.mxu0 %vm23852_vm10, %v26563_v35  ;;  %vm26919_vm10 = vnez %v26918_v23  ;;  %v26932_v23 = vld [vmem:[#allocation56_spill] sm:$0xff] }
 0xab0   : > { %17423 = vmatprep.subr.msk.bf16.mxu0 %vm26916_vm7, %v26563_v35  ;;  %vm8548_vm7 = vcmp.eq.s32.totalorder %v22094_v45, %v24728_v5 }
 0xab1   : > { %vm17436_vm0 = vmpackc.low %vm8551_vm14, %vm8548_vm7  ;;  %vm8567_vm7 = vcmp.eq.s32.totalorder %v23149_v55, %v24805_v31 }
 0xab3   : > { %17425 = vmatpush1.bf16.msk.msra.mxu0 %vm26919_vm10, %v26563_v35  ;;  %vm8554_vm10 = vcmp.eq.s32.totalorder %v22094_v45, %v24746_v9 }
 0xab4   : > { %17427 = vmatprep.subr.msk.bf16.mxu0 %vm17426_vm9, %v26563_v35  ;;  %vm8555_vm9 = vcmp.eq.s32.totalorder %v23149_v55, %v24746_v9  ;;  %vm17440_vm15 = vmpackc.low %vm8557_vm12, %vm8554_vm10  ;;  %vm26923_vm12 = vcmask 334848  }
 0xab5   : > { %vm17438_vm11 = vmpackc.low %vm8558_vm1, %vm8555_vm9  ;;  %vm26921_vm9 = vcmask 1040384  }
 0xab6   : > { %vm17447_vm1 = vmpackc.low %vm26921_vm9, %vm8567_vm7  ;;  %vm9507_vm7 = vcmp.eq.s32.totalorder %v22094_v45, %v9456_v40  ;;  %v25164_v40 = vadd.s32 184, %v26924_v11 }
 0xab7   : > { %17429 = vmatpush1.bf16.msk.msra.mxu0 %vm17428_vm2, %v26563_v35  ;;  %vm8561_vm2 = vcmp.eq.s32.totalorder %v23149_v55, %v24780_v21 }
 0xab8   : > { %17431 = vmatprep.subr.msk.bf16.mxu0 %vm17430_vm13, %v26563_v35  ;;  %vm8564_vm13 = vcmp.eq.s32.totalorder %v23149_v55, %v24783_v20 }
 0xab9   : > { %vm17442_vm3 = vmpackc.low %vm8564_vm13, %vm8561_vm2  ;;  %vm18224_vm2 = vmmov 0   ;;  %vm9495_vm13 = vcmp.eq.s32.totalorder %v22094_v45, %v9452_v28 }
 0xaba   : > { %16624 = vmatprep.mubr.msk.f32.mxu1 %vm18224_vm2, %v26561_v61 }
 0xabb   : > { %17433 = vmatpush1.bf16.msk.msra.mxu0 %vm17432_vm8, %v26563_v35  ;;  %vm8563_vm8 = vcmp.eq.s32.totalorder %v22094_v45, %v24783_v20 }
 0xabc   : > { %17435 = vmatprep.subr.msk.bf16.mxu0 %vm17434_vm5, %v26563_v35  ;;  %vm8569_vm5 = vcmp.eq.s32.totalorder %v22094_v45, %v24786_v59  ;;  %vm17444_vm14 = vmpackc.low %vm8563_vm8, %vm8560_vm4  ;;  %vm9501_vm4 = vcmp.eq.s32.totalorder %v22094_v45, %v9454_v12  ;;  %vm9504_vm8 = vcmp.eq.s32.totalorder %v22094_v45, %v9455_v33  ;;  %v26945_v12 = vld [vmem:[#allocation114_spill] sm:$0xff]  ;;  %v25161_v33 = vadd.s32 176, %v26924_v11 }
 0xabd   : > { %v7887_v19 = vpop.f32.mrb[92].mxu1  ;;  %v15186_v56 = vsel %vm8569_vm5, 1.0, %v26561_v61  ;;  %vm17497_vm5 = vmpackc.low %vm9504_vm8, %vm9501_vm4 }
 0xabe   : > { %v7889_v41 = vpop.f32.mrb[93].mxu1  ;;  %v17449_v36 = vpack.c.bf16 %v15186_v56, %v26761_v57 }
 0xabf   : > { %17437 = vmatpush1.bf16.msk.msra.mxu0 %vm17436_vm0, %v26563_v35  ;;  %vm8566_vm0 = vcmp.eq.s32.totalorder %v22094_v45, %v24805_v31  ;;  %v26933_v41 = vld [vmem:[#allocation57_spill] sm:$0xff] }
 0xac0   : > { %17439 = vmatprep.subr.msk.bf16.mxu0 %vm17438_vm11, %v26563_v35  ;;  %vm26922_vm11 = vmmov %vm26921_vm9  ;;  %v9461_v54 = vadd.s32 1, %v26933_v41 }
 0xac1   : > { %v7892_v43 = vpop.f32.mrb[94].mxu1  ;;  %vm17450_vm10 = vmpackc.low %vm26922_vm11, %vm8566_vm0  ;;  %vm9516_vm0 = vcmp.eq.s32.totalorder %v22094_v45, %v9459_v39  ;;  %v25178_v39 = vadd.s32 192, %v26924_v11 }
 0xac2   : > { %v7894_v52 = vpop.f32.mrb[95].mxu1 }
 0xac3   : > { %17441 = vmatpush1.bf16.msk.msra.mxu0 %vm17440_vm15, %v26563_v35  ;;  %vm8856_vm15 = vcmask 130048  }
 0xac4   : > { %17443 = vmatprep.subr.msk.bf16.mxu0 %vm17442_vm3, %v26563_v35  ;;  %vm17494_vm3 = vmpackc.low %vm9498_vm6, %vm9495_vm13 }
 0xac7   : > { %17445 = vmatpush1.bf16.msk.msra.mxu0 %vm17444_vm14, %v26563_v35  ;;  %vm9510_vm14 = vcmp.eq.s32.totalorder %v22094_v45, %v9457_v58  ;;  %v9474_v58 = vadd.s32 1, %v25161_v33 }
 0xac8   : > { %17448 = vmatprep.subr.msk.bf16.mxu0 %vm17447_vm1, %v17446_v42  ;;  %vm17500_vm9 = vmpackc.low %vm9510_vm14, %vm9507_vm7  ;;  %vm9513_vm1 = vcmp.eq.s32.totalorder %v22094_v45, %v9458_v14  ;;  %v26935_v42 = vld [vmem:[#allocation100_spill] sm:$0xff]  ;;  %v9475_v14 = vadd.s32 1, %v25164_v40 }
 0xac9   : > { %vm17503_vm11 = vmpackc.low %vm9516_vm0, %vm9513_vm1  ;;  %v9463_v56 = vadd.s32 1, %v26935_v42 }
 0xacb   : > { %17451 = vmatpush1.bf16.msk.msra.mxu0 %vm17450_vm10, %v17449_v36  ;;  %v26936_v36 = vld [vmem:[#allocation101_spill] sm:$0xff] }
 0xace   : > { %8740 = vmatmul.mubr.f32.vlgmr.msra.gmra.mrb[180].mxu0 %v24387_v16 }
 0xacf   : > { %15234 = vmatprep.mubr.msk.f32.mxu0 %vm26923_vm12, %v24414_v4  ;;  %vm9522_vm12 = vcmp.eq.s32.totalorder %v22094_v45, %v9461_v54 }
 0xad2   : > { %8746 = vmatmul.mubr.f32.gmra.mrb[182].mxu0 %v24405_v62 }
 0xad3   : > { %8924 = vmatprep.mubr.f32.mxu0 %v26561_v61 }
 0xae9   : > { %v8186_v8 = vpop.f32.mrb[96].mxu1 }
 0xaea   : > { %v8188_v46 = vpop.f32.mrb[97].mxu1 }
 0xaeb   : > { %v26937_v46 = vld [vmem:[#allocation102_spill] sm:$0xff] }
 0xaed   : > { %v8191_v30 = vpop.f32.mrb[98].mxu1 }
 0xaee   : > { %v8193_v24 = vpop.f32.mrb[99].mxu1 }
 0xaef   : > { %v26938_v24 = vld [vmem:[#allocation104_spill] sm:$0xff] }
 0xaf1   : > { %v7720_v27 = vpop.f32.mrb[184].mxu0 }
 0xaf2   : > { %v7888_v5 = vadd.f32 %v7887_v19, %v7720_v27  ;;  %v7722_v47 = vpop.f32.mrb[185].mxu0  ;;  %v9460_v19 = vadd.s32 1, %v26932_v23  ;;  %v9467_v27 = vadd.s32 1, %v26938_v24 }
 0xaf4   : > { %v8197_v17 = vadd.f32 %v8186_v8, %v7888_v5  ;;  %vm9519_vm10 = vcmp.eq.s32.totalorder %v22094_v45, %v9460_v19  ;;  %v9464_v8 = vadd.s32 1, %v26936_v36  ;;  %v26939_v5 = vld [vmem:[#allocation103_spill] sm:$0xff]  ;;  %vm9541_vm7 = vcmp.eq.s32.totalorder %v23149_v55, %v9467_v27 }
 0xaf5   : > { %v7725_v16 = vpop.f32.mrb[186].mxu0  ;;  %vm17506_vm13 = vmpackc.low %vm9522_vm12, %vm9519_vm10  ;;  %v9466_v47 = vadd.s32 1, %v26939_v5  ;;  %v9476_v19 = vadd.s32 1, %v25178_v39 }
 0xaf6   : > { %v7893_v49 = vadd.f32 %v7892_v43, %v7725_v16  ;;  %v7727_v9 = vpop.f32.mrb[187].mxu0  ;;  %v26934_v43 = vld [vmem:[#allocation60_spill] sm:$0xff]  ;;  %vm9531_vm8 = vcmp.eq.s32.totalorder %v22094_v45, %v9464_v8 }
 0xaf7   : > { %v9462_v52 = vadd.s32 1, %v26934_v43  ;;  %vm9537_vm0 = vcmp.eq.s32.totalorder %v22094_v45, %v9466_v47  ;;  %v25205_v47 = vadd.s32 232, %v26924_v11 }
 0xaf8   : > { %v8200_v4 = vadd.f32 %v8191_v30, %v7893_v49  ;;  %v9465_v30 = vadd.s32 1, %v26937_v46 }
 0xaf9   : > { %vm9525_vm6 = vcmp.eq.s32.totalorder %v22094_v45, %v9462_v52  ;;  %v25190_v52 = vadd.s32 208, %v26924_v11 }
 0xafb   : > { %v9478_v8 = vadd.s32 1, %v25190_v52 }
 0xb15   : > { %v8502_v6 = vpop.f32.mrb[100].mxu1 }
 0xb16   : > { %v8513_v25 = vadd.f32 %v8502_v6, %v8197_v17  ;;  %v8504_v21 = vpop.f32.mrb[101].mxu1  ;;  %v25130_v17 = vpack.c.bf16 %v26761_v57, %v26561_v61 }
 0xb19   : > { %v8507_v20 = vpop.f32.mrb[102].mxu1 }
 0xb1a   : > { %v8516_v59 = vadd.f32 %v8507_v20, %v8200_v4  ;;  %v8509_v62 = vpop.f32.mrb[103].mxu1  ;;  %v26940_v4 = vld [vmem:[#allocation107_spill] sm:$0xff] }
 0xb1b   : > { %v9468_v6 = vadd.s32 1, %v26940_v4 }
 0xb1d   : > { %vm9544_vm12 = vcmp.eq.s32.totalorder %v23149_v55, %v9468_v6  ;;  %v25219_v6 = vadd.s32 248, %v26924_v11 }
 0xb41   : > { %v8818_v31 = vpop.f32.mrb[104].mxu1 }
 0xb42   : > { %v8829_v15 = vadd.f32 %v8818_v31, %v8513_v25  ;;  %v8820_v2 = vpop.f32.mrb[105].mxu1  ;;  %v26941_v25 = vld [vmem:[#allocation109_spill] sm:$0xff] }
 0xb43   : > { %v9469_v21 = vadd.s32 1, %v26941_v25 }
 0xb44   : > { %v8845_v26 = vadd.f32 %v25071_v50, %v8829_v15 }
 0xb45   : > { %v8823_v7 = vpop.f32.mrb[106].mxu1 }
 0xb46   : > { %v8832_v34 = vadd.f32 %v8823_v7, %v8516_v59  ;;  %v8825_v32 = vpop.f32.mrb[107].mxu1  ;;  %v8851_v18 = vmax.f32 %v8845_v26, 0.0  ;;  %v26942_v26 = vld [vmem:[#allocation110_spill] sm:$0xff] }
 0xb47   : > { %v26943_v32 = vld [vmem:[#allocation113_spill] sm:$0xff] }
 0xb48   : > { %v8848_v63 = vadd.f32 %v25074_v37, %v8832_v34  ;;  %v9470_v34 = vadd.s32 1, %v26942_v26 }
 0xb4a   : > { %v8854_v0 = vmax.f32 %v8848_v63, 0.0  ;;  %v9471_v63 = vadd.s32 1, %v26943_v32 }
 0xb4c   : > { %v17491_v22 = vpack.c.bf16 %v8854_v0, %v8851_v18 }
 0xb4e   : > { %17492 = vmatpush3.bf16.msra.mxu1 %v17491_v22  ;;  %v9473_v22 = vadd.s32 1, %v26945_v12 }
 0xb4f   : > { %17493 = vmatprep.subr.bf16.mxu1 %v26735_v10 }
 0xb51   : > { %16625 = vmatmul.mubr.msk.f32.vlgmr.msra.gmra.mrb[108].mxu1 %vm8856_vm15, %v25086_v29 }
 0xb52   : > { %17495 = vmatpush1.bf16.msk.msra.mxu1 %vm17494_vm3, %v26563_v35  ;;  %vm9528_vm3 = vcmp.eq.s32.totalorder %v22094_v45, %v9463_v56  ;;  %v25193_v56 = vadd.s32 216, %v26924_v11 }
 0xb53   : > { %17496 = vmatprep.subr.bf16.mxu1 %v26735_v10  ;;  %vm17509_vm4 = vmpackc.low %vm9528_vm3, %vm9525_vm6  ;;  %vm9550_vm3 = vcmp.eq.s32.totalorder %v23149_v55, %v9470_v34 }
 0xb56   : > { %17498 = vmatpush1.bf16.msk.msra.mxu1 %vm17497_vm5, %v26563_v35  ;;  %vm9534_vm5 = vcmp.eq.s32.totalorder %v22094_v45, %v9465_v30  ;;  %v9479_v30 = vadd.s32 1, %v25193_v56 }
 0xb57   : > { %17499 = vmatprep.subr.bf16.mxu1 %v26735_v10  ;;  %vm17512_vm14 = vmpackc.low %vm9534_vm5, %vm9531_vm8 }
 0xb5a   : > { %17501 = vmatpush1.bf16.msk.msra.mxu1 %vm17500_vm9, %v26563_v35  ;;  %vm18225_vm9 = vmmov 1  }
 0xb5b   : > { %17502 = vmatprep.subr.bf16.mxu1 %v26735_v10  ;;  %vm17515_vm1 = vmpackc.low %vm9541_vm7, %vm18225_vm9  ;;  %vm9559_vm7 = vcmp.eq.s32.totalorder %v23149_v55, %v9473_v22  ;;  %v25273_v22 = vadd.s32 296, %v26924_v11 }
 0xb5e   : > { %17504 = vmatpush1.bf16.msk.msra.mxu1 %vm17503_vm11, %v26563_v35  ;;  %vm9540_vm11 = vcmp.eq.s32.totalorder %v22094_v45, %v9467_v27  ;;  %v25202_v27 = vadd.s32 224, %v26924_v11 }
 0xb5f   : > { %17505 = vmatprep.subr.bf16.mxu1 %v26735_v10  ;;  %vm17517_vm10 = vmpackc.low %vm9540_vm11, %vm9537_vm0  ;;  %vm9565_vm0 = vcmp.eq.s32.totalorder %v23149_v55, %v9475_v14  ;;  %vm9568_vm11 = vcmp.eq.s32.totalorder %v23149_v55, %v9476_v19  ;;  %v9025_v14 = vadd.s32 2, %v26927_v48 }
 0xb62   : > { %17507 = vmatpush1.bf16.msk.msra.mxu1 %vm17506_vm13, %v26563_v35  ;;  %vm9547_vm13 = vcmp.eq.s32.totalorder %v23149_v55, %v9469_v21 }
 0xb63   : > { %17508 = vmatprep.subr.bf16.mxu1 %v26735_v10  ;;  %vm17519_vm6 = vmpackc.low %vm9547_vm13, %vm9544_vm12  ;;  %vm9574_vm13 = vcmp.eq.s32.totalorder %v23149_v55, %v9478_v8 }
 0xb66   : > { %17510 = vmatpush1.bf16.msk.msra.mxu1 %vm17509_vm4, %v26563_v35  ;;  %vm9553_vm4 = vcmp.eq.s32.totalorder %v23149_v55, %v9471_v63  ;;  %v25261_v63 = vadd.s32 272, %v26924_v11 }
 0xb67   : > { %17511 = vmatprep.subr.bf16.mxu1 %v26735_v10  ;;  %vm17522_vm8 = vmpackc.low %vm9553_vm4, %vm9550_vm3 }
 0xb6a   : > { %17513 = vmatpush1.bf16.msk.msra.mxu1 %vm17512_vm14, %v26563_v35 }
 0xb6b   : > { %17516 = vmatprep.subr.msk.bf16.mxu1 %vm17515_vm1, %v25130_v17  ;;  %vm9562_vm1 = vcmp.eq.s32.totalorder %v23149_v55, %v9474_v58  ;;  %v9486_v58 = vadd.s32 1, %v25261_v63 }
 0xb6e   : > { %17518 = vmatpush1.bf16.msk.msra.mxu1 %vm17517_vm10, %v26563_v35 }
 0xb6f   : > { %17520 = vmatprep.subr.msk.bf16.mxu1 %vm17519_vm6, %v26563_v35  ;;  %vm9577_vm6 = vcmp.eq.s32.totalorder %v23149_v55, %v9479_v30 }
 0xb70   : > { %vm17534_vm3 = vmpackc.low %vm9577_vm6, %vm9574_vm13 }
 0xb72   : > { %17521 = vmatpush1.bf16.msra.mxu1 %v26735_v10 }
 0xb73   : > { %17523 = vmatprep.subr.msk.bf16.mxu1 %vm17522_vm8, %v26563_v35 }
 0xb76   : > { %17524 = vmatpush1.bf16.msra.mxu1 %v26735_v10 }
 0xba1   : > { %v8741_v16 = vpop.f32.mrb[180].mxu0 }
 0xba2   : > { %v8743_v49 = vpop.f32.mrb[181].mxu0  ;;  %v8843_v9 = vadd.f32 %v25071_v50, %v8741_v16  ;;  %v9480_v16 = vadd.s32 1, %v25202_v27 }
 0xba3   : > { %v8844_v20 = vadd.f32 %v25071_v50, %v8743_v49  ;;  %v9481_v49 = vadd.s32 1, %v25205_v47 }
 0xba4   : > { %v8849_v2 = vmax.f32 %v8843_v9, 0.0  ;;  %vm9580_vm4 = vcmp.eq.s32.totalorder %v23149_v55, %v9480_v16  ;;  %v25216_v9 = vadd.s32 240, %v26924_v11  ;;  %v25329_v16 = vadd.s32 328, %v26924_v11 }
 0xba5   : > { %v8747_v59 = vpop.f32.mrb[182].mxu0  ;;  %v8850_v50 = vmax.f32 %v8844_v20, 0.0  ;;  %vm9583_vm8 = vcmp.eq.s32.totalorder %v23149_v55, %v9481_v49  ;;  %v9483_v20 = vadd.s32 1, %v25219_v6 }
 0xba6   : > { %v8846_v62 = vadd.f32 %v25074_v37, %v8747_v59  ;;  %v8749_v31 = vpop.f32.mrb[183].mxu0  ;;  %v9482_v21 = vadd.s32 1, %v25216_v9 }
 0xba7   : > { %v8847_v15 = vadd.f32 %v25074_v37, %v8749_v31  ;;  %v26944_v37 = vld [vmem:[#allocation117_spill] sm:$0xff] }
 0xba8   : > { %v8852_v7 = vmax.f32 %v8846_v62, 0.0  ;;  %v9472_v0 = vadd.s32 1, %v26944_v37 }
 0xba9   : > { %v8853_v28 = vmax.f32 %v8847_v15, 0.0  ;;  %v25253_v15 = vadd.s32 256, %v26924_v11 }
 0xbaa   : > { %v17488_v53 = vpack.c.bf16 %v8852_v7, %v8849_v2  ;;  %vm9556_vm5 = vcmp.eq.s32.totalorder %v23149_v55, %v9472_v0  ;;  %v25256_v2 = vadd.s32 264, %v26924_v11  ;;  %v25270_v0 = vadd.s32 288, %v26924_v11 }
 0xbab   : > { %v17486_v18 = vpack.c.bf16 %v8853_v28, %v8850_v50  ;;  %vm17525_vm14 = vmpackc.low %vm9559_vm7, %vm9556_vm5  ;;  %vm9586_vm7 = vcmp.eq.s32.totalorder %v23149_v55, %v9482_v21  ;;  %26946 = vst [vmem:[#allocation19_spill] sm:$0xff] %v25253_v15  ;;  %v9484_v7 = vadd.s32 1, %v25253_v15  ;;  %v9022_v50 = vadd.s32 2, %v26924_v11 }
 0xbac   : > { %17526 = vmatprep.subr.msk.bf16.mxu1 %vm17525_vm14, %v26563_v35  ;;  %vm17537_vm5 = vmpackc.low %vm9583_vm8, %vm9580_vm4  ;;  %vm9589_vm14 = vcmp.eq.s32.totalorder %v23149_v55, %v9483_v20  ;;  %26947 = vst [vmem:[#allocation20_spill] sm:$0xff] %v25256_v2  ;;  %v9485_v34 = vadd.s32 1, %v25256_v2  ;;  %v9023_v28 = vadd.s32 2, %v26925_v60  ;;  %v9488_v49 = vadd.s32 1, %v25270_v0 }
 0xbad   : > { %17487 = vmatprep.subr.bf16.mxu0 %v17486_v18  ;;  %17527 = vmatpush1.bf16.msra.mxu1 %v26735_v10  ;;  %v9024_v18 = vadd.s32 2, %v26926_v51  ;;  %vm9065_vm13 = vcmp.eq.s32.totalorder %v22094_v45, %v9022_v50  ;;  %v9489_v21 = vadd.s32 1, %v25273_v22  ;;  %v25304_v50 = vadd.s32 312, %v26924_v11 }
 0xbae   : > { %17489 = vmatpush1.bf16.msra.mxu0 %v17488_v53  ;;  %v25266_v53 = vadd.s32 280, %v26924_v11  ;;  %vm9068_vm6 = vcmp.eq.s32.totalorder %v22094_v45, %v9023_v28  ;;  %v9032_v28 = vadd.s32 2, %v26934_v43 }
 0xbaf   : > { %16627 = vmatprep.subr.mxu0 %v26561_v61  ;;  %vm9071_vm4 = vcmp.eq.s32.totalorder %v22094_v45, %v9024_v18  ;;  %vm17577_vm8 = vmpackc.low %vm9068_vm6, %vm9065_vm13  ;;  %v9029_v18 = vadd.s32 2, %v26931_v3 }
 0xbb1   : > { %15259 = vmatmul.mubr.msk.f32.vlgmr.msra.gmra.mrb[188].mxu0 %vm8856_vm15, %v25086_v29  ;;  %v25181_v29 = vadd.s32 200, %v26924_v11  ;;  %vm17528_vm15 = vmpackc.low %vm9565_vm0, %vm9562_vm1  ;;  %vm26465_vm0 = vcmask 662528  }
 0xbb2   : > { %16628 = vmatpush3.msra.mxu0 %v26561_v61  ;;  %16629 = vmatprep.mubr.msk.f32.mxu0 %vm18224_vm2, %v26561_v61  ;;  %vm17540_vm1 = vmpackc.low %vm9589_vm14, %vm9586_vm7  ;;  %vm9074_vm7 = vcmp.eq.s32.totalorder %v22094_v45, %v9025_v14  ;;  %v9028_v14 = vadd.s32 2, %v26930_v44 }
 0xbb3   : > { %17543 = vmatprep.subr.bf16.mxu0 %v26735_v10  ;;  %17529 = vmatprep.subr.msk.bf16.mxu1 %vm17528_vm15, %v26563_v35  ;;  %v9477_v54 = vadd.s32 1, %v25181_v29  ;;  %vm9590_vm15 = vcmp.eq.s32.totalorder %v23907_v38, %v9483_v20 }
 0xbb4   : > { %17530 = vmatpush1.bf16.msra.mxu1 %v26735_v10 }
 0xbb5   : > { %vm9571_vm10 = vcmp.eq.s32.totalorder %v23149_v55, %v9477_v54  ;;  %v9487_v54 = vadd.s32 1, %v25266_v53 }
 0xbb6   : > { %vm17531_vm12 = vmpackc.low %vm9571_vm10, %vm9568_vm11  ;;  %vm9593_vm10 = vcmp.eq.s32.totalorder %v23907_v38, %v9484_v7  ;;  %v9026_v7 = vadd.s32 2, %v26928_v13 }
 0xbb7   : > { %17532 = vmatprep.subr.msk.bf16.mxu1 %vm17531_vm12, %v26563_v35  ;;  %vm17558_vm11 = vmpackc.low %vm9590_vm15, %vm18225_vm9  ;;  %vm9596_vm12 = vcmp.eq.s32.totalorder %v23907_v38, %v9485_v34  ;;  %vm9602_vm14 = vcmp.eq.s32.totalorder %v23907_v38, %v9487_v54  ;;  %v9027_v34 = vadd.s32 2, %v26929_v1  ;;  %vm9605_vm15 = vcmp.eq.s32.totalorder %v23907_v38, %v9488_v49 }
 0xbb8   : > { %17533 = vmatpush1.bf16.msra.mxu1 %v26735_v10  ;;  %v9030_v49 = vadd.s32 2, %v26932_v23 }
 0xbb9   : > { %17535 = vmatprep.subr.msk.bf16.mxu1 %vm17534_vm3, %v26563_v35  ;;  %vm25287_vm3 = vmpackc.low %vm9596_vm12, %vm9593_vm10  ;;  %vm9077_vm12 = vcmp.eq.s32.totalorder %v22094_v45, %v9026_v7  ;;  %vm9080_vm13 = vcmp.eq.s32.totalorder %v22094_v45, %v9027_v34  ;;  %v9493_v7 = vadd.s32 1, %v25329_v16  ;;  %v25356_v34 = vadd.s32 336, %v26924_v11 }
 0xbbc   : > { %17536 = vmatpush1.bf16.msra.mxu1 %v26735_v10 }
 0xbbd   : > { %17538 = vmatprep.subr.msk.bf16.mxu1 %vm17537_vm5, %v26563_v35  ;;  %vm9599_vm5 = vcmp.eq.s32.totalorder %v23907_v38, %v9486_v58 }
 0xbbe   : > { %vm17565_vm10 = vmpackc.low %vm9602_vm14, %vm9599_vm5  ;;  %vm9086_vm5 = vcmp.eq.s32.totalorder %v22094_v45, %v9029_v18  ;;  %v9034_v18 = vadd.s32 2, %v26936_v36 }
 0xbc0   : > { %17539 = vmatpush1.bf16.msra.mxu1 %v26735_v10 }
 0xbc1   : > { %17541 = vmatprep.subr.msk.bf16.mxu1 %vm17540_vm1, %v26563_v35  ;;  %vm25312_vm1 = vmpackc.low %vm9074_vm7, %vm9071_vm4 }
 0xbc2   : > { %vm17583_vm4 = vmpackc.low %vm9080_vm13, %vm9077_vm12 }
 0xbc4   : > { %17542 = vmatpush1.bf16.msra.mxu1 %v26735_v10 }
 0xbc5   : > { %17576 = vmatprep.subr.bf16.mxu1 %v26735_v10 }
 0xc24   : > { %v25228_v59 = vpop.f32.mrb[108].mxu1 }
 0xc25   : > { %v9887_v62 = vrot.slane %v25228_v59, 1  ;;  %v16626_v31 = vpop.f32.mrb[109].mxu1 }
 0xc26   : > { %v25298_v31 = vadd.s32 304, %v26924_v11 }
 0xc27   : > { %16630 = vmatmul.mubr.msk.f32.vlgmr.msra.gmra.mrb[190].mxu0 %vm26465_vm0, %v9887_v62 }
 0xc28   : > { %17544 = vmatpush3.bf16.msra.mxu0 %v26735_v10  ;;  %v9490_v54 = vadd.s32 1, %v25298_v31 }
 0xc29   : > { %17545 = vmatprep.subr.bf16.mxu0 %v26735_v10 }
 0xc2c   : > { %17546 = vmatpush3.bf16.msra.mxu0 %v26735_v10 }
 0xc2d   : > { %17547 = vmatprep.subr.bf16.mxu0 %v26735_v10 }
 0xc30   : > { %17548 = vmatpush3.bf16.msra.mxu0 %v26735_v10 }
 0xc31   : > { %17549 = vmatprep.subr.bf16.mxu0 %v26735_v10 }
 0xc34   : > { %17550 = vmatpush3.bf16.msra.mxu0 %v26735_v10 }
 0xc35   : > { %17551 = vmatprep.subr.bf16.mxu0 %v26735_v10 }
 0xc38   : > { %17552 = vmatpush3.bf16.msra.mxu0 %v26735_v10 }
 0xc39   : > { %17553 = vmatprep.subr.bf16.mxu0 %v26735_v10 }
 0xc3c   : > { %17554 = vmatpush3.bf16.msra.mxu0 %v26735_v10 }
 0xc3d   : > { %17555 = vmatprep.subr.bf16.mxu0 %v26735_v10 }
 0xc40   : > { %17556 = vmatpush3.bf16.msra.mxu0 %v26735_v10 }
 0xc41   : > { %17559 = vmatprep.subr.msk.bf16.mxu0 %vm17558_vm11, %v25130_v17  ;;  %vm9608_vm11 = vcmp.eq.s32.totalorder %v23907_v38, %v9489_v21  ;;  %v9031_v21 = vadd.s32 2, %v26933_v41 }
 0xc42   : > { %vm17568_vm6 = vmpackc.low %vm9608_vm11, %vm9605_vm15  ;;  %vm9620_vm11 = vcmp.eq.s32.totalorder %v23907_v38, %v9493_v7 }
 0xc43   : > { %vm9092_vm12 = vcmp.eq.s32.totalorder %v22094_v45, %v9031_v21  ;;  %v9038_v21 = vadd.s32 2, %v26940_v4 }
 0xc44   : > { %17560 = vmatpush3.bf16.msra.mxu0 %v26735_v10 }
 0xc45   : > { %17561 = vmatprep.subr.bf16.mxu0 %v26735_v10 }
 0xc84   : > { %v25279_v19 = vpop.f32.mrb[188].mxu0 }
 0xc85   : > { %v25284_v8 = vpop.f32.mrb[189].mxu0  ;;  %v9885_v20 = vrot.slane %v25279_v19, 1 }
 0xc86   : > { %v9886_v30 = vrot.slane %v25284_v8, 1 }
 0xc88   : > { %9966 = vmatprep.mubr.f32.mxu1 %v9886_v30  ;;  %10108 = vmatprep.mubr.f32.mxu0 %v9886_v30  ;;  %v25326_v30 = vadd.s32 320, %v26924_v11 }
 0xc89   : > { %9967 = vmatmul.mubr.f32.vlgmr.msra.gmra.mrb[110].mxu1 %v9885_v20  ;;  %10109 = vmatmul.mubr.f32.vlgmr.msra.gmra.mrb[192].mxu0 %v9885_v20  ;;  %v9491_v20 = vadd.s32 1, %v25304_v50 }
 0xc8a   : > { %17563 = vmatpush3.bf16.msk.msra.mxu0 %vm25287_vm3, %v26563_v35  ;;  %17578 = vmatpush1.bf16.msk.msra.mxu1 %vm17577_vm8, %v26563_v35  ;;  %vm9083_vm3 = vcmp.eq.s32.totalorder %v22094_v45, %v9028_v14  ;;  %vm9611_vm8 = vcmp.eq.s32.totalorder %v23907_v38, %v9490_v54  ;;  %v9492_v58 = vadd.s32 1, %v25326_v30  ;;  %v9494_v14 = vadd.s32 1, %v25356_v34 }
 0xc8b   : > { %17564 = vmatprep.subr.bf16.mxu0 %v26735_v10  ;;  %17579 = vmatprep.subr.bf16.mxu1 %v26735_v10  ;;  %vm9614_vm7 = vcmp.eq.s32.totalorder %v23907_v38, %v9491_v20  ;;  %vm17586_vm14 = vmpackc.low %vm9086_vm5, %vm9083_vm3  ;;  %v9033_v54 = vadd.s32 2, %v26935_v42  ;;  %vm9095_vm3 = vcmp.eq.s32.totalorder %v22094_v45, %v9032_v28  ;;  %v9035_v20 = vadd.s32 2, %v26937_v46 }
 0xc8c   : > { %16654 = vmatprep.mubr.msk.f32.mxu0 %vm18224_vm2, %v26561_v61  ;;  %10259 = vmatprep.mubr.f32.mxu1 %v25284_v8  ;;  %vm9617_vm15 = vcmp.eq.s32.totalorder %v23907_v38, %v9492_v58  ;;  %v9037_v58 = vadd.s32 2, %v26938_v24  ;;  %v9039_v28 = vadd.s32 2, %v26941_v25 }
 0xc8d   : > { %vm17574_vm13 = vmpackc.low %vm9620_vm11, %vm9617_vm15  ;;  %vm26952_vm15 = vcmask 1040384  }
 0xc8e   : > { %17566 = vmatpush3.bf16.msk.msra.mxu0 %vm17565_vm10, %v26563_v35  ;;  %17581 = vmatpush1.bf16.msk.msra.mxu1 %vm25312_vm1, %v26563_v35  ;;  %vm17571_vm1 = vmpackc.low %vm9614_vm7, %vm9611_vm8  ;;  %vm9089_vm10 = vcmp.eq.s32.totalorder %v22094_v45, %v9030_v49  ;;  %vm9098_vm8 = vcmp.eq.s32.totalorder %v22094_v45, %v9033_v54  ;;  %vm9101_vm7 = vcmp.eq.s32.totalorder %v22094_v45, %v9034_v18  ;;  %v9036_v49 = vadd.s32 2, %v26939_v5 }
 0xc8f   : > { %17567 = vmatprep.subr.bf16.mxu0 %v26735_v10  ;;  %17582 = vmatprep.subr.bf16.mxu1 %v26735_v10  ;;  %vm17592_vm5 = vmpackc.low %vm9098_vm8, %vm9095_vm3  ;;  %vm9117_vm3 = vcmp.eq.s32.totalorder %v23149_v55, %v9039_v28  ;;  %v9042_v54 = vadd.s32 2, %v26944_v37  ;;  %v9043_v18 = vadd.s32 2, %v26945_v12  ;;  %v9049_v28 = vadd.s32 2, %v25193_v56 }
 0xc92   : > { %17569 = vmatpush3.bf16.msk.msra.mxu0 %vm17568_vm6, %v26563_v35  ;;  %17584 = vmatpush1.bf16.msk.msra.mxu1 %vm17583_vm4, %v26563_v35  ;;  %vm17589_vm6 = vmpackc.low %vm9092_vm12, %vm9089_vm10  ;;  %vm9623_vm4 = vcmp.eq.s32.totalorder %v23907_v38, %v9494_v14  ;;  %vm9107_vm12 = vcmp.eq.s32.totalorder %v22094_v45, %v9036_v49  ;;  %v9041_v14 = vadd.s32 2, %v26943_v32  ;;  %v9047_v49 = vadd.s32 2, %v25181_v29 }
 0xc93   : > { %17570 = vmatprep.subr.bf16.mxu0 %v26735_v10  ;;  %17585 = vmatprep.subr.bf16.mxu1 %v26735_v10  ;;  %v15350_v7 = vsel %vm9623_vm4, 1.0, %v26561_v61 }
 0xc96   : > { %17572 = vmatpush3.bf16.msk.msra.mxu0 %vm17571_vm1, %v26563_v35  ;;  %17587 = vmatpush1.bf16.msk.msra.mxu1 %vm17586_vm14, %v26563_v35  ;;  %vm9104_vm14 = vcmp.eq.s32.totalorder %v22094_v45, %v9035_v20  ;;  %vm9111_vm1 = vcmp.eq.s32.totalorder %v23149_v55, %v9037_v58  ;;  %v9044_v20 = vadd.s32 2, %v25161_v33 }
 0xc97   : > { %17573 = vmatprep.subr.bf16.mxu0 %v26735_v10  ;;  %17588 = vmatprep.subr.bf16.mxu1 %v26735_v10  ;;  %vm17595_vm11 = vmpackc.low %vm9104_vm14, %vm9101_vm7  ;;  %vm9123_vm7 = vcmp.eq.s32.totalorder %v23149_v55, %v9041_v14  ;;  %v9050_v14 = vadd.s32 2, %v25202_v27 }
 0xc98   : > { %vm17598_vm10 = vmpackc.low %vm9111_vm1, %vm18225_vm9  ;;  %vm9126_vm1 = vcmp.eq.s32.totalorder %v23149_v55, %v9042_v54  ;;  %v9051_v54 = vadd.s32 2, %v25205_v47 }
 0xc9a   : > { %17575 = vmatpush3.bf16.msk.msra.mxu0 %vm17574_vm13, %v26563_v35  ;;  %17590 = vmatpush1.bf16.msk.msra.mxu1 %vm17589_vm6, %v26563_v35  ;;  %vm9110_vm13 = vcmp.eq.s32.totalorder %v22094_v45, %v9037_v58  ;;  %vm9114_vm6 = vcmp.eq.s32.totalorder %v23149_v55, %v9038_v21  ;;  %v9045_v58 = vadd.s32 2, %v25164_v40  ;;  %v9048_v21 = vadd.s32 2, %v25190_v52 }
 0xc9b   : > { %16652 = vmatprep.subr.mxu0 %v26561_v61  ;;  %17591 = vmatprep.subr.bf16.mxu1 %v26735_v10  ;;  %vm17600_vm4 = vmpackc.low %vm9110_vm13, %vm9107_vm12 }
 0xc9c   : > { %vm17602_vm8 = vmpackc.low %vm9117_vm3, %vm9114_vm6  ;;  %vm9135_vm12 = vcmp.eq.s32.totalorder %v23149_v55, %v9045_v58  ;;  %vm9141_vm3 = vcmp.eq.s32.totalorder %v23149_v55, %v9047_v49  ;;  %v9055_v58 = vadd.s32 2, %v25256_v2  ;;  %v9057_v49 = vadd.s32 2, %v25266_v53 }
 0xc9e   : > { %16653 = vmatpush3.msk.msra.mxu0 %vm26952_vm15, %v15350_v7  ;;  %17593 = vmatpush1.bf16.msk.msra.mxu1 %vm17592_vm5, %v26563_v35  ;;  %vm9129_vm15 = vcmp.eq.s32.totalorder %v23149_v55, %v9043_v18  ;;  %v9046_v7 = vadd.s32 2, %v25178_v39  ;;  %v9052_v18 = vadd.s32 2, %v25216_v9 }
 0xc9f   : > { %16655 = vmatmul.mubr.msk.f32.vlgmr.msra.gmra.mrb[194].mxu0 %vm26465_vm0, %v9887_v62  ;;  %16657 = vmatprep.subr.mxu0 %v26561_v61  ;;  %v9040_v62 = vadd.s32 2, %v26942_v26 }
 0xca0   : > { %17594 = vmatprep.subr.bf16.mxu1 %v26735_v10  ;;  %16658 = vmatpush3.msra.mxu0 %v26561_v61  ;;  %vm9138_vm6 = vcmp.eq.s32.totalorder %v23149_v55, %v9046_v7  ;;  %v9056_v7 = vadd.s32 2, %v25261_v63 }
 0xca1   : > { %16659 = vmatprep.mubr.msk.f32.mxu0 %vm18224_vm2, %v26561_v61  ;;  %17626 = vmatprep.subr.bf16.mxu0 %v26735_v10  ;;  %vm9120_vm5 = vcmp.eq.s32.totalorder %v23149_v55, %v9040_v62  ;;  %v9053_v62 = vadd.s32 2, %v25219_v6 }
 0xca2   : > { %17596 = vmatpush1.bf16.msk.msra.mxu1 %vm17595_vm11, %v26563_v35  ;;  %vm17605_vm14 = vmpackc.low %vm9123_vm7, %vm9120_vm5  ;;  %vm9147_vm5 = vcmp.eq.s32.totalorder %v23149_v55, %v9049_v28  ;;  %v9060_v28 = vadd.s32 2, %v25298_v31 }
 0xca3   : > { %16660 = vmatmul.mubr.msk.f32.vlgmr.msra.gmra.mrb[196].mxu0 %vm26465_vm0, %v25228_v59  ;;  %17599 = vmatprep.subr.msk.bf16.mxu1 %vm17598_vm10, %v25130_v17  ;;  %vm17608_vm11 = vmpackc.low %vm9129_vm15, %vm9126_vm1  ;;  %vm9132_vm10 = vcmp.eq.s32.totalorder %v23149_v55, %v9044_v20  ;;  %vm9160_vm7 = vcmp.eq.s32.totalorder %v23907_v38, %v9053_v62  ;;  %vm9150_vm1 = vcmp.eq.s32.totalorder %v23149_v55, %v9050_v14  ;;  %v9054_v20 = vadd.s32 2, %v25253_v15 }
 0xca4   : > { %17627 = vmatpush3.bf16.msra.mxu0 %v26735_v10  ;;  %10401 = vmatprep.mubr.f32.mxu0 %v25284_v8  ;;  %vm17611_vm13 = vmpackc.low %vm9135_vm12, %vm9132_vm10  ;;  %vm9153_vm15 = vcmp.eq.s32.totalorder %v23149_v55, %v9051_v54  ;;  %vm9156_vm12 = vcmp.eq.s32.totalorder %v23149_v55, %v9052_v18  ;;  %v9062_v14 = vadd.s32 2, %v25326_v30  ;;  %v9063_v54 = vadd.s32 2, %v25329_v16 }
 0xca5   : > { %17628 = vmatprep.subr.bf16.mxu0 %v26735_v10  ;;  %vm17620_vm10 = vmpackc.low %vm9153_vm15, %vm9150_vm1  ;;  %v10866_v18 = vrot.slane %v25228_v59, 2 }
 0xca6   : > { %17601 = vmatpush1.bf16.msk.msra.mxu1 %vm17600_vm4, %v26563_v35  ;;  %vm17614_vm4 = vmpackc.low %vm9141_vm3, %vm9138_vm6  ;;  %vm9163_vm6 = vcmp.eq.s32.totalorder %v23907_v38, %v9054_v20  ;;  %vm9166_vm3 = vcmp.eq.s32.totalorder %v23907_v38, %v9055_v58  ;;  %v10865_v20 = vrot.slane %v25284_v8, 2  ;;  %v9064_v58 = vadd.s32 2, %v25356_v34 }
 0xca7   : > { %17603 = vmatprep.subr.msk.bf16.mxu1 %vm17602_vm8, %v26563_v35  ;;  %vm9144_vm8 = vcmp.eq.s32.totalorder %v23149_v55, %v9048_v21  ;;  %v9059_v21 = vadd.s32 2, %v25273_v22 }
 0xca8   : > { %17629 = vmatpush3.bf16.msra.mxu0 %v26735_v10 }
 0xca9   : > { %17630 = vmatprep.subr.bf16.mxu0 %v26735_v10  ;;  %vm9178_vm15 = vcmp.eq.s32.totalorder %v23907_v38, %v9059_v21  ;;  %v11166_v21 = vadd.s32 4294967295, %v26925_v60 }
 0xcaa   : > { %17604 = vmatpush1.bf16.msra.mxu1 %v26735_v10 }
 0xcab   : > { %17606 = vmatprep.subr.msk.bf16.mxu1 %vm17605_vm14, %v26563_v35  ;;  %vm17617_vm14 = vmpackc.low %vm9147_vm5, %vm9144_vm8  ;;  %vm9169_vm5 = vcmp.eq.s32.totalorder %v23907_v38, %v9056_v7  ;;  %v10864_v7 = vrot.slane %v25279_v19, 2 }
 0xcac   : > { %17631 = vmatpush3.bf16.msra.mxu0 %v26735_v10  ;;  %vm17645_vm8 = vmpackc.low %vm9166_vm3, %vm9163_vm6  ;;  %vm10578_vm6 = vcmp.eq.s32.totalorder %v23907_v38, %v25256_v2 }
 0xcad   : > { %17632 = vmatprep.subr.bf16.mxu0 %v26735_v10 }
 0xcae   : > { %17607 = vmatpush1.bf16.msra.mxu1 %v26735_v10 }
 0xcaf   : > { %17609 = vmatprep.subr.msk.bf16.mxu1 %vm17608_vm11, %v26563_v35  ;;  %vm17641_vm11 = vmpackc.low %vm9160_vm7, %vm18225_vm9  ;;  %vm9172_vm7 = vcmp.eq.s32.totalorder %v23907_v38, %v9057_v49 }
 0xcb0   : > { %17633 = vmatpush3.bf16.msra.mxu0 %v26735_v10 }
 0xcb1   : > { %17634 = vmatprep.subr.bf16.mxu0 %v26735_v10 }
 0xcb2   : > { %17610 = vmatpush1.bf16.msra.mxu1 %v26735_v10 }
 0xcb3   : > { %17612 = vmatprep.subr.msk.bf16.mxu1 %vm17611_vm13, %v26563_v35  ;;  %vm9159_vm13 = vcmp.eq.s32.totalorder %v23149_v55, %v9053_v62  ;;  %v9061_v62 = vadd.s32 2, %v25304_v50 }
 0xcb4   : > { %17635 = vmatpush3.bf16.msra.mxu0 %v26735_v10 }
 0xcb5   : > { %17636 = vmatprep.subr.bf16.mxu0 %v26735_v10 }
 0xcb6   : > { %17613 = vmatpush1.bf16.msra.mxu1 %v26735_v10 }
 0xcb7   : > { %17615 = vmatprep.subr.msk.bf16.mxu1 %vm17614_vm4, %v26563_v35  ;;  %vm17623_vm4 = vmpackc.low %vm9159_vm13, %vm9156_vm12  ;;  %vm9184_vm12 = vcmp.eq.s32.totalorder %v23907_v38, %v9061_v62  ;;  %vm10575_vm13 = vcmp.eq.s32.totalorder %v23907_v38, %v25253_v15  ;;  %v11168_v62 = vadd.s32 4294967295, %v26927_v48 }
 0xcb8   : > { %17637 = vmatpush3.bf16.msra.mxu0 %v26735_v10 }
 0xcb9   : > { %17638 = vmatprep.subr.bf16.mxu0 %v26735_v10 }
 0xcba   : > { %17616 = vmatpush1.bf16.msra.mxu1 %v26735_v10 }
 0xcbb   : > { %17618 = vmatprep.subr.msk.bf16.mxu1 %vm17617_vm14, %v26563_v35  ;;  %vm17648_vm14 = vmpackc.low %vm9172_vm7, %vm9169_vm5  ;;  %vm10581_vm7 = vcmp.eq.s32.totalorder %v23907_v38, %v25261_v63 }
 0xcbc   : > { %17639 = vmatpush3.bf16.msra.mxu0 %v26735_v10  ;;  %vm17708_vm5 = vmpackc.low %vm10578_vm6, %vm10575_vm13  ;;  %vm10587_vm13 = vcmp.eq.s32.totalorder %v23907_v38, %v25270_v0  ;;  %vm10590_vm6 = vcmp.eq.s32.totalorder %v23907_v38, %v25273_v22 }
 0xcbd   : > { %17642 = vmatprep.subr.msk.bf16.mxu0 %vm17641_vm11, %v25130_v17  ;;  %v9058_v17 = vadd.s32 2, %v25270_v0 }
 0xcbe   : > { %17619 = vmatpush1.bf16.msra.mxu1 %v26735_v10 }
 0xcbf   : > { %17621 = vmatprep.subr.msk.bf16.mxu1 %vm17620_vm10, %v26563_v35  ;;  %vm9175_vm1 = vcmp.eq.s32.totalorder %v23907_v38, %v9058_v17  ;;  %vm9181_vm10 = vcmp.eq.s32.totalorder %v23907_v38, %v9060_v28  ;;  %v11165_v17 = vadd.s32 4294967295, %v26924_v11  ;;  %v11167_v28 = vadd.s32 4294967295, %v26926_v51 }
 0xcc0   : > { %17643 = vmatpush3.bf16.msra.mxu0 %v26735_v10  ;;  %vm17651_vm11 = vmpackc.low %vm9178_vm15, %vm9175_vm1  ;;  %vm9193_vm15 = vcmp.eq.s32.totalorder %v23907_v38, %v9064_v58  ;;  %v26466_v58 = vrot.slane %v25284_v8, 3 }
 0xcc1   : > { %17644 = vmatprep.subr.bf16.mxu0 %v26735_v10  ;;  %vm17654_vm3 = vmpackc.low %vm9184_vm12, %vm9181_vm10  ;;  %vm10477_vm10 = vcmp.eq.s32.totalorder %v22094_v45, %v26924_v11  ;;  %vm10480_vm12 = vcmp.eq.s32.totalorder %v22094_v45, %v26925_v60  ;;  %v15305_v49 = vsel %vm9193_vm15, 1.0, %v26561_v61 }
 0xcc2   : > { %17622 = vmatpush1.bf16.msra.mxu1 %v26735_v10 }
 0xcc3   : > { %10402 = vmatmul.mubr.f32.vlgmr.msra.gmra.mrb[198].mxu0 %v25279_v19  ;;  %17624 = vmatprep.subr.msk.bf16.mxu1 %vm17623_vm4, %v26563_v35  ;;  %vm9187_vm4 = vcmp.eq.s32.totalorder %v23907_v38, %v9062_v14 }
 0xcc4   : > { %17646 = vmatpush3.bf16.msk.msra.mxu0 %vm17645_vm8, %v26563_v35  ;;  %16684 = vmatprep.mubr.msk.f32.mxu0 %vm18224_vm2, %v26561_v61  ;;  %vm9190_vm8 = vcmp.eq.s32.totalorder %v23907_v38, %v9063_v54  ;;  %v11169_v54 = vadd.s32 4294967295, %v26928_v13 }
 0xcc5   : > { %17647 = vmatprep.subr.bf16.mxu0 %v26735_v10  ;;  %vm17657_vm1 = vmpackc.low %vm9190_vm8, %vm9187_vm4  ;;  %vm10483_vm8 = vcmp.eq.s32.totalorder %v22094_v45, %v26926_v51 }
 0xcc6   : > { %17625 = vmatpush1.bf16.msra.mxu1 %v26735_v10  ;;  %vm17714_vm4 = vmpackc.low %vm10590_vm6, %vm10587_vm13  ;;  %vm10599_vm13 = vcmp.eq.s32.totalorder %v23907_v38, %v25326_v30  ;;  %vm10602_vm6 = vcmp.eq.s32.totalorder %v23907_v38, %v25329_v16 }
 0xcc7   : > { %16687 = vmatprep.subr.mxu1 %v26561_v61 }
 0xcc8   : > { %17649 = vmatpush3.bf16.msk.msra.mxu0 %vm17648_vm14, %v26563_v35  ;;  %vm10584_vm14 = vcmp.eq.s32.totalorder %v23907_v38, %v25266_v53 }
 0xcc9   : > { %10260 = vmatmul.mubr.f32.vlgmr.msra.gmra.mrb[112].mxu1 %v25279_v19  ;;  %17650 = vmatprep.subr.bf16.mxu0 %v26735_v10 }
 0xcca   : > { %16688 = vmatpush3.msra.mxu1 %v26561_v61  ;;  %16689 = vmatprep.mubr.msk.f32.mxu1 %vm18224_vm2, %v26561_v61 }
 0xccb   : > { %11022 = vmatprep.subr.mxu1 %v26561_v61 }
 0xccc   : > { %17652 = vmatpush3.bf16.msk.msra.mxu0 %vm17651_vm11, %v26563_v35  ;;  %vm17711_vm11 = vmpackc.low %vm10584_vm14, %vm10581_vm7  ;;  %vm26953_vm7 = vcmask 1040384   ;;  %vm10593_vm14 = vcmp.eq.s32.totalorder %v23907_v38, %v25298_v31 }
 0xccd   : > { %16690 = vmatmul.mubr.msk.f32.vlgmr.msra.gmra.mrb[114].mxu1 %vm26465_vm0, %v10866_v18  ;;  %17653 = vmatprep.subr.bf16.mxu0 %v26735_v10 }
 0xcce   : > { %11023 = vmatpush1.msra.mxu1 %v26561_v61  ;;  %11086 = vmatprep.mubr.f32.mxu1 %v10865_v20 }
 0xccf   : > { %17707 = vmatprep.subr.bf16.mxu1 %v26735_v10 }
 0xcd0   : > { %17655 = vmatpush3.bf16.msk.msra.mxu0 %vm17654_vm3, %v26563_v35  ;;  %vm17660_vm3 = vmpackc.low %vm10480_vm12, %vm10477_vm10  ;;  %vm10489_vm10 = vcmp.eq.s32.totalorder %v22094_v45, %v26928_v13  ;;  %vm10492_vm12 = vcmp.eq.s32.totalorder %v22094_v45, %v26929_v1 }
 0xcd1   : > { %11087 = vmatmul.mubr.f32.vlgmr.msra.gmra.mrb[116].mxu1 %v10864_v7  ;;  %17656 = vmatprep.subr.bf16.mxu0 %v26735_v10 }
 0xcd2   : > { %17709 = vmatpush3.bf16.msk.msra.mxu1 %vm17708_vm5, %v26563_v35  ;;  %16714 = vmatprep.mubr.msk.f32.mxu1 %vm18224_vm2, %v26561_v61  ;;  %vm10486_vm5 = vcmp.eq.s32.totalorder %v22094_v45, %v26927_v48 }
 0xcd3   : > { %17710 = vmatprep.subr.bf16.mxu1 %v26735_v10  ;;  %vm17663_vm15 = vmpackc.low %vm10486_vm5, %vm10483_vm8  ;;  %vm10495_vm8 = vcmp.eq.s32.totalorder %v22094_v45, %v26930_v44  ;;  %vm10498_vm5 = vcmp.eq.s32.totalorder %v22094_v45, %v26931_v3 }
 0xcd4   : > { %17658 = vmatpush3.bf16.msk.msra.mxu0 %vm17657_vm1, %v26563_v35  ;;  %vm10596_vm1 = vcmp.eq.s32.totalorder %v23907_v38, %v25304_v50 }
 0xcd5   : > { %16682 = vmatprep.subr.mxu0 %v26561_v61 }
 0xcd6   : > { %17712 = vmatpush3.bf16.msk.msra.mxu1 %vm17711_vm11, %v26563_v35  ;;  %vm17717_vm11 = vmpackc.low %vm10596_vm1, %vm10593_vm14  ;;  %vm11208_vm14 = vcmp.eq.s32.totalorder %v22094_v45, %v11165_v17  ;;  %vm11211_vm1 = vcmp.eq.s32.totalorder %v22094_v45, %v11166_v21  ;;  %v11173_v17 = vadd.s32 4294967295, %v26932_v23  ;;  %v11174_v21 = vadd.s32 4294967295, %v26933_v41 }
 0xcd7   : > { %17713 = vmatprep.subr.bf16.mxu1 %v26735_v10 }
 0xcd8   : > { %16683 = vmatpush3.msk.msra.mxu0 %vm26953_vm7, %v15305_v49  ;;  %vm10605_vm7 = vcmp.eq.s32.totalorder %v23907_v38, %v25356_v34  ;;  %v11172_v49 = vadd.s32 4294967295, %v26931_v3 }
 0xcd9   : > { %17659 = vmatprep.subr.bf16.mxu0 %v26735_v10  ;;  %16685 = vmatmul.mubr.msk.f32.vlgmr.msra.gmra.mrb[200].mxu0 %vm26465_vm0, %v25228_v59  ;;  %v15487_v14 = vsel %vm10605_vm7, 1.0, %v26561_v61 }
 0xcda   : > { %17661 = vmatpush1.bf16.msk.msra.mxu0 %vm17660_vm3, %v26563_v35  ;;  %17715 = vmatpush3.bf16.msk.msra.mxu1 %vm17714_vm4, %v26563_v35  ;;  %vm17666_vm3 = vmpackc.low %vm10492_vm12, %vm10489_vm10  ;;  %vm10504_vm10 = vcmp.eq.s32.totalorder %v22094_v45, %v26933_v41 }
 0xcdb   : > { %17662 = vmatprep.subr.bf16.mxu0 %v26735_v10  ;;  %17716 = vmatprep.subr.bf16.mxu1 %v26735_v10  ;;  %vm17720_vm4 = vmpackc.low %vm10602_vm6, %vm10599_vm13  ;;  %vm26954_vm13 = vcmask 1040384   ;;  %vm11214_vm6 = vcmp.eq.s32.totalorder %v22094_v45, %v11167_v28  ;;  %v11175_v28 = vadd.s32 4294967295, %v26934_v43 }
 0xcdc   : > { %10944 = vmatprep.mubr.f32.mxu0 %v10865_v20  ;;  %vm17723_vm12 = vmpackc.low %vm11211_vm1, %vm11208_vm14  ;;  %v11170_v20 = vadd.s32 4294967295, %v26929_v1  ;;  %vm11220_vm14 = vcmp.eq.s32.totalorder %v22094_v45, %v11169_v54  ;;  %v11178_v54 = vadd.s32 4294967295, %v26937_v46 }
 0xcde   : > { %17664 = vmatpush1.bf16.msk.msra.mxu0 %vm17663_vm15, %v26563_v35  ;;  %17718 = vmatpush3.bf16.msk.msra.mxu1 %vm17717_vm11, %v26563_v35  ;;  %vm17669_vm15 = vmpackc.low %vm10498_vm5, %vm10495_vm8  ;;  %vm10501_vm11 = vcmp.eq.s32.totalorder %v22094_v45, %v26932_v23  ;;  %vm10507_vm8 = vcmp.eq.s32.totalorder %v22094_v45, %v26934_v43  ;;  %vm10510_vm5 = vcmp.eq.s32.totalorder %v22094_v45, %v26935_v42 }
 0xcdf   : > { %17665 = vmatprep.subr.bf16.mxu0 %v26735_v10  ;;  %17719 = vmatprep.subr.bf16.mxu1 %v26735_v10  ;;  %vm11223_vm1 = vcmp.eq.s32.totalorder %v22094_v45, %v11170_v20  ;;  %v11179_v20 = vadd.s32 4294967295, %v26939_v5 }
 0xce2   : > { %17667 = vmatpush1.bf16.msk.msra.mxu0 %vm17666_vm3, %v26563_v35  ;;  %17721 = vmatpush3.bf16.msk.msra.mxu1 %vm17720_vm4, %v26563_v35  ;;  %vm11217_vm3 = vcmp.eq.s32.totalorder %v22094_v45, %v11168_v62  ;;  %vm17672_vm4 = vmpackc.low %vm10504_vm10, %vm10501_vm11  ;;  %vm10513_vm11 = vcmp.eq.s32.totalorder %v22094_v45, %v26936_v36  ;;  %vm10516_vm10 = vcmp.eq.s32.totalorder %v22094_v45, %v26937_v46  ;;  %v11176_v62 = vadd.s32 4294967295, %v26935_v42 }
 0xce3   : > { %17668 = vmatprep.subr.bf16.mxu0 %v26735_v10  ;;  %16712 = vmatprep.subr.mxu1 %v26561_v61  ;;  %vm17726_vm7 = vmpackc.low %vm11217_vm3, %vm11214_vm6  ;;  %vm11229_vm6 = vcmp.eq.s32.totalorder %v22094_v45, %v11172_v49 }
 0xce4   : > { %vm17678_vm3 = vmpackc.low %vm10516_vm10, %vm10513_vm11 }
 0xce6   : > { %17670 = vmatpush1.bf16.msk.msra.mxu0 %vm17669_vm15, %v26563_v35  ;;  %16713 = vmatpush3.msk.msra.mxu1 %vm26954_vm13, %v15487_v14  ;;  %vm17675_vm15 = vmpackc.low %vm10510_vm5, %vm10507_vm8  ;;  %vm10522_vm8 = vcmp.eq.s32.totalorder %v22094_v45, %v26938_v24  ;;  %v11177_v14 = vadd.s32 4294967295, %v26936_v36 }
 0xce7   : > { %17722 = vmatprep.subr.bf16.mxu1 %v26735_v10  ;;  %16715 = vmatmul.mubr.msk.f32.vlgmr.msra.gmra.mrb[118].mxu1 %vm26465_vm0, %v10866_v18  ;;  %v11171_v18 = vadd.s32 4294967295, %v26930_v44  ;;  %vm11241_vm0 = vcmp.eq.s32.totalorder %v22094_v45, %v11176_v62  ;;  %v11183_v62 = vadd.s32 4294967295, %v26942_v26 }
 0xce8   : > { %17724 = vmatpush1.bf16.msk.msra.mxu1 %vm17723_vm12, %v26563_v35  ;;  %17671 = vmatprep.subr.bf16.mxu0 %v26735_v10  ;;  %vm17729_vm12 = vmpackc.low %vm11223_vm1, %vm11220_vm14  ;;  %vm10529_vm14 = vcmp.eq.s32.totalorder %v23149_v55, %v26941_v25  ;;  %vm11232_vm1 = vcmp.eq.s32.totalorder %v22094_v45, %v11173_v17  ;;  %v11181_v17 = vadd.s32 4294967295, %v26940_v4 }
 0xce9   : > { %17725 = vmatprep.subr.bf16.mxu1 %v26735_v10  ;;  %11675 = vmatprep.mubr.f32.mxu1 %v26466_v58  ;;  %vm11226_vm13 = vcmp.eq.s32.totalorder %v22094_v45, %v11171_v18  ;;  %v11180_v18 = vadd.s32 4294967295, %v26938_v24  ;;  %v11200_v58 = vadd.s32 4294967295, %v25266_v53 }
 0xcea   : > { %17673 = vmatpush1.bf16.msk.msra.mxu0 %vm17672_vm4, %v26563_v35  ;;  %vm10519_vm4 = vcmp.eq.s32.totalorder %v22094_v45, %v26939_v5  ;;  %vm17732_vm5 = vmpackc.low %vm11229_vm6, %vm11226_vm13  ;;  %vm10532_vm13 = vcmp.eq.s32.totalorder %v23149_v55, %v26942_v26  ;;  %vm10535_vm6 = vcmp.eq.s32.totalorder %v23149_v55, %v26943_v32 }
 0xceb   : > { %17674 = vmatprep.subr.bf16.mxu0 %v26735_v10  ;;  %vm17681_vm11 = vmpackc.low %vm10522_vm8, %vm10519_vm4 }
 0xcec   : > { %17727 = vmatpush1.bf16.msk.msra.mxu1 %vm17726_vm7, %v26563_v35  ;;  %vm10526_vm7 = vcmp.eq.s32.totalorder %v23149_v55, %v26940_v4  ;;  %vm17686_vm4 = vmpackc.low %vm10535_vm6, %vm10532_vm13  ;;  %vm11253_vm13 = vcmp.eq.s32.totalorder %v22094_v45, %v11180_v18  ;;  %vm11257_vm6 = vcmp.eq.s32.totalorder %v23149_v55, %v11181_v17  ;;  %v25709_v18 = vpack.c.bf16 %v26561_v61, %v26761_v57 }
 0xced   : > { %17728 = vmatprep.subr.bf16.mxu1 %v26735_v10  ;;  %vm17683_vm10 = vmpackc.low %vm10529_vm14, %vm10526_vm7  ;;  %vm10541_vm7 = vcmp.eq.s32.totalorder %v23149_v55, %v26945_v12  ;;  %vm11244_vm14 = vcmp.eq.s32.totalorder %v22094_v45, %v11177_v14  ;;  %v11184_v14 = vadd.s32 4294967295, %v26943_v32 }
 0xcee   : > { %17676 = vmatpush1.bf16.msk.msra.mxu0 %vm17675_vm15, %v26563_v35  ;;  %vm11235_vm15 = vcmp.eq.s32.totalorder %v22094_v45, %v11174_v21  ;;  %v11182_v21 = vadd.s32 4294967295, %v26941_v25 }
 0xcef   : > { %17677 = vmatprep.subr.bf16.mxu0 %v26735_v10 }
 0xcf0   : > { %17730 = vmatpush1.bf16.msk.msra.mxu1 %vm17729_vm12, %v26563_v35  ;;  %vm17735_vm12 = vmpackc.low %vm11235_vm15, %vm11232_vm1  ;;  %vm11247_vm1 = vcmp.eq.s32.totalorder %v22094_v45, %v11178_v54  ;;  %v11185_v54 = vadd.s32 4294967295, %v26944_v37 }
 0xcf1   : > { %17731 = vmatprep.subr.bf16.mxu1 %v26735_v10  ;;  %vm17741_vm15 = vmpackc.low %vm11247_vm1, %vm11244_vm14  ;;  %vm11256_vm1 = vcmp.eq.s32.totalorder %v22094_v45, %v11181_v17  ;;  %v11187_v17 = vadd.s32 4294967295, %v25161_v33 }
 0xcf2   : > { %17679 = vmatpush1.bf16.msk.msra.mxu0 %vm17678_vm3, %v26563_v35  ;;  %vm11238_vm3 = vcmp.eq.s32.totalorder %v22094_v45, %v11175_v28 }
 0xcf3   : > { %17680 = vmatprep.subr.bf16.mxu0 %v26735_v10  ;;  %vm17738_vm8 = vmpackc.low %vm11241_vm0, %vm11238_vm3  ;;  %vm11260_vm3 = vcmp.eq.s32.totalorder %v23149_v55, %v11182_v21  ;;  %v11188_v21 = vadd.s32 4294967295, %v25164_v40 }
 0xcf4   : > { %17733 = vmatpush1.bf16.msk.msra.mxu1 %vm17732_vm5, %v26563_v35  ;;  %vm10538_vm5 = vcmp.eq.s32.totalorder %v23149_v55, %v26944_v37  ;;  %vm17746_vm14 = vmpackc.low %vm11260_vm3, %vm11257_vm6  ;;  %vm11269_vm3 = vcmp.eq.s32.totalorder %v23149_v55, %v11185_v54  ;;  %v11192_v54 = vadd.s32 4294967295, %v25193_v56 }
 0xcf5   : > { %17734 = vmatprep.subr.bf16.mxu1 %v26735_v10  ;;  %vm17689_vm0 = vmpackc.low %vm10541_vm7, %vm10538_vm5  ;;  %vm10550_vm5 = vcmp.eq.s32.totalorder %v23149_v55, %v25178_v39  ;;  %vm10553_vm7 = vcmp.eq.s32.totalorder %v23149_v55, %v25181_v29 }
 0xcf6   : > { %17682 = vmatpush1.bf16.msk.msra.mxu0 %vm17681_vm11, %v26563_v35  ;;  %vm10544_vm11 = vcmp.eq.s32.totalorder %v23149_v55, %v25161_v33 }
 0xcf7   : > { %17684 = vmatprep.subr.msk.bf16.mxu0 %vm17683_vm10, %v26563_v35  ;;  %vm10547_vm10 = vcmp.eq.s32.totalorder %v23149_v55, %v25164_v40 }
 0xcf8   : > { %17736 = vmatpush1.bf16.msk.msra.mxu1 %vm17735_vm12, %v26563_v35  ;;  %vm11250_vm12 = vcmp.eq.s32.totalorder %v22094_v45, %v11179_v20  ;;  %v11186_v20 = vadd.s32 4294967295, %v26945_v12 }
 0xcf9   : > { %17737 = vmatprep.subr.bf16.mxu1 %v26735_v10 }
 0xcfa   : > { %17685 = vmatpush1.bf16.msra.mxu0 %v26735_v10  ;;  %v25674_v49 = vpop.f32.mrb[190].mxu0 }
 0xcfb   : > { %17687 = vmatprep.subr.msk.bf16.mxu0 %vm17686_vm4, %v26563_v35  ;;  %v16631_v28 = vpop.f32.mrb[191].mxu0  ;;  %vm17692_vm4 = vmpackc.low %vm10547_vm10, %vm10544_vm11 }
 0xcfc   : > { %17739 = vmatpush1.bf16.msk.msra.mxu1 %vm17738_vm8, %v26563_v35  ;;  %vm17744_vm8 = vmpackc.low %vm11253_vm13, %vm11250_vm12  ;;  %vm10556_vm12 = vcmp.eq.s32.totalorder %v23149_v55, %v25190_v52  ;;  %vm10559_vm13 = vcmp.eq.s32.totalorder %v23149_v55, %v25193_v56  ;;  %v11189_v28 = vadd.s32 4294967295, %v25178_v39 }
 0xcfd   : > { %17740 = vmatprep.subr.bf16.mxu1 %v26735_v10  ;;  %vm17695_vm11 = vmpackc.low %vm10553_vm7, %vm10550_vm5  ;;  %vm10562_vm5 = vcmp.eq.s32.totalorder %v23149_v55, %v25202_v27  ;;  %vm10565_vm7 = vcmp.eq.s32.totalorder %v23149_v55, %v25205_v47 }
 0xcfe   : > { %17688 = vmatpush1.bf16.msra.mxu0 %v26735_v10  ;;  %vm17749_vm10 = vmpackc.low %vm18225_vm9, %vm11256_vm1  ;;  %vm11275_vm1 = vcmp.eq.s32.totalorder %v23149_v55, %v11187_v17  ;;  %v11194_v17 = vadd.s32 4294967295, %v25205_v47 }
 0xcff   : > { %17690 = vmatprep.subr.msk.bf16.mxu0 %vm17689_vm0, %v26563_v35  ;;  %vm11263_vm0 = vcmp.eq.s32.totalorder %v23149_v55, %v11183_v62  ;;  %v11190_v62 = vadd.s32 4294967295, %v25181_v29 }
 0xd00   : > { %17742 = vmatpush1.bf16.msk.msra.mxu1 %vm17741_vm15, %v26563_v35  ;;  %vm11266_vm15 = vcmp.eq.s32.totalorder %v23149_v55, %v11184_v14  ;;  %v11191_v14 = vadd.s32 4294967295, %v25190_v52 }
 0xd01   : > { %17743 = vmatprep.subr.bf16.mxu1 %v26735_v10  ;;  %vm17751_vm6 = vmpackc.low %vm11266_vm15, %vm11263_vm0  ;;  %vm11278_vm0 = vcmp.eq.s32.totalorder %v23149_v55, %v11188_v21  ;;  %v11197_v21 = vadd.s32 4294967295, %v25253_v15 }
 0xd02   : > { %17691 = vmatpush1.bf16.msra.mxu0 %v26735_v10  ;;  %vm17701_vm15 = vmpackc.low %vm10565_vm7, %vm10562_vm5  ;;  %vm11290_vm5 = vcmp.eq.s32.totalorder %v23149_v55, %v11192_v54  ;;  %v11199_v54 = vadd.s32 4294967295, %v25261_v63 }
 0xd03   : > { %17693 = vmatprep.subr.msk.bf16.mxu0 %vm17692_vm4, %v26563_v35  ;;  %vm11272_vm4 = vcmp.eq.s32.totalorder %v23149_v55, %v11186_v20  ;;  %v11193_v20 = vadd.s32 4294967295, %v25202_v27 }
 0xd04   : > { %17745 = vmatpush1.bf16.msk.msra.mxu1 %vm17744_vm8, %v26563_v35  ;;  %vm17698_vm8 = vmpackc.low %vm10559_vm13, %vm10556_vm12  ;;  %vm11281_vm13 = vcmp.eq.s32.totalorder %v23149_v55, %v11189_v28  ;;  %v11198_v28 = vadd.s32 4294967295, %v25256_v2 }
 0xd05   : > { %17747 = vmatprep.subr.msk.bf16.mxu1 %vm17746_vm14, %v26563_v35  ;;  %vm17754_vm14 = vmpackc.low %vm11272_vm4, %vm11269_vm3 }
 0xd06   : > { %17694 = vmatpush1.bf16.msra.mxu0 %v26735_v10  ;;  %vm17757_vm12 = vmpackc.low %vm11278_vm0, %vm11275_vm1  ;;  %vm11296_vm1 = vcmp.eq.s32.totalorder %v23149_v55, %v11194_v17  ;;  %vm11306_vm0 = vcmp.eq.s32.totalorder %v23907_v38, %v11197_v21  ;;  %v11595_v17 = vrot.slane %v25279_v19, 3 }
 0xd07   : > { %17696 = vmatprep.subr.msk.bf16.mxu0 %vm17695_vm11, %v26563_v35  ;;  %vm10568_vm11 = vcmp.eq.s32.totalorder %v23149_v55, %v25216_v9 }
 0xd08   : > { %17750 = vmatpush1.bf16.msk.msra.mxu1 %vm17749_vm10, %v25709_v18  ;;  %vm10571_vm10 = vcmp.eq.s32.totalorder %v23149_v55, %v25219_v6 }
 0xd09   : > { %17752 = vmatprep.subr.msk.bf16.mxu1 %vm17751_vm6, %v26563_v35  ;;  %vm11284_vm6 = vcmp.eq.s32.totalorder %v23149_v55, %v11190_v62  ;;  %vm17704_vm3 = vmpackc.low %vm10571_vm10, %vm10568_vm11  ;;  %v11195_v62 = vadd.s32 4294967295, %v25216_v9 }
 0xd0a   : > { %17697 = vmatpush1.bf16.msra.mxu0 %v26735_v10  ;;  %vm17760_vm4 = vmpackc.low %vm11284_vm6, %vm11281_vm13  ;;  %vm11312_vm6 = vcmp.eq.s32.totalorder %v23907_v38, %v11199_v54  ;;  %v11206_v54 = vadd.s32 4294967295, %v25329_v16 }
 0xd0b   : > { %17699 = vmatprep.subr.msk.bf16.mxu0 %vm17698_vm8, %v26563_v35  ;;  %vm11287_vm8 = vcmp.eq.s32.totalorder %v23149_v55, %v11191_v14  ;;  %v11196_v14 = vadd.s32 4294967295, %v25219_v6 }
 0xd0c   : > { %17753 = vmatpush1.bf16.msra.mxu1 %v26735_v10  ;;  %vm17763_vm7 = vmpackc.low %vm11290_vm5, %vm11287_vm8 }
 0xd0d   : > { %17755 = vmatprep.subr.msk.bf16.mxu1 %vm17754_vm14, %v26563_v35  ;;  %vm11293_vm14 = vcmp.eq.s32.totalorder %v23149_v55, %v11193_v20  ;;  %v26955_v20 = vrot.slane %v25284_v8, 3  ;;  %vm11302_vm13 = vcmp.eq.s32.totalorder %v23149_v55, %v11196_v14  ;;  %v11205_v14 = vadd.s32 4294967295, %v25326_v30 }
 0xd0e   : > { %17700 = vmatpush1.bf16.msra.mxu0 %v26735_v10  ;;  %vm17766_vm11 = vmpackc.low %vm11296_vm1, %vm11293_vm14  ;;  %vm11305_vm14 = vcmp.eq.s32.totalorder %v23149_v55, %v11197_v21  ;;  %v11896_v21 = vadd.s32 4294967294, %v26924_v11 }
 0xd0f   : > { %17702 = vmatprep.subr.msk.bf16.mxu0 %vm17701_vm15, %v26563_v35  ;;  %vm11309_vm15 = vcmp.eq.s32.totalorder %v23907_v38, %v11198_v28  ;;  %v11202_v28 = vadd.s32 4294967295, %v25273_v22 }
 0xd10   : > { %17756 = vmatpush1.bf16.msra.mxu1 %v26735_v10  ;;  %vm17773_vm10 = vmpackc.low %vm11309_vm15, %vm11306_vm0 }
 0xd11   : > { %17758 = vmatprep.subr.msk.bf16.mxu1 %vm17757_vm12, %v26563_v35  ;;  %vm11299_vm12 = vcmp.eq.s32.totalorder %v23149_v55, %v11195_v62  ;;  %v11204_v62 = vadd.s32 4294967295, %v25304_v50 }
 0xd12   : > { %17703 = vmatpush1.bf16.msra.mxu0 %v26735_v10 }
 0xd13   : > { %17705 = vmatprep.subr.msk.bf16.mxu0 %vm17704_vm3, %v26563_v35  ;;  %vm11315_vm3 = vcmp.eq.s32.totalorder %v23907_v38, %v11200_v58  ;;  %v11203_v58 = vadd.s32 4294967295, %v25298_v31  ;;  %vm11327_vm15 = vcmp.eq.s32.totalorder %v23907_v38, %v11204_v62 }
 0xd14   : > { %17759 = vmatpush1.bf16.msra.mxu1 %v26735_v10  ;;  %vm17776_vm8 = vmpackc.low %vm11315_vm3, %vm11312_vm6  ;;  %vm11939_vm3 = vcmp.eq.s32.totalorder %v22094_v45, %v11896_v21  ;;  %v11932_v21 = vadd.s32 4294967294, %v25270_v0 }
 0xd15   : > { %17761 = vmatprep.subr.msk.bf16.mxu1 %vm17760_vm4, %v26563_v35  ;;  %vm17769_vm4 = vmpackc.low %vm11302_vm13, %vm11299_vm12  ;;  %vm11324_vm0 = vcmp.eq.s32.totalorder %v23907_v38, %v11203_v58  ;;  %vm11333_vm12 = vcmp.eq.s32.totalorder %v23907_v38, %v11206_v54  ;;  %v11597_v58 = vrot.slane %v25228_v59, 3  ;;  %v11898_v54 = vadd.s32 4294967294, %v26926_v51 }
 0xd16   : > { %17706 = vmatpush1.bf16.msra.mxu0 %v26735_v10 }
 0xd17   : > { %11753 = vmatprep.subr.mxu0 %v26561_v61 }
 0xd18   : > { %17762 = vmatpush1.bf16.msra.mxu1 %v26735_v10 }
 0xd19   : > { %10945 = vmatmul.mubr.f32.vlgmr.msra.gmra.mrb[202].mxu0 %v10864_v7  ;;  %17764 = vmatprep.subr.msk.bf16.mxu1 %vm17763_vm7, %v26563_v35  ;;  %v11201_v7 = vadd.s32 4294967295, %v25270_v0  ;;  %vm11321_vm7 = vcmp.eq.s32.totalorder %v23907_v38, %v11202_v28  ;;  %v11929_v28 = vadd.s32 4294967294, %v25256_v2  ;;  %v11930_v2 = vadd.s32 4294967294, %v25261_v63 }
 0xd1a   : > { %11754 = vmatpush1.msra.mxu0 %v26561_v61  ;;  %11817 = vmatprep.mubr.f32.mxu0 %v26955_v20  ;;  %v11207_v20 = vadd.s32 4294967295, %v25356_v34 }
 0xd1b   : > { %17772 = vmatprep.subr.bf16.mxu0 %v26735_v10  ;;  %vm11318_vm5 = vcmp.eq.s32.totalorder %v23907_v38, %v11201_v7  ;;  %v25819_v7 = vadd.s32 4294967294, %v25253_v15  ;;  %v11931_v15 = vadd.s32 4294967294, %v25266_v53 }
 0xd1c   : > { %17765 = vmatpush1.bf16.msra.mxu1 %v26735_v10  ;;  %vm17779_vm1 = vmpackc.low %vm11321_vm7, %vm11318_vm5  ;;  %vm11336_vm13 = vcmp.eq.s32.totalorder %v23907_v38, %v11207_v20  ;;  %v11899_v20 = vadd.s32 4294967294, %v26927_v48  ;;  %vm12040_vm7 = vcmp.eq.s32.totalorder %v23907_v38, %v11929_v28  ;;  %v11901_v28 = vadd.s32 4294967294, %v26929_v1 }
 0xd1d   : > { %11818 = vmatmul.mubr.f32.vlgmr.msra.gmra.mrb[204].mxu0 %v11595_v17  ;;  %17767 = vmatprep.subr.msk.bf16.mxu1 %vm17766_vm11, %v26563_v35  ;;  %vm17782_vm11 = vmpackc.low %vm11327_vm15, %vm11324_vm0  ;;  %v15577_v62 = vsel %vm11336_vm13, 1.0, %v26561_v61  ;;  %vm12037_vm5 = vcmp.eq.s32.totalorder %v23907_v38, %v25819_v7  ;;  %vm11945_vm15 = vcmp.eq.s32.totalorder %v22094_v45, %v11898_v54  ;;  %vm12046_vm13 = vcmp.eq.s32.totalorder %v23907_v38, %v11931_v15 }
 0xd1e   : > { %17774 = vmatpush3.bf16.msk.msra.mxu0 %vm17773_vm10, %v26563_v35  ;;  %16739 = vmatprep.mubr.msk.f32.mxu0 %vm18224_vm2, %v26561_v61  ;;  %vm11330_vm10 = vcmp.eq.s32.totalorder %v23907_v38, %v11205_v14  ;;  %v12327_v14 = vrot.slane %v25284_v8, 4  ;;  %vm17838_vm0 = vmpackc.low %vm12040_vm7, %vm12037_vm5  ;;  %v26959_v54 = vrot.slane %v25279_v19, 4  ;;  %v11902_v15 = vadd.s32 4294967294, %v26930_v44 }
 0xd1f   : > { %17775 = vmatprep.subr.bf16.mxu0 %v26735_v10  ;;  %vm17785_vm6 = vmpackc.low %vm11333_vm12, %vm11330_vm10  ;;  %vm12043_vm12 = vcmp.eq.s32.totalorder %v23907_v38, %v11930_v2  ;;  %v11903_v2 = vadd.s32 4294967294, %v26931_v3  ;;  %vm12049_vm5 = vcmp.eq.s32.totalorder %v23907_v38, %v11932_v21  ;;  %v11904_v21 = vadd.s32 4294967294, %v26932_v23 }
 0xd20   : > { %17768 = vmatpush1.bf16.msra.mxu1 %v26735_v10 }
 0xd21   : > { %17770 = vmatprep.subr.msk.bf16.mxu1 %vm17769_vm4, %v26563_v35 }
 0xd22   : > { %17777 = vmatpush3.bf16.msk.msra.mxu0 %vm17776_vm8, %v26563_v35  ;;  %vm26956_vm8 = vcmask 662528  }
 0xd23   : > { %17778 = vmatprep.subr.bf16.mxu0 %v26735_v10  ;;  %vm26958_vm10 = vmmov %vm26956_vm8 }
 0xd24   : > { %17771 = vmatpush1.bf16.msra.mxu1 %v26735_v10 }
 0xd25   : > { %15611 = vmatprep.subr.msk.mxu1 %vm11305_vm14, %v26761_v57 }
 0xd26   : > { %17780 = vmatpush3.bf16.msk.msra.mxu0 %vm17779_vm1, %v26563_v35  ;;  %vm26957_vm1 = vcmask 1040384  }
 0xd27   : > { %11676 = vmatmul.mubr.f32.vlgmr.msra.gmra.mrb[120].mxu1 %v11595_v17  ;;  %17781 = vmatprep.subr.bf16.mxu0 %v26735_v10  ;;  %v11897_v17 = vadd.s32 4294967294, %v26925_v60 }
 0xd28   : > { %11683 = vmatpush1.msra.mxu1 %v26561_v61  ;;  %11746 = vmatprep.mubr.f32.mxu1 %v26561_v61 }
 0xd29   : > { %12484 = vmatprep.subr.mxu1 %v26561_v61  ;;  %vm11942_vm4 = vcmp.eq.s32.totalorder %v22094_v45, %v11897_v17  ;;  %v11900_v17 = vadd.s32 4294967294, %v26928_v13 }
 0xd2a   : > { %17783 = vmatpush3.bf16.msk.msra.mxu0 %vm17782_vm11, %v26563_v35  ;;  %vm17788_vm14 = vmpackc.low %vm11942_vm4, %vm11939_vm3  ;;  %vm11948_vm11 = vcmp.eq.s32.totalorder %v22094_v45, %v11899_v20  ;;  %v11935_v20 = vadd.s32 4294967294, %v25304_v50 }
 0xd2b   : > { %17784 = vmatprep.subr.bf16.mxu0 %v26735_v10  ;;  %vm17841_vm3 = vmpackc.low %vm12046_vm13, %vm12043_vm12  ;;  %vm11951_vm4 = vcmp.eq.s32.totalorder %v22094_v45, %v11900_v17  ;;  %v11905_v17 = vadd.s32 4294967294, %v26933_v41 }
 0xd2e   : > { %17786 = vmatpush3.bf16.msk.msra.mxu0 %vm17785_vm6, %v26563_v35  ;;  %vm17791_vm6 = vmpackc.low %vm11948_vm11, %vm11945_vm15  ;;  %vm11960_vm15 = vcmp.eq.s32.totalorder %v22094_v45, %v11903_v2  ;;  %v12627_v2 = vadd.s32 4294967293, %v26924_v11 }
 0xd2f   : > { %15612 = vmatmul.mubr.msk.f32.vlgmr.msra.gmra.mrb[120].mxu1 %vm26956_vm8, %v11597_v58  ;;  %16737 = vmatprep.subr.mxu0 %v26561_v61  ;;  %vm11954_vm8 = vcmp.eq.s32.totalorder %v22094_v45, %v11901_v28  ;;  %v11937_v28 = vadd.s32 4294967294, %v25329_v16 }
 0xd30   : > { %12485 = vmatpush1.msra.mxu1 %v26561_v61  ;;  %12548 = vmatprep.mubr.f32.mxu1 %v12327_v14 }
 0xd31   : > { %17837 = vmatprep.subr.bf16.mxu1 %v26735_v10 }
 0xd32   : > { %16738 = vmatpush3.msk.msra.mxu0 %vm26957_vm1, %v15577_v62  ;;  %v11933_v62 = vadd.s32 4294967294, %v25273_v22 }
 0xd33   : > { %17787 = vmatprep.subr.bf16.mxu0 %v26735_v10  ;;  %16740 = vmatmul.mubr.msk.f32.vlgmr.msra.gmra.mrb[206].mxu0 %vm26958_vm10, %v11597_v58  ;;  %v11934_v58 = vadd.s32 4294967294, %v25298_v31  ;;  %vm12058_vm10 = vcmp.eq.s32.totalorder %v23907_v38, %v11935_v20  ;;  %v11908_v20 = vadd.s32 4294967294, %v26936_v36 }
 0xd34   : > { %17789 = vmatpush1.bf16.msk.msra.mxu0 %vm17788_vm14, %v26563_v35  ;;  %12549 = vmatmul.mubr.f32.vlgmr.msra.gmra.mrb[122].mxu1 %v26959_v54  ;;  %vm12052_vm7 = vcmp.eq.s32.totalorder %v23907_v38, %v11933_v62  ;;  %vm17794_vm14 = vmpackc.low %vm11954_vm8, %vm11951_vm4  ;;  %v11938_v62 = vadd.s32 4294967294, %v25356_v34  ;;  %v11906_v54 = vadd.s32 4294967294, %v26934_v43  ;;  %vm12064_vm8 = vcmp.eq.s32.totalorder %v23907_v38, %v11937_v28 }
 0xd35   : > { %17839 = vmatpush3.bf16.msk.msra.mxu1 %vm17838_vm0, %v26563_v35  ;;  %17790 = vmatprep.subr.bf16.mxu0 %v26735_v10  ;;  %vm17844_vm1 = vmpackc.low %vm12052_vm7, %vm12049_vm5  ;;  %vm11957_vm0 = vcmp.eq.s32.totalorder %v22094_v45, %v11902_v15  ;;  %vm12055_vm11 = vcmp.eq.s32.totalorder %v23907_v38, %v11934_v58  ;;  %v11907_v15 = vadd.s32 4294967294, %v26935_v42  ;;  %v12628_v58 = vadd.s32 4294967293, %v26925_v60 }
 0xd36   : > { %17840 = vmatprep.subr.bf16.mxu1 %v26735_v10  ;;  %16764 = vmatprep.mubr.msk.f32.mxu1 %vm18224_vm2, %v26561_v61  ;;  %vm17797_vm12 = vmpackc.low %vm11960_vm15, %vm11957_vm0  ;;  %vm12067_vm7 = vcmp.eq.s32.totalorder %v23907_v38, %v11938_v62  ;;  %v12629_v60 = vadd.s32 4294967293, %v26926_v51  ;;  %v11910_v28 = vadd.s32 4294967294, %v26939_v5  ;;  %v11911_v62 = vadd.s32 4294967294, %v26938_v24 }
 0xd37   : > { %12406 = vmatprep.mubr.f32.mxu0 %v12327_v14  ;;  %v11936_v14 = vadd.s32 4294967294, %v25326_v30  ;;  %vm17847_vm13 = vmpackc.low %vm12058_vm10, %vm12055_vm11  ;;  %vm11972_vm0 = vcmp.eq.s32.totalorder %v22094_v45, %v11907_v15  ;;  %vm12670_vm11 = vcmp.eq.s32.totalorder %v22094_v45, %v12627_v2  ;;  %vm12673_vm10 = vcmp.eq.s32.totalorder %v22094_v45, %v12628_v58 }
 0xd38   : > { %17792 = vmatpush1.bf16.msk.msra.mxu0 %vm17791_vm6, %v26563_v35  ;;  %vm11963_vm6 = vcmp.eq.s32.totalorder %v22094_v45, %v11904_v21  ;;  %v11909_v21 = vadd.s32 4294967294, %v26937_v46  ;;  %v11913_v15 = vadd.s32 4294967294, %v26941_v25  ;;  %v12328_v51 = vrot.slane %v25228_v59, 4 }
 0xd39   : > { %17842 = vmatpush3.bf16.msk.msra.mxu1 %vm17841_vm3, %v26563_v35  ;;  %17793 = vmatprep.subr.bf16.mxu0 %v26735_v10  ;;  %vm11966_vm3 = vcmp.eq.s32.totalorder %v22094_v45, %v11905_v17  ;;  %vm12061_vm4 = vcmp.eq.s32.totalorder %v23907_v38, %v11936_v14  ;;  %v15669_v17 = vsel %vm12067_vm7, 1.0, %v26561_v61  ;;  %v12630_v14 = vadd.s32 4294967293, %v26927_v48 }
 0xd3a   : > { %17843 = vmatprep.subr.bf16.mxu1 %v26735_v10  ;;  %vm17800_vm5 = vmpackc.low %vm11966_vm3, %vm11963_vm6  ;;  %v13058_v48 = vrot.slane %v25284_v8, 5  ;;  %vm26960_vm3 = vcmask 1040384   ;;  %v12631_v2 = vadd.s32 4294967293, %v26928_v13  ;;  %v12632_v58 = vadd.s32 4294967293, %v26929_v1 }
 0xd3b   : > { %vm17853_vm6 = vmpackc.low %vm12673_vm10, %vm12670_vm11  ;;  %vm26961_vm7 = vcmask 662528   ;;  %v11914_v13 = vadd.s32 4294967294, %v26942_v26  ;;  %v11915_v1 = vadd.s32 4294967294, %v26943_v32 }
 0xd3c   : > { %17795 = vmatpush1.bf16.msk.msra.mxu0 %vm17794_vm14, %v26563_v35  ;;  %vm17850_vm14 = vmpackc.low %vm12064_vm8, %vm12061_vm4  ;;  %vm12676_vm8 = vcmp.eq.s32.totalorder %v22094_v45, %v12629_v60  ;;  %v11917_v60 = vadd.s32 4294967294, %v26945_v12 }
 0xd3d   : > { %17845 = vmatpush3.bf16.msk.msra.mxu1 %vm17844_vm1, %v26563_v35  ;;  %17796 = vmatprep.subr.bf16.mxu0 %v26735_v10  ;;  %vm11969_vm1 = vcmp.eq.s32.totalorder %v22094_v45, %v11906_v54  ;;  %v11912_v54 = vadd.s32 4294967294, %v26940_v4 }
 0xd3e   : > { %17846 = vmatprep.subr.bf16.mxu1 %v26735_v10  ;;  %vm17803_vm15 = vmpackc.low %vm11972_vm0, %vm11969_vm1  ;;  %vm11984_vm1 = vcmp.eq.s32.totalorder %v22094_v45, %v11911_v62  ;;  %v11920_v62 = vadd.s32 4294967294, %v25178_v39 }
 0xd3f   : > { %vm11988_vm0 = vcmp.eq.s32.totalorder %v23149_v55, %v11912_v54 }
 0xd40   : > { %17798 = vmatpush1.bf16.msk.msra.mxu0 %vm17797_vm12, %v26563_v35  ;;  %vm11975_vm12 = vcmp.eq.s32.totalorder %v22094_v45, %v11908_v20  ;;  %v12633_v20 = vadd.s32 4294967293, %v26930_v44  ;;  %v12635_v44 = vadd.s32 4294967293, %v26932_v23  ;;  %v12637_v23 = vadd.s32 4294967293, %v26934_v43 }
 0xd41   : > { %17848 = vmatpush3.bf16.msk.msra.mxu1 %vm17847_vm13, %v26563_v35  ;;  %17799 = vmatprep.subr.bf16.mxu0 %v26735_v10  ;;  %vm11978_vm13 = vcmp.eq.s32.totalorder %v22094_v45, %v11909_v21  ;;  %v12634_v21 = vadd.s32 4294967293, %v26931_v3  ;;  %v12636_v3 = vadd.s32 4294967293, %v26933_v41  ;;  %v12638_v41 = vadd.s32 4294967293, %v26935_v42 }
 0xd42   : > { %17849 = vmatprep.subr.bf16.mxu1 %v26735_v10  ;;  %vm17806_vm4 = vmpackc.low %vm11978_vm13, %vm11975_vm12  ;;  %vm12682_vm12 = vcmp.eq.s32.totalorder %v22094_v45, %v12631_v2  ;;  %vm12685_vm13 = vcmp.eq.s32.totalorder %v22094_v45, %v12632_v58  ;;  %v12639_v43 = vadd.s32 4294967293, %v26936_v36  ;;  %v12640_v42 = vadd.s32 4294967293, %v26937_v46 }
 0xd43   : > { %v11923_v2 = vadd.s32 4294967294, %v25193_v56  ;;  %v12641_v58 = vadd.s32 4294967293, %v26939_v5  ;;  %v11925_v5 = vadd.s32 4294967294, %v25205_v47 }
 0xd44   : > { %17801 = vmatpush1.bf16.msk.msra.mxu0 %vm17800_vm5, %v26563_v35  ;;  %vm12679_vm5 = vcmp.eq.s32.totalorder %v22094_v45, %v12630_v14  ;;  %v11918_v14 = vadd.s32 4294967294, %v25161_v33 }
 0xd45   : > { %17851 = vmatpush3.bf16.msk.msra.mxu1 %vm17850_vm14, %v26563_v35  ;;  %17802 = vmatprep.subr.bf16.mxu0 %v26735_v10  ;;  %vm11981_vm14 = vcmp.eq.s32.totalorder %v22094_v45, %v11910_v28  ;;  %vm17856_vm11 = vmpackc.low %vm12679_vm5, %vm12676_vm8  ;;  %vm11997_vm8 = vcmp.eq.s32.totalorder %v23149_v55, %v11915_v1  ;;  %v11919_v28 = vadd.s32 4294967294, %v25164_v40 }
 0xd46   : > { %16762 = vmatprep.subr.mxu1 %v26561_v61  ;;  %vm17809_vm10 = vmpackc.low %vm11984_vm1, %vm11981_vm14  ;;  %vm12688_vm14 = vcmp.eq.s32.totalorder %v22094_v45, %v12633_v20  ;;  %vm12691_vm1 = vcmp.eq.s32.totalorder %v22094_v45, %v12634_v21 }
 0xd47   : > { %vm17859_vm5 = vmpackc.low %vm12685_vm13, %vm12682_vm12  ;;  %vm12694_vm12 = vcmp.eq.s32.totalorder %v22094_v45, %v12635_v44  ;;  %vm12697_vm13 = vcmp.eq.s32.totalorder %v22094_v45, %v12636_v3  ;;  %v11927_v3 = vadd.s32 4294967294, %v25219_v6 }
 0xd48   : > { %17804 = vmatpush1.bf16.msk.msra.mxu0 %vm17803_vm15, %v26563_v35  ;;  %vm11991_vm15 = vcmp.eq.s32.totalorder %v23149_v55, %v11913_v15  ;;  %v11922_v15 = vadd.s32 4294967294, %v25190_v52 }
 0xd49   : > { %16763 = vmatpush3.msk.msra.mxu1 %vm26960_vm3, %v15669_v17  ;;  %17805 = vmatprep.subr.bf16.mxu0 %v26735_v10  ;;  %vm11987_vm3 = vcmp.eq.s32.totalorder %v22094_v45, %v11912_v54  ;;  %v11916_v17 = vadd.s32 4294967294, %v26944_v37  ;;  %v11921_v54 = vadd.s32 4294967294, %v25181_v29 }
 0xd4a   : > { %17852 = vmatprep.subr.bf16.mxu1 %v26735_v10  ;;  %16765 = vmatmul.mubr.msk.f32.vlgmr.msra.gmra.mrb[124].mxu1 %vm26961_vm7, %v12328_v51  ;;  %vm17814_vm7 = vmpackc.low %vm18225_vm9, %vm11987_vm3  ;;  %vm12006_vm3 = vcmp.eq.s32.totalorder %v23149_v55, %v11918_v14 }
 0xd4b   : > { %17854 = vmatpush1.bf16.msk.msra.mxu1 %vm17853_vm6, %v26563_v35  ;;  %13137 = vmatprep.mubr.f32.mxu1 %v13058_v48  ;;  %vm17811_vm6 = vmpackc.low %vm11991_vm15, %vm11988_vm0  ;;  %vm12000_vm15 = vcmp.eq.s32.totalorder %v23149_v55, %v11916_v17  ;;  %v12643_v17 = vadd.s32 4294967293, %v26940_v4  ;;  %v12645_v4 = vadd.s32 4294967293, %v26942_v26  ;;  %v12647_v26 = vadd.s32 4294967293, %v26944_v37 }
 0xd4c   : > { %17807 = vmatpush1.bf16.msk.msra.mxu0 %vm17806_vm4, %v26563_v35  ;;  %17855 = vmatprep.subr.bf16.mxu1 %v26735_v10  ;;  %vm11994_vm4 = vcmp.eq.s32.totalorder %v23149_v55, %v11914_v13  ;;  %v12642_v13 = vadd.s32 4294967293, %v26938_v24  ;;  %v11924_v24 = vadd.s32 4294967294, %v25202_v27  ;;  %v12650_v37 = vadd.s32 4294967293, %v25164_v40 }
 0xd4d   : > { %17808 = vmatprep.subr.bf16.mxu0 %v26735_v10  ;;  %vm17816_vm0 = vmpackc.low %vm11997_vm8, %vm11994_vm4  ;;  %vm12009_vm4 = vcmp.eq.s32.totalorder %v23149_v55, %v11919_v28  ;;  %v12653_v40 = vadd.s32 4294967293, %v25190_v52  ;;  %v26963_v52 = vld [vmem:[#allocation19_spill] sm:$0xff]  ;;  %v26964_v28 = vld [vmem:[#allocation20_spill] sm:$0xff] }
 0xd4e   : > { %vm17865_vm8 = vmpackc.low %vm12697_vm13, %vm12694_vm12  ;;  %vm12018_vm13 = vcmp.eq.s32.totalorder %v23149_v55, %v11922_v15  ;;  %v12662_v15 = vadd.s32 4294967293, %v25266_v53  ;;  %v12665_v53 = vadd.s32 4294967293, %v25298_v31 }
 0xd4f   : > { %17857 = vmatpush1.bf16.msk.msra.mxu1 %vm17856_vm11, %v26563_v35  ;;  %vm12003_vm11 = vcmp.eq.s32.totalorder %v23149_v55, %v11917_v60  ;;  %v12644_v60 = vadd.s32 4294967293, %v26941_v25  ;;  %v12646_v25 = vadd.s32 4294967293, %v26943_v32  ;;  %v12648_v32 = vadd.s32 4294967293, %v26945_v12 }
 0xd50   : > { %17810 = vmatpush1.bf16.msk.msra.mxu0 %vm17809_vm10, %v26563_v35  ;;  %17858 = vmatprep.subr.bf16.mxu1 %v26735_v10  ;;  %vm17862_vm10 = vmpackc.low %vm12691_vm1, %vm12688_vm14  ;;  %vm12012_vm1 = vcmp.eq.s32.totalorder %v23149_v55, %v11920_v62  ;;  %v12651_v12 = vadd.s32 4294967293, %v25178_v39  ;;  %v12656_v62 = vadd.s32 4294967293, %v25205_v47  ;;  %v12658_v47 = vadd.s32 4294967293, %v25219_v6 }
 0xd51   : > { %17812 = vmatprep.subr.msk.bf16.mxu0 %vm17811_vm6, %v26563_v35  ;;  %vm17819_vm6 = vmpackc.low %vm12003_vm11, %vm12000_vm15  ;;  %vm12706_vm11 = vcmp.eq.s32.totalorder %v22094_v45, %v12639_v43  ;;  %v12663_v6 = vadd.s32 4294967293, %v25270_v0  ;;  %v12666_v0 = vadd.s32 4294967293, %v25304_v50 }
 0xd52   : > { %vm17822_vm14 = vmpackc.low %vm12009_vm4, %vm12006_vm3  ;;  %vm12712_vm4 = vcmp.eq.s32.totalorder %v22094_v45, %v12641_v58 }
 0xd53   : > { %17860 = vmatpush1.bf16.msk.msra.mxu1 %vm17859_vm5, %v26563_v35  ;;  %vm12700_vm5 = vcmp.eq.s32.totalorder %v22094_v45, %v12637_v23  ;;  %v12660_v23 = vadd.s32 4294967293, %v26964_v28 }
 0xd54   : > { %17815 = vmatpush1.bf16.msk.msra.mxu0 %vm17814_vm7, %v25709_v18  ;;  %17861 = vmatprep.subr.bf16.mxu1 %v26735_v10  ;;  %vm12703_vm7 = vcmp.eq.s32.totalorder %v22094_v45, %v12638_v41  ;;  %v12655_v41 = vadd.s32 4294967293, %v25202_v27  ;;  %v12657_v27 = vadd.s32 4294967293, %v25216_v9 }
 0xd55   : > { %17817 = vmatprep.subr.msk.bf16.mxu0 %vm17816_vm0, %v26563_v35  ;;  %vm12015_vm0 = vcmp.eq.s32.totalorder %v23149_v55, %v11921_v54  ;;  %vm17868_vm15 = vmpackc.low %vm12703_vm7, %vm12700_vm5  ;;  %vm12719_vm7 = vcmp.eq.s32.totalorder %v23149_v55, %v12643_v17 }
 0xd56   : > { %vm17825_vm12 = vmpackc.low %vm12015_vm0, %vm12012_vm1  ;;  %vm12024_vm1 = vcmp.eq.s32.totalorder %v23149_v55, %v11924_v24  ;;  %vm12027_vm0 = vcmp.eq.s32.totalorder %v23149_v55, %v11925_v5 }
 0xd57   : > { %17863 = vmatpush1.bf16.msk.msra.mxu1 %vm17862_vm10, %v26563_v35  ;;  %vm12709_vm10 = vcmp.eq.s32.totalorder %v22094_v45, %v12640_v42  ;;  %v12661_v42 = vadd.s32 4294967293, %v25261_v63  ;;  %v12664_v63 = vadd.s32 4294967293, %v25273_v22  ;;  %v12667_v22 = vadd.s32 4294967293, %v25326_v30 }
 0xd58   : > { %17818 = vmatpush1.bf16.msra.mxu0 %v26735_v10  ;;  %17864 = vmatprep.subr.bf16.mxu1 %v26735_v10  ;;  %vm17871_vm3 = vmpackc.low %vm12709_vm10, %vm12706_vm11  ;;  %vm12718_vm10 = vcmp.eq.s32.totalorder %v22094_v45, %v12643_v17 }
 0xd59   : > { %17820 = vmatprep.subr.msk.bf16.mxu0 %vm17819_vm6, %v26563_v35  ;;  %vm12021_vm6 = vcmp.eq.s32.totalorder %v23149_v55, %v11923_v2 }
 0xd5a   : > { %vm17828_vm5 = vmpackc.low %vm12021_vm6, %vm12018_vm13  ;;  %vm12725_vm13 = vcmp.eq.s32.totalorder %v23149_v55, %v12645_v4  ;;  %vm12728_vm6 = vcmp.eq.s32.totalorder %v23149_v55, %v12646_v25 }
 0xd5b   : > { %17866 = vmatpush1.bf16.msk.msra.mxu1 %vm17865_vm8, %v26563_v35  ;;  %vm12715_vm8 = vcmp.eq.s32.totalorder %v22094_v45, %v12642_v13  ;;  %v12649_v45 = vadd.s32 4294967293, %v25161_v33  ;;  %v12652_v33 = vadd.s32 4294967293, %v25181_v29  ;;  %v26962_v29 = vrot.slane %v25279_v19, 4 }
 0xd5c   : > { %17821 = vmatpush1.bf16.msra.mxu0 %v26735_v10  ;;  %17867 = vmatprep.subr.bf16.mxu1 %v26735_v10  ;;  %v16098_v36 = vpop.f32.mrb[192].mxu0  ;;  %v9968_v46 = vpop.f32.mrb[110].mxu1 }
 0xd5d   : > { %17823 = vmatprep.subr.msk.bf16.mxu0 %vm17822_vm14, %v26563_v35  ;;  %v16099_v1 = vpop.f32.mrb[193].mxu0  ;;  %v26000_v20 = vadd.f32 %v25674_v49, %v9968_v46  ;;  %v26002_v21 = vpop.f32.mrb[111].mxu1  ;;  %vm12722_vm14 = vcmp.eq.s32.totalorder %v23149_v55, %v12644_v60  ;;  %v11926_v49 = vadd.s32 4294967294, %v25216_v9  ;;  %v13057_v9 = vrot.slane %v25279_v19, 5 }
 0xd5e   : > { %v26010_v44 = vadd.f32 %v16099_v1, %v16098_v36  ;;  %vm17876_vm11 = vmpackc.low %vm12722_vm14, %vm12719_vm7  ;;  %vm12731_vm14 = vcmp.eq.s32.totalorder %v23149_v55, %v12647_v26  ;;  %v12668_v19 = vadd.s32 4294967293, %v25329_v16 }
 0xd5f   : > { %17869 = vmatpush1.bf16.msk.msra.mxu1 %vm17868_vm15, %v26563_v35  ;;  %vm17874_vm15 = vmpackc.low %vm12715_vm8, %vm12712_vm4  ;;  %vm12033_vm4 = vcmp.eq.s32.totalorder %v23149_v55, %v11927_v3 }
 0xd60   : > { %17824 = vmatpush1.bf16.msra.mxu0 %v26735_v10  ;;  %17870 = vmatprep.subr.bf16.mxu1 %v26735_v10  ;;  %vm17879_vm8 = vmpackc.low %vm18225_vm9, %vm12718_vm10 }
 0xd61   : > { %17826 = vmatprep.subr.msk.bf16.mxu0 %vm17825_vm12, %v26563_v35  ;;  %vm17831_vm12 = vmpackc.low %vm12027_vm0, %vm12024_vm1  ;;  %vm12734_vm1 = vcmp.eq.s32.totalorder %v23149_v55, %v12648_v32  ;;  %vm12737_vm0 = vcmp.eq.s32.totalorder %v23149_v55, %v12649_v45 }
 0xd62   : > { %vm17884_vm9 = vmpackc.low %vm12734_vm1, %vm12731_vm14  ;;  %vm12755_vm14 = vcmp.eq.s32.totalorder %v23149_v55, %v12655_v41  ;;  %vm12758_vm1 = vcmp.eq.s32.totalorder %v23149_v55, %v12656_v62 }
 0xd63   : > { %17872 = vmatpush1.bf16.msk.msra.mxu1 %vm17871_vm3, %v26563_v35  ;;  %vm12030_vm3 = vcmp.eq.s32.totalorder %v23149_v55, %v11926_v49 }
 0xd64   : > { %17827 = vmatpush1.bf16.msra.mxu0 %v26735_v10  ;;  %17873 = vmatprep.subr.bf16.mxu1 %v26735_v10  ;;  %vm17834_vm7 = vmpackc.low %vm12033_vm4, %vm12030_vm3  ;;  %vm12749_vm3 = vcmp.eq.s32.totalorder %v23149_v55, %v12653_v40 }
 0xd65   : > { %17829 = vmatprep.subr.msk.bf16.mxu0 %vm17828_vm5, %v26563_v35  ;;  %vm17881_vm5 = vmpackc.low %vm12728_vm6, %vm12725_vm13  ;;  %vm12746_vm13 = vcmp.eq.s32.totalorder %v23149_v55, %v12652_v33 }
 0xd67   : > { %17875 = vmatpush1.bf16.msk.msra.mxu1 %vm17874_vm15, %v26563_v35  ;;  %vm12740_vm15 = vcmp.eq.s32.totalorder %v23149_v55, %v12650_v37 }
 0xd68   : > { %17830 = vmatpush1.bf16.msra.mxu0 %v26735_v10  ;;  %17877 = vmatprep.subr.msk.bf16.mxu1 %vm17876_vm11, %v26563_v35  ;;  %vm12036_vm11 = vcmp.eq.s32.totalorder %v23149_v55, %v25819_v7  ;;  %vm17887_vm10 = vmpackc.low %vm12740_vm15, %vm12737_vm0 }
 0xd69   : > { %17832 = vmatprep.subr.msk.bf16.mxu0 %vm17831_vm12, %v26563_v35  ;;  %vm12743_vm12 = vcmp.eq.s32.totalorder %v23149_v55, %v12651_v12  ;;  %vm17896_vm15 = vmpackc.low %vm12758_vm1, %vm12755_vm14  ;;  %vm12789_vm14 = vcmp.eq.s32.totalorder %v23907_v38, %v12666_v0 }
 0xd6a   : > { %vm17890_vm6 = vmpackc.low %vm12746_vm13, %vm12743_vm12  ;;  %vm12761_vm12 = vcmp.eq.s32.totalorder %v23149_v55, %v12657_v27  ;;  %vm12764_vm13 = vcmp.eq.s32.totalorder %v23149_v55, %v12658_v47 }
 0xd6b   : > { %17880 = vmatpush1.bf16.msk.msra.mxu1 %vm17879_vm8, %v25709_v18  ;;  %v12654_v18 = vadd.s32 4294967293, %v25193_v56  ;;  %v12659_v56 = vadd.s32 4294967293, %v26963_v52 }
 0xd6c   : > { %17833 = vmatpush1.bf16.msra.mxu0 %v26735_v10  ;;  %17882 = vmatprep.subr.msk.bf16.mxu1 %vm17881_vm5, %v26563_v35 }
 0xd6d   : > { %17835 = vmatprep.subr.msk.bf16.mxu0 %vm17834_vm7, %v26563_v35  ;;  %vm12752_vm4 = vcmp.eq.s32.totalorder %v23149_v55, %v12654_v18  ;;  %vm12768_vm5 = vcmp.eq.s32.totalorder %v23907_v38, %v12659_v56  ;;  %vm12771_vm7 = vcmp.eq.s32.totalorder %v23907_v38, %v12660_v23 }
 0xd6e   : > { %vm17893_vm8 = vmpackc.low %vm12752_vm4, %vm12749_vm3  ;;  %vm12780_vm4 = vcmp.eq.s32.totalorder %v23907_v38, %v12663_v6 }
 0xd6f   : > { %17883 = vmatpush1.bf16.msra.mxu1 %v26735_v10  ;;  %vm17903_vm0 = vmpackc.low %vm12771_vm7, %vm12768_vm5  ;;  %vm12767_vm7 = vcmp.eq.s32.totalorder %v23149_v55, %v12659_v56  ;;  %v12669_v55 = vadd.s32 4294967293, %v25356_v34 }
 0xd70   : > { %17836 = vmatpush1.bf16.msra.mxu0 %v26735_v10  ;;  %17885 = vmatprep.subr.msk.bf16.mxu1 %vm17884_vm9, %v26563_v35  ;;  %vm26965_vm9 = vcmask 662528   ;;  %vm17899_vm3 = vmpackc.low %vm12764_vm13, %vm12761_vm12  ;;  %vm26967_vm12 = vcmask 1040384  }
 0xd71   : > { %15703 = vmatprep.subr.msk.mxu0 %vm12036_vm11, %v26761_v57  ;;  %vm12774_vm11 = vcmp.eq.s32.totalorder %v23907_v38, %v12661_v42 }
 0xd72   : > { %v10180_v39 = vpop.f32.mrb[194].mxu0 }
 0xd73   : > { %17886 = vmatpush1.bf16.msra.mxu1 %v26735_v10  ;;  %12407 = vmatmul.mubr.f32.vlgmr.msra.gmra.mrb[208].mxu0 %v26962_v29  ;;  %v26076_v7 = vadd.f32 %v26010_v44, %v10180_v39  ;;  %v16656_v14 = vpop.f32.mrb[195].mxu0 }
 0xd74   : > { %17888 = vmatprep.subr.msk.bf16.mxu1 %vm17887_vm10, %v26563_v35  ;;  %12414 = vmatpush1.msra.mxu0 %v26561_v61  ;;  %vm12777_vm10 = vcmp.eq.s32.totalorder %v23907_v38, %v12662_v15 }
 0xd75   : > { %12477 = vmatprep.mubr.f32.mxu0 %v26561_v61  ;;  %13215 = vmatprep.subr.mxu0 %v26561_v61 }
 0xd76   : > { %v26088_v54 = vpop.f32.mrb[196].mxu0 }
 0xd77   : > { %17889 = vmatpush1.bf16.msra.mxu1 %v26735_v10  ;;  %v16661_v43 = vpop.f32.mrb[197].mxu0 }
 0xd78   : > { %17891 = vmatprep.subr.msk.bf16.mxu1 %vm17890_vm6, %v26563_v35  ;;  %vm17906_vm6 = vmpackc.low %vm12777_vm10, %vm12774_vm11  ;;  %vm12798_vm11 = vcmp.eq.s32.totalorder %v23907_v38, %v12669_v55  ;;  %vm26966_vm10 = vcmask 662528   ;;  %v13362_v43 = vpop.permute.xlu0 %13361 }
 0xd79   : > { %v15761_v8 = vsel %vm12798_vm11, 1.0, %v26561_v61  ;;  %vm26968_vm13 = vmmov %vm26966_vm10 }
 0xd7b   : > { %17892 = vmatpush1.bf16.msra.mxu1 %v26735_v10  ;;  %15704 = vmatmul.mubr.msk.f32.vlgmr.msra.gmra.mrb[208].mxu0 %vm26965_vm9, %v12328_v51  ;;  %vm12792_vm9 = vcmp.eq.s32.totalorder %v23907_v38, %v12667_v22 }
 0xd7c   : > { %17894 = vmatprep.subr.msk.bf16.mxu1 %vm17893_vm8, %v26563_v35  ;;  %13216 = vmatpush1.msra.mxu0 %v26561_v61  ;;  %vm12783_vm8 = vcmp.eq.s32.totalorder %v23907_v38, %v12664_v63 }
 0xd7d   : > { %13279 = vmatprep.mubr.f32.mxu0 %v13058_v48  ;;  %17902 = vmatprep.subr.bf16.mxu0 %v26735_v10  ;;  %vm17909_vm5 = vmpackc.low %vm12783_vm8, %vm12780_vm4 }
 0xd7f   : > { %17895 = vmatpush1.bf16.msra.mxu1 %v26735_v10  ;;  %13280 = vmatmul.mubr.f32.vlgmr.msra.gmra.mrb[210].mxu0 %v13057_v9 }
 0xd80   : > { %17904 = vmatpush3.bf16.msk.msra.mxu0 %vm17903_vm0, %v26563_v35  ;;  %17897 = vmatprep.subr.msk.bf16.mxu1 %vm17896_vm15, %v26563_v35  ;;  %vm12795_vm0 = vcmp.eq.s32.totalorder %v23907_v38, %v12668_v19 }
 0xd81   : > { %17905 = vmatprep.subr.bf16.mxu0 %v26735_v10  ;;  %16789 = vmatprep.mubr.msk.f32.mxu0 %vm18224_vm2, %v26561_v61  ;;  %vm12786_vm2 = vcmp.eq.s32.totalorder %v23907_v38, %v12665_v53  ;;  %vm17915_vm15 = vmpackc.low %vm12795_vm0, %vm12792_vm9 }
 0xd82   : > { %vm17912_vm1 = vmpackc.low %vm12789_vm14, %vm12786_vm2 }
 0xd83   : > { %17898 = vmatpush1.bf16.msra.mxu1 %v26735_v10 }
 0xd84   : > { %17907 = vmatpush3.bf16.msk.msra.mxu0 %vm17906_vm6, %v26563_v35  ;;  %17900 = vmatprep.subr.msk.bf16.mxu1 %vm17899_vm3, %v26563_v35 }
 0xd85   : > { %17908 = vmatprep.subr.bf16.mxu0 %v26735_v10 }
 0xd87   : > { %17901 = vmatpush1.bf16.msra.mxu1 %v26735_v10 }
 0xd88   : > { %17910 = vmatpush3.bf16.msk.msra.mxu0 %vm17909_vm5, %v26563_v35  ;;  %15795 = vmatprep.subr.msk.mxu1 %vm12767_vm7, %v26761_v57  ;;  %v13059_v57 = vrot.slane %v25228_v59, 5 }
 0xd89   : > { %17911 = vmatprep.subr.bf16.mxu0 %v26735_v10 }
 0xd8a   : > { %13138 = vmatmul.mubr.f32.vlgmr.msra.gmra.mrb[126].mxu1 %v13057_v9 }
 0xd8b   : > { %13145 = vmatpush1.msra.mxu1 %v26561_v61  ;;  %13208 = vmatprep.mubr.f32.mxu1 %v26561_v61 }
 0xd8c   : > { %17913 = vmatpush3.bf16.msk.msra.mxu0 %vm17912_vm1, %v26563_v35 }
 0xd8d   : > { %17914 = vmatprep.subr.bf16.mxu0 %v26735_v10 }
 0xd90   : > { %17916 = vmatpush3.bf16.msk.msra.mxu0 %vm17915_vm15, %v26563_v35 }
 0xd91   : > { %16787 = vmatprep.subr.mxu0 %v26561_v61 }
 0xd92   : > { %15796 = vmatmul.mubr.msk.f32.vlgmr.msra.gmra.mrb[126].mxu1 %vm26966_vm10, %v13059_v57 }
 0xd94   : > { %16788 = vmatpush3.msk.msra.mxu0 %vm26967_vm12, %v15761_v8 }
 0xd95   : > { %16790 = vmatmul.mubr.msk.f32.vlgmr.msra.gmra.mrb[212].mxu0 %vm26968_vm13, %v13059_v57  ;;  %v18226_v57 = vmov 1966171168  }
 0xd96   : > { %v16147_v31 = vpop.f32.mrb[198].mxu0  ;;  %v13379_v8 = vunpack.c.l.s4 %v18226_v57 }
 0xd97   : > { %v16148_v50 = vpop.f32.mrb[199].mxu0 }
 0xd98   : > { %v16149_v10 = vadd.f32 %v16148_v50, %v16147_v31  ;;  %v13380_v31 = vunpack.c.0.s8 %v13379_v8 }
 0xd9a   : > { %v10404_v30 = vadd.f32 %v16149_v10, %v26076_v7 }
 0xd9c   : > { %v10261_v38 = vpop.f32.mrb[112].mxu1 }
 0xd9d   : > { %v10262_v35 = vadd.f32 %v10261_v38, %v26000_v20  ;;  %v10263_v16 = vpop.f32.mrb[113].mxu1  ;;  %v13383_v38 = vsub.s32 %v13380_v31, %v26924_v11 }
 0xd9e   : > { %v10264_v59 = vadd.f32 %v10263_v16, %v26002_v21 }
 0xd9f   : > { %v10333_v34 = vadd.f32 %v26088_v54, %v10262_v35  ;;  %v13366_v54 = vsub.s32 0, %v26924_v11 }
 0xda0   : > { %v11017_v61 = vpop.f32.mrb[114].mxu1 }
 0xda1   : > { %v16691_v51 = vpop.f32.mrb[115].mxu1  ;;  %v13367_v15 = vrot.slane %v13362_v43, %v13366_v54 }
 0xda4   : > { %v11088_v48 = vpop.f32.mrb[116].mxu1 }
 0xda5   : > { %v11090_v2 = vpop.f32.mrb[117].mxu1 }
 0xdac   : > { %v10473_v36 = vpop.f32.mrb[200].mxu0 }
 0xdad   : > { %v10474_v46 = vadd.f32 %v10473_v36, %v10404_v30  ;;  %v16686_v58 = vpop.f32.mrb[201].mxu0 }
 0xdba   : > { %v11158_v13 = vpop.f32.mrb[118].mxu1 }
 0xdbb   : > { %v11159_v1 = vadd.f32 %v11158_v13, %v11088_v48  ;;  %v16716_v17 = vpop.f32.mrb[119].mxu1 }
 0xdbd   : > { %v11164_v60 = vadd.f32 %v11159_v1, %v10474_v46 }
 0xdec   : > { %v10946_v44 = vpop.f32.mrb[202].mxu0 }
 0xded   : > { %v11018_v24 = vadd.f32 %v11017_v61, %v10946_v44  ;;  %v10948_v5 = vpop.f32.mrb[203].mxu0  ;;  %v26971_v61 = vlaneseq }
 0xdee   : > { %v11163_v20 = vadd.f32 %v10948_v5, %v10264_v59 }
 0xdef   : > { %v11162_v4 = vadd.f32 %v11018_v24, %v10333_v34  ;;  %vm13403_vm6 = vcmp.lt.s32.totalorder %v26971_v61, 336 }
 0xdf0   : > { %v11819_v25 = vpop.f32.mrb[204].mxu0 }
 0xdf1   : > { %v11821_v21 = vpop.f32.mrb[205].mxu0 }
 0xe02   : > { %v11748_v49 = vpop.f32.mrb[120].mxu1 }
 0xe03   : > { %v11893_v3 = vadd.f32 %v11748_v49, %v11162_v4  ;;  %v11750_v26 = vpop.f32.mrb[121].mxu1 }
 0xe04   : > { %v11894_v32 = vadd.f32 %v11750_v26, %v11163_v20 }
 0xe06   : > { %v11889_v45 = vpop.f32.mrb[206].mxu0 }
 0xe07   : > { %v11890_v37 = vadd.f32 %v11889_v45, %v11819_v25  ;;  %v12550_v12 = vpop.f32.mrb[122].mxu1  ;;  %v16741_v33 = vpop.f32.mrb[207].mxu0 }
 0xe08   : > { %v12552_v40 = vpop.f32.mrb[123].mxu1 }
 0xe09   : > { %v11895_v18 = vadd.f32 %v11890_v37, %v11164_v60 }
 0xe1d   : > { %v12620_v39 = vpop.f32.mrb[124].mxu1 }
 0xe1e   : > { %v12621_v29 = vadd.f32 %v12620_v39, %v12550_v12  ;;  %v16766_v7 = vpop.f32.mrb[125].mxu1 }
 0xe20   : > { %v12626_v14 = vadd.f32 %v12621_v29, %v11895_v18 }
 0xe4e   : > { %v12479_v52 = vpop.f32.mrb[208].mxu0 }
 0xe4f   : > { %v12624_v56 = vadd.f32 %v12479_v52, %v11893_v3  ;;  %v12481_v28 = vpop.f32.mrb[209].mxu0 }
 0xe50   : > { %v12625_v23 = vadd.f32 %v12481_v28, %v11894_v32 }
 0xe52   : > { %v13281_v41 = vpop.f32.mrb[210].mxu0 }
 0xe53   : > { %v13283_v62 = vpop.f32.mrb[211].mxu0 }
 0xe65   : > { %v13210_v42 = vpop.f32.mrb[126].mxu1 }
 0xe66   : > { %v13355_v27 = vadd.f32 %v13210_v42, %v12624_v56  ;;  %v13212_v47 = vpop.f32.mrb[127].mxu1 }
 0xe67   : > { %v13356_v9 = vadd.f32 %v13212_v47, %v12625_v23 }
 0xe68   : > { %v13368_v6 = vadd.f32 %v13367_v15, %v13355_v27  ;;  %v13351_v63 = vpop.f32.mrb[212].mxu0 }
 0xe69   : > { %v13369_v53 = vadd.f32 %v13367_v15, %v13356_v9  ;;  %v13352_v0 = vadd.f32 %v13351_v63, %v13281_v41  ;;  %v16791_v22 = vpop.f32.mrb[213].mxu0 }
 0xe6a   : > { %18129 = vtanh.f32 %v13368_v6 }
 0xe6b   : > { %18131 = vtanh.f32 %v13369_v53  ;;  %v13357_v19 = vadd.f32 %v13352_v0, %v12626_v14 }
 0xe6d   : > { %v13370_v55 = vadd.f32 %v13367_v15, %v13357_v19 }
 0xe6f   : > { %18133 = vtanh.f32 %v13370_v55 }
 0xe74   : > { %v18130_v50 = vpop.eup %18129 }
 0xe75   : > { %v18132_v10 = vpop.eup %18131 }
 0xe76   : > { %v13377_v30 = vcombine.low %v18130_v50, %v18132_v10 }
 0xe78   : > { %v13384_v16 = vrot.slane %v13377_v30, %v13383_v38 }
 0xe79   : > { %v18134_v35 = vpop.eup %18133 }
 0xe7a   : > { %v13391_v59 = vrot.slane %v18134_v35, %v13383_v38 }
 0xe7c   : > { %v13392_v34 = vcombine.low %v13384_v16, %v13391_v59 }
 0xe7e   : > { %v13399_v51 = vrot.slane %v13392_v34, %v13383_v38 }
 0xe80   : > { %13405 = vst.msk [vmem:[%s434_s21] sm:$0x7] %vm13403_vm6, %v13399_v51 }
 0xe81   : > { %18163 = shalt.err (!%p18160_p1)
}
 0xe82   : > { %s18164_s13 = scalar_lea.hbm %s26166_s12, 48  ;;  %s18168_s19 = scalar_lea.hbm %s26972_s0, 96 }
 0xe83   : > { %p18165_p2 = scmp.ne.s32.totalorder %s26166_s12, %s18164_s13  ;;  %p18169_p7 = scmp.lt.u32.totalorder %s26166_s12, %s26972_s0 }
 0xe84   : > { %p18170_p8 = scmp.lt.u32.totalorder %s18168_s19, %s18164_s13  ;;  %p18172_p10 = scmp.lt.u32.totalorder %s18164_s13, %s26166_s12 }
 0xe85   : > { %p18166_p3 = pnand %p18165_p2, %p18339_p5 }
 0xe86   : > { %p18171_p9 = por %p18170_p8, %p18169_p7 }
 0xe87   : > { %p18167_p4 = pneg %p18166_p3 }
 0xe88   : > { %p18173_p11 = por %p18172_p10, %p18171_p9 }
 0xe8a   : > { %p18174_p12 = pnand %p18173_p11, %p18167_p4 }
 0xe8c   : > { %18177 = shalt.err (!%p18174_p12)
}
 0xe8d   : > { %18073 = dma.vmem_to_hbm [thread:$0]  (%p18339_p5), %s26168_s23, 48, %s26166_s12, %s13407_s15  }
 0xe8e PF: > { %s26973_s20 = sld [smem:[#allocation11_spill]]  ;;  %s26974_s21 = sld [smem:[#allocation9_spill]] }
 0xe94   : > { %p18085_p13 = scmp.ge.s32.totalorder %s26973_s20, 2  ;;  %s13433_s14 = sand.u32 1, %s26974_s21  }
 0xe95   : > { %s13434_s16 = scalar_lea.sflag [#allocation4], %s13433_s14 }
 0xe96   : > { %p18080_p0 = pnand %p18085_p13, %p18343_p6 }
 0xe98   : > { %18199 = dma.done.wait (!%p18080_p0), %s13434_s16, 48  }
 0xe99   : > { %18201 = vsyncadd (!%p18080_p0), %s13434_s16, 4294967248  ;;  %s26976_s30 = sld [smem:[#allocation13_spill]]  ;;  %s26977_s22 = sld [smem:[#allocation10_spill]] }
 0xe9a   : > { %s26978_s29 = sld [smem:[#allocation14_spill]]  ;;  %s26979_s27 = smov %s18208_s28 }
 0xe9f   : > { %p26_p1 = scmp.ge.s32.totalorder %s26976_s30, 4   ;;  %s26980_s28 = smov %s26977_s22 }
 0xea1   :  { %28 = sbr.rel (!%p26_p1) target bundleno = 7 (0x7), region = 133 }
 0xea8   :  { %13439 = vsyncpa [#allocation4], 1 }
 0xea9   :  { %13441 = vsyncpa [#allocation4 + $0x1], 1 }
 0xeaa   :  { %13442 = vsyncpa [#allocation5], 1 }
 0xeab   :  { %13444 = vsyncpa [#allocation5 + $0x1], 1 }

</bundles_post_ra>
